<compile_context>
chip_gen: v5e
topology: v5e:2x2
jax: 0.10.0
libtpu: 0.0.40
codegen_flags: <defaults>
</compile_context>

<pallas_src>
import functools

import jax
import jax.numpy as jnp
from jax.experimental import pallas as pl
from jax.experimental.pallas import tpu as pltpu

MATMUL_DTYPE = jnp.bfloat16          # MXU operand dtype; accumulation stays f32.


# ----------------------------- shape helpers --------------------------------

def _conv_dims(h, w):
    """Spatial output dims of the three convs (conv1 viewed post space-to-depth)."""
    oh1, ow1 = h // 2 - 1, w // 2 - 1          # conv1: k=4, s=2  (== k=2, s=1 on s2d)
    oh2, ow2 = oh1 - 4, ow1 - 4                # conv2: k=5, s=1
    oh3, ow3 = oh2 - 2, ow2 - 2                # conv3: k=3, s=1
    assert oh3 >= 1 and ow3 >= 1, "observation too small for DQNBase convs"
    return (oh1, ow1), (oh2, ow2), (oh3, ow3)


# ------------------------------ Pallas kernel --------------------------------

def _dqn_fused_kernel(x_ref, w1_ref, b1_ref, w2_ref, b2_ref, w3_ref, b3_ref,
                      f1w_ref, f1b_ref, f2w_ref, f2b_ref, out_ref,
                      *, bt, dims, cdt):
    """Whole DQNBase forward for one batch block; activations never leave VMEM."""
    (oh1, ow1), (oh2, ow2), (oh3, ow3) = dims
    c2 = b1_ref.shape[-1]                      # stacked channel width (2 * conv Cout)

    # Hoist only the tiny biases / fc matrices; conv tap weights are read from
    # VMEM at the point of use to keep vector-register pressure low.
    b1 = b1_ref[...]
    b2 = b2_ref[...]
    b3 = b3_ref[...]
    f1w = f1w_ref[...]
    f1b = f1b_ref[...]
    f2w = f2w_ref[...]
    f2b = f2b_ref[...]

    def conv_crelu_rows(read_row, w_ref, bias, kh, kw, n_oh, n_ow):
        """VALID conv as tap accumulation + cReLU via stacked [+W, -W].

        Returns a list of n_oh rows, each an (n_ow, c2) f32 value.
        """
        rows = []
        for oh in range(n_oh):
            acc = None
            for ki in range(kh):
                for kj in range(kw):
                    xt = read_row(oh + ki, kj, n_ow)           # (n_ow, Cin)
                    p = jnp.dot(xt.astype(cdt), w_ref[ki * kw + kj],
                                preferred_element_type=jnp.float32)
                    acc = p if acc is None else acc + p
            rows.append(jnp.maximum(acc + bias, 0.0))          # cReLU (stacked)
        return rows

    # Static unroll over the batch block -> every slice below is static.
    for b in range(bt):
        # conv1 (space-to-depth'd: 2x2 taps, stride 1) + cReLU
        r1 = conv_crelu_rows(lambda h, kj, n: x_ref[b, h, kj:kj + n, :],
                             w1_ref, b1, 2, 2, oh1, ow1)
        # conv2 (5x5) + cReLU
        r2 = conv_crelu_rows(lambda h, kj, n: r1[h][kj:kj + n, :],
                             w2_ref, b2, 5, 5, oh2, ow2)
        # conv3 (3x3) + cReLU
        r3 = conv_crelu_rows(lambda h, kj, n: r2[h][kj:kj + n, :],
                             w3_ref, b3, 3, 3, oh3, ow3)
        # fc1 contraction accumulated directly from the (h, w, c)-ordered
        # feature pieces (no flatten scratch, no VMEM round-trip).
        hid = f1b
        for oh in range(oh3):
            for ow in range(ow3):
                pos = oh * ow3 + ow
                hid = hid + jnp.dot(r3[oh][ow:ow + 1, :].astype(cdt),
                                    f1w[pos * c2:(pos + 1) * c2, :],
                                    preferred_element_type=jnp.float32)
        hid = jnp.maximum(hid, 0.0)                            # ReLU
        q = jnp.dot(hid.astype(cdt), f2w,
                    preferred_element_type=jnp.float32) + f2b
        out_ref[b:b + 1, :] = q.astype(out_ref.dtype)


# ------------------------- one-time parameter prep ---------------------------

def prepare_params(params, input_shape):
    """One-time weight transforms: stacked [+W,-W] cReLU weights, per-tap GEMM
    matrices, /255 folded into conv1, fc1 rows permuted to (h, w, c) flatten
    order, bf16 operand casts."""
    cin, h, w = input_shape
    _, _, (oh3, ow3) = _conv_dims(h, w)

    def stack_pm_w(wc):                      # (Cout,Cin,KH,KW) -> (2Cout,Cin,KH,KW)
        return jnp.concatenate([wc, -wc], axis=0)

    def stack_pm_b(b):
        return jnp.concatenate([b, -b], axis=0).reshape(1, -1).astype(jnp.float32)

    def conv_taps(ws):                       # (2Cout,Cin,KH,KW) -> (KH*KW,Cin,2Cout)
        co2, ci, kh, kw = ws.shape
        t = jnp.transpose(ws, (2, 3, 1, 0))
        return t.reshape(kh * kw, ci, co2).astype(MATMUL_DTYPE)

    # conv1: fold the /255 input scale into the weight, then express the
    # (k=4, s=2) conv as a (k=2, s=1) conv on 2x2 space-to-depth input.
    # Grouped input channel order is (di, dj, c) with c fastest.
    w1s = stack_pm_w(params['w1']) * (1.0 / 255.0)              # (16, Cin, 4, 4)
    taps = []
    for ki in range(2):
        for kj in range(2):
            sub = w1s[:, :, 2 * ki:2 * ki + 2, 2 * kj:2 * kj + 2]   # (2Co,Ci,2,2)
            taps.append(jnp.transpose(sub, (2, 3, 1, 0)).reshape(4 * cin, -1))
    w1t = jnp.stack(taps, axis=0).astype(MATMUL_DTYPE)          # (4, 4*Cin, 2Co)

    # fc1: permute rows from PyTorch's (c, h, w) flatten order to (h, w, c).
    c3 = 2 * params['w3'].shape[0]
    hw = oh3 * ow3
    i = jnp.arange(c3 * hw)
    src = (i % c3) * hw + (i // c3)
    f1w = params['fc1_w'][src, :]

    return dict(
        w1=w1t, b1=stack_pm_b(params['b1']),
        w2=conv_taps(stack_pm_w(params['w2'])), b2=stack_pm_b(params['b2']),
        w3=conv_taps(stack_pm_w(params['w3'])), b3=stack_pm_b(params['b3']),
        f1w=f1w.astype(MATMUL_DTYPE),
        f1b=params['fc1_b'].reshape(1, -1).astype(jnp.float32),
        f2w=params['fc2_w'].astype(MATMUL_DTYPE),
        f2b=params['fc2_b'].reshape(1, -1).astype(jnp.float32),
    )


# --------------------------------- forward -----------------------------------

def dqn_forward(x_nchw, prepared, *, block_b=8):
    n, cin, h, w = x_nchw.shape
    assert h % 2 == 0 and w % 2 == 0, "conv1 space-to-depth needs even H, W"
    dims = _conv_dims(h, w)
    num_actions = prepared['f2w'].shape[-1]

    # NCHW -> 2x2 space-to-depth NHWC, cast once to the MXU operand dtype
    # (halves the input DMA; the matmul operands would be bf16 anyway).
    xs = x_nchw.astype(MATMUL_DTYPE).reshape(n, cin, h // 2, 2, w // 2, 2)
    xs = xs.transpose(0, 2, 4, 3, 5, 1).reshape(n, h // 2, w // 2, 4 * cin)

    bt = n if n <= block_b else block_b
    pad = (-n) % bt
    if pad:
        xs = jnp.pad(xs, ((0, pad), (0, 0), (0, 0), (0, 0)))
    n_pad = xs.shape[0]

    weight_args = (prepared['w1'], prepared['b1'], prepared['w2'], prepared['b2'],
                   prepared['w3'], prepared['b3'], prepared['f1w'], prepared['f1b'],
                   prepared['f2w'], prepared['f2b'])

    def _replicated_spec(a):
        zeros = (0,) * a.ndim
        return pl.BlockSpec(a.shape, lambda i: zeros)

    kern = functools.partial(_dqn_fused_kernel, bt=bt, dims=dims, cdt=MATMUL_DTYPE)

    q = pl.pallas_call(
        kern,
        out_shape=jax.ShapeDtypeStruct((n_pad, num_actions), jnp.float32),
        grid_spec=pltpu.PrefetchScalarGridSpec(
            num_scalar_prefetch=0,
            grid=(n_pad // bt,),
            in_specs=[pl.BlockSpec((bt, h // 2, w // 2, 4 * cin),
                                   lambda i: (i, 0, 0, 0))]
                     + [_replicated_spec(a) for a in weight_args],
            out_specs=pl.BlockSpec((bt, num_actions), lambda i: (i, 0)),
        ),
        compiler_params=pltpu.CompilerParams(
            dimension_semantics=("parallel",)),
    )(xs, *weight_args)
    return q[:n]


# --------------------- pure-JAX reference (for checking) ---------------------

def ref_forward(x_nchw, params, operand_dtype=jnp.float32):
    """DQNBase.forward reference. With operand_dtype=bfloat16 it mirrors the
    kernel's MXU numerics (bf16 operands, f32 accumulation)."""
    f32 = jnp.float32
    cast = lambda a: a.astype(operand_dtype)
    w1 = params['w1'] * (1.0 / 255.0)        # x/255 folded into conv1 (as the kernel)

    def conv(x, wc, b, s):
        y = jax.lax.conv_general_dilated(
            cast(x), cast(wc), (s, s), 'VALID',
            dimension_numbers=('NCHW', 'OIHW', 'NCHW'),
            preferred_element_type=f32)
        return y + b.reshape(1, -1, 1, 1)

    def crelu(z):
        return jnp.concatenate([jnp.maximum(z, 0.0), jnp.maximum(-z, 0.0)], axis=1)

    x = x_nchw.astype(f32)
    x = crelu(conv(x, w1, params['b1'], 2))
    x = crelu(conv(x, params['w2'], params['b2'], 1))
    x = crelu(conv(x, params['w3'], params['b3'], 1))
    x = x.reshape(x.shape[0], -1)
    hdn = jnp.maximum(jnp.dot(cast(x), cast(params['fc1_w']),
                              preferred_element_type=f32) + params['fc1_b'], 0.0)
    return jnp.dot(cast(hdn), cast(params['fc2_w']),
                   preferred_element_type=f32) + params['fc2_b']


# --------------------------------- params ------------------------------------

def init_params(key, input_shape, num_actions):
    cin = input_shape[0]
    (oh3, ow3) = _conv_dims(input_shape[1], input_shape[2])[2]
    feat = 16 * oh3 * ow3
    ks = jax.random.split(key, 10)

    def conv_w(k, cout, cin_, kk):
        return jax.random.normal(k, (cout, cin_, kk, kk), jnp.float32) / jnp.sqrt(cin_ * kk * kk)

    return dict(
        w1=conv_w(ks[0], 8, cin, 4),
        b1=0.1 * jax.random.normal(ks[1], (8,), jnp.float32),
        w2=conv_w(ks[2], 8, 16, 5),
        b2=0.1 * jax.random.normal(ks[3], (8,), jnp.float32),
        w3=conv_w(ks[4], 8, 16, 3),
        b3=0.1 * jax.random.normal(ks[5], (8,), jnp.float32),
        # Linear weights stored as (in, out)  (== PyTorch weight.T)
        fc1_w=jax.random.normal(ks[6], (feat, 32), jnp.float32) / jnp.sqrt(feat),
        fc1_b=0.1 * jax.random.normal(ks[7], (32,), jnp.float32),
        fc2_w=jax.random.normal(ks[8], (32, num_actions), jnp.float32) / jnp.sqrt(32.0),
        fc2_b=0.1 * jax.random.normal(ks[9], (num_actions,), jnp.float32),
    )


# ----------------------------------- main -------------------------------------

if __name__ == "__main__":
    # env.observation_space.shape = (4, 16, 16), env.action_space.n = 6
    INPUT_SHAPE = (4, 16, 16)
    NUM_ACTIONS = 6
    BATCH = 2

    key = jax.random.PRNGKey(0)
    k_params, k_x = jax.random.split(key)

    params = init_params(k_params, INPUT_SHAPE, NUM_ACTIONS)
    prepared = prepare_params(params, INPUT_SHAPE)

    x = jax.random.uniform(k_x, (BATCH,) + INPUT_SHAPE, jnp.float32,
                           minval=0.0, maxval=255.0)

    fwd = jax.jit(dqn_forward)
    q = jax.block_until_ready(fwd(x, prepared))
    assert q.shape == (BATCH, NUM_ACTIONS), q.shape

    # Tight structural check vs a reference with matched bf16-operand numerics.
    q_match = jax.block_until_ready(ref_forward(x, params, MATMUL_DTYPE))
    err_match = float(jnp.max(jnp.abs(q - q_match)))
    assert err_match < 1e-2, f"mismatch vs bf16-matched reference: {err_match}"

    # Full-f32 PyTorch-semantics check (loose tol accounts for bf16 MXU operands).
    q_f32 = jax.block_until_ready(ref_forward(x, params, jnp.float32))
    err_f32 = float(jnp.max(jnp.abs(q - q_f32)))
    assert err_f32 < 1e-1, f"mismatch vs f32 reference: {err_f32}"

    # TODO(synk): DQNBase.act() epsilon-greedy uses host-side python `random`; not a kernel op.
    print("KERNEL_OK")
</pallas_src>

<mosaic_0001>
module attributes {stable_mosaic.version = 11 : i64} {
  func.func @_dqn_fused_kernel(%arg0: i32, %arg1: memref<2x8x8x16xbf16, #tpu.memory_space<vmem>>, %arg2: memref<4x16x16xbf16, #tpu.memory_space<vmem>>, %arg3: memref<1x16xf32, #tpu.memory_space<vmem>>, %arg4: memref<25x16x16xbf16, #tpu.memory_space<vmem>>, %arg5: memref<1x16xf32, #tpu.memory_space<vmem>>, %arg6: memref<9x16x16xbf16, #tpu.memory_space<vmem>>, %arg7: memref<1x16xf32, #tpu.memory_space<vmem>>, %arg8: memref<16x32xbf16, #tpu.memory_space<vmem>>, %arg9: memref<1x32xf32, #tpu.memory_space<vmem>>, %arg10: memref<32x6xbf16, #tpu.memory_space<vmem>>, %arg11: memref<1x6xf32, #tpu.memory_space<vmem>>, %arg12: memref<2x6xf32, #tpu.memory_space<vmem>>) attributes {dimension_semantics = [#tpu.dimension_semantics<parallel>], iteration_bounds = array<i64: 1>, scalar_prefetch = 0 : i64, scratch_operands = 0 : i64, tpu.core_type = #tpu.core_type<tc>, window_params = [{transform_indices = @transform_0, window_bounds = array<i64: 2, 8, 8, 16>}, {pipeline_mode = #tpu.pipeline_mode<synchronous>, transform_indices = @transform_1, window_bounds = array<i64: 4, 16, 16>}, {pipeline_mode = #tpu.pipeline_mode<synchronous>, transform_indices = @transform_2, window_bounds = array<i64: 1, 16>}, {pipeline_mode = #tpu.pipeline_mode<synchronous>, transform_indices = @transform_3, window_bounds = array<i64: 25, 16, 16>}, {pipeline_mode = #tpu.pipeline_mode<synchronous>, transform_indices = @transform_4, window_bounds = array<i64: 1, 16>}, {pipeline_mode = #tpu.pipeline_mode<synchronous>, transform_indices = @transform_5, window_bounds = array<i64: 9, 16, 16>}, {pipeline_mode = #tpu.pipeline_mode<synchronous>, transform_indices = @transform_6, window_bounds = array<i64: 1, 16>}, {pipeline_mode = #tpu.pipeline_mode<synchronous>, transform_indices = @transform_7, window_bounds = array<i64: 16, 32>}, {pipeline_mode = #tpu.pipeline_mode<synchronous>, transform_indices = @transform_8, window_bounds = array<i64: 1, 32>}, {pipeline_mode = #tpu.pipeline_mode<synchronous>, transform_indices = @transform_9, window_bounds = array<i64: 32, 6>}, {pipeline_mode = #tpu.pipeline_mode<synchronous>, transform_indices = @transform_10, window_bounds = array<i64: 1, 6>}, {transform_indices = @transform_11, window_bounds = array<i64: 2, 6>}]} {
    %c0 = arith.constant 0 : index
    %c0_0 = arith.constant 0 : index
    %0 = vector.load %arg3[%c0, %c0_0] : memref<1x16xf32, #tpu.memory_space<vmem>>, vector<1x16xf32>
    %c0_1 = arith.constant 0 : index
    %c0_2 = arith.constant 0 : index
    %1 = vector.load %arg5[%c0_1, %c0_2] : memref<1x16xf32, #tpu.memory_space<vmem>>, vector<1x16xf32>
    %c0_3 = arith.constant 0 : index
    %c0_4 = arith.constant 0 : index
    %2 = vector.load %arg7[%c0_3, %c0_4] : memref<1x16xf32, #tpu.memory_space<vmem>>, vector<1x16xf32>
    %c0_5 = arith.constant 0 : index
    %c0_6 = arith.constant 0 : index
    %3 = vector.load %arg8[%c0_5, %c0_6] : memref<16x32xbf16, #tpu.memory_space<vmem>>, vector<16x32xbf16>
    %c0_7 = arith.constant 0 : index
    %c0_8 = arith.constant 0 : index
    %4 = vector.load %arg9[%c0_7, %c0_8] : memref<1x32xf32, #tpu.memory_space<vmem>>, vector<1x32xf32>
    %c0_9 = arith.constant 0 : index
    %c0_10 = arith.constant 0 : index
    %5 = vector.load %arg10[%c0_9, %c0_10] : memref<32x6xbf16, #tpu.memory_space<vmem>>, vector<32x6xbf16>
    %c0_11 = arith.constant 0 : index
    %c0_12 = arith.constant 0 : index
    %6 = vector.load %arg11[%c0_11, %c0_12] : memref<1x6xf32, #tpu.memory_space<vmem>>, vector<1x6xf32>
    %c0_13 = arith.constant 0 : index
    %c0_14 = arith.constant 0 : index
    %c0_15 = arith.constant 0 : index
    %c0_16 = arith.constant 0 : index
    %7 = vector.load %arg1[%c0_13, %c0_14, %c0_15, %c0_16] : memref<2x8x8x16xbf16, #tpu.memory_space<vmem>>, vector<1x1x7x16xbf16>
    %8 = vector.shape_cast %7 : vector<1x1x7x16xbf16> to vector<7x16xbf16>
    %c0_17 = arith.constant 0 : index
    %c0_18 = arith.constant 0 : index
    %c0_19 = arith.constant 0 : index
    %9 = vector.load %arg2[%c0_17, %c0_18, %c0_19] : memref<4x16x16xbf16, #tpu.memory_space<vmem>>, vector<1x16x16xbf16>
    %10 = vector.shape_cast %9 : vector<1x16x16xbf16> to vector<16x16xbf16>
    %cst = arith.constant dense<0.000000e+00> : vector<7x16xf32>
    %11 = tpu.matmul %8, %10, %cst {dimension_numbers = #tpu.dot_dimension_numbers<[1], [0], [0], [1], [0, 0, 1, 1], [], []>} : vector<7x16xbf16>, vector<16x16xbf16>, vector<7x16xf32> -> vector<7x16xf32>
    %c0_20 = arith.constant 0 : index
    %c0_21 = arith.constant 0 : index
    %c1 = arith.constant 1 : index
    %c0_22 = arith.constant 0 : index
    %12 = vector.load %arg1[%c0_20, %c0_21, %c1, %c0_22] : memref<2x8x8x16xbf16, #tpu.memory_space<vmem>>, vector<1x1x7x16xbf16>
    %13 = vector.shape_cast %12 : vector<1x1x7x16xbf16> to vector<7x16xbf16>
    %c1_23 = arith.constant 1 : index
    %c0_24 = arith.constant 0 : index
    %c0_25 = arith.constant 0 : index
    %14 = vector.load %arg2[%c1_23, %c0_24, %c0_25] : memref<4x16x16xbf16, #tpu.memory_space<vmem>>, vector<1x16x16xbf16>
    %15 = vector.shape_cast %14 : vector<1x16x16xbf16> to vector<16x16xbf16>
    %cst_26 = arith.constant dense<0.000000e+00> : vector<7x16xf32>
    %16 = tpu.matmul %13, %15, %cst_26 {dimension_numbers = #tpu.dot_dimension_numbers<[1], [0], [0], [1], [0, 0, 1, 1], [], []>} : vector<7x16xbf16>, vector<16x16xbf16>, vector<7x16xf32> -> vector<7x16xf32>
    %17 = arith.addf %11, %16 : vector<7x16xf32>
    %c0_27 = arith.constant 0 : index
    %c1_28 = arith.constant 1 : index
    %c0_29 = arith.constant 0 : index
    %c0_30 = arith.constant 0 : index
    %18 = vector.load %arg1[%c0_27, %c1_28, %c0_29, %c0_30] : memref<2x8x8x16xbf16, #tpu.memory_space<vmem>>, vector<1x1x7x16xbf16>
    %19 = vector.shape_cast %18 : vector<1x1x7x16xbf16> to vector<7x16xbf16>
    %c2 = arith.constant 2 : index
    %c0_31 = arith.constant 0 : index
    %c0_32 = arith.constant 0 : index
    %20 = vector.load %arg2[%c2, %c0_31, %c0_32] : memref<4x16x16xbf16, #tpu.memory_space<vmem>>, vector<1x16x16xbf16>
    %21 = vector.shape_cast %20 : vector<1x16x16xbf16> to vector<16x16xbf16>
    %cst_33 = arith.constant dense<0.000000e+00> : vector<7x16xf32>
    %22 = tpu.matmul %19, %21, %cst_33 {dimension_numbers = #tpu.dot_dimension_numbers<[1], [0], [0], [1], [0, 0, 1, 1], [], []>} : vector<7x16xbf16>, vector<16x16xbf16>, vector<7x16xf32> -> vector<7x16xf32>
    %23 = arith.addf %17, %22 : vector<7x16xf32>
    %c0_34 = arith.constant 0 : index
    %c1_35 = arith.constant 1 : index
    %c1_36 = arith.constant 1 : index
    %c0_37 = arith.constant 0 : index
    %24 = vector.load %arg1[%c0_34, %c1_35, %c1_36, %c0_37] : memref<2x8x8x16xbf16, #tpu.memory_space<vmem>>, vector<1x1x7x16xbf16>
    %25 = vector.shape_cast %24 : vector<1x1x7x16xbf16> to vector<7x16xbf16>
    %c3 = arith.constant 3 : index
    %c0_38 = arith.constant 0 : index
    %c0_39 = arith.constant 0 : index
    %26 = vector.load %arg2[%c3, %c0_38, %c0_39] : memref<4x16x16xbf16, #tpu.memory_space<vmem>>, vector<1x16x16xbf16>
    %27 = vector.shape_cast %26 : vector<1x16x16xbf16> to vector<16x16xbf16>
    %cst_40 = arith.constant dense<0.000000e+00> : vector<7x16xf32>
    %28 = tpu.matmul %25, %27, %cst_40 {dimension_numbers = #tpu.dot_dimension_numbers<[1], [0], [0], [1], [0, 0, 1, 1], [], []>} : vector<7x16xbf16>, vector<16x16xbf16>, vector<7x16xf32> -> vector<7x16xf32>
    %29 = arith.addf %23, %28 : vector<7x16xf32>
    %30 = vector.broadcast %0 : vector<1x16xf32> to vector<7x16xf32>
    %31 = arith.addf %29, %30 : vector<7x16xf32>
    %cst_41 = arith.constant 0.000000e+00 : f32
    %32 = vector.broadcast %cst_41 : f32 to vector<7x16xf32>
    %33 = arith.maximumf %31, %32 : vector<7x16xf32>
    %c0_42 = arith.constant 0 : index
    %c1_43 = arith.constant 1 : index
    %c0_44 = arith.constant 0 : index
    %c0_45 = arith.constant 0 : index
    %34 = vector.load %arg1[%c0_42, %c1_43, %c0_44, %c0_45] : memref<2x8x8x16xbf16, #tpu.memory_space<vmem>>, vector<1x1x7x16xbf16>
    %35 = vector.shape_cast %34 : vector<1x1x7x16xbf16> to vector<7x16xbf16>
    %c0_46 = arith.constant 0 : index
    %c0_47 = arith.constant 0 : index
    %c0_48 = arith.constant 0 : index
    %36 = vector.load %arg2[%c0_46, %c0_47, %c0_48] : memref<4x16x16xbf16, #tpu.memory_space<vmem>>, vector<1x16x16xbf16>
    %37 = vector.shape_cast %36 : vector<1x16x16xbf16> to vector<16x16xbf16>
    %cst_49 = arith.constant dense<0.000000e+00> : vector<7x16xf32>
    %38 = tpu.matmul %35, %37, %cst_49 {dimension_numbers = #tpu.dot_dimension_numbers<[1], [0], [0], [1], [0, 0, 1, 1], [], []>} : vector<7x16xbf16>, vector<16x16xbf16>, vector<7x16xf32> -> vector<7x16xf32>
    %c0_50 = arith.constant 0 : index
    %c1_51 = arith.constant 1 : index
    %c1_52 = arith.constant 1 : index
    %c0_53 = arith.constant 0 : index
    %39 = vector.load %arg1[%c0_50, %c1_51, %c1_52, %c0_53] : memref<2x8x8x16xbf16, #tpu.memory_space<vmem>>, vector<1x1x7x16xbf16>
    %40 = vector.shape_cast %39 : vector<1x1x7x16xbf16> to vector<7x16xbf16>
    %c1_54 = arith.constant 1 : index
    %c0_55 = arith.constant 0 : index
    %c0_56 = arith.constant 0 : index
    %41 = vector.load %arg2[%c1_54, %c0_55, %c0_56] : memref<4x16x16xbf16, #tpu.memory_space<vmem>>, vector<1x16x16xbf16>
    %42 = vector.shape_cast %41 : vector<1x16x16xbf16> to vector<16x16xbf16>
    %cst_57 = arith.constant dense<0.000000e+00> : vector<7x16xf32>
    %43 = tpu.matmul %40, %42, %cst_57 {dimension_numbers = #tpu.dot_dimension_numbers<[1], [0], [0], [1], [0, 0, 1, 1], [], []>} : vector<7x16xbf16>, vector<16x16xbf16>, vector<7x16xf32> -> vector<7x16xf32>
    %44 = arith.addf %38, %43 : vector<7x16xf32>
    %c0_58 = arith.constant 0 : index
    %c2_59 = arith.constant 2 : index
    %c0_60 = arith.constant 0 : index
    %c0_61 = arith.constant 0 : index
    %45 = vector.load %arg1[%c0_58, %c2_59, %c0_60, %c0_61] : memref<2x8x8x16xbf16, #tpu.memory_space<vmem>>, vector<1x1x7x16xbf16>
    %46 = vector.shape_cast %45 : vector<1x1x7x16xbf16> to vector<7x16xbf16>
    %c2_62 = arith.constant 2 : index
    %c0_63 = arith.constant 0 : index
    %c0_64 = arith.constant 0 : index
    %47 = vector.load %arg2[%c2_62, %c0_63, %c0_64] : memref<4x16x16xbf16, #tpu.memory_space<vmem>>, vector<1x16x16xbf16>
    %48 = vector.shape_cast %47 : vector<1x16x16xbf16> to vector<16x16xbf16>
    %cst_65 = arith.constant dense<0.000000e+00> : vector<7x16xf32>
    %49 = tpu.matmul %46, %48, %cst_65 {dimension_numbers = #tpu.dot_dimension_numbers<[1], [0], [0], [1], [0, 0, 1, 1], [], []>} : vector<7x16xbf16>, vector<16x16xbf16>, vector<7x16xf32> -> vector<7x16xf32>
    %50 = arith.addf %44, %49 : vector<7x16xf32>
    %c0_66 = arith.constant 0 : index
    %c2_67 = arith.constant 2 : index
    %c1_68 = arith.constant 1 : index
    %c0_69 = arith.constant 0 : index
    %51 = vector.load %arg1[%c0_66, %c2_67, %c1_68, %c0_69] : memref<2x8x8x16xbf16, #tpu.memory_space<vmem>>, vector<1x1x7x16xbf16>
    %52 = vector.shape_cast %51 : vector<1x1x7x16xbf16> to vector<7x16xbf16>
    %c3_70 = arith.constant 3 : index
    %c0_71 = arith.constant 0 : index
    %c0_72 = arith.constant 0 : index
    %53 = vector.load %arg2[%c3_70, %c0_71, %c0_72] : memref<4x16x16xbf16, #tpu.memory_space<vmem>>, vector<1x16x16xbf16>
    %54 = vector.shape_cast %53 : vector<1x16x16xbf16> to vector<16x16xbf16>
    %cst_73 = arith.constant dense<0.000000e+00> : vector<7x16xf32>
    %55 = tpu.matmul %52, %54, %cst_73 {dimension_numbers = #tpu.dot_dimension_numbers<[1], [0], [0], [1], [0, 0, 1, 1], [], []>} : vector<7x16xbf16>, vector<16x16xbf16>, vector<7x16xf32> -> vector<7x16xf32>
    %56 = arith.addf %50, %55 : vector<7x16xf32>
    %57 = vector.broadcast %0 : vector<1x16xf32> to vector<7x16xf32>
    %58 = arith.addf %56, %57 : vector<7x16xf32>
    %cst_74 = arith.constant 0.000000e+00 : f32
    %59 = vector.broadcast %cst_74 : f32 to vector<7x16xf32>
    %60 = arith.maximumf %58, %59 : vector<7x16xf32>
    %c0_75 = arith.constant 0 : index
    %c2_76 = arith.constant 2 : index
    %c0_77 = arith.constant 0 : index
    %c0_78 = arith.constant 0 : index
    %61 = vector.load %arg1[%c0_75, %c2_76, %c0_77, %c0_78] : memref<2x8x8x16xbf16, #tpu.memory_space<vmem>>, vector<1x1x7x16xbf16>
    %62 = vector.shape_cast %61 : vector<1x1x7x16xbf16> to vector<7x16xbf16>
    %c0_79 = arith.constant 0 : index
    %c0_80 = arith.constant 0 : index
    %c0_81 = arith.constant 0 : index
    %63 = vector.load %arg2[%c0_79, %c0_80, %c0_81] : memref<4x16x16xbf16, #tpu.memory_space<vmem>>, vector<1x16x16xbf16>
    %64 = vector.shape_cast %63 : vector<1x16x16xbf16> to vector<16x16xbf16>
    %cst_82 = arith.constant dense<0.000000e+00> : vector<7x16xf32>
    %65 = tpu.matmul %62, %64, %cst_82 {dimension_numbers = #tpu.dot_dimension_numbers<[1], [0], [0], [1], [0, 0, 1, 1], [], []>} : vector<7x16xbf16>, vector<16x16xbf16>, vector<7x16xf32> -> vector<7x16xf32>
    %c0_83 = arith.constant 0 : index
    %c2_84 = arith.constant 2 : index
    %c1_85 = arith.constant 1 : index
    %c0_86 = arith.constant 0 : index
    %66 = vector.load %arg1[%c0_83, %c2_84, %c1_85, %c0_86] : memref<2x8x8x16xbf16, #tpu.memory_space<vmem>>, vector<1x1x7x16xbf16>
    %67 = vector.shape_cast %66 : vector<1x1x7x16xbf16> to vector<7x16xbf16>
    %c1_87 = arith.constant 1 : index
    %c0_88 = arith.constant 0 : index
    %c0_89 = arith.constant 0 : index
    %68 = vector.load %arg2[%c1_87, %c0_88, %c0_89] : memref<4x16x16xbf16, #tpu.memory_space<vmem>>, vector<1x16x16xbf16>
    %69 = vector.shape_cast %68 : vector<1x16x16xbf16> to vector<16x16xbf16>
    %cst_90 = arith.constant dense<0.000000e+00> : vector<7x16xf32>
    %70 = tpu.matmul %67, %69, %cst_90 {dimension_numbers = #tpu.dot_dimension_numbers<[1], [0], [0], [1], [0, 0, 1, 1], [], []>} : vector<7x16xbf16>, vector<16x16xbf16>, vector<7x16xf32> -> vector<7x16xf32>
    %71 = arith.addf %65, %70 : vector<7x16xf32>
    %c0_91 = arith.constant 0 : index
    %c3_92 = arith.constant 3 : index
    %c0_93 = arith.constant 0 : index
    %c0_94 = arith.constant 0 : index
    %72 = vector.load %arg1[%c0_91, %c3_92, %c0_93, %c0_94] : memref<2x8x8x16xbf16, #tpu.memory_space<vmem>>, vector<1x1x7x16xbf16>
    %73 = vector.shape_cast %72 : vector<1x1x7x16xbf16> to vector<7x16xbf16>
    %c2_95 = arith.constant 2 : index
    %c0_96 = arith.constant 0 : index
    %c0_97 = arith.constant 0 : index
    %74 = vector.load %arg2[%c2_95, %c0_96, %c0_97] : memref<4x16x16xbf16, #tpu.memory_space<vmem>>, vector<1x16x16xbf16>
    %75 = vector.shape_cast %74 : vector<1x16x16xbf16> to vector<16x16xbf16>
    %cst_98 = arith.constant dense<0.000000e+00> : vector<7x16xf32>
    %76 = tpu.matmul %73, %75, %cst_98 {dimension_numbers = #tpu.dot_dimension_numbers<[1], [0], [0], [1], [0, 0, 1, 1], [], []>} : vector<7x16xbf16>, vector<16x16xbf16>, vector<7x16xf32> -> vector<7x16xf32>
    %77 = arith.addf %71, %76 : vector<7x16xf32>
    %c0_99 = arith.constant 0 : index
    %c3_100 = arith.constant 3 : index
    %c1_101 = arith.constant 1 : index
    %c0_102 = arith.constant 0 : index
    %78 = vector.load %arg1[%c0_99, %c3_100, %c1_101, %c0_102] : memref<2x8x8x16xbf16, #tpu.memory_space<vmem>>, vector<1x1x7x16xbf16>
    %79 = vector.shape_cast %78 : vector<1x1x7x16xbf16> to vector<7x16xbf16>
    %c3_103 = arith.constant 3 : index
    %c0_104 = arith.constant 0 : index
    %c0_105 = arith.constant 0 : index
    %80 = vector.load %arg2[%c3_103, %c0_104, %c0_105] : memref<4x16x16xbf16, #tpu.memory_space<vmem>>, vector<1x16x16xbf16>
    %81 = vector.shape_cast %80 : vector<1x16x16xbf16> to vector<16x16xbf16>
    %cst_106 = arith.constant dense<0.000000e+00> : vector<7x16xf32>
    %82 = tpu.matmul %79, %81, %cst_106 {dimension_numbers = #tpu.dot_dimension_numbers<[1], [0], [0], [1], [0, 0, 1, 1], [], []>} : vector<7x16xbf16>, vector<16x16xbf16>, vector<7x16xf32> -> vector<7x16xf32>
    %83 = arith.addf %77, %82 : vector<7x16xf32>
    %84 = vector.broadcast %0 : vector<1x16xf32> to vector<7x16xf32>
    %85 = arith.addf %83, %84 : vector<7x16xf32>
    %cst_107 = arith.constant 0.000000e+00 : f32
    %86 = vector.broadcast %cst_107 : f32 to vector<7x16xf32>
    %87 = arith.maximumf %85, %86 : vector<7x16xf32>
    %c0_108 = arith.constant 0 : index
    %c3_109 = arith.constant 3 : index
    %c0_110 = arith.constant 0 : index
    %c0_111 = arith.constant 0 : index
    %88 = vector.load %arg1[%c0_108, %c3_109, %c0_110, %c0_111] : memref<2x8x8x16xbf16, #tpu.memory_space<vmem>>, vector<1x1x7x16xbf16>
    %89 = vector.shape_cast %88 : vector<1x1x7x16xbf16> to vector<7x16xbf16>
    %c0_112 = arith.constant 0 : index
    %c0_113 = arith.constant 0 : index
    %c0_114 = arith.constant 0 : index
    %90 = vector.load %arg2[%c0_112, %c0_113, %c0_114] : memref<4x16x16xbf16, #tpu.memory_space<vmem>>, vector<1x16x16xbf16>
    %91 = vector.shape_cast %90 : vector<1x16x16xbf16> to vector<16x16xbf16>
    %cst_115 = arith.constant dense<0.000000e+00> : vector<7x16xf32>
    %92 = tpu.matmul %89, %91, %cst_115 {dimension_numbers = #tpu.dot_dimension_numbers<[1], [0], [0], [1], [0, 0, 1, 1], [], []>} : vector<7x16xbf16>, vector<16x16xbf16>, vector<7x16xf32> -> vector<7x16xf32>
    %c0_116 = arith.constant 0 : index
    %c3_117 = arith.constant 3 : index
    %c1_118 = arith.constant 1 : index
    %c0_119 = arith.constant 0 : index
    %93 = vector.load %arg1[%c0_116, %c3_117, %c1_118, %c0_119] : memref<2x8x8x16xbf16, #tpu.memory_space<vmem>>, vector<1x1x7x16xbf16>
    %94 = vector.shape_cast %93 : vector<1x1x7x16xbf16> to vector<7x16xbf16>
    %c1_120 = arith.constant 1 : index
    %c0_121 = arith.constant 0 : index
    %c0_122 = arith.constant 0 : index
    %95 = vector.load %arg2[%c1_120, %c0_121, %c0_122] : memref<4x16x16xbf16, #tpu.memory_space<vmem>>, vector<1x16x16xbf16>
    %96 = vector.shape_cast %95 : vector<1x16x16xbf16> to vector<16x16xbf16>
    %cst_123 = arith.constant dense<0.000000e+00> : vector<7x16xf32>
    %97 = tpu.matmul %94, %96, %cst_123 {dimension_numbers = #tpu.dot_dimension_numbers<[1], [0], [0], [1], [0, 0, 1, 1], [], []>} : vector<7x16xbf16>, vector<16x16xbf16>, vector<7x16xf32> -> vector<7x16xf32>
    %98 = arith.addf %92, %97 : vector<7x16xf32>
    %c0_124 = arith.constant 0 : index
    %c4 = arith.constant 4 : index
    %c0_125 = arith.constant 0 : index
    %c0_126 = arith.constant 0 : index
    %99 = vector.load %arg1[%c0_124, %c4, %c0_125, %c0_126] : memref<2x8x8x16xbf16, #tpu.memory_space<vmem>>, vector<1x1x7x16xbf16>
    %100 = vector.shape_cast %99 : vector<1x1x7x16xbf16> to vector<7x16xbf16>
    %c2_127 = arith.constant 2 : index
    %c0_128 = arith.constant 0 : index
    %c0_129 = arith.constant 0 : index
    %101 = vector.load %arg2[%c2_127, %c0_128, %c0_129] : memref<4x16x16xbf16, #tpu.memory_space<vmem>>, vector<1x16x16xbf16>
    %102 = vector.shape_cast %101 : vector<1x16x16xbf16> to vector<16x16xbf16>
    %cst_130 = arith.constant dense<0.000000e+00> : vector<7x16xf32>
    %103 = tpu.matmul %100, %102, %cst_130 {dimension_numbers = #tpu.dot_dimension_numbers<[1], [0], [0], [1], [0, 0, 1, 1], [], []>} : vector<7x16xbf16>, vector<16x16xbf16>, vector<7x16xf32> -> vector<7x16xf32>
    %104 = arith.addf %98, %103 : vector<7x16xf32>
    %c0_131 = arith.constant 0 : index
    %c4_132 = arith.constant 4 : index
    %c1_133 = arith.constant 1 : index
    %c0_134 = arith.constant 0 : index
    %105 = vector.load %arg1[%c0_131, %c4_132, %c1_133, %c0_134] : memref<2x8x8x16xbf16, #tpu.memory_space<vmem>>, vector<1x1x7x16xbf16>
    %106 = vector.shape_cast %105 : vector<1x1x7x16xbf16> to vector<7x16xbf16>
    %c3_135 = arith.constant 3 : index
    %c0_136 = arith.constant 0 : index
    %c0_137 = arith.constant 0 : index
    %107 = vector.load %arg2[%c3_135, %c0_136, %c0_137] : memref<4x16x16xbf16, #tpu.memory_space<vmem>>, vector<1x16x16xbf16>
    %108 = vector.shape_cast %107 : vector<1x16x16xbf16> to vector<16x16xbf16>
    %cst_138 = arith.constant dense<0.000000e+00> : vector<7x16xf32>
    %109 = tpu.matmul %106, %108, %cst_138 {dimension_numbers = #tpu.dot_dimension_numbers<[1], [0], [0], [1], [0, 0, 1, 1], [], []>} : vector<7x16xbf16>, vector<16x16xbf16>, vector<7x16xf32> -> vector<7x16xf32>
    %110 = arith.addf %104, %109 : vector<7x16xf32>
    %111 = vector.broadcast %0 : vector<1x16xf32> to vector<7x16xf32>
    %112 = arith.addf %110, %111 : vector<7x16xf32>
    %cst_139 = arith.constant 0.000000e+00 : f32
    %113 = vector.broadcast %cst_139 : f32 to vector<7x16xf32>
    %114 = arith.maximumf %112, %113 : vector<7x16xf32>
    %c0_140 = arith.constant 0 : index
    %c4_141 = arith.constant 4 : index
    %c0_142 = arith.constant 0 : index
    %c0_143 = arith.constant 0 : index
    %115 = vector.load %arg1[%c0_140, %c4_141, %c0_142, %c0_143] : memref<2x8x8x16xbf16, #tpu.memory_space<vmem>>, vector<1x1x7x16xbf16>
    %116 = vector.shape_cast %115 : vector<1x1x7x16xbf16> to vector<7x16xbf16>
    %c0_144 = arith.constant 0 : index
    %c0_145 = arith.constant 0 : index
    %c0_146 = arith.constant 0 : index
    %117 = vector.load %arg2[%c0_144, %c0_145, %c0_146] : memref<4x16x16xbf16, #tpu.memory_space<vmem>>, vector<1x16x16xbf16>
    %118 = vector.shape_cast %117 : vector<1x16x16xbf16> to vector<16x16xbf16>
    %cst_147 = arith.constant dense<0.000000e+00> : vector<7x16xf32>
    %119 = tpu.matmul %116, %118, %cst_147 {dimension_numbers = #tpu.dot_dimension_numbers<[1], [0], [0], [1], [0, 0, 1, 1], [], []>} : vector<7x16xbf16>, vector<16x16xbf16>, vector<7x16xf32> -> vector<7x16xf32>
    %c0_148 = arith.constant 0 : index
    %c4_149 = arith.constant 4 : index
    %c1_150 = arith.constant 1 : index
    %c0_151 = arith.constant 0 : index
    %120 = vector.load %arg1[%c0_148, %c4_149, %c1_150, %c0_151] : memref<2x8x8x16xbf16, #tpu.memory_space<vmem>>, vector<1x1x7x16xbf16>
    %121 = vector.shape_cast %120 : vector<1x1x7x16xbf16> to vector<7x16xbf16>
    %c1_152 = arith.constant 1 : index
    %c0_153 = arith.constant 0 : index
    %c0_154 = arith.constant 0 : index
    %122 = vector.load %arg2[%c1_152, %c0_153, %c0_154] : memref<4x16x16xbf16, #tpu.memory_space<vmem>>, vector<1x16x16xbf16>
    %123 = vector.shape_cast %122 : vector<1x16x16xbf16> to vector<16x16xbf16>
    %cst_155 = arith.constant dense<0.000000e+00> : vector<7x16xf32>
    %124 = tpu.matmul %121, %123, %cst_155 {dimension_numbers = #tpu.dot_dimension_numbers<[1], [0], [0], [1], [0, 0, 1, 1], [], []>} : vector<7x16xbf16>, vector<16x16xbf16>, vector<7x16xf32> -> vector<7x16xf32>
    %125 = arith.addf %119, %124 : vector<7x16xf32>
    %c0_156 = arith.constant 0 : index
    %c5 = arith.constant 5 : index
    %c0_157 = arith.constant 0 : index
    %c0_158 = arith.constant 0 : index
    %126 = vector.load %arg1[%c0_156, %c5, %c0_157, %c0_158] : memref<2x8x8x16xbf16, #tpu.memory_space<vmem>>, vector<1x1x7x16xbf16>
    %127 = vector.shape_cast %126 : vector<1x1x7x16xbf16> to vector<7x16xbf16>
    %c2_159 = arith.constant 2 : index
    %c0_160 = arith.constant 0 : index
    %c0_161 = arith.constant 0 : index
    %128 = vector.load %arg2[%c2_159, %c0_160, %c0_161] : memref<4x16x16xbf16, #tpu.memory_space<vmem>>, vector<1x16x16xbf16>
    %129 = vector.shape_cast %128 : vector<1x16x16xbf16> to vector<16x16xbf16>
    %cst_162 = arith.constant dense<0.000000e+00> : vector<7x16xf32>
    %130 = tpu.matmul %127, %129, %cst_162 {dimension_numbers = #tpu.dot_dimension_numbers<[1], [0], [0], [1], [0, 0, 1, 1], [], []>} : vector<7x16xbf16>, vector<16x16xbf16>, vector<7x16xf32> -> vector<7x16xf32>
    %131 = arith.addf %125, %130 : vector<7x16xf32>
    %c0_163 = arith.constant 0 : index
    %c5_164 = arith.constant 5 : index
    %c1_165 = arith.constant 1 : index
    %c0_166 = arith.constant 0 : index
    %132 = vector.load %arg1[%c0_163, %c5_164, %c1_165, %c0_166] : memref<2x8x8x16xbf16, #tpu.memory_space<vmem>>, vector<1x1x7x16xbf16>
    %133 = vector.shape_cast %132 : vector<1x1x7x16xbf16> to vector<7x16xbf16>
    %c3_167 = arith.constant 3 : index
    %c0_168 = arith.constant 0 : index
    %c0_169 = arith.constant 0 : index
    %134 = vector.load %arg2[%c3_167, %c0_168, %c0_169] : memref<4x16x16xbf16, #tpu.memory_space<vmem>>, vector<1x16x16xbf16>
    %135 = vector.shape_cast %134 : vector<1x16x16xbf16> to vector<16x16xbf16>
    %cst_170 = arith.constant dense<0.000000e+00> : vector<7x16xf32>
    %136 = tpu.matmul %133, %135, %cst_170 {dimension_numbers = #tpu.dot_dimension_numbers<[1], [0], [0], [1], [0, 0, 1, 1], [], []>} : vector<7x16xbf16>, vector<16x16xbf16>, vector<7x16xf32> -> vector<7x16xf32>
    %137 = arith.addf %131, %136 : vector<7x16xf32>
    %138 = vector.broadcast %0 : vector<1x16xf32> to vector<7x16xf32>
    %139 = arith.addf %137, %138 : vector<7x16xf32>
    %cst_171 = arith.constant 0.000000e+00 : f32
    %140 = vector.broadcast %cst_171 : f32 to vector<7x16xf32>
    %141 = arith.maximumf %139, %140 : vector<7x16xf32>
    %c0_172 = arith.constant 0 : index
    %c5_173 = arith.constant 5 : index
    %c0_174 = arith.constant 0 : index
    %c0_175 = arith.constant 0 : index
    %142 = vector.load %arg1[%c0_172, %c5_173, %c0_174, %c0_175] : memref<2x8x8x16xbf16, #tpu.memory_space<vmem>>, vector<1x1x7x16xbf16>
    %143 = vector.shape_cast %142 : vector<1x1x7x16xbf16> to vector<7x16xbf16>
    %c0_176 = arith.constant 0 : index
    %c0_177 = arith.constant 0 : index
    %c0_178 = arith.constant 0 : index
    %144 = vector.load %arg2[%c0_176, %c0_177, %c0_178] : memref<4x16x16xbf16, #tpu.memory_space<vmem>>, vector<1x16x16xbf16>
    %145 = vector.shape_cast %144 : vector<1x16x16xbf16> to vector<16x16xbf16>
    %cst_179 = arith.constant dense<0.000000e+00> : vector<7x16xf32>
    %146 = tpu.matmul %143, %145, %cst_179 {dimension_numbers = #tpu.dot_dimension_numbers<[1], [0], [0], [1], [0, 0, 1, 1], [], []>} : vector<7x16xbf16>, vector<16x16xbf16>, vector<7x16xf32> -> vector<7x16xf32>
    %c0_180 = arith.constant 0 : index
    %c5_181 = arith.constant 5 : index
    %c1_182 = arith.constant 1 : index
    %c0_183 = arith.constant 0 : index
    %147 = vector.load %arg1[%c0_180, %c5_181, %c1_182, %c0_183] : memref<2x8x8x16xbf16, #tpu.memory_space<vmem>>, vector<1x1x7x16xbf16>
    %148 = vector.shape_cast %147 : vector<1x1x7x16xbf16> to vector<7x16xbf16>
    %c1_184 = arith.constant 1 : index
    %c0_185 = arith.constant 0 : index
    %c0_186 = arith.constant 0 : index
    %149 = vector.load %arg2[%c1_184, %c0_185, %c0_186] : memref<4x16x16xbf16, #tpu.memory_space<vmem>>, vector<1x16x16xbf16>
    %150 = vector.shape_cast %149 : vector<1x16x16xbf16> to vector<16x16xbf16>
    %cst_187 = arith.constant dense<0.000000e+00> : vector<7x16xf32>
    %151 = tpu.matmul %148, %150, %cst_187 {dimension_numbers = #tpu.dot_dimension_numbers<[1], [0], [0], [1], [0, 0, 1, 1], [], []>} : vector<7x16xbf16>, vector<16x16xbf16>, vector<7x16xf32> -> vector<7x16xf32>
    %152 = arith.addf %146, %151 : vector<7x16xf32>
    %c0_188 = arith.constant 0 : index
    %c6 = arith.constant 6 : index
    %c0_189 = arith.constant 0 : index
    %c0_190 = arith.constant 0 : index
    %153 = vector.load %arg1[%c0_188, %c6, %c0_189, %c0_190] : memref<2x8x8x16xbf16, #tpu.memory_space<vmem>>, vector<1x1x7x16xbf16>
    %154 = vector.shape_cast %153 : vector<1x1x7x16xbf16> to vector<7x16xbf16>
    %c2_191 = arith.constant 2 : index
    %c0_192 = arith.constant 0 : index
    %c0_193 = arith.constant 0 : index
    %155 = vector.load %arg2[%c2_191, %c0_192, %c0_193] : memref<4x16x16xbf16, #tpu.memory_space<vmem>>, vector<1x16x16xbf16>
    %156 = vector.shape_cast %155 : vector<1x16x16xbf16> to vector<16x16xbf16>
    %cst_194 = arith.constant dense<0.000000e+00> : vector<7x16xf32>
    %157 = tpu.matmul %154, %156, %cst_194 {dimension_numbers = #tpu.dot_dimension_numbers<[1], [0], [0], [1], [0, 0, 1, 1], [], []>} : vector<7x16xbf16>, vector<16x16xbf16>, vector<7x16xf32> -> vector<7x16xf32>
    %158 = arith.addf %152, %157 : vector<7x16xf32>
    %c0_195 = arith.constant 0 : index
    %c6_196 = arith.constant 6 : index
    %c1_197 = arith.constant 1 : index
    %c0_198 = arith.constant 0 : index
    %159 = vector.load %arg1[%c0_195, %c6_196, %c1_197, %c0_198] : memref<2x8x8x16xbf16, #tpu.memory_space<vmem>>, vector<1x1x7x16xbf16>
    %160 = vector.shape_cast %159 : vector<1x1x7x16xbf16> to vector<7x16xbf16>
    %c3_199 = arith.constant 3 : index
    %c0_200 = arith.constant 0 : index
    %c0_201 = arith.constant 0 : index
    %161 = vector.load %arg2[%c3_199, %c0_200, %c0_201] : memref<4x16x16xbf16, #tpu.memory_space<vmem>>, vector<1x16x16xbf16>
    %162 = vector.shape_cast %161 : vector<1x16x16xbf16> to vector<16x16xbf16>
    %cst_202 = arith.constant dense<0.000000e+00> : vector<7x16xf32>
    %163 = tpu.matmul %160, %162, %cst_202 {dimension_numbers = #tpu.dot_dimension_numbers<[1], [0], [0], [1], [0, 0, 1, 1], [], []>} : vector<7x16xbf16>, vector<16x16xbf16>, vector<7x16xf32> -> vector<7x16xf32>
    %164 = arith.addf %158, %163 : vector<7x16xf32>
    %165 = vector.broadcast %0 : vector<1x16xf32> to vector<7x16xf32>
    %166 = arith.addf %164, %165 : vector<7x16xf32>
    %cst_203 = arith.constant 0.000000e+00 : f32
    %167 = vector.broadcast %cst_203 : f32 to vector<7x16xf32>
    %168 = arith.maximumf %166, %167 : vector<7x16xf32>
    %c0_204 = arith.constant 0 : index
    %c6_205 = arith.constant 6 : index
    %c0_206 = arith.constant 0 : index
    %c0_207 = arith.constant 0 : index
    %169 = vector.load %arg1[%c0_204, %c6_205, %c0_206, %c0_207] : memref<2x8x8x16xbf16, #tpu.memory_space<vmem>>, vector<1x1x7x16xbf16>
    %170 = vector.shape_cast %169 : vector<1x1x7x16xbf16> to vector<7x16xbf16>
    %c0_208 = arith.constant 0 : index
    %c0_209 = arith.constant 0 : index
    %c0_210 = arith.constant 0 : index
    %171 = vector.load %arg2[%c0_208, %c0_209, %c0_210] : memref<4x16x16xbf16, #tpu.memory_space<vmem>>, vector<1x16x16xbf16>
    %172 = vector.shape_cast %171 : vector<1x16x16xbf16> to vector<16x16xbf16>
    %cst_211 = arith.constant dense<0.000000e+00> : vector<7x16xf32>
    %173 = tpu.matmul %170, %172, %cst_211 {dimension_numbers = #tpu.dot_dimension_numbers<[1], [0], [0], [1], [0, 0, 1, 1], [], []>} : vector<7x16xbf16>, vector<16x16xbf16>, vector<7x16xf32> -> vector<7x16xf32>
    %c0_212 = arith.constant 0 : index
    %c6_213 = arith.constant 6 : index
    %c1_214 = arith.constant 1 : index
    %c0_215 = arith.constant 0 : index
    %174 = vector.load %arg1[%c0_212, %c6_213, %c1_214, %c0_215] : memref<2x8x8x16xbf16, #tpu.memory_space<vmem>>, vector<1x1x7x16xbf16>
    %175 = vector.shape_cast %174 : vector<1x1x7x16xbf16> to vector<7x16xbf16>
    %c1_216 = arith.constant 1 : index
    %c0_217 = arith.constant 0 : index
    %c0_218 = arith.constant 0 : index
    %176 = vector.load %arg2[%c1_216, %c0_217, %c0_218] : memref<4x16x16xbf16, #tpu.memory_space<vmem>>, vector<1x16x16xbf16>
    %177 = vector.shape_cast %176 : vector<1x16x16xbf16> to vector<16x16xbf16>
    %cst_219 = arith.constant dense<0.000000e+00> : vector<7x16xf32>
    %178 = tpu.matmul %175, %177, %cst_219 {dimension_numbers = #tpu.dot_dimension_numbers<[1], [0], [0], [1], [0, 0, 1, 1], [], []>} : vector<7x16xbf16>, vector<16x16xbf16>, vector<7x16xf32> -> vector<7x16xf32>
    %179 = arith.addf %173, %178 : vector<7x16xf32>
    %c0_220 = arith.constant 0 : index
    %c7 = arith.constant 7 : index
    %c0_221 = arith.constant 0 : index
    %c0_222 = arith.constant 0 : index
    %180 = vector.load %arg1[%c0_220, %c7, %c0_221, %c0_222] : memref<2x8x8x16xbf16, #tpu.memory_space<vmem>>, vector<1x1x7x16xbf16>
    %181 = vector.shape_cast %180 : vector<1x1x7x16xbf16> to vector<7x16xbf16>
    %c2_223 = arith.constant 2 : index
    %c0_224 = arith.constant 0 : index
    %c0_225 = arith.constant 0 : index
    %182 = vector.load %arg2[%c2_223, %c0_224, %c0_225] : memref<4x16x16xbf16, #tpu.memory_space<vmem>>, vector<1x16x16xbf16>
    %183 = vector.shape_cast %182 : vector<1x16x16xbf16> to vector<16x16xbf16>
    %cst_226 = arith.constant dense<0.000000e+00> : vector<7x16xf32>
    %184 = tpu.matmul %181, %183, %cst_226 {dimension_numbers = #tpu.dot_dimension_numbers<[1], [0], [0], [1], [0, 0, 1, 1], [], []>} : vector<7x16xbf16>, vector<16x16xbf16>, vector<7x16xf32> -> vector<7x16xf32>
    %185 = arith.addf %179, %184 : vector<7x16xf32>
    %c0_227 = arith.constant 0 : index
    %c7_228 = arith.constant 7 : index
    %c1_229 = arith.constant 1 : index
    %c0_230 = arith.constant 0 : index
    %186 = vector.load %arg1[%c0_227, %c7_228, %c1_229, %c0_230] : memref<2x8x8x16xbf16, #tpu.memory_space<vmem>>, vector<1x1x7x16xbf16>
    %187 = vector.shape_cast %186 : vector<1x1x7x16xbf16> to vector<7x16xbf16>
    %c3_231 = arith.constant 3 : index
    %c0_232 = arith.constant 0 : index
    %c0_233 = arith.constant 0 : index
    %188 = vector.load %arg2[%c3_231, %c0_232, %c0_233] : memref<4x16x16xbf16, #tpu.memory_space<vmem>>, vector<1x16x16xbf16>
    %189 = vector.shape_cast %188 : vector<1x16x16xbf16> to vector<16x16xbf16>
    %cst_234 = arith.constant dense<0.000000e+00> : vector<7x16xf32>
    %190 = tpu.matmul %187, %189, %cst_234 {dimension_numbers = #tpu.dot_dimension_numbers<[1], [0], [0], [1], [0, 0, 1, 1], [], []>} : vector<7x16xbf16>, vector<16x16xbf16>, vector<7x16xf32> -> vector<7x16xf32>
    %191 = arith.addf %185, %190 : vector<7x16xf32>
    %192 = vector.broadcast %0 : vector<1x16xf32> to vector<7x16xf32>
    %193 = arith.addf %191, %192 : vector<7x16xf32>
    %cst_235 = arith.constant 0.000000e+00 : f32
    %194 = vector.broadcast %cst_235 : f32 to vector<7x16xf32>
    %195 = arith.maximumf %193, %194 : vector<7x16xf32>
    %196 = vector.extract_strided_slice %33 {offsets = [0, 0], sizes = [3, 16], strides = [1, 1]} : vector<7x16xf32> to vector<3x16xf32>
    %197 = arith.truncf %196 : vector<3x16xf32> to vector<3x16xbf16>
    %c0_236 = arith.constant 0 : index
    %c0_237 = arith.constant 0 : index
    %c0_238 = arith.constant 0 : index
    %198 = vector.load %arg4[%c0_236, %c0_237, %c0_238] : memref<25x16x16xbf16, #tpu.memory_space<vmem>>, vector<1x16x16xbf16>
    %199 = vector.shape_cast %198 : vector<1x16x16xbf16> to vector<16x16xbf16>
    %cst_239 = arith.constant dense<0.000000e+00> : vector<3x16xf32>
    %200 = tpu.matmul %197, %199, %cst_239 {dimension_numbers = #tpu.dot_dimension_numbers<[1], [0], [0], [1], [0, 0, 1, 1], [], []>} : vector<3x16xbf16>, vector<16x16xbf16>, vector<3x16xf32> -> vector<3x16xf32>
    %201 = vector.extract_strided_slice %33 {offsets = [1, 0], sizes = [3, 16], strides = [1, 1]} : vector<7x16xf32> to vector<3x16xf32>
    %202 = arith.truncf %201 : vector<3x16xf32> to vector<3x16xbf16>
    %c1_240 = arith.constant 1 : index
    %c0_241 = arith.constant 0 : index
    %c0_242 = arith.constant 0 : index
    %203 = vector.load %arg4[%c1_240, %c0_241, %c0_242] : memref<25x16x16xbf16, #tpu.memory_space<vmem>>, vector<1x16x16xbf16>
    %204 = vector.shape_cast %203 : vector<1x16x16xbf16> to vector<16x16xbf16>
    %cst_243 = arith.constant dense<0.000000e+00> : vector<3x16xf32>
    %205 = tpu.matmul %202, %204, %cst_243 {dimension_numbers = #tpu.dot_dimension_numbers<[1], [0], [0], [1], [0, 0, 1, 1], [], []>} : vector<3x16xbf16>, vector<16x16xbf16>, vector<3x16xf32> -> vector<3x16xf32>
    %206 = arith.addf %200, %205 : vector<3x16xf32>
    %207 = vector.extract_strided_slice %33 {offsets = [2, 0], sizes = [3, 16], strides = [1, 1]} : vector<7x16xf32> to vector<3x16xf32>
    %208 = arith.truncf %207 : vector<3x16xf32> to vector<3x16xbf16>
    %c2_244 = arith.constant 2 : index
    %c0_245 = arith.constant 0 : index
    %c0_246 = arith.constant 0 : index
    %209 = vector.load %arg4[%c2_244, %c0_245, %c0_246] : memref<25x16x16xbf16, #tpu.memory_space<vmem>>, vector<1x16x16xbf16>
    %210 = vector.shape_cast %209 : vector<1x16x16xbf16> to vector<16x16xbf16>
    %cst_247 = arith.constant dense<0.000000e+00> : vector<3x16xf32>
    %211 = tpu.matmul %208, %210, %cst_247 {dimension_numbers = #tpu.dot_dimension_numbers<[1], [0], [0], [1], [0, 0, 1, 1], [], []>} : vector<3x16xbf16>, vector<16x16xbf16>, vector<3x16xf32> -> vector<3x16xf32>
    %212 = arith.addf %206, %211 : vector<3x16xf32>
    %213 = vector.extract_strided_slice %33 {offsets = [3, 0], sizes = [3, 16], strides = [1, 1]} : vector<7x16xf32> to vector<3x16xf32>
    %214 = arith.truncf %213 : vector<3x16xf32> to vector<3x16xbf16>
    %c3_248 = arith.constant 3 : index
    %c0_249 = arith.constant 0 : index
    %c0_250 = arith.constant 0 : index
    %215 = vector.load %arg4[%c3_248, %c0_249, %c0_250] : memref<25x16x16xbf16, #tpu.memory_space<vmem>>, vector<1x16x16xbf16>
    %216 = vector.shape_cast %215 : vector<1x16x16xbf16> to vector<16x16xbf16>
    %cst_251 = arith.constant dense<0.000000e+00> : vector<3x16xf32>
    %217 = tpu.matmul %214, %216, %cst_251 {dimension_numbers = #tpu.dot_dimension_numbers<[1], [0], [0], [1], [0, 0, 1, 1], [], []>} : vector<3x16xbf16>, vector<16x16xbf16>, vector<3x16xf32> -> vector<3x16xf32>
    %218 = arith.addf %212, %217 : vector<3x16xf32>
    %219 = vector.extract_strided_slice %33 {offsets = [4, 0], sizes = [3, 16], strides = [1, 1]} : vector<7x16xf32> to vector<3x16xf32>
    %220 = arith.truncf %219 : vector<3x16xf32> to vector<3x16xbf16>
    %c4_252 = arith.constant 4 : index
    %c0_253 = arith.constant 0 : index
    %c0_254 = arith.constant 0 : index
    %221 = vector.load %arg4[%c4_252, %c0_253, %c0_254] : memref<25x16x16xbf16, #tpu.memory_space<vmem>>, vector<1x16x16xbf16>
    %222 = vector.shape_cast %221 : vector<1x16x16xbf16> to vector<16x16xbf16>
    %cst_255 = arith.constant dense<0.000000e+00> : vector<3x16xf32>
    %223 = tpu.matmul %220, %222, %cst_255 {dimension_numbers = #tpu.dot_dimension_numbers<[1], [0], [0], [1], [0, 0, 1, 1], [], []>} : vector<3x16xbf16>, vector<16x16xbf16>, vector<3x16xf32> -> vector<3x16xf32>
    %224 = arith.addf %218, %223 : vector<3x16xf32>
    %225 = vector.extract_strided_slice %60 {offsets = [0, 0], sizes = [3, 16], strides = [1, 1]} : vector<7x16xf32> to vector<3x16xf32>
    %226 = arith.truncf %225 : vector<3x16xf32> to vector<3x16xbf16>
    %c5_256 = arith.constant 5 : index
    %c0_257 = arith.constant 0 : index
    %c0_258 = arith.constant 0 : index
    %227 = vector.load %arg4[%c5_256, %c0_257, %c0_258] : memref<25x16x16xbf16, #tpu.memory_space<vmem>>, vector<1x16x16xbf16>
    %228 = vector.shape_cast %227 : vector<1x16x16xbf16> to vector<16x16xbf16>
    %cst_259 = arith.constant dense<0.000000e+00> : vector<3x16xf32>
    %229 = tpu.matmul %226, %228, %cst_259 {dimension_numbers = #tpu.dot_dimension_numbers<[1], [0], [0], [1], [0, 0, 1, 1], [], []>} : vector<3x16xbf16>, vector<16x16xbf16>, vector<3x16xf32> -> vector<3x16xf32>
    %230 = arith.addf %224, %229 : vector<3x16xf32>
    %231 = vector.extract_strided_slice %60 {offsets = [1, 0], sizes = [3, 16], strides = [1, 1]} : vector<7x16xf32> to vector<3x16xf32>
    %232 = arith.truncf %231 : vector<3x16xf32> to vector<3x16xbf16>
    %c6_260 = arith.constant 6 : index
    %c0_261 = arith.constant 0 : index
    %c0_262 = arith.constant 0 : index
    %233 = vector.load %arg4[%c6_260, %c0_261, %c0_262] : memref<25x16x16xbf16, #tpu.memory_space<vmem>>, vector<1x16x16xbf16>
    %234 = vector.shape_cast %233 : vector<1x16x16xbf16> to vector<16x16xbf16>
    %cst_263 = arith.constant dense<0.000000e+00> : vector<3x16xf32>
    %235 = tpu.matmul %232, %234, %cst_263 {dimension_numbers = #tpu.dot_dimension_numbers<[1], [0], [0], [1], [0, 0, 1, 1], [], []>} : vector<3x16xbf16>, vector<16x16xbf16>, vector<3x16xf32> -> vector<3x16xf32>
    %236 = arith.addf %230, %235 : vector<3x16xf32>
    %237 = vector.extract_strided_slice %60 {offsets = [2, 0], sizes = [3, 16], strides = [1, 1]} : vector<7x16xf32> to vector<3x16xf32>
    %238 = arith.truncf %237 : vector<3x16xf32> to vector<3x16xbf16>
    %c7_264 = arith.constant 7 : index
    %c0_265 = arith.constant 0 : index
    %c0_266 = arith.constant 0 : index
    %239 = vector.load %arg4[%c7_264, %c0_265, %c0_266] : memref<25x16x16xbf16, #tpu.memory_space<vmem>>, vector<1x16x16xbf16>
    %240 = vector.shape_cast %239 : vector<1x16x16xbf16> to vector<16x16xbf16>
    %cst_267 = arith.constant dense<0.000000e+00> : vector<3x16xf32>
    %241 = tpu.matmul %238, %240, %cst_267 {dimension_numbers = #tpu.dot_dimension_numbers<[1], [0], [0], [1], [0, 0, 1, 1], [], []>} : vector<3x16xbf16>, vector<16x16xbf16>, vector<3x16xf32> -> vector<3x16xf32>
    %242 = arith.addf %236, %241 : vector<3x16xf32>
    %243 = vector.extract_strided_slice %60 {offsets = [3, 0], sizes = [3, 16], strides = [1, 1]} : vector<7x16xf32> to vector<3x16xf32>
    %244 = arith.truncf %243 : vector<3x16xf32> to vector<3x16xbf16>
    %c8 = arith.constant 8 : index
    %c0_268 = arith.constant 0 : index
    %c0_269 = arith.constant 0 : index
    %245 = vector.load %arg4[%c8, %c0_268, %c0_269] : memref<25x16x16xbf16, #tpu.memory_space<vmem>>, vector<1x16x16xbf16>
    %246 = vector.shape_cast %245 : vector<1x16x16xbf16> to vector<16x16xbf16>
    %cst_270 = arith.constant dense<0.000000e+00> : vector<3x16xf32>
    %247 = tpu.matmul %244, %246, %cst_270 {dimension_numbers = #tpu.dot_dimension_numbers<[1], [0], [0], [1], [0, 0, 1, 1], [], []>} : vector<3x16xbf16>, vector<16x16xbf16>, vector<3x16xf32> -> vector<3x16xf32>
    %248 = arith.addf %242, %247 : vector<3x16xf32>
    %249 = vector.extract_strided_slice %60 {offsets = [4, 0], sizes = [3, 16], strides = [1, 1]} : vector<7x16xf32> to vector<3x16xf32>
    %250 = arith.truncf %249 : vector<3x16xf32> to vector<3x16xbf16>
    %c9 = arith.constant 9 : index
    %c0_271 = arith.constant 0 : index
    %c0_272 = arith.constant 0 : index
    %251 = vector.load %arg4[%c9, %c0_271, %c0_272] : memref<25x16x16xbf16, #tpu.memory_space<vmem>>, vector<1x16x16xbf16>
    %252 = vector.shape_cast %251 : vector<1x16x16xbf16> to vector<16x16xbf16>
    %cst_273 = arith.constant dense<0.000000e+00> : vector<3x16xf32>
    %253 = tpu.matmul %250, %252, %cst_273 {dimension_numbers = #tpu.dot_dimension_numbers<[1], [0], [0], [1], [0, 0, 1, 1], [], []>} : vector<3x16xbf16>, vector<16x16xbf16>, vector<3x16xf32> -> vector<3x16xf32>
    %254 = arith.addf %248, %253 : vector<3x16xf32>
    %255 = vector.extract_strided_slice %87 {offsets = [0, 0], sizes = [3, 16], strides = [1, 1]} : vector<7x16xf32> to vector<3x16xf32>
    %256 = arith.truncf %255 : vector<3x16xf32> to vector<3x16xbf16>
    %c10 = arith.constant 10 : index
    %c0_274 = arith.constant 0 : index
    %c0_275 = arith.constant 0 : index
    %257 = vector.load %arg4[%c10, %c0_274, %c0_275] : memref<25x16x16xbf16, #tpu.memory_space<vmem>>, vector<1x16x16xbf16>
    %258 = vector.shape_cast %257 : vector<1x16x16xbf16> to vector<16x16xbf16>
    %cst_276 = arith.constant dense<0.000000e+00> : vector<3x16xf32>
    %259 = tpu.matmul %256, %258, %cst_276 {dimension_numbers = #tpu.dot_dimension_numbers<[1], [0], [0], [1], [0, 0, 1, 1], [], []>} : vector<3x16xbf16>, vector<16x16xbf16>, vector<3x16xf32> -> vector<3x16xf32>
    %260 = arith.addf %254, %259 : vector<3x16xf32>
    %261 = vector.extract_strided_slice %87 {offsets = [1, 0], sizes = [3, 16], strides = [1, 1]} : vector<7x16xf32> to vector<3x16xf32>
    %262 = arith.truncf %261 : vector<3x16xf32> to vector<3x16xbf16>
    %c11 = arith.constant 11 : index
    %c0_277 = arith.constant 0 : index
    %c0_278 = arith.constant 0 : index
    %263 = vector.load %arg4[%c11, %c0_277, %c0_278] : memref<25x16x16xbf16, #tpu.memory_space<vmem>>, vector<1x16x16xbf16>
    %264 = vector.shape_cast %263 : vector<1x16x16xbf16> to vector<16x16xbf16>
    %cst_279 = arith.constant dense<0.000000e+00> : vector<3x16xf32>
    %265 = tpu.matmul %262, %264, %cst_279 {dimension_numbers = #tpu.dot_dimension_numbers<[1], [0], [0], [1], [0, 0, 1, 1], [], []>} : vector<3x16xbf16>, vector<16x16xbf16>, vector<3x16xf32> -> vector<3x16xf32>
    %266 = arith.addf %260, %265 : vector<3x16xf32>
    %267 = vector.extract_strided_slice %87 {offsets = [2, 0], sizes = [3, 16], strides = [1, 1]} : vector<7x16xf32> to vector<3x16xf32>
    %268 = arith.truncf %267 : vector<3x16xf32> to vector<3x16xbf16>
    %c12 = arith.constant 12 : index
    %c0_280 = arith.constant 0 : index
    %c0_281 = arith.constant 0 : index
    %269 = vector.load %arg4[%c12, %c0_280, %c0_281] : memref<25x16x16xbf16, #tpu.memory_space<vmem>>, vector<1x16x16xbf16>
    %270 = vector.shape_cast %269 : vector<1x16x16xbf16> to vector<16x16xbf16>
    %cst_282 = arith.constant dense<0.000000e+00> : vector<3x16xf32>
    %271 = tpu.matmul %268, %270, %cst_282 {dimension_numbers = #tpu.dot_dimension_numbers<[1], [0], [0], [1], [0, 0, 1, 1], [], []>} : vector<3x16xbf16>, vector<16x16xbf16>, vector<3x16xf32> -> vector<3x16xf32>
    %272 = arith.addf %266, %271 : vector<3x16xf32>
    %273 = vector.extract_strided_slice %87 {offsets = [3, 0], sizes = [3, 16], strides = [1, 1]} : vector<7x16xf32> to vector<3x16xf32>
    %274 = arith.truncf %273 : vector<3x16xf32> to vector<3x16xbf16>
    %c13 = arith.constant 13 : index
    %c0_283 = arith.constant 0 : index
    %c0_284 = arith.constant 0 : index
    %275 = vector.load %arg4[%c13, %c0_283, %c0_284] : memref<25x16x16xbf16, #tpu.memory_space<vmem>>, vector<1x16x16xbf16>
    %276 = vector.shape_cast %275 : vector<1x16x16xbf16> to vector<16x16xbf16>
    %cst_285 = arith.constant dense<0.000000e+00> : vector<3x16xf32>
    %277 = tpu.matmul %274, %276, %cst_285 {dimension_numbers = #tpu.dot_dimension_numbers<[1], [0], [0], [1], [0, 0, 1, 1], [], []>} : vector<3x16xbf16>, vector<16x16xbf16>, vector<3x16xf32> -> vector<3x16xf32>
    %278 = arith.addf %272, %277 : vector<3x16xf32>
    %279 = vector.extract_strided_slice %87 {offsets = [4, 0], sizes = [3, 16], strides = [1, 1]} : vector<7x16xf32> to vector<3x16xf32>
    %280 = arith.truncf %279 : vector<3x16xf32> to vector<3x16xbf16>
    %c14 = arith.constant 14 : index
    %c0_286 = arith.constant 0 : index
    %c0_287 = arith.constant 0 : index
    %281 = vector.load %arg4[%c14, %c0_286, %c0_287] : memref<25x16x16xbf16, #tpu.memory_space<vmem>>, vector<1x16x16xbf16>
    %282 = vector.shape_cast %281 : vector<1x16x16xbf16> to vector<16x16xbf16>
    %cst_288 = arith.constant dense<0.000000e+00> : vector<3x16xf32>
    %283 = tpu.matmul %280, %282, %cst_288 {dimension_numbers = #tpu.dot_dimension_numbers<[1], [0], [0], [1], [0, 0, 1, 1], [], []>} : vector<3x16xbf16>, vector<16x16xbf16>, vector<3x16xf32> -> vector<3x16xf32>
    %284 = arith.addf %278, %283 : vector<3x16xf32>
    %285 = vector.extract_strided_slice %114 {offsets = [0, 0], sizes = [3, 16], strides = [1, 1]} : vector<7x16xf32> to vector<3x16xf32>
    %286 = arith.truncf %285 : vector<3x16xf32> to vector<3x16xbf16>
    %c15 = arith.constant 15 : index
    %c0_289 = arith.constant 0 : index
    %c0_290 = arith.constant 0 : index
    %287 = vector.load %arg4[%c15, %c0_289, %c0_290] : memref<25x16x16xbf16, #tpu.memory_space<vmem>>, vector<1x16x16xbf16>
    %288 = vector.shape_cast %287 : vector<1x16x16xbf16> to vector<16x16xbf16>
    %cst_291 = arith.constant dense<0.000000e+00> : vector<3x16xf32>
    %289 = tpu.matmul %286, %288, %cst_291 {dimension_numbers = #tpu.dot_dimension_numbers<[1], [0], [0], [1], [0, 0, 1, 1], [], []>} : vector<3x16xbf16>, vector<16x16xbf16>, vector<3x16xf32> -> vector<3x16xf32>
    %290 = arith.addf %284, %289 : vector<3x16xf32>
    %291 = vector.extract_strided_slice %114 {offsets = [1, 0], sizes = [3, 16], strides = [1, 1]} : vector<7x16xf32> to vector<3x16xf32>
    %292 = arith.truncf %291 : vector<3x16xf32> to vector<3x16xbf16>
    %c16 = arith.constant 16 : index
    %c0_292 = arith.constant 0 : index
    %c0_293 = arith.constant 0 : index
    %293 = vector.load %arg4[%c16, %c0_292, %c0_293] : memref<25x16x16xbf16, #tpu.memory_space<vmem>>, vector<1x16x16xbf16>
    %294 = vector.shape_cast %293 : vector<1x16x16xbf16> to vector<16x16xbf16>
    %cst_294 = arith.constant dense<0.000000e+00> : vector<3x16xf32>
    %295 = tpu.matmul %292, %294, %cst_294 {dimension_numbers = #tpu.dot_dimension_numbers<[1], [0], [0], [1], [0, 0, 1, 1], [], []>} : vector<3x16xbf16>, vector<16x16xbf16>, vector<3x16xf32> -> vector<3x16xf32>
    %296 = arith.addf %290, %295 : vector<3x16xf32>
    %297 = vector.extract_strided_slice %114 {offsets = [2, 0], sizes = [3, 16], strides = [1, 1]} : vector<7x16xf32> to vector<3x16xf32>
    %298 = arith.truncf %297 : vector<3x16xf32> to vector<3x16xbf16>
    %c17 = arith.constant 17 : index
    %c0_295 = arith.constant 0 : index
    %c0_296 = arith.constant 0 : index
    %299 = vector.load %arg4[%c17, %c0_295, %c0_296] : memref<25x16x16xbf16, #tpu.memory_space<vmem>>, vector<1x16x16xbf16>
    %300 = vector.shape_cast %299 : vector<1x16x16xbf16> to vector<16x16xbf16>
    %cst_297 = arith.constant dense<0.000000e+00> : vector<3x16xf32>
    %301 = tpu.matmul %298, %300, %cst_297 {dimension_numbers = #tpu.dot_dimension_numbers<[1], [0], [0], [1], [0, 0, 1, 1], [], []>} : vector<3x16xbf16>, vector<16x16xbf16>, vector<3x16xf32> -> vector<3x16xf32>
    %302 = arith.addf %296, %301 : vector<3x16xf32>
    %303 = vector.extract_strided_slice %114 {offsets = [3, 0], sizes = [3, 16], strides = [1, 1]} : vector<7x16xf32> to vector<3x16xf32>
    %304 = arith.truncf %303 : vector<3x16xf32> to vector<3x16xbf16>
    %c18 = arith.constant 18 : index
    %c0_298 = arith.constant 0 : index
    %c0_299 = arith.constant 0 : index
    %305 = vector.load %arg4[%c18, %c0_298, %c0_299] : memref<25x16x16xbf16, #tpu.memory_space<vmem>>, vector<1x16x16xbf16>
    %306 = vector.shape_cast %305 : vector<1x16x16xbf16> to vector<16x16xbf16>
    %cst_300 = arith.constant dense<0.000000e+00> : vector<3x16xf32>
    %307 = tpu.matmul %304, %306, %cst_300 {dimension_numbers = #tpu.dot_dimension_numbers<[1], [0], [0], [1], [0, 0, 1, 1], [], []>} : vector<3x16xbf16>, vector<16x16xbf16>, vector<3x16xf32> -> vector<3x16xf32>
    %308 = arith.addf %302, %307 : vector<3x16xf32>
    %309 = vector.extract_strided_slice %114 {offsets = [4, 0], sizes = [3, 16], strides = [1, 1]} : vector<7x16xf32> to vector<3x16xf32>
    %310 = arith.truncf %309 : vector<3x16xf32> to vector<3x16xbf16>
    %c19 = arith.constant 19 : index
    %c0_301 = arith.constant 0 : index
    %c0_302 = arith.constant 0 : index
    %311 = vector.load %arg4[%c19, %c0_301, %c0_302] : memref<25x16x16xbf16, #tpu.memory_space<vmem>>, vector<1x16x16xbf16>
    %312 = vector.shape_cast %311 : vector<1x16x16xbf16> to vector<16x16xbf16>
    %cst_303 = arith.constant dense<0.000000e+00> : vector<3x16xf32>
    %313 = tpu.matmul %310, %312, %cst_303 {dimension_numbers = #tpu.dot_dimension_numbers<[1], [0], [0], [1], [0, 0, 1, 1], [], []>} : vector<3x16xbf16>, vector<16x16xbf16>, vector<3x16xf32> -> vector<3x16xf32>
    %314 = arith.addf %308, %313 : vector<3x16xf32>
    %315 = vector.extract_strided_slice %141 {offsets = [0, 0], sizes = [3, 16], strides = [1, 1]} : vector<7x16xf32> to vector<3x16xf32>
    %316 = arith.truncf %315 : vector<3x16xf32> to vector<3x16xbf16>
    %c20 = arith.constant 20 : index
    %c0_304 = arith.constant 0 : index
    %c0_305 = arith.constant 0 : index
    %317 = vector.load %arg4[%c20, %c0_304, %c0_305] : memref<25x16x16xbf16, #tpu.memory_space<vmem>>, vector<1x16x16xbf16>
    %318 = vector.shape_cast %317 : vector<1x16x16xbf16> to vector<16x16xbf16>
    %cst_306 = arith.constant dense<0.000000e+00> : vector<3x16xf32>
    %319 = tpu.matmul %316, %318, %cst_306 {dimension_numbers = #tpu.dot_dimension_numbers<[1], [0], [0], [1], [0, 0, 1, 1], [], []>} : vector<3x16xbf16>, vector<16x16xbf16>, vector<3x16xf32> -> vector<3x16xf32>
    %320 = arith.addf %314, %319 : vector<3x16xf32>
    %321 = vector.extract_strided_slice %141 {offsets = [1, 0], sizes = [3, 16], strides = [1, 1]} : vector<7x16xf32> to vector<3x16xf32>
    %322 = arith.truncf %321 : vector<3x16xf32> to vector<3x16xbf16>
    %c21 = arith.constant 21 : index
    %c0_307 = arith.constant 0 : index
    %c0_308 = arith.constant 0 : index
    %323 = vector.load %arg4[%c21, %c0_307, %c0_308] : memref<25x16x16xbf16, #tpu.memory_space<vmem>>, vector<1x16x16xbf16>
    %324 = vector.shape_cast %323 : vector<1x16x16xbf16> to vector<16x16xbf16>
    %cst_309 = arith.constant dense<0.000000e+00> : vector<3x16xf32>
    %325 = tpu.matmul %322, %324, %cst_309 {dimension_numbers = #tpu.dot_dimension_numbers<[1], [0], [0], [1], [0, 0, 1, 1], [], []>} : vector<3x16xbf16>, vector<16x16xbf16>, vector<3x16xf32> -> vector<3x16xf32>
    %326 = arith.addf %320, %325 : vector<3x16xf32>
    %327 = vector.extract_strided_slice %141 {offsets = [2, 0], sizes = [3, 16], strides = [1, 1]} : vector<7x16xf32> to vector<3x16xf32>
    %328 = arith.truncf %327 : vector<3x16xf32> to vector<3x16xbf16>
    %c22 = arith.constant 22 : index
    %c0_310 = arith.constant 0 : index
    %c0_311 = arith.constant 0 : index
    %329 = vector.load %arg4[%c22, %c0_310, %c0_311] : memref<25x16x16xbf16, #tpu.memory_space<vmem>>, vector<1x16x16xbf16>
    %330 = vector.shape_cast %329 : vector<1x16x16xbf16> to vector<16x16xbf16>
    %cst_312 = arith.constant dense<0.000000e+00> : vector<3x16xf32>
    %331 = tpu.matmul %328, %330, %cst_312 {dimension_numbers = #tpu.dot_dimension_numbers<[1], [0], [0], [1], [0, 0, 1, 1], [], []>} : vector<3x16xbf16>, vector<16x16xbf16>, vector<3x16xf32> -> vector<3x16xf32>
    %332 = arith.addf %326, %331 : vector<3x16xf32>
    %333 = vector.extract_strided_slice %141 {offsets = [3, 0], sizes = [3, 16], strides = [1, 1]} : vector<7x16xf32> to vector<3x16xf32>
    %334 = arith.truncf %333 : vector<3x16xf32> to vector<3x16xbf16>
    %c23 = arith.constant 23 : index
    %c0_313 = arith.constant 0 : index
    %c0_314 = arith.constant 0 : index
    %335 = vector.load %arg4[%c23, %c0_313, %c0_314] : memref<25x16x16xbf16, #tpu.memory_space<vmem>>, vector<1x16x16xbf16>
    %336 = vector.shape_cast %335 : vector<1x16x16xbf16> to vector<16x16xbf16>
    %cst_315 = arith.constant dense<0.000000e+00> : vector<3x16xf32>
    %337 = tpu.matmul %334, %336, %cst_315 {dimension_numbers = #tpu.dot_dimension_numbers<[1], [0], [0], [1], [0, 0, 1, 1], [], []>} : vector<3x16xbf16>, vector<16x16xbf16>, vector<3x16xf32> -> vector<3x16xf32>
    %338 = arith.addf %332, %337 : vector<3x16xf32>
    %339 = vector.extract_strided_slice %141 {offsets = [4, 0], sizes = [3, 16], strides = [1, 1]} : vector<7x16xf32> to vector<3x16xf32>
    %340 = arith.truncf %339 : vector<3x16xf32> to vector<3x16xbf16>
    %c24 = arith.constant 24 : index
    %c0_316 = arith.constant 0 : index
    %c0_317 = arith.constant 0 : index
    %341 = vector.load %arg4[%c24, %c0_316, %c0_317] : memref<25x16x16xbf16, #tpu.memory_space<vmem>>, vector<1x16x16xbf16>
    %342 = vector.shape_cast %341 : vector<1x16x16xbf16> to vector<16x16xbf16>
    %cst_318 = arith.constant dense<0.000000e+00> : vector<3x16xf32>
    %343 = tpu.matmul %340, %342, %cst_318 {dimension_numbers = #tpu.dot_dimension_numbers<[1], [0], [0], [1], [0, 0, 1, 1], [], []>} : vector<3x16xbf16>, vector<16x16xbf16>, vector<3x16xf32> -> vector<3x16xf32>
    %344 = arith.addf %338, %343 : vector<3x16xf32>
    %345 = vector.broadcast %1 : vector<1x16xf32> to vector<3x16xf32>
    %346 = arith.addf %344, %345 : vector<3x16xf32>
    %cst_319 = arith.constant 0.000000e+00 : f32
    %347 = vector.broadcast %cst_319 : f32 to vector<3x16xf32>
    %348 = arith.maximumf %346, %347 : vector<3x16xf32>
    %349 = vector.extract_strided_slice %60 {offsets = [0, 0], sizes = [3, 16], strides = [1, 1]} : vector<7x16xf32> to vector<3x16xf32>
    %350 = arith.truncf %349 : vector<3x16xf32> to vector<3x16xbf16>
    %c0_320 = arith.constant 0 : index
    %c0_321 = arith.constant 0 : index
    %c0_322 = arith.constant 0 : index
    %351 = vector.load %arg4[%c0_320, %c0_321, %c0_322] : memref<25x16x16xbf16, #tpu.memory_space<vmem>>, vector<1x16x16xbf16>
    %352 = vector.shape_cast %351 : vector<1x16x16xbf16> to vector<16x16xbf16>
    %cst_323 = arith.constant dense<0.000000e+00> : vector<3x16xf32>
    %353 = tpu.matmul %350, %352, %cst_323 {dimension_numbers = #tpu.dot_dimension_numbers<[1], [0], [0], [1], [0, 0, 1, 1], [], []>} : vector<3x16xbf16>, vector<16x16xbf16>, vector<3x16xf32> -> vector<3x16xf32>
    %354 = vector.extract_strided_slice %60 {offsets = [1, 0], sizes = [3, 16], strides = [1, 1]} : vector<7x16xf32> to vector<3x16xf32>
    %355 = arith.truncf %354 : vector<3x16xf32> to vector<3x16xbf16>
    %c1_324 = arith.constant 1 : index
    %c0_325 = arith.constant 0 : index
    %c0_326 = arith.constant 0 : index
    %356 = vector.load %arg4[%c1_324, %c0_325, %c0_326] : memref<25x16x16xbf16, #tpu.memory_space<vmem>>, vector<1x16x16xbf16>
    %357 = vector.shape_cast %356 : vector<1x16x16xbf16> to vector<16x16xbf16>
    %cst_327 = arith.constant dense<0.000000e+00> : vector<3x16xf32>
    %358 = tpu.matmul %355, %357, %cst_327 {dimension_numbers = #tpu.dot_dimension_numbers<[1], [0], [0], [1], [0, 0, 1, 1], [], []>} : vector<3x16xbf16>, vector<16x16xbf16>, vector<3x16xf32> -> vector<3x16xf32>
    %359 = arith.addf %353, %358 : vector<3x16xf32>
    %360 = vector.extract_strided_slice %60 {offsets = [2, 0], sizes = [3, 16], strides = [1, 1]} : vector<7x16xf32> to vector<3x16xf32>
    %361 = arith.truncf %360 : vector<3x16xf32> to vector<3x16xbf16>
    %c2_328 = arith.constant 2 : index
    %c0_329 = arith.constant 0 : index
    %c0_330 = arith.constant 0 : index
    %362 = vector.load %arg4[%c2_328, %c0_329, %c0_330] : memref<25x16x16xbf16, #tpu.memory_space<vmem>>, vector<1x16x16xbf16>
    %363 = vector.shape_cast %362 : vector<1x16x16xbf16> to vector<16x16xbf16>
    %cst_331 = arith.constant dense<0.000000e+00> : vector<3x16xf32>
    %364 = tpu.matmul %361, %363, %cst_331 {dimension_numbers = #tpu.dot_dimension_numbers<[1], [0], [0], [1], [0, 0, 1, 1], [], []>} : vector<3x16xbf16>, vector<16x16xbf16>, vector<3x16xf32> -> vector<3x16xf32>
    %365 = arith.addf %359, %364 : vector<3x16xf32>
    %366 = vector.extract_strided_slice %60 {offsets = [3, 0], sizes = [3, 16], strides = [1, 1]} : vector<7x16xf32> to vector<3x16xf32>
    %367 = arith.truncf %366 : vector<3x16xf32> to vector<3x16xbf16>
    %c3_332 = arith.constant 3 : index
    %c0_333 = arith.constant 0 : index
    %c0_334 = arith.constant 0 : index
    %368 = vector.load %arg4[%c3_332, %c0_333, %c0_334] : memref<25x16x16xbf16, #tpu.memory_space<vmem>>, vector<1x16x16xbf16>
    %369 = vector.shape_cast %368 : vector<1x16x16xbf16> to vector<16x16xbf16>
    %cst_335 = arith.constant dense<0.000000e+00> : vector<3x16xf32>
    %370 = tpu.matmul %367, %369, %cst_335 {dimension_numbers = #tpu.dot_dimension_numbers<[1], [0], [0], [1], [0, 0, 1, 1], [], []>} : vector<3x16xbf16>, vector<16x16xbf16>, vector<3x16xf32> -> vector<3x16xf32>
    %371 = arith.addf %365, %370 : vector<3x16xf32>
    %372 = vector.extract_strided_slice %60 {offsets = [4, 0], sizes = [3, 16], strides = [1, 1]} : vector<7x16xf32> to vector<3x16xf32>
    %373 = arith.truncf %372 : vector<3x16xf32> to vector<3x16xbf16>
    %c4_336 = arith.constant 4 : index
    %c0_337 = arith.constant 0 : index
    %c0_338 = arith.constant 0 : index
    %374 = vector.load %arg4[%c4_336, %c0_337, %c0_338] : memref<25x16x16xbf16, #tpu.memory_space<vmem>>, vector<1x16x16xbf16>
    %375 = vector.shape_cast %374 : vector<1x16x16xbf16> to vector<16x16xbf16>
    %cst_339 = arith.constant dense<0.000000e+00> : vector<3x16xf32>
    %376 = tpu.matmul %373, %375, %cst_339 {dimension_numbers = #tpu.dot_dimension_numbers<[1], [0], [0], [1], [0, 0, 1, 1], [], []>} : vector<3x16xbf16>, vector<16x16xbf16>, vector<3x16xf32> -> vector<3x16xf32>
    %377 = arith.addf %371, %376 : vector<3x16xf32>
    %378 = vector.extract_strided_slice %87 {offsets = [0, 0], sizes = [3, 16], strides = [1, 1]} : vector<7x16xf32> to vector<3x16xf32>
    %379 = arith.truncf %378 : vector<3x16xf32> to vector<3x16xbf16>
    %c5_340 = arith.constant 5 : index
    %c0_341 = arith.constant 0 : index
    %c0_342 = arith.constant 0 : index
    %380 = vector.load %arg4[%c5_340, %c0_341, %c0_342] : memref<25x16x16xbf16, #tpu.memory_space<vmem>>, vector<1x16x16xbf16>
    %381 = vector.shape_cast %380 : vector<1x16x16xbf16> to vector<16x16xbf16>
    %cst_343 = arith.constant dense<0.000000e+00> : vector<3x16xf32>
    %382 = tpu.matmul %379, %381, %cst_343 {dimension_numbers = #tpu.dot_dimension_numbers<[1], [0], [0], [1], [0, 0, 1, 1], [], []>} : vector<3x16xbf16>, vector<16x16xbf16>, vector<3x16xf32> -> vector<3x16xf32>
    %383 = arith.addf %377, %382 : vector<3x16xf32>
    %384 = vector.extract_strided_slice %87 {offsets = [1, 0], sizes = [3, 16], strides = [1, 1]} : vector<7x16xf32> to vector<3x16xf32>
    %385 = arith.truncf %384 : vector<3x16xf32> to vector<3x16xbf16>
    %c6_344 = arith.constant 6 : index
    %c0_345 = arith.constant 0 : index
    %c0_346 = arith.constant 0 : index
    %386 = vector.load %arg4[%c6_344, %c0_345, %c0_346] : memref<25x16x16xbf16, #tpu.memory_space<vmem>>, vector<1x16x16xbf16>
    %387 = vector.shape_cast %386 : vector<1x16x16xbf16> to vector<16x16xbf16>
    %cst_347 = arith.constant dense<0.000000e+00> : vector<3x16xf32>
    %388 = tpu.matmul %385, %387, %cst_347 {dimension_numbers = #tpu.dot_dimension_numbers<[1], [0], [0], [1], [0, 0, 1, 1], [], []>} : vector<3x16xbf16>, vector<16x16xbf16>, vector<3x16xf32> -> vector<3x16xf32>
    %389 = arith.addf %383, %388 : vector<3x16xf32>
    %390 = vector.extract_strided_slice %87 {offsets = [2, 0], sizes = [3, 16], strides = [1, 1]} : vector<7x16xf32> to vector<3x16xf32>
    %391 = arith.truncf %390 : vector<3x16xf32> to vector<3x16xbf16>
    %c7_348 = arith.constant 7 : index
    %c0_349 = arith.constant 0 : index
    %c0_350 = arith.constant 0 : index
    %392 = vector.load %arg4[%c7_348, %c0_349, %c0_350] : memref<25x16x16xbf16, #tpu.memory_space<vmem>>, vector<1x16x16xbf16>
    %393 = vector.shape_cast %392 : vector<1x16x16xbf16> to vector<16x16xbf16>
    %cst_351 = arith.constant dense<0.000000e+00> : vector<3x16xf32>
    %394 = tpu.matmul %391, %393, %cst_351 {dimension_numbers = #tpu.dot_dimension_numbers<[1], [0], [0], [1], [0, 0, 1, 1], [], []>} : vector<3x16xbf16>, vector<16x16xbf16>, vector<3x16xf32> -> vector<3x16xf32>
    %395 = arith.addf %389, %394 : vector<3x16xf32>
    %396 = vector.extract_strided_slice %87 {offsets = [3, 0], sizes = [3, 16], strides = [1, 1]} : vector<7x16xf32> to vector<3x16xf32>
    %397 = arith.truncf %396 : vector<3x16xf32> to vector<3x16xbf16>
    %c8_352 = arith.constant 8 : index
    %c0_353 = arith.constant 0 : index
    %c0_354 = arith.constant 0 : index
    %398 = vector.load %arg4[%c8_352, %c0_353, %c0_354] : memref<25x16x16xbf16, #tpu.memory_space<vmem>>, vector<1x16x16xbf16>
    %399 = vector.shape_cast %398 : vector<1x16x16xbf16> to vector<16x16xbf16>
    %cst_355 = arith.constant dense<0.000000e+00> : vector<3x16xf32>
    %400 = tpu.matmul %397, %399, %cst_355 {dimension_numbers = #tpu.dot_dimension_numbers<[1], [0], [0], [1], [0, 0, 1, 1], [], []>} : vector<3x16xbf16>, vector<16x16xbf16>, vector<3x16xf32> -> vector<3x16xf32>
    %401 = arith.addf %395, %400 : vector<3x16xf32>
    %402 = vector.extract_strided_slice %87 {offsets = [4, 0], sizes = [3, 16], strides = [1, 1]} : vector<7x16xf32> to vector<3x16xf32>
    %403 = arith.truncf %402 : vector<3x16xf32> to vector<3x16xbf16>
    %c9_356 = arith.constant 9 : index
    %c0_357 = arith.constant 0 : index
    %c0_358 = arith.constant 0 : index
    %404 = vector.load %arg4[%c9_356, %c0_357, %c0_358] : memref<25x16x16xbf16, #tpu.memory_space<vmem>>, vector<1x16x16xbf16>
    %405 = vector.shape_cast %404 : vector<1x16x16xbf16> to vector<16x16xbf16>
    %cst_359 = arith.constant dense<0.000000e+00> : vector<3x16xf32>
    %406 = tpu.matmul %403, %405, %cst_359 {dimension_numbers = #tpu.dot_dimension_numbers<[1], [0], [0], [1], [0, 0, 1, 1], [], []>} : vector<3x16xbf16>, vector<16x16xbf16>, vector<3x16xf32> -> vector<3x16xf32>
    %407 = arith.addf %401, %406 : vector<3x16xf32>
    %408 = vector.extract_strided_slice %114 {offsets = [0, 0], sizes = [3, 16], strides = [1, 1]} : vector<7x16xf32> to vector<3x16xf32>
    %409 = arith.truncf %408 : vector<3x16xf32> to vector<3x16xbf16>
    %c10_360 = arith.constant 10 : index
    %c0_361 = arith.constant 0 : index
    %c0_362 = arith.constant 0 : index
    %410 = vector.load %arg4[%c10_360, %c0_361, %c0_362] : memref<25x16x16xbf16, #tpu.memory_space<vmem>>, vector<1x16x16xbf16>
    %411 = vector.shape_cast %410 : vector<1x16x16xbf16> to vector<16x16xbf16>
    %cst_363 = arith.constant dense<0.000000e+00> : vector<3x16xf32>
    %412 = tpu.matmul %409, %411, %cst_363 {dimension_numbers = #tpu.dot_dimension_numbers<[1], [0], [0], [1], [0, 0, 1, 1], [], []>} : vector<3x16xbf16>, vector<16x16xbf16>, vector<3x16xf32> -> vector<3x16xf32>
    %413 = arith.addf %407, %412 : vector<3x16xf32>
    %414 = vector.extract_strided_slice %114 {offsets = [1, 0], sizes = [3, 16], strides = [1, 1]} : vector<7x16xf32> to vector<3x16xf32>
    %415 = arith.truncf %414 : vector<3x16xf32> to vector<3x16xbf16>
    %c11_364 = arith.constant 11 : index
    %c0_365 = arith.constant 0 : index
    %c0_366 = arith.constant 0 : index
    %416 = vector.load %arg4[%c11_364, %c0_365, %c0_366] : memref<25x16x16xbf16, #tpu.memory_space<vmem>>, vector<1x16x16xbf16>
    %417 = vector.shape_cast %416 : vector<1x16x16xbf16> to vector<16x16xbf16>
    %cst_367 = arith.constant dense<0.000000e+00> : vector<3x16xf32>
    %418 = tpu.matmul %415, %417, %cst_367 {dimension_numbers = #tpu.dot_dimension_numbers<[1], [0], [0], [1], [0, 0, 1, 1], [], []>} : vector<3x16xbf16>, vector<16x16xbf16>, vector<3x16xf32> -> vector<3x16xf32>
    %419 = arith.addf %413, %418 : vector<3x16xf32>
    %420 = vector.extract_strided_slice %114 {offsets = [2, 0], sizes = [3, 16], strides = [1, 1]} : vector<7x16xf32> to vector<3x16xf32>
    %421 = arith.truncf %420 : vector<3x16xf32> to vector<3x16xbf16>
    %c12_368 = arith.constant 12 : index
    %c0_369 = arith.constant 0 : index
    %c0_370 = arith.constant 0 : index
    %422 = vector.load %arg4[%c12_368, %c0_369, %c0_370] : memref<25x16x16xbf16, #tpu.memory_space<vmem>>, vector<1x16x16xbf16>
    %423 = vector.shape_cast %422 : vector<1x16x16xbf16> to vector<16x16xbf16>
    %cst_371 = arith.constant dense<0.000000e+00> : vector<3x16xf32>
    %424 = tpu.matmul %421, %423, %cst_371 {dimension_numbers = #tpu.dot_dimension_numbers<[1], [0], [0], [1], [0, 0, 1, 1], [], []>} : vector<3x16xbf16>, vector<16x16xbf16>, vector<3x16xf32> -> vector<3x16xf32>
    %425 = arith.addf %419, %424 : vector<3x16xf32>
    %426 = vector.extract_strided_slice %114 {offsets = [3, 0], sizes = [3, 16], strides = [1, 1]} : vector<7x16xf32> to vector<3x16xf32>
    %427 = arith.truncf %426 : vector<3x16xf32> to vector<3x16xbf16>
    %c13_372 = arith.constant 13 : index
    %c0_373 = arith.constant 0 : index
    %c0_374 = arith.constant 0 : index
    %428 = vector.load %arg4[%c13_372, %c0_373, %c0_374] : memref<25x16x16xbf16, #tpu.memory_space<vmem>>, vector<1x16x16xbf16>
    %429 = vector.shape_cast %428 : vector<1x16x16xbf16> to vector<16x16xbf16>
    %cst_375 = arith.constant dense<0.000000e+00> : vector<3x16xf32>
    %430 = tpu.matmul %427, %429, %cst_375 {dimension_numbers = #tpu.dot_dimension_numbers<[1], [0], [0], [1], [0, 0, 1, 1], [], []>} : vector<3x16xbf16>, vector<16x16xbf16>, vector<3x16xf32> -> vector<3x16xf32>
    %431 = arith.addf %425, %430 : vector<3x16xf32>
    %432 = vector.extract_strided_slice %114 {offsets = [4, 0], sizes = [3, 16], strides = [1, 1]} : vector<7x16xf32> to vector<3x16xf32>
    %433 = arith.truncf %432 : vector<3x16xf32> to vector<3x16xbf16>
    %c14_376 = arith.constant 14 : index
    %c0_377 = arith.constant 0 : index
    %c0_378 = arith.constant 0 : index
    %434 = vector.load %arg4[%c14_376, %c0_377, %c0_378] : memref<25x16x16xbf16, #tpu.memory_space<vmem>>, vector<1x16x16xbf16>
    %435 = vector.shape_cast %434 : vector<1x16x16xbf16> to vector<16x16xbf16>
    %cst_379 = arith.constant dense<0.000000e+00> : vector<3x16xf32>
    %436 = tpu.matmul %433, %435, %cst_379 {dimension_numbers = #tpu.dot_dimension_numbers<[1], [0], [0], [1], [0, 0, 1, 1], [], []>} : vector<3x16xbf16>, vector<16x16xbf16>, vector<3x16xf32> -> vector<3x16xf32>
    %437 = arith.addf %431, %436 : vector<3x16xf32>
    %438 = vector.extract_strided_slice %141 {offsets = [0, 0], sizes = [3, 16], strides = [1, 1]} : vector<7x16xf32> to vector<3x16xf32>
    %439 = arith.truncf %438 : vector<3x16xf32> to vector<3x16xbf16>
    %c15_380 = arith.constant 15 : index
    %c0_381 = arith.constant 0 : index
    %c0_382 = arith.constant 0 : index
    %440 = vector.load %arg4[%c15_380, %c0_381, %c0_382] : memref<25x16x16xbf16, #tpu.memory_space<vmem>>, vector<1x16x16xbf16>
    %441 = vector.shape_cast %440 : vector<1x16x16xbf16> to vector<16x16xbf16>
    %cst_383 = arith.constant dense<0.000000e+00> : vector<3x16xf32>
    %442 = tpu.matmul %439, %441, %cst_383 {dimension_numbers = #tpu.dot_dimension_numbers<[1], [0], [0], [1], [0, 0, 1, 1], [], []>} : vector<3x16xbf16>, vector<16x16xbf16>, vector<3x16xf32> -> vector<3x16xf32>
    %443 = arith.addf %437, %442 : vector<3x16xf32>
    %444 = vector.extract_strided_slice %141 {offsets = [1, 0], sizes = [3, 16], strides = [1, 1]} : vector<7x16xf32> to vector<3x16xf32>
    %445 = arith.truncf %444 : vector<3x16xf32> to vector<3x16xbf16>
    %c16_384 = arith.constant 16 : index
    %c0_385 = arith.constant 0 : index
    %c0_386 = arith.constant 0 : index
    %446 = vector.load %arg4[%c16_384, %c0_385, %c0_386] : memref<25x16x16xbf16, #tpu.memory_space<vmem>>, vector<1x16x16xbf16>
    %447 = vector.shape_cast %446 : vector<1x16x16xbf16> to vector<16x16xbf16>
    %cst_387 = arith.constant dense<0.000000e+00> : vector<3x16xf32>
    %448 = tpu.matmul %445, %447, %cst_387 {dimension_numbers = #tpu.dot_dimension_numbers<[1], [0], [0], [1], [0, 0, 1, 1], [], []>} : vector<3x16xbf16>, vector<16x16xbf16>, vector<3x16xf32> -> vector<3x16xf32>
    %449 = arith.addf %443, %448 : vector<3x16xf32>
    %450 = vector.extract_strided_slice %141 {offsets = [2, 0], sizes = [3, 16], strides = [1, 1]} : vector<7x16xf32> to vector<3x16xf32>
    %451 = arith.truncf %450 : vector<3x16xf32> to vector<3x16xbf16>
    %c17_388 = arith.constant 17 : index
    %c0_389 = arith.constant 0 : index
    %c0_390 = arith.constant 0 : index
    %452 = vector.load %arg4[%c17_388, %c0_389, %c0_390] : memref<25x16x16xbf16, #tpu.memory_space<vmem>>, vector<1x16x16xbf16>
    %453 = vector.shape_cast %452 : vector<1x16x16xbf16> to vector<16x16xbf16>
    %cst_391 = arith.constant dense<0.000000e+00> : vector<3x16xf32>
    %454 = tpu.matmul %451, %453, %cst_391 {dimension_numbers = #tpu.dot_dimension_numbers<[1], [0], [0], [1], [0, 0, 1, 1], [], []>} : vector<3x16xbf16>, vector<16x16xbf16>, vector<3x16xf32> -> vector<3x16xf32>
    %455 = arith.addf %449, %454 : vector<3x16xf32>
    %456 = vector.extract_strided_slice %141 {offsets = [3, 0], sizes = [3, 16], strides = [1, 1]} : vector<7x16xf32> to vector<3x16xf32>
    %457 = arith.truncf %456 : vector<3x16xf32> to vector<3x16xbf16>
    %c18_392 = arith.constant 18 : index
    %c0_393 = arith.constant 0 : index
    %c0_394 = arith.constant 0 : index
    %458 = vector.load %arg4[%c18_392, %c0_393, %c0_394] : memref<25x16x16xbf16, #tpu.memory_space<vmem>>, vector<1x16x16xbf16>
    %459 = vector.shape_cast %458 : vector<1x16x16xbf16> to vector<16x16xbf16>
    %cst_395 = arith.constant dense<0.000000e+00> : vector<3x16xf32>
    %460 = tpu.matmul %457, %459, %cst_395 {dimension_numbers = #tpu.dot_dimension_numbers<[1], [0], [0], [1], [0, 0, 1, 1], [], []>} : vector<3x16xbf16>, vector<16x16xbf16>, vector<3x16xf32> -> vector<3x16xf32>
    %461 = arith.addf %455, %460 : vector<3x16xf32>
    %462 = vector.extract_strided_slice %141 {offsets = [4, 0], sizes = [3, 16], strides = [1, 1]} : vector<7x16xf32> to vector<3x16xf32>
    %463 = arith.truncf %462 : vector<3x16xf32> to vector<3x16xbf16>
    %c19_396 = arith.constant 19 : index
    %c0_397 = arith.constant 0 : index
    %c0_398 = arith.constant 0 : index
    %464 = vector.load %arg4[%c19_396, %c0_397, %c0_398] : memref<25x16x16xbf16, #tpu.memory_space<vmem>>, vector<1x16x16xbf16>
    %465 = vector.shape_cast %464 : vector<1x16x16xbf16> to vector<16x16xbf16>
    %cst_399 = arith.constant dense<0.000000e+00> : vector<3x16xf32>
    %466 = tpu.matmul %463, %465, %cst_399 {dimension_numbers = #tpu.dot_dimension_numbers<[1], [0], [0], [1], [0, 0, 1, 1], [], []>} : vector<3x16xbf16>, vector<16x16xbf16>, vector<3x16xf32> -> vector<3x16xf32>
    %467 = arith.addf %461, %466 : vector<3x16xf32>
    %468 = vector.extract_strided_slice %168 {offsets = [0, 0], sizes = [3, 16], strides = [1, 1]} : vector<7x16xf32> to vector<3x16xf32>
    %469 = arith.truncf %468 : vector<3x16xf32> to vector<3x16xbf16>
    %c20_400 = arith.constant 20 : index
    %c0_401 = arith.constant 0 : index
    %c0_402 = arith.constant 0 : index
    %470 = vector.load %arg4[%c20_400, %c0_401, %c0_402] : memref<25x16x16xbf16, #tpu.memory_space<vmem>>, vector<1x16x16xbf16>
    %471 = vector.shape_cast %470 : vector<1x16x16xbf16> to vector<16x16xbf16>
    %cst_403 = arith.constant dense<0.000000e+00> : vector<3x16xf32>
    %472 = tpu.matmul %469, %471, %cst_403 {dimension_numbers = #tpu.dot_dimension_numbers<[1], [0], [0], [1], [0, 0, 1, 1], [], []>} : vector<3x16xbf16>, vector<16x16xbf16>, vector<3x16xf32> -> vector<3x16xf32>
    %473 = arith.addf %467, %472 : vector<3x16xf32>
    %474 = vector.extract_strided_slice %168 {offsets = [1, 0], sizes = [3, 16], strides = [1, 1]} : vector<7x16xf32> to vector<3x16xf32>
    %475 = arith.truncf %474 : vector<3x16xf32> to vector<3x16xbf16>
    %c21_404 = arith.constant 21 : index
    %c0_405 = arith.constant 0 : index
    %c0_406 = arith.constant 0 : index
    %476 = vector.load %arg4[%c21_404, %c0_405, %c0_406] : memref<25x16x16xbf16, #tpu.memory_space<vmem>>, vector<1x16x16xbf16>
    %477 = vector.shape_cast %476 : vector<1x16x16xbf16> to vector<16x16xbf16>
    %cst_407 = arith.constant dense<0.000000e+00> : vector<3x16xf32>
    %478 = tpu.matmul %475, %477, %cst_407 {dimension_numbers = #tpu.dot_dimension_numbers<[1], [0], [0], [1], [0, 0, 1, 1], [], []>} : vector<3x16xbf16>, vector<16x16xbf16>, vector<3x16xf32> -> vector<3x16xf32>
    %479 = arith.addf %473, %478 : vector<3x16xf32>
    %480 = vector.extract_strided_slice %168 {offsets = [2, 0], sizes = [3, 16], strides = [1, 1]} : vector<7x16xf32> to vector<3x16xf32>
    %481 = arith.truncf %480 : vector<3x16xf32> to vector<3x16xbf16>
    %c22_408 = arith.constant 22 : index
    %c0_409 = arith.constant 0 : index
    %c0_410 = arith.constant 0 : index
    %482 = vector.load %arg4[%c22_408, %c0_409, %c0_410] : memref<25x16x16xbf16, #tpu.memory_space<vmem>>, vector<1x16x16xbf16>
    %483 = vector.shape_cast %482 : vector<1x16x16xbf16> to vector<16x16xbf16>
    %cst_411 = arith.constant dense<0.000000e+00> : vector<3x16xf32>
    %484 = tpu.matmul %481, %483, %cst_411 {dimension_numbers = #tpu.dot_dimension_numbers<[1], [0], [0], [1], [0, 0, 1, 1], [], []>} : vector<3x16xbf16>, vector<16x16xbf16>, vector<3x16xf32> -> vector<3x16xf32>
    %485 = arith.addf %479, %484 : vector<3x16xf32>
    %486 = vector.extract_strided_slice %168 {offsets = [3, 0], sizes = [3, 16], strides = [1, 1]} : vector<7x16xf32> to vector<3x16xf32>
    %487 = arith.truncf %486 : vector<3x16xf32> to vector<3x16xbf16>
    %c23_412 = arith.constant 23 : index
    %c0_413 = arith.constant 0 : index
    %c0_414 = arith.constant 0 : index
    %488 = vector.load %arg4[%c23_412, %c0_413, %c0_414] : memref<25x16x16xbf16, #tpu.memory_space<vmem>>, vector<1x16x16xbf16>
    %489 = vector.shape_cast %488 : vector<1x16x16xbf16> to vector<16x16xbf16>
    %cst_415 = arith.constant dense<0.000000e+00> : vector<3x16xf32>
    %490 = tpu.matmul %487, %489, %cst_415 {dimension_numbers = #tpu.dot_dimension_numbers<[1], [0], [0], [1], [0, 0, 1, 1], [], []>} : vector<3x16xbf16>, vector<16x16xbf16>, vector<3x16xf32> -> vector<3x16xf32>
    %491 = arith.addf %485, %490 : vector<3x16xf32>
    %492 = vector.extract_strided_slice %168 {offsets = [4, 0], sizes = [3, 16], strides = [1, 1]} : vector<7x16xf32> to vector<3x16xf32>
    %493 = arith.truncf %492 : vector<3x16xf32> to vector<3x16xbf16>
    %c24_416 = arith.constant 24 : index
    %c0_417 = arith.constant 0 : index
    %c0_418 = arith.constant 0 : index
    %494 = vector.load %arg4[%c24_416, %c0_417, %c0_418] : memref<25x16x16xbf16, #tpu.memory_space<vmem>>, vector<1x16x16xbf16>
    %495 = vector.shape_cast %494 : vector<1x16x16xbf16> to vector<16x16xbf16>
    %cst_419 = arith.constant dense<0.000000e+00> : vector<3x16xf32>
    %496 = tpu.matmul %493, %495, %cst_419 {dimension_numbers = #tpu.dot_dimension_numbers<[1], [0], [0], [1], [0, 0, 1, 1], [], []>} : vector<3x16xbf16>, vector<16x16xbf16>, vector<3x16xf32> -> vector<3x16xf32>
    %497 = arith.addf %491, %496 : vector<3x16xf32>
    %498 = vector.broadcast %1 : vector<1x16xf32> to vector<3x16xf32>
    %499 = arith.addf %497, %498 : vector<3x16xf32>
    %cst_420 = arith.constant 0.000000e+00 : f32
    %500 = vector.broadcast %cst_420 : f32 to vector<3x16xf32>
    %501 = arith.maximumf %499, %500 : vector<3x16xf32>
    %502 = vector.extract_strided_slice %87 {offsets = [0, 0], sizes = [3, 16], strides = [1, 1]} : vector<7x16xf32> to vector<3x16xf32>
    %503 = arith.truncf %502 : vector<3x16xf32> to vector<3x16xbf16>
    %c0_421 = arith.constant 0 : index
    %c0_422 = arith.constant 0 : index
    %c0_423 = arith.constant 0 : index
    %504 = vector.load %arg4[%c0_421, %c0_422, %c0_423] : memref<25x16x16xbf16, #tpu.memory_space<vmem>>, vector<1x16x16xbf16>
    %505 = vector.shape_cast %504 : vector<1x16x16xbf16> to vector<16x16xbf16>
    %cst_424 = arith.constant dense<0.000000e+00> : vector<3x16xf32>
    %506 = tpu.matmul %503, %505, %cst_424 {dimension_numbers = #tpu.dot_dimension_numbers<[1], [0], [0], [1], [0, 0, 1, 1], [], []>} : vector<3x16xbf16>, vector<16x16xbf16>, vector<3x16xf32> -> vector<3x16xf32>
    %507 = vector.extract_strided_slice %87 {offsets = [1, 0], sizes = [3, 16], strides = [1, 1]} : vector<7x16xf32> to vector<3x16xf32>
    %508 = arith.truncf %507 : vector<3x16xf32> to vector<3x16xbf16>
    %c1_425 = arith.constant 1 : index
    %c0_426 = arith.constant 0 : index
    %c0_427 = arith.constant 0 : index
    %509 = vector.load %arg4[%c1_425, %c0_426, %c0_427] : memref<25x16x16xbf16, #tpu.memory_space<vmem>>, vector<1x16x16xbf16>
    %510 = vector.shape_cast %509 : vector<1x16x16xbf16> to vector<16x16xbf16>
    %cst_428 = arith.constant dense<0.000000e+00> : vector<3x16xf32>
    %511 = tpu.matmul %508, %510, %cst_428 {dimension_numbers = #tpu.dot_dimension_numbers<[1], [0], [0], [1], [0, 0, 1, 1], [], []>} : vector<3x16xbf16>, vector<16x16xbf16>, vector<3x16xf32> -> vector<3x16xf32>
    %512 = arith.addf %506, %511 : vector<3x16xf32>
    %513 = vector.extract_strided_slice %87 {offsets = [2, 0], sizes = [3, 16], strides = [1, 1]} : vector<7x16xf32> to vector<3x16xf32>
    %514 = arith.truncf %513 : vector<3x16xf32> to vector<3x16xbf16>
    %c2_429 = arith.constant 2 : index
    %c0_430 = arith.constant 0 : index
    %c0_431 = arith.constant 0 : index
    %515 = vector.load %arg4[%c2_429, %c0_430, %c0_431] : memref<25x16x16xbf16, #tpu.memory_space<vmem>>, vector<1x16x16xbf16>
    %516 = vector.shape_cast %515 : vector<1x16x16xbf16> to vector<16x16xbf16>
    %cst_432 = arith.constant dense<0.000000e+00> : vector<3x16xf32>
    %517 = tpu.matmul %514, %516, %cst_432 {dimension_numbers = #tpu.dot_dimension_numbers<[1], [0], [0], [1], [0, 0, 1, 1], [], []>} : vector<3x16xbf16>, vector<16x16xbf16>, vector<3x16xf32> -> vector<3x16xf32>
    %518 = arith.addf %512, %517 : vector<3x16xf32>
    %519 = vector.extract_strided_slice %87 {offsets = [3, 0], sizes = [3, 16], strides = [1, 1]} : vector<7x16xf32> to vector<3x16xf32>
    %520 = arith.truncf %519 : vector<3x16xf32> to vector<3x16xbf16>
    %c3_433 = arith.constant 3 : index
    %c0_434 = arith.constant 0 : index
    %c0_435 = arith.constant 0 : index
    %521 = vector.load %arg4[%c3_433, %c0_434, %c0_435] : memref<25x16x16xbf16, #tpu.memory_space<vmem>>, vector<1x16x16xbf16>
    %522 = vector.shape_cast %521 : vector<1x16x16xbf16> to vector<16x16xbf16>
    %cst_436 = arith.constant dense<0.000000e+00> : vector<3x16xf32>
    %523 = tpu.matmul %520, %522, %cst_436 {dimension_numbers = #tpu.dot_dimension_numbers<[1], [0], [0], [1], [0, 0, 1, 1], [], []>} : vector<3x16xbf16>, vector<16x16xbf16>, vector<3x16xf32> -> vector<3x16xf32>
    %524 = arith.addf %518, %523 : vector<3x16xf32>
    %525 = vector.extract_strided_slice %87 {offsets = [4, 0], sizes = [3, 16], strides = [1, 1]} : vector<7x16xf32> to vector<3x16xf32>
    %526 = arith.truncf %525 : vector<3x16xf32> to vector<3x16xbf16>
    %c4_437 = arith.constant 4 : index
    %c0_438 = arith.constant 0 : index
    %c0_439 = arith.constant 0 : index
    %527 = vector.load %arg4[%c4_437, %c0_438, %c0_439] : memref<25x16x16xbf16, #tpu.memory_space<vmem>>, vector<1x16x16xbf16>
    %528 = vector.shape_cast %527 : vector<1x16x16xbf16> to vector<16x16xbf16>
    %cst_440 = arith.constant dense<0.000000e+00> : vector<3x16xf32>
    %529 = tpu.matmul %526, %528, %cst_440 {dimension_numbers = #tpu.dot_dimension_numbers<[1], [0], [0], [1], [0, 0, 1, 1], [], []>} : vector<3x16xbf16>, vector<16x16xbf16>, vector<3x16xf32> -> vector<3x16xf32>
    %530 = arith.addf %524, %529 : vector<3x16xf32>
    %531 = vector.extract_strided_slice %114 {offsets = [0, 0], sizes = [3, 16], strides = [1, 1]} : vector<7x16xf32> to vector<3x16xf32>
    %532 = arith.truncf %531 : vector<3x16xf32> to vector<3x16xbf16>
    %c5_441 = arith.constant 5 : index
    %c0_442 = arith.constant 0 : index
    %c0_443 = arith.constant 0 : index
    %533 = vector.load %arg4[%c5_441, %c0_442, %c0_443] : memref<25x16x16xbf16, #tpu.memory_space<vmem>>, vector<1x16x16xbf16>
    %534 = vector.shape_cast %533 : vector<1x16x16xbf16> to vector<16x16xbf16>
    %cst_444 = arith.constant dense<0.000000e+00> : vector<3x16xf32>
    %535 = tpu.matmul %532, %534, %cst_444 {dimension_numbers = #tpu.dot_dimension_numbers<[1], [0], [0], [1], [0, 0, 1, 1], [], []>} : vector<3x16xbf16>, vector<16x16xbf16>, vector<3x16xf32> -> vector<3x16xf32>
    %536 = arith.addf %530, %535 : vector<3x16xf32>
    %537 = vector.extract_strided_slice %114 {offsets = [1, 0], sizes = [3, 16], strides = [1, 1]} : vector<7x16xf32> to vector<3x16xf32>
    %538 = arith.truncf %537 : vector<3x16xf32> to vector<3x16xbf16>
    %c6_445 = arith.constant 6 : index
    %c0_446 = arith.constant 0 : index
    %c0_447 = arith.constant 0 : index
    %539 = vector.load %arg4[%c6_445, %c0_446, %c0_447] : memref<25x16x16xbf16, #tpu.memory_space<vmem>>, vector<1x16x16xbf16>
    %540 = vector.shape_cast %539 : vector<1x16x16xbf16> to vector<16x16xbf16>
    %cst_448 = arith.constant dense<0.000000e+00> : vector<3x16xf32>
    %541 = tpu.matmul %538, %540, %cst_448 {dimension_numbers = #tpu.dot_dimension_numbers<[1], [0], [0], [1], [0, 0, 1, 1], [], []>} : vector<3x16xbf16>, vector<16x16xbf16>, vector<3x16xf32> -> vector<3x16xf32>
    %542 = arith.addf %536, %541 : vector<3x16xf32>
    %543 = vector.extract_strided_slice %114 {offsets = [2, 0], sizes = [3, 16], strides = [1, 1]} : vector<7x16xf32> to vector<3x16xf32>
    %544 = arith.truncf %543 : vector<3x16xf32> to vector<3x16xbf16>
    %c7_449 = arith.constant 7 : index
    %c0_450 = arith.constant 0 : index
    %c0_451 = arith.constant 0 : index
    %545 = vector.load %arg4[%c7_449, %c0_450, %c0_451] : memref<25x16x16xbf16, #tpu.memory_space<vmem>>, vector<1x16x16xbf16>
    %546 = vector.shape_cast %545 : vector<1x16x16xbf16> to vector<16x16xbf16>
    %cst_452 = arith.constant dense<0.000000e+00> : vector<3x16xf32>
    %547 = tpu.matmul %544, %546, %cst_452 {dimension_numbers = #tpu.dot_dimension_numbers<[1], [0], [0], [1], [0, 0, 1, 1], [], []>} : vector<3x16xbf16>, vector<16x16xbf16>, vector<3x16xf32> -> vector<3x16xf32>
    %548 = arith.addf %542, %547 : vector<3x16xf32>
    %549 = vector.extract_strided_slice %114 {offsets = [3, 0], sizes = [3, 16], strides = [1, 1]} : vector<7x16xf32> to vector<3x16xf32>
    %550 = arith.truncf %549 : vector<3x16xf32> to vector<3x16xbf16>
    %c8_453 = arith.constant 8 : index
    %c0_454 = arith.constant 0 : index
    %c0_455 = arith.constant 0 : index
    %551 = vector.load %arg4[%c8_453, %c0_454, %c0_455] : memref<25x16x16xbf16, #tpu.memory_space<vmem>>, vector<1x16x16xbf16>
    %552 = vector.shape_cast %551 : vector<1x16x16xbf16> to vector<16x16xbf16>
    %cst_456 = arith.constant dense<0.000000e+00> : vector<3x16xf32>
    %553 = tpu.matmul %550, %552, %cst_456 {dimension_numbers = #tpu.dot_dimension_numbers<[1], [0], [0], [1], [0, 0, 1, 1], [], []>} : vector<3x16xbf16>, vector<16x16xbf16>, vector<3x16xf32> -> vector<3x16xf32>
    %554 = arith.addf %548, %553 : vector<3x16xf32>
    %555 = vector.extract_strided_slice %114 {offsets = [4, 0], sizes = [3, 16], strides = [1, 1]} : vector<7x16xf32> to vector<3x16xf32>
    %556 = arith.truncf %555 : vector<3x16xf32> to vector<3x16xbf16>
    %c9_457 = arith.constant 9 : index
    %c0_458 = arith.constant 0 : index
    %c0_459 = arith.constant 0 : index
    %557 = vector.load %arg4[%c9_457, %c0_458, %c0_459] : memref<25x16x16xbf16, #tpu.memory_space<vmem>>, vector<1x16x16xbf16>
    %558 = vector.shape_cast %557 : vector<1x16x16xbf16> to vector<16x16xbf16>
    %cst_460 = arith.constant dense<0.000000e+00> : vector<3x16xf32>
    %559 = tpu.matmul %556, %558, %cst_460 {dimension_numbers = #tpu.dot_dimension_numbers<[1], [0], [0], [1], [0, 0, 1, 1], [], []>} : vector<3x16xbf16>, vector<16x16xbf16>, vector<3x16xf32> -> vector<3x16xf32>
    %560 = arith.addf %554, %559 : vector<3x16xf32>
    %561 = vector.extract_strided_slice %141 {offsets = [0, 0], sizes = [3, 16], strides = [1, 1]} : vector<7x16xf32> to vector<3x16xf32>
    %562 = arith.truncf %561 : vector<3x16xf32> to vector<3x16xbf16>
    %c10_461 = arith.constant 10 : index
    %c0_462 = arith.constant 0 : index
    %c0_463 = arith.constant 0 : index
    %563 = vector.load %arg4[%c10_461, %c0_462, %c0_463] : memref<25x16x16xbf16, #tpu.memory_space<vmem>>, vector<1x16x16xbf16>
    %564 = vector.shape_cast %563 : vector<1x16x16xbf16> to vector<16x16xbf16>
    %cst_464 = arith.constant dense<0.000000e+00> : vector<3x16xf32>
    %565 = tpu.matmul %562, %564, %cst_464 {dimension_numbers = #tpu.dot_dimension_numbers<[1], [0], [0], [1], [0, 0, 1, 1], [], []>} : vector<3x16xbf16>, vector<16x16xbf16>, vector<3x16xf32> -> vector<3x16xf32>
    %566 = arith.addf %560, %565 : vector<3x16xf32>
    %567 = vector.extract_strided_slice %141 {offsets = [1, 0], sizes = [3, 16], strides = [1, 1]} : vector<7x16xf32> to vector<3x16xf32>
    %568 = arith.truncf %567 : vector<3x16xf32> to vector<3x16xbf16>
    %c11_465 = arith.constant 11 : index
    %c0_466 = arith.constant 0 : index
    %c0_467 = arith.constant 0 : index
    %569 = vector.load %arg4[%c11_465, %c0_466, %c0_467] : memref<25x16x16xbf16, #tpu.memory_space<vmem>>, vector<1x16x16xbf16>
    %570 = vector.shape_cast %569 : vector<1x16x16xbf16> to vector<16x16xbf16>
    %cst_468 = arith.constant dense<0.000000e+00> : vector<3x16xf32>
    %571 = tpu.matmul %568, %570, %cst_468 {dimension_numbers = #tpu.dot_dimension_numbers<[1], [0], [0], [1], [0, 0, 1, 1], [], []>} : vector<3x16xbf16>, vector<16x16xbf16>, vector<3x16xf32> -> vector<3x16xf32>
    %572 = arith.addf %566, %571 : vector<3x16xf32>
    %573 = vector.extract_strided_slice %141 {offsets = [2, 0], sizes = [3, 16], strides = [1, 1]} : vector<7x16xf32> to vector<3x16xf32>
    %574 = arith.truncf %573 : vector<3x16xf32> to vector<3x16xbf16>
    %c12_469 = arith.constant 12 : index
    %c0_470 = arith.constant 0 : index
    %c0_471 = arith.constant 0 : index
    %575 = vector.load %arg4[%c12_469, %c0_470, %c0_471] : memref<25x16x16xbf16, #tpu.memory_space<vmem>>, vector<1x16x16xbf16>
    %576 = vector.shape_cast %575 : vector<1x16x16xbf16> to vector<16x16xbf16>
    %cst_472 = arith.constant dense<0.000000e+00> : vector<3x16xf32>
    %577 = tpu.matmul %574, %576, %cst_472 {dimension_numbers = #tpu.dot_dimension_numbers<[1], [0], [0], [1], [0, 0, 1, 1], [], []>} : vector<3x16xbf16>, vector<16x16xbf16>, vector<3x16xf32> -> vector<3x16xf32>
    %578 = arith.addf %572, %577 : vector<3x16xf32>
    %579 = vector.extract_strided_slice %141 {offsets = [3, 0], sizes = [3, 16], strides = [1, 1]} : vector<7x16xf32> to vector<3x16xf32>
    %580 = arith.truncf %579 : vector<3x16xf32> to vector<3x16xbf16>
    %c13_473 = arith.constant 13 : index
    %c0_474 = arith.constant 0 : index
    %c0_475 = arith.constant 0 : index
    %581 = vector.load %arg4[%c13_473, %c0_474, %c0_475] : memref<25x16x16xbf16, #tpu.memory_space<vmem>>, vector<1x16x16xbf16>
    %582 = vector.shape_cast %581 : vector<1x16x16xbf16> to vector<16x16xbf16>
    %cst_476 = arith.constant dense<0.000000e+00> : vector<3x16xf32>
    %583 = tpu.matmul %580, %582, %cst_476 {dimension_numbers = #tpu.dot_dimension_numbers<[1], [0], [0], [1], [0, 0, 1, 1], [], []>} : vector<3x16xbf16>, vector<16x16xbf16>, vector<3x16xf32> -> vector<3x16xf32>
    %584 = arith.addf %578, %583 : vector<3x16xf32>
    %585 = vector.extract_strided_slice %141 {offsets = [4, 0], sizes = [3, 16], strides = [1, 1]} : vector<7x16xf32> to vector<3x16xf32>
    %586 = arith.truncf %585 : vector<3x16xf32> to vector<3x16xbf16>
    %c14_477 = arith.constant 14 : index
    %c0_478 = arith.constant 0 : index
    %c0_479 = arith.constant 0 : index
    %587 = vector.load %arg4[%c14_477, %c0_478, %c0_479] : memref<25x16x16xbf16, #tpu.memory_space<vmem>>, vector<1x16x16xbf16>
    %588 = vector.shape_cast %587 : vector<1x16x16xbf16> to vector<16x16xbf16>
    %cst_480 = arith.constant dense<0.000000e+00> : vector<3x16xf32>
    %589 = tpu.matmul %586, %588, %cst_480 {dimension_numbers = #tpu.dot_dimension_numbers<[1], [0], [0], [1], [0, 0, 1, 1], [], []>} : vector<3x16xbf16>, vector<16x16xbf16>, vector<3x16xf32> -> vector<3x16xf32>
    %590 = arith.addf %584, %589 : vector<3x16xf32>
    %591 = vector.extract_strided_slice %168 {offsets = [0, 0], sizes = [3, 16], strides = [1, 1]} : vector<7x16xf32> to vector<3x16xf32>
    %592 = arith.truncf %591 : vector<3x16xf32> to vector<3x16xbf16>
    %c15_481 = arith.constant 15 : index
    %c0_482 = arith.constant 0 : index
    %c0_483 = arith.constant 0 : index
    %593 = vector.load %arg4[%c15_481, %c0_482, %c0_483] : memref<25x16x16xbf16, #tpu.memory_space<vmem>>, vector<1x16x16xbf16>
    %594 = vector.shape_cast %593 : vector<1x16x16xbf16> to vector<16x16xbf16>
    %cst_484 = arith.constant dense<0.000000e+00> : vector<3x16xf32>
    %595 = tpu.matmul %592, %594, %cst_484 {dimension_numbers = #tpu.dot_dimension_numbers<[1], [0], [0], [1], [0, 0, 1, 1], [], []>} : vector<3x16xbf16>, vector<16x16xbf16>, vector<3x16xf32> -> vector<3x16xf32>
    %596 = arith.addf %590, %595 : vector<3x16xf32>
    %597 = vector.extract_strided_slice %168 {offsets = [1, 0], sizes = [3, 16], strides = [1, 1]} : vector<7x16xf32> to vector<3x16xf32>
    %598 = arith.truncf %597 : vector<3x16xf32> to vector<3x16xbf16>
    %c16_485 = arith.constant 16 : index
    %c0_486 = arith.constant 0 : index
    %c0_487 = arith.constant 0 : index
    %599 = vector.load %arg4[%c16_485, %c0_486, %c0_487] : memref<25x16x16xbf16, #tpu.memory_space<vmem>>, vector<1x16x16xbf16>
    %600 = vector.shape_cast %599 : vector<1x16x16xbf16> to vector<16x16xbf16>
    %cst_488 = arith.constant dense<0.000000e+00> : vector<3x16xf32>
    %601 = tpu.matmul %598, %600, %cst_488 {dimension_numbers = #tpu.dot_dimension_numbers<[1], [0], [0], [1], [0, 0, 1, 1], [], []>} : vector<3x16xbf16>, vector<16x16xbf16>, vector<3x16xf32> -> vector<3x16xf32>
    %602 = arith.addf %596, %601 : vector<3x16xf32>
    %603 = vector.extract_strided_slice %168 {offsets = [2, 0], sizes = [3, 16], strides = [1, 1]} : vector<7x16xf32> to vector<3x16xf32>
    %604 = arith.truncf %603 : vector<3x16xf32> to vector<3x16xbf16>
    %c17_489 = arith.constant 17 : index
    %c0_490 = arith.constant 0 : index
    %c0_491 = arith.constant 0 : index
    %605 = vector.load %arg4[%c17_489, %c0_490, %c0_491] : memref<25x16x16xbf16, #tpu.memory_space<vmem>>, vector<1x16x16xbf16>
    %606 = vector.shape_cast %605 : vector<1x16x16xbf16> to vector<16x16xbf16>
    %cst_492 = arith.constant dense<0.000000e+00> : vector<3x16xf32>
    %607 = tpu.matmul %604, %606, %cst_492 {dimension_numbers = #tpu.dot_dimension_numbers<[1], [0], [0], [1], [0, 0, 1, 1], [], []>} : vector<3x16xbf16>, vector<16x16xbf16>, vector<3x16xf32> -> vector<3x16xf32>
    %608 = arith.addf %602, %607 : vector<3x16xf32>
    %609 = vector.extract_strided_slice %168 {offsets = [3, 0], sizes = [3, 16], strides = [1, 1]} : vector<7x16xf32> to vector<3x16xf32>
    %610 = arith.truncf %609 : vector<3x16xf32> to vector<3x16xbf16>
    %c18_493 = arith.constant 18 : index
    %c0_494 = arith.constant 0 : index
    %c0_495 = arith.constant 0 : index
    %611 = vector.load %arg4[%c18_493, %c0_494, %c0_495] : memref<25x16x16xbf16, #tpu.memory_space<vmem>>, vector<1x16x16xbf16>
    %612 = vector.shape_cast %611 : vector<1x16x16xbf16> to vector<16x16xbf16>
    %cst_496 = arith.constant dense<0.000000e+00> : vector<3x16xf32>
    %613 = tpu.matmul %610, %612, %cst_496 {dimension_numbers = #tpu.dot_dimension_numbers<[1], [0], [0], [1], [0, 0, 1, 1], [], []>} : vector<3x16xbf16>, vector<16x16xbf16>, vector<3x16xf32> -> vector<3x16xf32>
    %614 = arith.addf %608, %613 : vector<3x16xf32>
    %615 = vector.extract_strided_slice %168 {offsets = [4, 0], sizes = [3, 16], strides = [1, 1]} : vector<7x16xf32> to vector<3x16xf32>
    %616 = arith.truncf %615 : vector<3x16xf32> to vector<3x16xbf16>
    %c19_497 = arith.constant 19 : index
    %c0_498 = arith.constant 0 : index
    %c0_499 = arith.constant 0 : index
    %617 = vector.load %arg4[%c19_497, %c0_498, %c0_499] : memref<25x16x16xbf16, #tpu.memory_space<vmem>>, vector<1x16x16xbf16>
    %618 = vector.shape_cast %617 : vector<1x16x16xbf16> to vector<16x16xbf16>
    %cst_500 = arith.constant dense<0.000000e+00> : vector<3x16xf32>
    %619 = tpu.matmul %616, %618, %cst_500 {dimension_numbers = #tpu.dot_dimension_numbers<[1], [0], [0], [1], [0, 0, 1, 1], [], []>} : vector<3x16xbf16>, vector<16x16xbf16>, vector<3x16xf32> -> vector<3x16xf32>
    %620 = arith.addf %614, %619 : vector<3x16xf32>
    %621 = vector.extract_strided_slice %195 {offsets = [0, 0], sizes = [3, 16], strides = [1, 1]} : vector<7x16xf32> to vector<3x16xf32>
    %622 = arith.truncf %621 : vector<3x16xf32> to vector<3x16xbf16>
    %c20_501 = arith.constant 20 : index
    %c0_502 = arith.constant 0 : index
    %c0_503 = arith.constant 0 : index
    %623 = vector.load %arg4[%c20_501, %c0_502, %c0_503] : memref<25x16x16xbf16, #tpu.memory_space<vmem>>, vector<1x16x16xbf16>
    %624 = vector.shape_cast %623 : vector<1x16x16xbf16> to vector<16x16xbf16>
    %cst_504 = arith.constant dense<0.000000e+00> : vector<3x16xf32>
    %625 = tpu.matmul %622, %624, %cst_504 {dimension_numbers = #tpu.dot_dimension_numbers<[1], [0], [0], [1], [0, 0, 1, 1], [], []>} : vector<3x16xbf16>, vector<16x16xbf16>, vector<3x16xf32> -> vector<3x16xf32>
    %626 = arith.addf %620, %625 : vector<3x16xf32>
    %627 = vector.extract_strided_slice %195 {offsets = [1, 0], sizes = [3, 16], strides = [1, 1]} : vector<7x16xf32> to vector<3x16xf32>
    %628 = arith.truncf %627 : vector<3x16xf32> to vector<3x16xbf16>
    %c21_505 = arith.constant 21 : index
    %c0_506 = arith.constant 0 : index
    %c0_507 = arith.constant 0 : index
    %629 = vector.load %arg4[%c21_505, %c0_506, %c0_507] : memref<25x16x16xbf16, #tpu.memory_space<vmem>>, vector<1x16x16xbf16>
    %630 = vector.shape_cast %629 : vector<1x16x16xbf16> to vector<16x16xbf16>
    %cst_508 = arith.constant dense<0.000000e+00> : vector<3x16xf32>
    %631 = tpu.matmul %628, %630, %cst_508 {dimension_numbers = #tpu.dot_dimension_numbers<[1], [0], [0], [1], [0, 0, 1, 1], [], []>} : vector<3x16xbf16>, vector<16x16xbf16>, vector<3x16xf32> -> vector<3x16xf32>
    %632 = arith.addf %626, %631 : vector<3x16xf32>
    %633 = vector.extract_strided_slice %195 {offsets = [2, 0], sizes = [3, 16], strides = [1, 1]} : vector<7x16xf32> to vector<3x16xf32>
    %634 = arith.truncf %633 : vector<3x16xf32> to vector<3x16xbf16>
    %c22_509 = arith.constant 22 : index
    %c0_510 = arith.constant 0 : index
    %c0_511 = arith.constant 0 : index
    %635 = vector.load %arg4[%c22_509, %c0_510, %c0_511] : memref<25x16x16xbf16, #tpu.memory_space<vmem>>, vector<1x16x16xbf16>
    %636 = vector.shape_cast %635 : vector<1x16x16xbf16> to vector<16x16xbf16>
    %cst_512 = arith.constant dense<0.000000e+00> : vector<3x16xf32>
    %637 = tpu.matmul %634, %636, %cst_512 {dimension_numbers = #tpu.dot_dimension_numbers<[1], [0], [0], [1], [0, 0, 1, 1], [], []>} : vector<3x16xbf16>, vector<16x16xbf16>, vector<3x16xf32> -> vector<3x16xf32>
    %638 = arith.addf %632, %637 : vector<3x16xf32>
    %639 = vector.extract_strided_slice %195 {offsets = [3, 0], sizes = [3, 16], strides = [1, 1]} : vector<7x16xf32> to vector<3x16xf32>
    %640 = arith.truncf %639 : vector<3x16xf32> to vector<3x16xbf16>
    %c23_513 = arith.constant 23 : index
    %c0_514 = arith.constant 0 : index
    %c0_515 = arith.constant 0 : index
    %641 = vector.load %arg4[%c23_513, %c0_514, %c0_515] : memref<25x16x16xbf16, #tpu.memory_space<vmem>>, vector<1x16x16xbf16>
    %642 = vector.shape_cast %641 : vector<1x16x16xbf16> to vector<16x16xbf16>
    %cst_516 = arith.constant dense<0.000000e+00> : vector<3x16xf32>
    %643 = tpu.matmul %640, %642, %cst_516 {dimension_numbers = #tpu.dot_dimension_numbers<[1], [0], [0], [1], [0, 0, 1, 1], [], []>} : vector<3x16xbf16>, vector<16x16xbf16>, vector<3x16xf32> -> vector<3x16xf32>
    %644 = arith.addf %638, %643 : vector<3x16xf32>
    %645 = vector.extract_strided_slice %195 {offsets = [4, 0], sizes = [3, 16], strides = [1, 1]} : vector<7x16xf32> to vector<3x16xf32>
    %646 = arith.truncf %645 : vector<3x16xf32> to vector<3x16xbf16>
    %c24_517 = arith.constant 24 : index
    %c0_518 = arith.constant 0 : index
    %c0_519 = arith.constant 0 : index
    %647 = vector.load %arg4[%c24_517, %c0_518, %c0_519] : memref<25x16x16xbf16, #tpu.memory_space<vmem>>, vector<1x16x16xbf16>
    %648 = vector.shape_cast %647 : vector<1x16x16xbf16> to vector<16x16xbf16>
    %cst_520 = arith.constant dense<0.000000e+00> : vector<3x16xf32>
    %649 = tpu.matmul %646, %648, %cst_520 {dimension_numbers = #tpu.dot_dimension_numbers<[1], [0], [0], [1], [0, 0, 1, 1], [], []>} : vector<3x16xbf16>, vector<16x16xbf16>, vector<3x16xf32> -> vector<3x16xf32>
    %650 = arith.addf %644, %649 : vector<3x16xf32>
    %651 = vector.broadcast %1 : vector<1x16xf32> to vector<3x16xf32>
    %652 = arith.addf %650, %651 : vector<3x16xf32>
    %cst_521 = arith.constant 0.000000e+00 : f32
    %653 = vector.broadcast %cst_521 : f32 to vector<3x16xf32>
    %654 = arith.maximumf %652, %653 : vector<3x16xf32>
    %655 = vector.extract_strided_slice %348 {offsets = [0, 0], sizes = [1, 16], strides = [1, 1]} : vector<3x16xf32> to vector<1x16xf32>
    %656 = arith.truncf %655 : vector<1x16xf32> to vector<1x16xbf16>
    %c0_522 = arith.constant 0 : index
    %c0_523 = arith.constant 0 : index
    %c0_524 = arith.constant 0 : index
    %657 = vector.load %arg6[%c0_522, %c0_523, %c0_524] : memref<9x16x16xbf16, #tpu.memory_space<vmem>>, vector<1x16x16xbf16>
    %658 = vector.shape_cast %657 : vector<1x16x16xbf16> to vector<16x16xbf16>
    %cst_525 = arith.constant dense<0.000000e+00> : vector<1x16xf32>
    %659 = tpu.matmul %656, %658, %cst_525 {dimension_numbers = #tpu.dot_dimension_numbers<[1], [0], [0], [1], [0, 0, 1, 1], [], []>} : vector<1x16xbf16>, vector<16x16xbf16>, vector<1x16xf32> -> vector<1x16xf32>
    %660 = vector.extract_strided_slice %348 {offsets = [1, 0], sizes = [1, 16], strides = [1, 1]} : vector<3x16xf32> to vector<1x16xf32>
    %661 = arith.truncf %660 : vector<1x16xf32> to vector<1x16xbf16>
    %c1_526 = arith.constant 1 : index
    %c0_527 = arith.constant 0 : index
    %c0_528 = arith.constant 0 : index
    %662 = vector.load %arg6[%c1_526, %c0_527, %c0_528] : memref<9x16x16xbf16, #tpu.memory_space<vmem>>, vector<1x16x16xbf16>
    %663 = vector.shape_cast %662 : vector<1x16x16xbf16> to vector<16x16xbf16>
    %cst_529 = arith.constant dense<0.000000e+00> : vector<1x16xf32>
    %664 = tpu.matmul %661, %663, %cst_529 {dimension_numbers = #tpu.dot_dimension_numbers<[1], [0], [0], [1], [0, 0, 1, 1], [], []>} : vector<1x16xbf16>, vector<16x16xbf16>, vector<1x16xf32> -> vector<1x16xf32>
    %665 = arith.addf %659, %664 : vector<1x16xf32>
    %666 = vector.extract_strided_slice %348 {offsets = [2, 0], sizes = [1, 16], strides = [1, 1]} : vector<3x16xf32> to vector<1x16xf32>
    %667 = arith.truncf %666 : vector<1x16xf32> to vector<1x16xbf16>
    %c2_530 = arith.constant 2 : index
    %c0_531 = arith.constant 0 : index
    %c0_532 = arith.constant 0 : index
    %668 = vector.load %arg6[%c2_530, %c0_531, %c0_532] : memref<9x16x16xbf16, #tpu.memory_space<vmem>>, vector<1x16x16xbf16>
    %669 = vector.shape_cast %668 : vector<1x16x16xbf16> to vector<16x16xbf16>
    %cst_533 = arith.constant dense<0.000000e+00> : vector<1x16xf32>
    %670 = tpu.matmul %667, %669, %cst_533 {dimension_numbers = #tpu.dot_dimension_numbers<[1], [0], [0], [1], [0, 0, 1, 1], [], []>} : vector<1x16xbf16>, vector<16x16xbf16>, vector<1x16xf32> -> vector<1x16xf32>
    %671 = arith.addf %665, %670 : vector<1x16xf32>
    %672 = vector.extract_strided_slice %501 {offsets = [0, 0], sizes = [1, 16], strides = [1, 1]} : vector<3x16xf32> to vector<1x16xf32>
    %673 = arith.truncf %672 : vector<1x16xf32> to vector<1x16xbf16>
    %c3_534 = arith.constant 3 : index
    %c0_535 = arith.constant 0 : index
    %c0_536 = arith.constant 0 : index
    %674 = vector.load %arg6[%c3_534, %c0_535, %c0_536] : memref<9x16x16xbf16, #tpu.memory_space<vmem>>, vector<1x16x16xbf16>
    %675 = vector.shape_cast %674 : vector<1x16x16xbf16> to vector<16x16xbf16>
    %cst_537 = arith.constant dense<0.000000e+00> : vector<1x16xf32>
    %676 = tpu.matmul %673, %675, %cst_537 {dimension_numbers = #tpu.dot_dimension_numbers<[1], [0], [0], [1], [0, 0, 1, 1], [], []>} : vector<1x16xbf16>, vector<16x16xbf16>, vector<1x16xf32> -> vector<1x16xf32>
    %677 = arith.addf %671, %676 : vector<1x16xf32>
    %678 = vector.extract_strided_slice %501 {offsets = [1, 0], sizes = [1, 16], strides = [1, 1]} : vector<3x16xf32> to vector<1x16xf32>
    %679 = arith.truncf %678 : vector<1x16xf32> to vector<1x16xbf16>
    %c4_538 = arith.constant 4 : index
    %c0_539 = arith.constant 0 : index
    %c0_540 = arith.constant 0 : index
    %680 = vector.load %arg6[%c4_538, %c0_539, %c0_540] : memref<9x16x16xbf16, #tpu.memory_space<vmem>>, vector<1x16x16xbf16>
    %681 = vector.shape_cast %680 : vector<1x16x16xbf16> to vector<16x16xbf16>
    %cst_541 = arith.constant dense<0.000000e+00> : vector<1x16xf32>
    %682 = tpu.matmul %679, %681, %cst_541 {dimension_numbers = #tpu.dot_dimension_numbers<[1], [0], [0], [1], [0, 0, 1, 1], [], []>} : vector<1x16xbf16>, vector<16x16xbf16>, vector<1x16xf32> -> vector<1x16xf32>
    %683 = arith.addf %677, %682 : vector<1x16xf32>
    %684 = vector.extract_strided_slice %501 {offsets = [2, 0], sizes = [1, 16], strides = [1, 1]} : vector<3x16xf32> to vector<1x16xf32>
    %685 = arith.truncf %684 : vector<1x16xf32> to vector<1x16xbf16>
    %c5_542 = arith.constant 5 : index
    %c0_543 = arith.constant 0 : index
    %c0_544 = arith.constant 0 : index
    %686 = vector.load %arg6[%c5_542, %c0_543, %c0_544] : memref<9x16x16xbf16, #tpu.memory_space<vmem>>, vector<1x16x16xbf16>
    %687 = vector.shape_cast %686 : vector<1x16x16xbf16> to vector<16x16xbf16>
    %cst_545 = arith.constant dense<0.000000e+00> : vector<1x16xf32>
    %688 = tpu.matmul %685, %687, %cst_545 {dimension_numbers = #tpu.dot_dimension_numbers<[1], [0], [0], [1], [0, 0, 1, 1], [], []>} : vector<1x16xbf16>, vector<16x16xbf16>, vector<1x16xf32> -> vector<1x16xf32>
    %689 = arith.addf %683, %688 : vector<1x16xf32>
    %690 = vector.extract_strided_slice %654 {offsets = [0, 0], sizes = [1, 16], strides = [1, 1]} : vector<3x16xf32> to vector<1x16xf32>
    %691 = arith.truncf %690 : vector<1x16xf32> to vector<1x16xbf16>
    %c6_546 = arith.constant 6 : index
    %c0_547 = arith.constant 0 : index
    %c0_548 = arith.constant 0 : index
    %692 = vector.load %arg6[%c6_546, %c0_547, %c0_548] : memref<9x16x16xbf16, #tpu.memory_space<vmem>>, vector<1x16x16xbf16>
    %693 = vector.shape_cast %692 : vector<1x16x16xbf16> to vector<16x16xbf16>
    %cst_549 = arith.constant dense<0.000000e+00> : vector<1x16xf32>
    %694 = tpu.matmul %691, %693, %cst_549 {dimension_numbers = #tpu.dot_dimension_numbers<[1], [0], [0], [1], [0, 0, 1, 1], [], []>} : vector<1x16xbf16>, vector<16x16xbf16>, vector<1x16xf32> -> vector<1x16xf32>
    %695 = arith.addf %689, %694 : vector<1x16xf32>
    %696 = vector.extract_strided_slice %654 {offsets = [1, 0], sizes = [1, 16], strides = [1, 1]} : vector<3x16xf32> to vector<1x16xf32>
    %697 = arith.truncf %696 : vector<1x16xf32> to vector<1x16xbf16>
    %c7_550 = arith.constant 7 : index
    %c0_551 = arith.constant 0 : index
    %c0_552 = arith.constant 0 : index
    %698 = vector.load %arg6[%c7_550, %c0_551, %c0_552] : memref<9x16x16xbf16, #tpu.memory_space<vmem>>, vector<1x16x16xbf16>
    %699 = vector.shape_cast %698 : vector<1x16x16xbf16> to vector<16x16xbf16>
    %cst_553 = arith.constant dense<0.000000e+00> : vector<1x16xf32>
    %700 = tpu.matmul %697, %699, %cst_553 {dimension_numbers = #tpu.dot_dimension_numbers<[1], [0], [0], [1], [0, 0, 1, 1], [], []>} : vector<1x16xbf16>, vector<16x16xbf16>, vector<1x16xf32> -> vector<1x16xf32>
    %701 = arith.addf %695, %700 : vector<1x16xf32>
    %702 = vector.extract_strided_slice %654 {offsets = [2, 0], sizes = [1, 16], strides = [1, 1]} : vector<3x16xf32> to vector<1x16xf32>
    %703 = arith.truncf %702 : vector<1x16xf32> to vector<1x16xbf16>
    %c8_554 = arith.constant 8 : index
    %c0_555 = arith.constant 0 : index
    %c0_556 = arith.constant 0 : index
    %704 = vector.load %arg6[%c8_554, %c0_555, %c0_556] : memref<9x16x16xbf16, #tpu.memory_space<vmem>>, vector<1x16x16xbf16>
    %705 = vector.shape_cast %704 : vector<1x16x16xbf16> to vector<16x16xbf16>
    %cst_557 = arith.constant dense<0.000000e+00> : vector<1x16xf32>
    %706 = tpu.matmul %703, %705, %cst_557 {dimension_numbers = #tpu.dot_dimension_numbers<[1], [0], [0], [1], [0, 0, 1, 1], [], []>} : vector<1x16xbf16>, vector<16x16xbf16>, vector<1x16xf32> -> vector<1x16xf32>
    %707 = arith.addf %701, %706 : vector<1x16xf32>
    %708 = arith.addf %707, %2 : vector<1x16xf32>
    %cst_558 = arith.constant 0.000000e+00 : f32
    %709 = vector.broadcast %cst_558 : f32 to vector<1x16xf32>
    %710 = arith.maximumf %708, %709 : vector<1x16xf32>
    %711 = arith.truncf %710 : vector<1x16xf32> to vector<1x16xbf16>
    %cst_559 = arith.constant dense<0.000000e+00> : vector<1x32xf32>
    %712 = tpu.matmul %711, %3, %cst_559 {dimension_numbers = #tpu.dot_dimension_numbers<[1], [0], [0], [1], [0, 0, 1, 1], [], []>} : vector<1x16xbf16>, vector<16x32xbf16>, vector<1x32xf32> -> vector<1x32xf32>
    %713 = arith.addf %4, %712 : vector<1x32xf32>
    %cst_560 = arith.constant 0.000000e+00 : f32
    %714 = vector.broadcast %cst_560 : f32 to vector<1x32xf32>
    %715 = arith.maximumf %713, %714 : vector<1x32xf32>
    %716 = arith.truncf %715 : vector<1x32xf32> to vector<1x32xbf16>
    %cst_561 = arith.constant dense<0.000000e+00> : vector<1x6xf32>
    %717 = tpu.matmul %716, %5, %cst_561 {dimension_numbers = #tpu.dot_dimension_numbers<[1], [0], [0], [1], [0, 0, 1, 1], [], []>} : vector<1x32xbf16>, vector<32x6xbf16>, vector<1x6xf32> -> vector<1x6xf32>
    %718 = arith.addf %717, %6 : vector<1x6xf32>
    %c0_562 = arith.constant 0 : index
    %c0_563 = arith.constant 0 : index
    %719 = vector.load %arg12[%c0_562, %c0_563] : memref<2x6xf32, #tpu.memory_space<vmem>>, vector<1x6xf32>
    tpu.vector_store %arg12[%c0_562, %c0_563], %718 {strides = array<i32>} : memref<2x6xf32, #tpu.memory_space<vmem>>, vector<1x6xf32>,
    %c1_564 = arith.constant 1 : index
    %c0_565 = arith.constant 0 : index
    %c0_566 = arith.constant 0 : index
    %c0_567 = arith.constant 0 : index
    %720 = vector.load %arg1[%c1_564, %c0_565, %c0_566, %c0_567] : memref<2x8x8x16xbf16, #tpu.memory_space<vmem>>, vector<1x1x7x16xbf16>
    %721 = vector.shape_cast %720 : vector<1x1x7x16xbf16> to vector<7x16xbf16>
    %c0_568 = arith.constant 0 : index
    %c0_569 = arith.constant 0 : index
    %c0_570 = arith.constant 0 : index
    %722 = vector.load %arg2[%c0_568, %c0_569, %c0_570] : memref<4x16x16xbf16, #tpu.memory_space<vmem>>, vector<1x16x16xbf16>
    %723 = vector.shape_cast %722 : vector<1x16x16xbf16> to vector<16x16xbf16>
    %cst_571 = arith.constant dense<0.000000e+00> : vector<7x16xf32>
    %724 = tpu.matmul %721, %723, %cst_571 {dimension_numbers = #tpu.dot_dimension_numbers<[1], [0], [0], [1], [0, 0, 1, 1], [], []>} : vector<7x16xbf16>, vector<16x16xbf16>, vector<7x16xf32> -> vector<7x16xf32>
    %c1_572 = arith.constant 1 : index
    %c0_573 = arith.constant 0 : index
    %c1_574 = arith.constant 1 : index
    %c0_575 = arith.constant 0 : index
    %725 = vector.load %arg1[%c1_572, %c0_573, %c1_574, %c0_575] : memref<2x8x8x16xbf16, #tpu.memory_space<vmem>>, vector<1x1x7x16xbf16>
    %726 = vector.shape_cast %725 : vector<1x1x7x16xbf16> to vector<7x16xbf16>
    %c1_576 = arith.constant 1 : index
    %c0_577 = arith.constant 0 : index
    %c0_578 = arith.constant 0 : index
    %727 = vector.load %arg2[%c1_576, %c0_577, %c0_578] : memref<4x16x16xbf16, #tpu.memory_space<vmem>>, vector<1x16x16xbf16>
    %728 = vector.shape_cast %727 : vector<1x16x16xbf16> to vector<16x16xbf16>
    %cst_579 = arith.constant dense<0.000000e+00> : vector<7x16xf32>
    %729 = tpu.matmul %726, %728, %cst_579 {dimension_numbers = #tpu.dot_dimension_numbers<[1], [0], [0], [1], [0, 0, 1, 1], [], []>} : vector<7x16xbf16>, vector<16x16xbf16>, vector<7x16xf32> -> vector<7x16xf32>
    %730 = arith.addf %724, %729 : vector<7x16xf32>
    %c1_580 = arith.constant 1 : index
    %c1_581 = arith.constant 1 : index
    %c0_582 = arith.constant 0 : index
    %c0_583 = arith.constant 0 : index
    %731 = vector.load %arg1[%c1_580, %c1_581, %c0_582, %c0_583] : memref<2x8x8x16xbf16, #tpu.memory_space<vmem>>, vector<1x1x7x16xbf16>
    %732 = vector.shape_cast %731 : vector<1x1x7x16xbf16> to vector<7x16xbf16>
    %c2_584 = arith.constant 2 : index
    %c0_585 = arith.constant 0 : index
    %c0_586 = arith.constant 0 : index
    %733 = vector.load %arg2[%c2_584, %c0_585, %c0_586] : memref<4x16x16xbf16, #tpu.memory_space<vmem>>, vector<1x16x16xbf16>
    %734 = vector.shape_cast %733 : vector<1x16x16xbf16> to vector<16x16xbf16>
    %cst_587 = arith.constant dense<0.000000e+00> : vector<7x16xf32>
    %735 = tpu.matmul %732, %734, %cst_587 {dimension_numbers = #tpu.dot_dimension_numbers<[1], [0], [0], [1], [0, 0, 1, 1], [], []>} : vector<7x16xbf16>, vector<16x16xbf16>, vector<7x16xf32> -> vector<7x16xf32>
    %736 = arith.addf %730, %735 : vector<7x16xf32>
    %c1_588 = arith.constant 1 : index
    %c1_589 = arith.constant 1 : index
    %c1_590 = arith.constant 1 : index
    %c0_591 = arith.constant 0 : index
    %737 = vector.load %arg1[%c1_588, %c1_589, %c1_590, %c0_591] : memref<2x8x8x16xbf16, #tpu.memory_space<vmem>>, vector<1x1x7x16xbf16>
    %738 = vector.shape_cast %737 : vector<1x1x7x16xbf16> to vector<7x16xbf16>
    %c3_592 = arith.constant 3 : index
    %c0_593 = arith.constant 0 : index
    %c0_594 = arith.constant 0 : index
    %739 = vector.load %arg2[%c3_592, %c0_593, %c0_594] : memref<4x16x16xbf16, #tpu.memory_space<vmem>>, vector<1x16x16xbf16>
    %740 = vector.shape_cast %739 : vector<1x16x16xbf16> to vector<16x16xbf16>
    %cst_595 = arith.constant dense<0.000000e+00> : vector<7x16xf32>
    %741 = tpu.matmul %738, %740, %cst_595 {dimension_numbers = #tpu.dot_dimension_numbers<[1], [0], [0], [1], [0, 0, 1, 1], [], []>} : vector<7x16xbf16>, vector<16x16xbf16>, vector<7x16xf32> -> vector<7x16xf32>
    %742 = arith.addf %736, %741 : vector<7x16xf32>
    %743 = vector.broadcast %0 : vector<1x16xf32> to vector<7x16xf32>
    %744 = arith.addf %742, %743 : vector<7x16xf32>
    %cst_596 = arith.constant 0.000000e+00 : f32
    %745 = vector.broadcast %cst_596 : f32 to vector<7x16xf32>
    %746 = arith.maximumf %744, %745 : vector<7x16xf32>
    %c1_597 = arith.constant 1 : index
    %c1_598 = arith.constant 1 : index
    %c0_599 = arith.constant 0 : index
    %c0_600 = arith.constant 0 : index
    %747 = vector.load %arg1[%c1_597, %c1_598, %c0_599, %c0_600] : memref<2x8x8x16xbf16, #tpu.memory_space<vmem>>, vector<1x1x7x16xbf16>
    %748 = vector.shape_cast %747 : vector<1x1x7x16xbf16> to vector<7x16xbf16>
    %c0_601 = arith.constant 0 : index
    %c0_602 = arith.constant 0 : index
    %c0_603 = arith.constant 0 : index
    %749 = vector.load %arg2[%c0_601, %c0_602, %c0_603] : memref<4x16x16xbf16, #tpu.memory_space<vmem>>, vector<1x16x16xbf16>
    %750 = vector.shape_cast %749 : vector<1x16x16xbf16> to vector<16x16xbf16>
    %cst_604 = arith.constant dense<0.000000e+00> : vector<7x16xf32>
    %751 = tpu.matmul %748, %750, %cst_604 {dimension_numbers = #tpu.dot_dimension_numbers<[1], [0], [0], [1], [0, 0, 1, 1], [], []>} : vector<7x16xbf16>, vector<16x16xbf16>, vector<7x16xf32> -> vector<7x16xf32>
    %c1_605 = arith.constant 1 : index
    %c1_606 = arith.constant 1 : index
    %c1_607 = arith.constant 1 : index
    %c0_608 = arith.constant 0 : index
    %752 = vector.load %arg1[%c1_605, %c1_606, %c1_607, %c0_608] : memref<2x8x8x16xbf16, #tpu.memory_space<vmem>>, vector<1x1x7x16xbf16>
    %753 = vector.shape_cast %752 : vector<1x1x7x16xbf16> to vector<7x16xbf16>
    %c1_609 = arith.constant 1 : index
    %c0_610 = arith.constant 0 : index
    %c0_611 = arith.constant 0 : index
    %754 = vector.load %arg2[%c1_609, %c0_610, %c0_611] : memref<4x16x16xbf16, #tpu.memory_space<vmem>>, vector<1x16x16xbf16>
    %755 = vector.shape_cast %754 : vector<1x16x16xbf16> to vector<16x16xbf16>
    %cst_612 = arith.constant dense<0.000000e+00> : vector<7x16xf32>
    %756 = tpu.matmul %753, %755, %cst_612 {dimension_numbers = #tpu.dot_dimension_numbers<[1], [0], [0], [1], [0, 0, 1, 1], [], []>} : vector<7x16xbf16>, vector<16x16xbf16>, vector<7x16xf32> -> vector<7x16xf32>
    %757 = arith.addf %751, %756 : vector<7x16xf32>
    %c1_613 = arith.constant 1 : index
    %c2_614 = arith.constant 2 : index
    %c0_615 = arith.constant 0 : index
    %c0_616 = arith.constant 0 : index
    %758 = vector.load %arg1[%c1_613, %c2_614, %c0_615, %c0_616] : memref<2x8x8x16xbf16, #tpu.memory_space<vmem>>, vector<1x1x7x16xbf16>
    %759 = vector.shape_cast %758 : vector<1x1x7x16xbf16> to vector<7x16xbf16>
    %c2_617 = arith.constant 2 : index
    %c0_618 = arith.constant 0 : index
    %c0_619 = arith.constant 0 : index
    %760 = vector.load %arg2[%c2_617, %c0_618, %c0_619] : memref<4x16x16xbf16, #tpu.memory_space<vmem>>, vector<1x16x16xbf16>
    %761 = vector.shape_cast %760 : vector<1x16x16xbf16> to vector<16x16xbf16>
    %cst_620 = arith.constant dense<0.000000e+00> : vector<7x16xf32>
    %762 = tpu.matmul %759, %761, %cst_620 {dimension_numbers = #tpu.dot_dimension_numbers<[1], [0], [0], [1], [0, 0, 1, 1], [], []>} : vector<7x16xbf16>, vector<16x16xbf16>, vector<7x16xf32> -> vector<7x16xf32>
    %763 = arith.addf %757, %762 : vector<7x16xf32>
    %c1_621 = arith.constant 1 : index
    %c2_622 = arith.constant 2 : index
    %c1_623 = arith.constant 1 : index
    %c0_624 = arith.constant 0 : index
    %764 = vector.load %arg1[%c1_621, %c2_622, %c1_623, %c0_624] : memref<2x8x8x16xbf16, #tpu.memory_space<vmem>>, vector<1x1x7x16xbf16>
    %765 = vector.shape_cast %764 : vector<1x1x7x16xbf16> to vector<7x16xbf16>
    %c3_625 = arith.constant 3 : index
    %c0_626 = arith.constant 0 : index
    %c0_627 = arith.constant 0 : index
    %766 = vector.load %arg2[%c3_625, %c0_626, %c0_627] : memref<4x16x16xbf16, #tpu.memory_space<vmem>>, vector<1x16x16xbf16>
    %767 = vector.shape_cast %766 : vector<1x16x16xbf16> to vector<16x16xbf16>
    %cst_628 = arith.constant dense<0.000000e+00> : vector<7x16xf32>
    %768 = tpu.matmul %765, %767, %cst_628 {dimension_numbers = #tpu.dot_dimension_numbers<[1], [0], [0], [1], [0, 0, 1, 1], [], []>} : vector<7x16xbf16>, vector<16x16xbf16>, vector<7x16xf32> -> vector<7x16xf32>
    %769 = arith.addf %763, %768 : vector<7x16xf32>
    %770 = vector.broadcast %0 : vector<1x16xf32> to vector<7x16xf32>
    %771 = arith.addf %769, %770 : vector<7x16xf32>
    %cst_629 = arith.constant 0.000000e+00 : f32
    %772 = vector.broadcast %cst_629 : f32 to vector<7x16xf32>
    %773 = arith.maximumf %771, %772 : vector<7x16xf32>
    %c1_630 = arith.constant 1 : index
    %c2_631 = arith.constant 2 : index
    %c0_632 = arith.constant 0 : index
    %c0_633 = arith.constant 0 : index
    %774 = vector.load %arg1[%c1_630, %c2_631, %c0_632, %c0_633] : memref<2x8x8x16xbf16, #tpu.memory_space<vmem>>, vector<1x1x7x16xbf16>
    %775 = vector.shape_cast %774 : vector<1x1x7x16xbf16> to vector<7x16xbf16>
    %c0_634 = arith.constant 0 : index
    %c0_635 = arith.constant 0 : index
    %c0_636 = arith.constant 0 : index
    %776 = vector.load %arg2[%c0_634, %c0_635, %c0_636] : memref<4x16x16xbf16, #tpu.memory_space<vmem>>, vector<1x16x16xbf16>
    %777 = vector.shape_cast %776 : vector<1x16x16xbf16> to vector<16x16xbf16>
    %cst_637 = arith.constant dense<0.000000e+00> : vector<7x16xf32>
    %778 = tpu.matmul %775, %777, %cst_637 {dimension_numbers = #tpu.dot_dimension_numbers<[1], [0], [0], [1], [0, 0, 1, 1], [], []>} : vector<7x16xbf16>, vector<16x16xbf16>, vector<7x16xf32> -> vector<7x16xf32>
    %c1_638 = arith.constant 1 : index
    %c2_639 = arith.constant 2 : index
    %c1_640 = arith.constant 1 : index
    %c0_641 = arith.constant 0 : index
    %779 = vector.load %arg1[%c1_638, %c2_639, %c1_640, %c0_641] : memref<2x8x8x16xbf16, #tpu.memory_space<vmem>>, vector<1x1x7x16xbf16>
    %780 = vector.shape_cast %779 : vector<1x1x7x16xbf16> to vector<7x16xbf16>
    %c1_642 = arith.constant 1 : index
    %c0_643 = arith.constant 0 : index
    %c0_644 = arith.constant 0 : index
    %781 = vector.load %arg2[%c1_642, %c0_643, %c0_644] : memref<4x16x16xbf16, #tpu.memory_space<vmem>>, vector<1x16x16xbf16>
    %782 = vector.shape_cast %781 : vector<1x16x16xbf16> to vector<16x16xbf16>
    %cst_645 = arith.constant dense<0.000000e+00> : vector<7x16xf32>
    %783 = tpu.matmul %780, %782, %cst_645 {dimension_numbers = #tpu.dot_dimension_numbers<[1], [0], [0], [1], [0, 0, 1, 1], [], []>} : vector<7x16xbf16>, vector<16x16xbf16>, vector<7x16xf32> -> vector<7x16xf32>
    %784 = arith.addf %778, %783 : vector<7x16xf32>
    %c1_646 = arith.constant 1 : index
    %c3_647 = arith.constant 3 : index
    %c0_648 = arith.constant 0 : index
    %c0_649 = arith.constant 0 : index
    %785 = vector.load %arg1[%c1_646, %c3_647, %c0_648, %c0_649] : memref<2x8x8x16xbf16, #tpu.memory_space<vmem>>, vector<1x1x7x16xbf16>
    %786 = vector.shape_cast %785 : vector<1x1x7x16xbf16> to vector<7x16xbf16>
    %c2_650 = arith.constant 2 : index
    %c0_651 = arith.constant 0 : index
    %c0_652 = arith.constant 0 : index
    %787 = vector.load %arg2[%c2_650, %c0_651, %c0_652] : memref<4x16x16xbf16, #tpu.memory_space<vmem>>, vector<1x16x16xbf16>
    %788 = vector.shape_cast %787 : vector<1x16x16xbf16> to vector<16x16xbf16>
    %cst_653 = arith.constant dense<0.000000e+00> : vector<7x16xf32>
    %789 = tpu.matmul %786, %788, %cst_653 {dimension_numbers = #tpu.dot_dimension_numbers<[1], [0], [0], [1], [0, 0, 1, 1], [], []>} : vector<7x16xbf16>, vector<16x16xbf16>, vector<7x16xf32> -> vector<7x16xf32>
    %790 = arith.addf %784, %789 : vector<7x16xf32>
    %c1_654 = arith.constant 1 : index
    %c3_655 = arith.constant 3 : index
    %c1_656 = arith.constant 1 : index
    %c0_657 = arith.constant 0 : index
    %791 = vector.load %arg1[%c1_654, %c3_655, %c1_656, %c0_657] : memref<2x8x8x16xbf16, #tpu.memory_space<vmem>>, vector<1x1x7x16xbf16>
    %792 = vector.shape_cast %791 : vector<1x1x7x16xbf16> to vector<7x16xbf16>
    %c3_658 = arith.constant 3 : index
    %c0_659 = arith.constant 0 : index
    %c0_660 = arith.constant 0 : index
    %793 = vector.load %arg2[%c3_658, %c0_659, %c0_660] : memref<4x16x16xbf16, #tpu.memory_space<vmem>>, vector<1x16x16xbf16>
    %794 = vector.shape_cast %793 : vector<1x16x16xbf16> to vector<16x16xbf16>
    %cst_661 = arith.constant dense<0.000000e+00> : vector<7x16xf32>
    %795 = tpu.matmul %792, %794, %cst_661 {dimension_numbers = #tpu.dot_dimension_numbers<[1], [0], [0], [1], [0, 0, 1, 1], [], []>} : vector<7x16xbf16>, vector<16x16xbf16>, vector<7x16xf32> -> vector<7x16xf32>
    %796 = arith.addf %790, %795 : vector<7x16xf32>
    %797 = vector.broadcast %0 : vector<1x16xf32> to vector<7x16xf32>
    %798 = arith.addf %796, %797 : vector<7x16xf32>
    %cst_662 = arith.constant 0.000000e+00 : f32
    %799 = vector.broadcast %cst_662 : f32 to vector<7x16xf32>
    %800 = arith.maximumf %798, %799 : vector<7x16xf32>
    %c1_663 = arith.constant 1 : index
    %c3_664 = arith.constant 3 : index
    %c0_665 = arith.constant 0 : index
    %c0_666 = arith.constant 0 : index
    %801 = vector.load %arg1[%c1_663, %c3_664, %c0_665, %c0_666] : memref<2x8x8x16xbf16, #tpu.memory_space<vmem>>, vector<1x1x7x16xbf16>
    %802 = vector.shape_cast %801 : vector<1x1x7x16xbf16> to vector<7x16xbf16>
    %c0_667 = arith.constant 0 : index
    %c0_668 = arith.constant 0 : index
    %c0_669 = arith.constant 0 : index
    %803 = vector.load %arg2[%c0_667, %c0_668, %c0_669] : memref<4x16x16xbf16, #tpu.memory_space<vmem>>, vector<1x16x16xbf16>
    %804 = vector.shape_cast %803 : vector<1x16x16xbf16> to vector<16x16xbf16>
    %cst_670 = arith.constant dense<0.000000e+00> : vector<7x16xf32>
    %805 = tpu.matmul %802, %804, %cst_670 {dimension_numbers = #tpu.dot_dimension_numbers<[1], [0], [0], [1], [0, 0, 1, 1], [], []>} : vector<7x16xbf16>, vector<16x16xbf16>, vector<7x16xf32> -> vector<7x16xf32>
    %c1_671 = arith.constant 1 : index
    %c3_672 = arith.constant 3 : index
    %c1_673 = arith.constant 1 : index
    %c0_674 = arith.constant 0 : index
    %806 = vector.load %arg1[%c1_671, %c3_672, %c1_673, %c0_674] : memref<2x8x8x16xbf16, #tpu.memory_space<vmem>>, vector<1x1x7x16xbf16>
    %807 = vector.shape_cast %806 : vector<1x1x7x16xbf16> to vector<7x16xbf16>
    %c1_675 = arith.constant 1 : index
    %c0_676 = arith.constant 0 : index
    %c0_677 = arith.constant 0 : index
    %808 = vector.load %arg2[%c1_675, %c0_676, %c0_677] : memref<4x16x16xbf16, #tpu.memory_space<vmem>>, vector<1x16x16xbf16>
    %809 = vector.shape_cast %808 : vector<1x16x16xbf16> to vector<16x16xbf16>
    %cst_678 = arith.constant dense<0.000000e+00> : vector<7x16xf32>
    %810 = tpu.matmul %807, %809, %cst_678 {dimension_numbers = #tpu.dot_dimension_numbers<[1], [0], [0], [1], [0, 0, 1, 1], [], []>} : vector<7x16xbf16>, vector<16x16xbf16>, vector<7x16xf32> -> vector<7x16xf32>
    %811 = arith.addf %805, %810 : vector<7x16xf32>
    %c1_679 = arith.constant 1 : index
    %c4_680 = arith.constant 4 : index
    %c0_681 = arith.constant 0 : index
    %c0_682 = arith.constant 0 : index
    %812 = vector.load %arg1[%c1_679, %c4_680, %c0_681, %c0_682] : memref<2x8x8x16xbf16, #tpu.memory_space<vmem>>, vector<1x1x7x16xbf16>
    %813 = vector.shape_cast %812 : vector<1x1x7x16xbf16> to vector<7x16xbf16>
    %c2_683 = arith.constant 2 : index
    %c0_684 = arith.constant 0 : index
    %c0_685 = arith.constant 0 : index
    %814 = vector.load %arg2[%c2_683, %c0_684, %c0_685] : memref<4x16x16xbf16, #tpu.memory_space<vmem>>, vector<1x16x16xbf16>
    %815 = vector.shape_cast %814 : vector<1x16x16xbf16> to vector<16x16xbf16>
    %cst_686 = arith.constant dense<0.000000e+00> : vector<7x16xf32>
    %816 = tpu.matmul %813, %815, %cst_686 {dimension_numbers = #tpu.dot_dimension_numbers<[1], [0], [0], [1], [0, 0, 1, 1], [], []>} : vector<7x16xbf16>, vector<16x16xbf16>, vector<7x16xf32> -> vector<7x16xf32>
    %817 = arith.addf %811, %816 : vector<7x16xf32>
    %c1_687 = arith.constant 1 : index
    %c4_688 = arith.constant 4 : index
    %c1_689 = arith.constant 1 : index
    %c0_690 = arith.constant 0 : index
    %818 = vector.load %arg1[%c1_687, %c4_688, %c1_689, %c0_690] : memref<2x8x8x16xbf16, #tpu.memory_space<vmem>>, vector<1x1x7x16xbf16>
    %819 = vector.shape_cast %818 : vector<1x1x7x16xbf16> to vector<7x16xbf16>
    %c3_691 = arith.constant 3 : index
    %c0_692 = arith.constant 0 : index
    %c0_693 = arith.constant 0 : index
    %820 = vector.load %arg2[%c3_691, %c0_692, %c0_693] : memref<4x16x16xbf16, #tpu.memory_space<vmem>>, vector<1x16x16xbf16>
    %821 = vector.shape_cast %820 : vector<1x16x16xbf16> to vector<16x16xbf16>
    %cst_694 = arith.constant dense<0.000000e+00> : vector<7x16xf32>
    %822 = tpu.matmul %819, %821, %cst_694 {dimension_numbers = #tpu.dot_dimension_numbers<[1], [0], [0], [1], [0, 0, 1, 1], [], []>} : vector<7x16xbf16>, vector<16x16xbf16>, vector<7x16xf32> -> vector<7x16xf32>
    %823 = arith.addf %817, %822 : vector<7x16xf32>
    %824 = vector.broadcast %0 : vector<1x16xf32> to vector<7x16xf32>
    %825 = arith.addf %823, %824 : vector<7x16xf32>
    %cst_695 = arith.constant 0.000000e+00 : f32
    %826 = vector.broadcast %cst_695 : f32 to vector<7x16xf32>
    %827 = arith.maximumf %825, %826 : vector<7x16xf32>
    %c1_696 = arith.constant 1 : index
    %c4_697 = arith.constant 4 : index
    %c0_698 = arith.constant 0 : index
    %c0_699 = arith.constant 0 : index
    %828 = vector.load %arg1[%c1_696, %c4_697, %c0_698, %c0_699] : memref<2x8x8x16xbf16, #tpu.memory_space<vmem>>, vector<1x1x7x16xbf16>
    %829 = vector.shape_cast %828 : vector<1x1x7x16xbf16> to vector<7x16xbf16>
    %c0_700 = arith.constant 0 : index
    %c0_701 = arith.constant 0 : index
    %c0_702 = arith.constant 0 : index
    %830 = vector.load %arg2[%c0_700, %c0_701, %c0_702] : memref<4x16x16xbf16, #tpu.memory_space<vmem>>, vector<1x16x16xbf16>
    %831 = vector.shape_cast %830 : vector<1x16x16xbf16> to vector<16x16xbf16>
    %cst_703 = arith.constant dense<0.000000e+00> : vector<7x16xf32>
    %832 = tpu.matmul %829, %831, %cst_703 {dimension_numbers = #tpu.dot_dimension_numbers<[1], [0], [0], [1], [0, 0, 1, 1], [], []>} : vector<7x16xbf16>, vector<16x16xbf16>, vector<7x16xf32> -> vector<7x16xf32>
    %c1_704 = arith.constant 1 : index
    %c4_705 = arith.constant 4 : index
    %c1_706 = arith.constant 1 : index
    %c0_707 = arith.constant 0 : index
    %833 = vector.load %arg1[%c1_704, %c4_705, %c1_706, %c0_707] : memref<2x8x8x16xbf16, #tpu.memory_space<vmem>>, vector<1x1x7x16xbf16>
    %834 = vector.shape_cast %833 : vector<1x1x7x16xbf16> to vector<7x16xbf16>
    %c1_708 = arith.constant 1 : index
    %c0_709 = arith.constant 0 : index
    %c0_710 = arith.constant 0 : index
    %835 = vector.load %arg2[%c1_708, %c0_709, %c0_710] : memref<4x16x16xbf16, #tpu.memory_space<vmem>>, vector<1x16x16xbf16>
    %836 = vector.shape_cast %835 : vector<1x16x16xbf16> to vector<16x16xbf16>
    %cst_711 = arith.constant dense<0.000000e+00> : vector<7x16xf32>
    %837 = tpu.matmul %834, %836, %cst_711 {dimension_numbers = #tpu.dot_dimension_numbers<[1], [0], [0], [1], [0, 0, 1, 1], [], []>} : vector<7x16xbf16>, vector<16x16xbf16>, vector<7x16xf32> -> vector<7x16xf32>
    %838 = arith.addf %832, %837 : vector<7x16xf32>
    %c1_712 = arith.constant 1 : index
    %c5_713 = arith.constant 5 : index
    %c0_714 = arith.constant 0 : index
    %c0_715 = arith.constant 0 : index
    %839 = vector.load %arg1[%c1_712, %c5_713, %c0_714, %c0_715] : memref<2x8x8x16xbf16, #tpu.memory_space<vmem>>, vector<1x1x7x16xbf16>
    %840 = vector.shape_cast %839 : vector<1x1x7x16xbf16> to vector<7x16xbf16>
    %c2_716 = arith.constant 2 : index
    %c0_717 = arith.constant 0 : index
    %c0_718 = arith.constant 0 : index
    %841 = vector.load %arg2[%c2_716, %c0_717, %c0_718] : memref<4x16x16xbf16, #tpu.memory_space<vmem>>, vector<1x16x16xbf16>
    %842 = vector.shape_cast %841 : vector<1x16x16xbf16> to vector<16x16xbf16>
    %cst_719 = arith.constant dense<0.000000e+00> : vector<7x16xf32>
    %843 = tpu.matmul %840, %842, %cst_719 {dimension_numbers = #tpu.dot_dimension_numbers<[1], [0], [0], [1], [0, 0, 1, 1], [], []>} : vector<7x16xbf16>, vector<16x16xbf16>, vector<7x16xf32> -> vector<7x16xf32>
    %844 = arith.addf %838, %843 : vector<7x16xf32>
    %c1_720 = arith.constant 1 : index
    %c5_721 = arith.constant 5 : index
    %c1_722 = arith.constant 1 : index
    %c0_723 = arith.constant 0 : index
    %845 = vector.load %arg1[%c1_720, %c5_721, %c1_722, %c0_723] : memref<2x8x8x16xbf16, #tpu.memory_space<vmem>>, vector<1x1x7x16xbf16>
    %846 = vector.shape_cast %845 : vector<1x1x7x16xbf16> to vector<7x16xbf16>
    %c3_724 = arith.constant 3 : index
    %c0_725 = arith.constant 0 : index
    %c0_726 = arith.constant 0 : index
    %847 = vector.load %arg2[%c3_724, %c0_725, %c0_726] : memref<4x16x16xbf16, #tpu.memory_space<vmem>>, vector<1x16x16xbf16>
    %848 = vector.shape_cast %847 : vector<1x16x16xbf16> to vector<16x16xbf16>
    %cst_727 = arith.constant dense<0.000000e+00> : vector<7x16xf32>
    %849 = tpu.matmul %846, %848, %cst_727 {dimension_numbers = #tpu.dot_dimension_numbers<[1], [0], [0], [1], [0, 0, 1, 1], [], []>} : vector<7x16xbf16>, vector<16x16xbf16>, vector<7x16xf32> -> vector<7x16xf32>
    %850 = arith.addf %844, %849 : vector<7x16xf32>
    %851 = vector.broadcast %0 : vector<1x16xf32> to vector<7x16xf32>
    %852 = arith.addf %850, %851 : vector<7x16xf32>
    %cst_728 = arith.constant 0.000000e+00 : f32
    %853 = vector.broadcast %cst_728 : f32 to vector<7x16xf32>
    %854 = arith.maximumf %852, %853 : vector<7x16xf32>
    %c1_729 = arith.constant 1 : index
    %c5_730 = arith.constant 5 : index
    %c0_731 = arith.constant 0 : index
    %c0_732 = arith.constant 0 : index
    %855 = vector.load %arg1[%c1_729, %c5_730, %c0_731, %c0_732] : memref<2x8x8x16xbf16, #tpu.memory_space<vmem>>, vector<1x1x7x16xbf16>
    %856 = vector.shape_cast %855 : vector<1x1x7x16xbf16> to vector<7x16xbf16>
    %c0_733 = arith.constant 0 : index
    %c0_734 = arith.constant 0 : index
    %c0_735 = arith.constant 0 : index
    %857 = vector.load %arg2[%c0_733, %c0_734, %c0_735] : memref<4x16x16xbf16, #tpu.memory_space<vmem>>, vector<1x16x16xbf16>
    %858 = vector.shape_cast %857 : vector<1x16x16xbf16> to vector<16x16xbf16>
    %cst_736 = arith.constant dense<0.000000e+00> : vector<7x16xf32>
    %859 = tpu.matmul %856, %858, %cst_736 {dimension_numbers = #tpu.dot_dimension_numbers<[1], [0], [0], [1], [0, 0, 1, 1], [], []>} : vector<7x16xbf16>, vector<16x16xbf16>, vector<7x16xf32> -> vector<7x16xf32>
    %c1_737 = arith.constant 1 : index
    %c5_738 = arith.constant 5 : index
    %c1_739 = arith.constant 1 : index
    %c0_740 = arith.constant 0 : index
    %860 = vector.load %arg1[%c1_737, %c5_738, %c1_739, %c0_740] : memref<2x8x8x16xbf16, #tpu.memory_space<vmem>>, vector<1x1x7x16xbf16>
    %861 = vector.shape_cast %860 : vector<1x1x7x16xbf16> to vector<7x16xbf16>
    %c1_741 = arith.constant 1 : index
    %c0_742 = arith.constant 0 : index
    %c0_743 = arith.constant 0 : index
    %862 = vector.load %arg2[%c1_741, %c0_742, %c0_743] : memref<4x16x16xbf16, #tpu.memory_space<vmem>>, vector<1x16x16xbf16>
    %863 = vector.shape_cast %862 : vector<1x16x16xbf16> to vector<16x16xbf16>
    %cst_744 = arith.constant dense<0.000000e+00> : vector<7x16xf32>
    %864 = tpu.matmul %861, %863, %cst_744 {dimension_numbers = #tpu.dot_dimension_numbers<[1], [0], [0], [1], [0, 0, 1, 1], [], []>} : vector<7x16xbf16>, vector<16x16xbf16>, vector<7x16xf32> -> vector<7x16xf32>
    %865 = arith.addf %859, %864 : vector<7x16xf32>
    %c1_745 = arith.constant 1 : index
    %c6_746 = arith.constant 6 : index
    %c0_747 = arith.constant 0 : index
    %c0_748 = arith.constant 0 : index
    %866 = vector.load %arg1[%c1_745, %c6_746, %c0_747, %c0_748] : memref<2x8x8x16xbf16, #tpu.memory_space<vmem>>, vector<1x1x7x16xbf16>
    %867 = vector.shape_cast %866 : vector<1x1x7x16xbf16> to vector<7x16xbf16>
    %c2_749 = arith.constant 2 : index
    %c0_750 = arith.constant 0 : index
    %c0_751 = arith.constant 0 : index
    %868 = vector.load %arg2[%c2_749, %c0_750, %c0_751] : memref<4x16x16xbf16, #tpu.memory_space<vmem>>, vector<1x16x16xbf16>
    %869 = vector.shape_cast %868 : vector<1x16x16xbf16> to vector<16x16xbf16>
    %cst_752 = arith.constant dense<0.000000e+00> : vector<7x16xf32>
    %870 = tpu.matmul %867, %869, %cst_752 {dimension_numbers = #tpu.dot_dimension_numbers<[1], [0], [0], [1], [0, 0, 1, 1], [], []>} : vector<7x16xbf16>, vector<16x16xbf16>, vector<7x16xf32> -> vector<7x16xf32>
    %871 = arith.addf %865, %870 : vector<7x16xf32>
    %c1_753 = arith.constant 1 : index
    %c6_754 = arith.constant 6 : index
    %c1_755 = arith.constant 1 : index
    %c0_756 = arith.constant 0 : index
    %872 = vector.load %arg1[%c1_753, %c6_754, %c1_755, %c0_756] : memref<2x8x8x16xbf16, #tpu.memory_space<vmem>>, vector<1x1x7x16xbf16>
    %873 = vector.shape_cast %872 : vector<1x1x7x16xbf16> to vector<7x16xbf16>
    %c3_757 = arith.constant 3 : index
    %c0_758 = arith.constant 0 : index
    %c0_759 = arith.constant 0 : index
    %874 = vector.load %arg2[%c3_757, %c0_758, %c0_759] : memref<4x16x16xbf16, #tpu.memory_space<vmem>>, vector<1x16x16xbf16>
    %875 = vector.shape_cast %874 : vector<1x16x16xbf16> to vector<16x16xbf16>
    %cst_760 = arith.constant dense<0.000000e+00> : vector<7x16xf32>
    %876 = tpu.matmul %873, %875, %cst_760 {dimension_numbers = #tpu.dot_dimension_numbers<[1], [0], [0], [1], [0, 0, 1, 1], [], []>} : vector<7x16xbf16>, vector<16x16xbf16>, vector<7x16xf32> -> vector<7x16xf32>
    %877 = arith.addf %871, %876 : vector<7x16xf32>
    %878 = vector.broadcast %0 : vector<1x16xf32> to vector<7x16xf32>
    %879 = arith.addf %877, %878 : vector<7x16xf32>
    %cst_761 = arith.constant 0.000000e+00 : f32
    %880 = vector.broadcast %cst_761 : f32 to vector<7x16xf32>
    %881 = arith.maximumf %879, %880 : vector<7x16xf32>
    %c1_762 = arith.constant 1 : index
    %c6_763 = arith.constant 6 : index
    %c0_764 = arith.constant 0 : index
    %c0_765 = arith.constant 0 : index
    %882 = vector.load %arg1[%c1_762, %c6_763, %c0_764, %c0_765] : memref<2x8x8x16xbf16, #tpu.memory_space<vmem>>, vector<1x1x7x16xbf16>
    %883 = vector.shape_cast %882 : vector<1x1x7x16xbf16> to vector<7x16xbf16>
    %c0_766 = arith.constant 0 : index
    %c0_767 = arith.constant 0 : index
    %c0_768 = arith.constant 0 : index
    %884 = vector.load %arg2[%c0_766, %c0_767, %c0_768] : memref<4x16x16xbf16, #tpu.memory_space<vmem>>, vector<1x16x16xbf16>
    %885 = vector.shape_cast %884 : vector<1x16x16xbf16> to vector<16x16xbf16>
    %cst_769 = arith.constant dense<0.000000e+00> : vector<7x16xf32>
    %886 = tpu.matmul %883, %885, %cst_769 {dimension_numbers = #tpu.dot_dimension_numbers<[1], [0], [0], [1], [0, 0, 1, 1], [], []>} : vector<7x16xbf16>, vector<16x16xbf16>, vector<7x16xf32> -> vector<7x16xf32>
    %c1_770 = arith.constant 1 : index
    %c6_771 = arith.constant 6 : index
    %c1_772 = arith.constant 1 : index
    %c0_773 = arith.constant 0 : index
    %887 = vector.load %arg1[%c1_770, %c6_771, %c1_772, %c0_773] : memref<2x8x8x16xbf16, #tpu.memory_space<vmem>>, vector<1x1x7x16xbf16>
    %888 = vector.shape_cast %887 : vector<1x1x7x16xbf16> to vector<7x16xbf16>
    %c1_774 = arith.constant 1 : index
    %c0_775 = arith.constant 0 : index
    %c0_776 = arith.constant 0 : index
    %889 = vector.load %arg2[%c1_774, %c0_775, %c0_776] : memref<4x16x16xbf16, #tpu.memory_space<vmem>>, vector<1x16x16xbf16>
    %890 = vector.shape_cast %889 : vector<1x16x16xbf16> to vector<16x16xbf16>
    %cst_777 = arith.constant dense<0.000000e+00> : vector<7x16xf32>
    %891 = tpu.matmul %888, %890, %cst_777 {dimension_numbers = #tpu.dot_dimension_numbers<[1], [0], [0], [1], [0, 0, 1, 1], [], []>} : vector<7x16xbf16>, vector<16x16xbf16>, vector<7x16xf32> -> vector<7x16xf32>
    %892 = arith.addf %886, %891 : vector<7x16xf32>
    %c1_778 = arith.constant 1 : index
    %c7_779 = arith.constant 7 : index
    %c0_780 = arith.constant 0 : index
    %c0_781 = arith.constant 0 : index
    %893 = vector.load %arg1[%c1_778, %c7_779, %c0_780, %c0_781] : memref<2x8x8x16xbf16, #tpu.memory_space<vmem>>, vector<1x1x7x16xbf16>
    %894 = vector.shape_cast %893 : vector<1x1x7x16xbf16> to vector<7x16xbf16>
    %c2_782 = arith.constant 2 : index
    %c0_783 = arith.constant 0 : index
    %c0_784 = arith.constant 0 : index
    %895 = vector.load %arg2[%c2_782, %c0_783, %c0_784] : memref<4x16x16xbf16, #tpu.memory_space<vmem>>, vector<1x16x16xbf16>
    %896 = vector.shape_cast %895 : vector<1x16x16xbf16> to vector<16x16xbf16>
    %cst_785 = arith.constant dense<0.000000e+00> : vector<7x16xf32>
    %897 = tpu.matmul %894, %896, %cst_785 {dimension_numbers = #tpu.dot_dimension_numbers<[1], [0], [0], [1], [0, 0, 1, 1], [], []>} : vector<7x16xbf16>, vector<16x16xbf16>, vector<7x16xf32> -> vector<7x16xf32>
    %898 = arith.addf %892, %897 : vector<7x16xf32>
    %c1_786 = arith.constant 1 : index
    %c7_787 = arith.constant 7 : index
    %c1_788 = arith.constant 1 : index
    %c0_789 = arith.constant 0 : index
    %899 = vector.load %arg1[%c1_786, %c7_787, %c1_788, %c0_789] : memref<2x8x8x16xbf16, #tpu.memory_space<vmem>>, vector<1x1x7x16xbf16>
    %900 = vector.shape_cast %899 : vector<1x1x7x16xbf16> to vector<7x16xbf16>
    %c3_790 = arith.constant 3 : index
    %c0_791 = arith.constant 0 : index
    %c0_792 = arith.constant 0 : index
    %901 = vector.load %arg2[%c3_790, %c0_791, %c0_792] : memref<4x16x16xbf16, #tpu.memory_space<vmem>>, vector<1x16x16xbf16>
    %902 = vector.shape_cast %901 : vector<1x16x16xbf16> to vector<16x16xbf16>
    %cst_793 = arith.constant dense<0.000000e+00> : vector<7x16xf32>
    %903 = tpu.matmul %900, %902, %cst_793 {dimension_numbers = #tpu.dot_dimension_numbers<[1], [0], [0], [1], [0, 0, 1, 1], [], []>} : vector<7x16xbf16>, vector<16x16xbf16>, vector<7x16xf32> -> vector<7x16xf32>
    %904 = arith.addf %898, %903 : vector<7x16xf32>
    %905 = vector.broadcast %0 : vector<1x16xf32> to vector<7x16xf32>
    %906 = arith.addf %904, %905 : vector<7x16xf32>
    %cst_794 = arith.constant 0.000000e+00 : f32
    %907 = vector.broadcast %cst_794 : f32 to vector<7x16xf32>
    %908 = arith.maximumf %906, %907 : vector<7x16xf32>
    %909 = vector.extract_strided_slice %746 {offsets = [0, 0], sizes = [3, 16], strides = [1, 1]} : vector<7x16xf32> to vector<3x16xf32>
    %910 = arith.truncf %909 : vector<3x16xf32> to vector<3x16xbf16>
    %c0_795 = arith.constant 0 : index
    %c0_796 = arith.constant 0 : index
    %c0_797 = arith.constant 0 : index
    %911 = vector.load %arg4[%c0_795, %c0_796, %c0_797] : memref<25x16x16xbf16, #tpu.memory_space<vmem>>, vector<1x16x16xbf16>
    %912 = vector.shape_cast %911 : vector<1x16x16xbf16> to vector<16x16xbf16>
    %cst_798 = arith.constant dense<0.000000e+00> : vector<3x16xf32>
    %913 = tpu.matmul %910, %912, %cst_798 {dimension_numbers = #tpu.dot_dimension_numbers<[1], [0], [0], [1], [0, 0, 1, 1], [], []>} : vector<3x16xbf16>, vector<16x16xbf16>, vector<3x16xf32> -> vector<3x16xf32>
    %914 = vector.extract_strided_slice %746 {offsets = [1, 0], sizes = [3, 16], strides = [1, 1]} : vector<7x16xf32> to vector<3x16xf32>
    %915 = arith.truncf %914 : vector<3x16xf32> to vector<3x16xbf16>
    %c1_799 = arith.constant 1 : index
    %c0_800 = arith.constant 0 : index
    %c0_801 = arith.constant 0 : index
    %916 = vector.load %arg4[%c1_799, %c0_800, %c0_801] : memref<25x16x16xbf16, #tpu.memory_space<vmem>>, vector<1x16x16xbf16>
    %917 = vector.shape_cast %916 : vector<1x16x16xbf16> to vector<16x16xbf16>
    %cst_802 = arith.constant dense<0.000000e+00> : vector<3x16xf32>
    %918 = tpu.matmul %915, %917, %cst_802 {dimension_numbers = #tpu.dot_dimension_numbers<[1], [0], [0], [1], [0, 0, 1, 1], [], []>} : vector<3x16xbf16>, vector<16x16xbf16>, vector<3x16xf32> -> vector<3x16xf32>
    %919 = arith.addf %913, %918 : vector<3x16xf32>
    %920 = vector.extract_strided_slice %746 {offsets = [2, 0], sizes = [3, 16], strides = [1, 1]} : vector<7x16xf32> to vector<3x16xf32>
    %921 = arith.truncf %920 : vector<3x16xf32> to vector<3x16xbf16>
    %c2_803 = arith.constant 2 : index
    %c0_804 = arith.constant 0 : index
    %c0_805 = arith.constant 0 : index
    %922 = vector.load %arg4[%c2_803, %c0_804, %c0_805] : memref<25x16x16xbf16, #tpu.memory_space<vmem>>, vector<1x16x16xbf16>
    %923 = vector.shape_cast %922 : vector<1x16x16xbf16> to vector<16x16xbf16>
    %cst_806 = arith.constant dense<0.000000e+00> : vector<3x16xf32>
    %924 = tpu.matmul %921, %923, %cst_806 {dimension_numbers = #tpu.dot_dimension_numbers<[1], [0], [0], [1], [0, 0, 1, 1], [], []>} : vector<3x16xbf16>, vector<16x16xbf16>, vector<3x16xf32> -> vector<3x16xf32>
    %925 = arith.addf %919, %924 : vector<3x16xf32>
    %926 = vector.extract_strided_slice %746 {offsets = [3, 0], sizes = [3, 16], strides = [1, 1]} : vector<7x16xf32> to vector<3x16xf32>
    %927 = arith.truncf %926 : vector<3x16xf32> to vector<3x16xbf16>
    %c3_807 = arith.constant 3 : index
    %c0_808 = arith.constant 0 : index
    %c0_809 = arith.constant 0 : index
    %928 = vector.load %arg4[%c3_807, %c0_808, %c0_809] : memref<25x16x16xbf16, #tpu.memory_space<vmem>>, vector<1x16x16xbf16>
    %929 = vector.shape_cast %928 : vector<1x16x16xbf16> to vector<16x16xbf16>
    %cst_810 = arith.constant dense<0.000000e+00> : vector<3x16xf32>
    %930 = tpu.matmul %927, %929, %cst_810 {dimension_numbers = #tpu.dot_dimension_numbers<[1], [0], [0], [1], [0, 0, 1, 1], [], []>} : vector<3x16xbf16>, vector<16x16xbf16>, vector<3x16xf32> -> vector<3x16xf32>
    %931 = arith.addf %925, %930 : vector<3x16xf32>
    %932 = vector.extract_strided_slice %746 {offsets = [4, 0], sizes = [3, 16], strides = [1, 1]} : vector<7x16xf32> to vector<3x16xf32>
    %933 = arith.truncf %932 : vector<3x16xf32> to vector<3x16xbf16>
    %c4_811 = arith.constant 4 : index
    %c0_812 = arith.constant 0 : index
    %c0_813 = arith.constant 0 : index
    %934 = vector.load %arg4[%c4_811, %c0_812, %c0_813] : memref<25x16x16xbf16, #tpu.memory_space<vmem>>, vector<1x16x16xbf16>
    %935 = vector.shape_cast %934 : vector<1x16x16xbf16> to vector<16x16xbf16>
    %cst_814 = arith.constant dense<0.000000e+00> : vector<3x16xf32>
    %936 = tpu.matmul %933, %935, %cst_814 {dimension_numbers = #tpu.dot_dimension_numbers<[1], [0], [0], [1], [0, 0, 1, 1], [], []>} : vector<3x16xbf16>, vector<16x16xbf16>, vector<3x16xf32> -> vector<3x16xf32>
    %937 = arith.addf %931, %936 : vector<3x16xf32>
    %938 = vector.extract_strided_slice %773 {offsets = [0, 0], sizes = [3, 16], strides = [1, 1]} : vector<7x16xf32> to vector<3x16xf32>
    %939 = arith.truncf %938 : vector<3x16xf32> to vector<3x16xbf16>
    %c5_815 = arith.constant 5 : index
    %c0_816 = arith.constant 0 : index
    %c0_817 = arith.constant 0 : index
    %940 = vector.load %arg4[%c5_815, %c0_816, %c0_817] : memref<25x16x16xbf16, #tpu.memory_space<vmem>>, vector<1x16x16xbf16>
    %941 = vector.shape_cast %940 : vector<1x16x16xbf16> to vector<16x16xbf16>
    %cst_818 = arith.constant dense<0.000000e+00> : vector<3x16xf32>
    %942 = tpu.matmul %939, %941, %cst_818 {dimension_numbers = #tpu.dot_dimension_numbers<[1], [0], [0], [1], [0, 0, 1, 1], [], []>} : vector<3x16xbf16>, vector<16x16xbf16>, vector<3x16xf32> -> vector<3x16xf32>
    %943 = arith.addf %937, %942 : vector<3x16xf32>
    %944 = vector.extract_strided_slice %773 {offsets = [1, 0], sizes = [3, 16], strides = [1, 1]} : vector<7x16xf32> to vector<3x16xf32>
    %945 = arith.truncf %944 : vector<3x16xf32> to vector<3x16xbf16>
    %c6_819 = arith.constant 6 : index
    %c0_820 = arith.constant 0 : index
    %c0_821 = arith.constant 0 : index
    %946 = vector.load %arg4[%c6_819, %c0_820, %c0_821] : memref<25x16x16xbf16, #tpu.memory_space<vmem>>, vector<1x16x16xbf16>
    %947 = vector.shape_cast %946 : vector<1x16x16xbf16> to vector<16x16xbf16>
    %cst_822 = arith.constant dense<0.000000e+00> : vector<3x16xf32>
    %948 = tpu.matmul %945, %947, %cst_822 {dimension_numbers = #tpu.dot_dimension_numbers<[1], [0], [0], [1], [0, 0, 1, 1], [], []>} : vector<3x16xbf16>, vector<16x16xbf16>, vector<3x16xf32> -> vector<3x16xf32>
    %949 = arith.addf %943, %948 : vector<3x16xf32>
    %950 = vector.extract_strided_slice %773 {offsets = [2, 0], sizes = [3, 16], strides = [1, 1]} : vector<7x16xf32> to vector<3x16xf32>
    %951 = arith.truncf %950 : vector<3x16xf32> to vector<3x16xbf16>
    %c7_823 = arith.constant 7 : index
    %c0_824 = arith.constant 0 : index
    %c0_825 = arith.constant 0 : index
    %952 = vector.load %arg4[%c7_823, %c0_824, %c0_825] : memref<25x16x16xbf16, #tpu.memory_space<vmem>>, vector<1x16x16xbf16>
    %953 = vector.shape_cast %952 : vector<1x16x16xbf16> to vector<16x16xbf16>
    %cst_826 = arith.constant dense<0.000000e+00> : vector<3x16xf32>
    %954 = tpu.matmul %951, %953, %cst_826 {dimension_numbers = #tpu.dot_dimension_numbers<[1], [0], [0], [1], [0, 0, 1, 1], [], []>} : vector<3x16xbf16>, vector<16x16xbf16>, vector<3x16xf32> -> vector<3x16xf32>
    %955 = arith.addf %949, %954 : vector<3x16xf32>
    %956 = vector.extract_strided_slice %773 {offsets = [3, 0], sizes = [3, 16], strides = [1, 1]} : vector<7x16xf32> to vector<3x16xf32>
    %957 = arith.truncf %956 : vector<3x16xf32> to vector<3x16xbf16>
    %c8_827 = arith.constant 8 : index
    %c0_828 = arith.constant 0 : index
    %c0_829 = arith.constant 0 : index
    %958 = vector.load %arg4[%c8_827, %c0_828, %c0_829] : memref<25x16x16xbf16, #tpu.memory_space<vmem>>, vector<1x16x16xbf16>
    %959 = vector.shape_cast %958 : vector<1x16x16xbf16> to vector<16x16xbf16>
    %cst_830 = arith.constant dense<0.000000e+00> : vector<3x16xf32>
    %960 = tpu.matmul %957, %959, %cst_830 {dimension_numbers = #tpu.dot_dimension_numbers<[1], [0], [0], [1], [0, 0, 1, 1], [], []>} : vector<3x16xbf16>, vector<16x16xbf16>, vector<3x16xf32> -> vector<3x16xf32>
    %961 = arith.addf %955, %960 : vector<3x16xf32>
    %962 = vector.extract_strided_slice %773 {offsets = [4, 0], sizes = [3, 16], strides = [1, 1]} : vector<7x16xf32> to vector<3x16xf32>
    %963 = arith.truncf %962 : vector<3x16xf32> to vector<3x16xbf16>
    %c9_831 = arith.constant 9 : index
    %c0_832 = arith.constant 0 : index
    %c0_833 = arith.constant 0 : index
    %964 = vector.load %arg4[%c9_831, %c0_832, %c0_833] : memref<25x16x16xbf16, #tpu.memory_space<vmem>>, vector<1x16x16xbf16>
    %965 = vector.shape_cast %964 : vector<1x16x16xbf16> to vector<16x16xbf16>
    %cst_834 = arith.constant dense<0.000000e+00> : vector<3x16xf32>
    %966 = tpu.matmul %963, %965, %cst_834 {dimension_numbers = #tpu.dot_dimension_numbers<[1], [0], [0], [1], [0, 0, 1, 1], [], []>} : vector<3x16xbf16>, vector<16x16xbf16>, vector<3x16xf32> -> vector<3x16xf32>
    %967 = arith.addf %961, %966 : vector<3x16xf32>
    %968 = vector.extract_strided_slice %800 {offsets = [0, 0], sizes = [3, 16], strides = [1, 1]} : vector<7x16xf32> to vector<3x16xf32>
    %969 = arith.truncf %968 : vector<3x16xf32> to vector<3x16xbf16>
    %c10_835 = arith.constant 10 : index
    %c0_836 = arith.constant 0 : index
    %c0_837 = arith.constant 0 : index
    %970 = vector.load %arg4[%c10_835, %c0_836, %c0_837] : memref<25x16x16xbf16, #tpu.memory_space<vmem>>, vector<1x16x16xbf16>
    %971 = vector.shape_cast %970 : vector<1x16x16xbf16> to vector<16x16xbf16>
    %cst_838 = arith.constant dense<0.000000e+00> : vector<3x16xf32>
    %972 = tpu.matmul %969, %971, %cst_838 {dimension_numbers = #tpu.dot_dimension_numbers<[1], [0], [0], [1], [0, 0, 1, 1], [], []>} : vector<3x16xbf16>, vector<16x16xbf16>, vector<3x16xf32> -> vector<3x16xf32>
    %973 = arith.addf %967, %972 : vector<3x16xf32>
    %974 = vector.extract_strided_slice %800 {offsets = [1, 0], sizes = [3, 16], strides = [1, 1]} : vector<7x16xf32> to vector<3x16xf32>
    %975 = arith.truncf %974 : vector<3x16xf32> to vector<3x16xbf16>
    %c11_839 = arith.constant 11 : index
    %c0_840 = arith.constant 0 : index
    %c0_841 = arith.constant 0 : index
    %976 = vector.load %arg4[%c11_839, %c0_840, %c0_841] : memref<25x16x16xbf16, #tpu.memory_space<vmem>>, vector<1x16x16xbf16>
    %977 = vector.shape_cast %976 : vector<1x16x16xbf16> to vector<16x16xbf16>
    %cst_842 = arith.constant dense<0.000000e+00> : vector<3x16xf32>
    %978 = tpu.matmul %975, %977, %cst_842 {dimension_numbers = #tpu.dot_dimension_numbers<[1], [0], [0], [1], [0, 0, 1, 1], [], []>} : vector<3x16xbf16>, vector<16x16xbf16>, vector<3x16xf32> -> vector<3x16xf32>
    %979 = arith.addf %973, %978 : vector<3x16xf32>
    %980 = vector.extract_strided_slice %800 {offsets = [2, 0], sizes = [3, 16], strides = [1, 1]} : vector<7x16xf32> to vector<3x16xf32>
    %981 = arith.truncf %980 : vector<3x16xf32> to vector<3x16xbf16>
    %c12_843 = arith.constant 12 : index
    %c0_844 = arith.constant 0 : index
    %c0_845 = arith.constant 0 : index
    %982 = vector.load %arg4[%c12_843, %c0_844, %c0_845] : memref<25x16x16xbf16, #tpu.memory_space<vmem>>, vector<1x16x16xbf16>
    %983 = vector.shape_cast %982 : vector<1x16x16xbf16> to vector<16x16xbf16>
    %cst_846 = arith.constant dense<0.000000e+00> : vector<3x16xf32>
    %984 = tpu.matmul %981, %983, %cst_846 {dimension_numbers = #tpu.dot_dimension_numbers<[1], [0], [0], [1], [0, 0, 1, 1], [], []>} : vector<3x16xbf16>, vector<16x16xbf16>, vector<3x16xf32> -> vector<3x16xf32>
    %985 = arith.addf %979, %984 : vector<3x16xf32>
    %986 = vector.extract_strided_slice %800 {offsets = [3, 0], sizes = [3, 16], strides = [1, 1]} : vector<7x16xf32> to vector<3x16xf32>
    %987 = arith.truncf %986 : vector<3x16xf32> to vector<3x16xbf16>
    %c13_847 = arith.constant 13 : index
    %c0_848 = arith.constant 0 : index
    %c0_849 = arith.constant 0 : index
    %988 = vector.load %arg4[%c13_847, %c0_848, %c0_849] : memref<25x16x16xbf16, #tpu.memory_space<vmem>>, vector<1x16x16xbf16>
    %989 = vector.shape_cast %988 : vector<1x16x16xbf16> to vector<16x16xbf16>
    %cst_850 = arith.constant dense<0.000000e+00> : vector<3x16xf32>
    %990 = tpu.matmul %987, %989, %cst_850 {dimension_numbers = #tpu.dot_dimension_numbers<[1], [0], [0], [1], [0, 0, 1, 1], [], []>} : vector<3x16xbf16>, vector<16x16xbf16>, vector<3x16xf32> -> vector<3x16xf32>
    %991 = arith.addf %985, %990 : vector<3x16xf32>
    %992 = vector.extract_strided_slice %800 {offsets = [4, 0], sizes = [3, 16], strides = [1, 1]} : vector<7x16xf32> to vector<3x16xf32>
    %993 = arith.truncf %992 : vector<3x16xf32> to vector<3x16xbf16>
    %c14_851 = arith.constant 14 : index
    %c0_852 = arith.constant 0 : index
    %c0_853 = arith.constant 0 : index
    %994 = vector.load %arg4[%c14_851, %c0_852, %c0_853] : memref<25x16x16xbf16, #tpu.memory_space<vmem>>, vector<1x16x16xbf16>
    %995 = vector.shape_cast %994 : vector<1x16x16xbf16> to vector<16x16xbf16>
    %cst_854 = arith.constant dense<0.000000e+00> : vector<3x16xf32>
    %996 = tpu.matmul %993, %995, %cst_854 {dimension_numbers = #tpu.dot_dimension_numbers<[1], [0], [0], [1], [0, 0, 1, 1], [], []>} : vector<3x16xbf16>, vector<16x16xbf16>, vector<3x16xf32> -> vector<3x16xf32>
    %997 = arith.addf %991, %996 : vector<3x16xf32>
    %998 = vector.extract_strided_slice %827 {offsets = [0, 0], sizes = [3, 16], strides = [1, 1]} : vector<7x16xf32> to vector<3x16xf32>
    %999 = arith.truncf %998 : vector<3x16xf32> to vector<3x16xbf16>
    %c15_855 = arith.constant 15 : index
    %c0_856 = arith.constant 0 : index
    %c0_857 = arith.constant 0 : index
    %1000 = vector.load %arg4[%c15_855, %c0_856, %c0_857] : memref<25x16x16xbf16, #tpu.memory_space<vmem>>, vector<1x16x16xbf16>
    %1001 = vector.shape_cast %1000 : vector<1x16x16xbf16> to vector<16x16xbf16>
    %cst_858 = arith.constant dense<0.000000e+00> : vector<3x16xf32>
    %1002 = tpu.matmul %999, %1001, %cst_858 {dimension_numbers = #tpu.dot_dimension_numbers<[1], [0], [0], [1], [0, 0, 1, 1], [], []>} : vector<3x16xbf16>, vector<16x16xbf16>, vector<3x16xf32> -> vector<3x16xf32>
    %1003 = arith.addf %997, %1002 : vector<3x16xf32>
    %1004 = vector.extract_strided_slice %827 {offsets = [1, 0], sizes = [3, 16], strides = [1, 1]} : vector<7x16xf32> to vector<3x16xf32>
    %1005 = arith.truncf %1004 : vector<3x16xf32> to vector<3x16xbf16>
    %c16_859 = arith.constant 16 : index
    %c0_860 = arith.constant 0 : index
    %c0_861 = arith.constant 0 : index
    %1006 = vector.load %arg4[%c16_859, %c0_860, %c0_861] : memref<25x16x16xbf16, #tpu.memory_space<vmem>>, vector<1x16x16xbf16>
    %1007 = vector.shape_cast %1006 : vector<1x16x16xbf16> to vector<16x16xbf16>
    %cst_862 = arith.constant dense<0.000000e+00> : vector<3x16xf32>
    %1008 = tpu.matmul %1005, %1007, %cst_862 {dimension_numbers = #tpu.dot_dimension_numbers<[1], [0], [0], [1], [0, 0, 1, 1], [], []>} : vector<3x16xbf16>, vector<16x16xbf16>, vector<3x16xf32> -> vector<3x16xf32>
    %1009 = arith.addf %1003, %1008 : vector<3x16xf32>
    %1010 = vector.extract_strided_slice %827 {offsets = [2, 0], sizes = [3, 16], strides = [1, 1]} : vector<7x16xf32> to vector<3x16xf32>
    %1011 = arith.truncf %1010 : vector<3x16xf32> to vector<3x16xbf16>
    %c17_863 = arith.constant 17 : index
    %c0_864 = arith.constant 0 : index
    %c0_865 = arith.constant 0 : index
    %1012 = vector.load %arg4[%c17_863, %c0_864, %c0_865] : memref<25x16x16xbf16, #tpu.memory_space<vmem>>, vector<1x16x16xbf16>
    %1013 = vector.shape_cast %1012 : vector<1x16x16xbf16> to vector<16x16xbf16>
    %cst_866 = arith.constant dense<0.000000e+00> : vector<3x16xf32>
    %1014 = tpu.matmul %1011, %1013, %cst_866 {dimension_numbers = #tpu.dot_dimension_numbers<[1], [0], [0], [1], [0, 0, 1, 1], [], []>} : vector<3x16xbf16>, vector<16x16xbf16>, vector<3x16xf32> -> vector<3x16xf32>
    %1015 = arith.addf %1009, %1014 : vector<3x16xf32>
    %1016 = vector.extract_strided_slice %827 {offsets = [3, 0], sizes = [3, 16], strides = [1, 1]} : vector<7x16xf32> to vector<3x16xf32>
    %1017 = arith.truncf %1016 : vector<3x16xf32> to vector<3x16xbf16>
    %c18_867 = arith.constant 18 : index
    %c0_868 = arith.constant 0 : index
    %c0_869 = arith.constant 0 : index
    %1018 = vector.load %arg4[%c18_867, %c0_868, %c0_869] : memref<25x16x16xbf16, #tpu.memory_space<vmem>>, vector<1x16x16xbf16>
    %1019 = vector.shape_cast %1018 : vector<1x16x16xbf16> to vector<16x16xbf16>
    %cst_870 = arith.constant dense<0.000000e+00> : vector<3x16xf32>
    %1020 = tpu.matmul %1017, %1019, %cst_870 {dimension_numbers = #tpu.dot_dimension_numbers<[1], [0], [0], [1], [0, 0, 1, 1], [], []>} : vector<3x16xbf16>, vector<16x16xbf16>, vector<3x16xf32> -> vector<3x16xf32>
    %1021 = arith.addf %1015, %1020 : vector<3x16xf32>
    %1022 = vector.extract_strided_slice %827 {offsets = [4, 0], sizes = [3, 16], strides = [1, 1]} : vector<7x16xf32> to vector<3x16xf32>
    %1023 = arith.truncf %1022 : vector<3x16xf32> to vector<3x16xbf16>
    %c19_871 = arith.constant 19 : index
    %c0_872 = arith.constant 0 : index
    %c0_873 = arith.constant 0 : index
    %1024 = vector.load %arg4[%c19_871, %c0_872, %c0_873] : memref<25x16x16xbf16, #tpu.memory_space<vmem>>, vector<1x16x16xbf16>
    %1025 = vector.shape_cast %1024 : vector<1x16x16xbf16> to vector<16x16xbf16>
    %cst_874 = arith.constant dense<0.000000e+00> : vector<3x16xf32>
    %1026 = tpu.matmul %1023, %1025, %cst_874 {dimension_numbers = #tpu.dot_dimension_numbers<[1], [0], [0], [1], [0, 0, 1, 1], [], []>} : vector<3x16xbf16>, vector<16x16xbf16>, vector<3x16xf32> -> vector<3x16xf32>
    %1027 = arith.addf %1021, %1026 : vector<3x16xf32>
    %1028 = vector.extract_strided_slice %854 {offsets = [0, 0], sizes = [3, 16], strides = [1, 1]} : vector<7x16xf32> to vector<3x16xf32>
    %1029 = arith.truncf %1028 : vector<3x16xf32> to vector<3x16xbf16>
    %c20_875 = arith.constant 20 : index
    %c0_876 = arith.constant 0 : index
    %c0_877 = arith.constant 0 : index
    %1030 = vector.load %arg4[%c20_875, %c0_876, %c0_877] : memref<25x16x16xbf16, #tpu.memory_space<vmem>>, vector<1x16x16xbf16>
    %1031 = vector.shape_cast %1030 : vector<1x16x16xbf16> to vector<16x16xbf16>
    %cst_878 = arith.constant dense<0.000000e+00> : vector<3x16xf32>
    %1032 = tpu.matmul %1029, %1031, %cst_878 {dimension_numbers = #tpu.dot_dimension_numbers<[1], [0], [0], [1], [0, 0, 1, 1], [], []>} : vector<3x16xbf16>, vector<16x16xbf16>, vector<3x16xf32> -> vector<3x16xf32>
    %1033 = arith.addf %1027, %1032 : vector<3x16xf32>
    %1034 = vector.extract_strided_slice %854 {offsets = [1, 0], sizes = [3, 16], strides = [1, 1]} : vector<7x16xf32> to vector<3x16xf32>
    %1035 = arith.truncf %1034 : vector<3x16xf32> to vector<3x16xbf16>
    %c21_879 = arith.constant 21 : index
    %c0_880 = arith.constant 0 : index
    %c0_881 = arith.constant 0 : index
    %1036 = vector.load %arg4[%c21_879, %c0_880, %c0_881] : memref<25x16x16xbf16, #tpu.memory_space<vmem>>, vector<1x16x16xbf16>
    %1037 = vector.shape_cast %1036 : vector<1x16x16xbf16> to vector<16x16xbf16>
    %cst_882 = arith.constant dense<0.000000e+00> : vector<3x16xf32>
    %1038 = tpu.matmul %1035, %1037, %cst_882 {dimension_numbers = #tpu.dot_dimension_numbers<[1], [0], [0], [1], [0, 0, 1, 1], [], []>} : vector<3x16xbf16>, vector<16x16xbf16>, vector<3x16xf32> -> vector<3x16xf32>
    %1039 = arith.addf %1033, %1038 : vector<3x16xf32>
    %1040 = vector.extract_strided_slice %854 {offsets = [2, 0], sizes = [3, 16], strides = [1, 1]} : vector<7x16xf32> to vector<3x16xf32>
    %1041 = arith.truncf %1040 : vector<3x16xf32> to vector<3x16xbf16>
    %c22_883 = arith.constant 22 : index
    %c0_884 = arith.constant 0 : index
    %c0_885 = arith.constant 0 : index
    %1042 = vector.load %arg4[%c22_883, %c0_884, %c0_885] : memref<25x16x16xbf16, #tpu.memory_space<vmem>>, vector<1x16x16xbf16>
    %1043 = vector.shape_cast %1042 : vector<1x16x16xbf16> to vector<16x16xbf16>
    %cst_886 = arith.constant dense<0.000000e+00> : vector<3x16xf32>
    %1044 = tpu.matmul %1041, %1043, %cst_886 {dimension_numbers = #tpu.dot_dimension_numbers<[1], [0], [0], [1], [0, 0, 1, 1], [], []>} : vector<3x16xbf16>, vector<16x16xbf16>, vector<3x16xf32> -> vector<3x16xf32>
    %1045 = arith.addf %1039, %1044 : vector<3x16xf32>
    %1046 = vector.extract_strided_slice %854 {offsets = [3, 0], sizes = [3, 16], strides = [1, 1]} : vector<7x16xf32> to vector<3x16xf32>
    %1047 = arith.truncf %1046 : vector<3x16xf32> to vector<3x16xbf16>
    %c23_887 = arith.constant 23 : index
    %c0_888 = arith.constant 0 : index
    %c0_889 = arith.constant 0 : index
    %1048 = vector.load %arg4[%c23_887, %c0_888, %c0_889] : memref<25x16x16xbf16, #tpu.memory_space<vmem>>, vector<1x16x16xbf16>
    %1049 = vector.shape_cast %1048 : vector<1x16x16xbf16> to vector<16x16xbf16>
    %cst_890 = arith.constant dense<0.000000e+00> : vector<3x16xf32>
    %1050 = tpu.matmul %1047, %1049, %cst_890 {dimension_numbers = #tpu.dot_dimension_numbers<[1], [0], [0], [1], [0, 0, 1, 1], [], []>} : vector<3x16xbf16>, vector<16x16xbf16>, vector<3x16xf32> -> vector<3x16xf32>
    %1051 = arith.addf %1045, %1050 : vector<3x16xf32>
    %1052 = vector.extract_strided_slice %854 {offsets = [4, 0], sizes = [3, 16], strides = [1, 1]} : vector<7x16xf32> to vector<3x16xf32>
    %1053 = arith.truncf %1052 : vector<3x16xf32> to vector<3x16xbf16>
    %c24_891 = arith.constant 24 : index
    %c0_892 = arith.constant 0 : index
    %c0_893 = arith.constant 0 : index
    %1054 = vector.load %arg4[%c24_891, %c0_892, %c0_893] : memref<25x16x16xbf16, #tpu.memory_space<vmem>>, vector<1x16x16xbf16>
    %1055 = vector.shape_cast %1054 : vector<1x16x16xbf16> to vector<16x16xbf16>
    %cst_894 = arith.constant dense<0.000000e+00> : vector<3x16xf32>
    %1056 = tpu.matmul %1053, %1055, %cst_894 {dimension_numbers = #tpu.dot_dimension_numbers<[1], [0], [0], [1], [0, 0, 1, 1], [], []>} : vector<3x16xbf16>, vector<16x16xbf16>, vector<3x16xf32> -> vector<3x16xf32>
    %1057 = arith.addf %1051, %1056 : vector<3x16xf32>
    %1058 = vector.broadcast %1 : vector<1x16xf32> to vector<3x16xf32>
    %1059 = arith.addf %1057, %1058 : vector<3x16xf32>
    %cst_895 = arith.constant 0.000000e+00 : f32
    %1060 = vector.broadcast %cst_895 : f32 to vector<3x16xf32>
    %1061 = arith.maximumf %1059, %1060 : vector<3x16xf32>
    %1062 = vector.extract_strided_slice %773 {offsets = [0, 0], sizes = [3, 16], strides = [1, 1]} : vector<7x16xf32> to vector<3x16xf32>
    %1063 = arith.truncf %1062 : vector<3x16xf32> to vector<3x16xbf16>
    %c0_896 = arith.constant 0 : index
    %c0_897 = arith.constant 0 : index
    %c0_898 = arith.constant 0 : index
    %1064 = vector.load %arg4[%c0_896, %c0_897, %c0_898] : memref<25x16x16xbf16, #tpu.memory_space<vmem>>, vector<1x16x16xbf16>
    %1065 = vector.shape_cast %1064 : vector<1x16x16xbf16> to vector<16x16xbf16>
    %cst_899 = arith.constant dense<0.000000e+00> : vector<3x16xf32>
    %1066 = tpu.matmul %1063, %1065, %cst_899 {dimension_numbers = #tpu.dot_dimension_numbers<[1], [0], [0], [1], [0, 0, 1, 1], [], []>} : vector<3x16xbf16>, vector<16x16xbf16>, vector<3x16xf32> -> vector<3x16xf32>
    %1067 = vector.extract_strided_slice %773 {offsets = [1, 0], sizes = [3, 16], strides = [1, 1]} : vector<7x16xf32> to vector<3x16xf32>
    %1068 = arith.truncf %1067 : vector<3x16xf32> to vector<3x16xbf16>
    %c1_900 = arith.constant 1 : index
    %c0_901 = arith.constant 0 : index
    %c0_902 = arith.constant 0 : index
    %1069 = vector.load %arg4[%c1_900, %c0_901, %c0_902] : memref<25x16x16xbf16, #tpu.memory_space<vmem>>, vector<1x16x16xbf16>
    %1070 = vector.shape_cast %1069 : vector<1x16x16xbf16> to vector<16x16xbf16>
    %cst_903 = arith.constant dense<0.000000e+00> : vector<3x16xf32>
    %1071 = tpu.matmul %1068, %1070, %cst_903 {dimension_numbers = #tpu.dot_dimension_numbers<[1], [0], [0], [1], [0, 0, 1, 1], [], []>} : vector<3x16xbf16>, vector<16x16xbf16>, vector<3x16xf32> -> vector<3x16xf32>
    %1072 = arith.addf %1066, %1071 : vector<3x16xf32>
    %1073 = vector.extract_strided_slice %773 {offsets = [2, 0], sizes = [3, 16], strides = [1, 1]} : vector<7x16xf32> to vector<3x16xf32>
    %1074 = arith.truncf %1073 : vector<3x16xf32> to vector<3x16xbf16>
    %c2_904 = arith.constant 2 : index
    %c0_905 = arith.constant 0 : index
    %c0_906 = arith.constant 0 : index
    %1075 = vector.load %arg4[%c2_904, %c0_905, %c0_906] : memref<25x16x16xbf16, #tpu.memory_space<vmem>>, vector<1x16x16xbf16>
    %1076 = vector.shape_cast %1075 : vector<1x16x16xbf16> to vector<16x16xbf16>
    %cst_907 = arith.constant dense<0.000000e+00> : vector<3x16xf32>
    %1077 = tpu.matmul %1074, %1076, %cst_907 {dimension_numbers = #tpu.dot_dimension_numbers<[1], [0], [0], [1], [0, 0, 1, 1], [], []>} : vector<3x16xbf16>, vector<16x16xbf16>, vector<3x16xf32> -> vector<3x16xf32>
    %1078 = arith.addf %1072, %1077 : vector<3x16xf32>
    %1079 = vector.extract_strided_slice %773 {offsets = [3, 0], sizes = [3, 16], strides = [1, 1]} : vector<7x16xf32> to vector<3x16xf32>
    %1080 = arith.truncf %1079 : vector<3x16xf32> to vector<3x16xbf16>
    %c3_908 = arith.constant 3 : index
    %c0_909 = arith.constant 0 : index
    %c0_910 = arith.constant 0 : index
    %1081 = vector.load %arg4[%c3_908, %c0_909, %c0_910] : memref<25x16x16xbf16, #tpu.memory_space<vmem>>, vector<1x16x16xbf16>
    %1082 = vector.shape_cast %1081 : vector<1x16x16xbf16> to vector<16x16xbf16>
    %cst_911 = arith.constant dense<0.000000e+00> : vector<3x16xf32>
    %1083 = tpu.matmul %1080, %1082, %cst_911 {dimension_numbers = #tpu.dot_dimension_numbers<[1], [0], [0], [1], [0, 0, 1, 1], [], []>} : vector<3x16xbf16>, vector<16x16xbf16>, vector<3x16xf32> -> vector<3x16xf32>
    %1084 = arith.addf %1078, %1083 : vector<3x16xf32>
    %1085 = vector.extract_strided_slice %773 {offsets = [4, 0], sizes = [3, 16], strides = [1, 1]} : vector<7x16xf32> to vector<3x16xf32>
    %1086 = arith.truncf %1085 : vector<3x16xf32> to vector<3x16xbf16>
    %c4_912 = arith.constant 4 : index
    %c0_913 = arith.constant 0 : index
    %c0_914 = arith.constant 0 : index
    %1087 = vector.load %arg4[%c4_912, %c0_913, %c0_914] : memref<25x16x16xbf16, #tpu.memory_space<vmem>>, vector<1x16x16xbf16>
    %1088 = vector.shape_cast %1087 : vector<1x16x16xbf16> to vector<16x16xbf16>
    %cst_915 = arith.constant dense<0.000000e+00> : vector<3x16xf32>
    %1089 = tpu.matmul %1086, %1088, %cst_915 {dimension_numbers = #tpu.dot_dimension_numbers<[1], [0], [0], [1], [0, 0, 1, 1], [], []>} : vector<3x16xbf16>, vector<16x16xbf16>, vector<3x16xf32> -> vector<3x16xf32>
    %1090 = arith.addf %1084, %1089 : vector<3x16xf32>
    %1091 = vector.extract_strided_slice %800 {offsets = [0, 0], sizes = [3, 16], strides = [1, 1]} : vector<7x16xf32> to vector<3x16xf32>
    %1092 = arith.truncf %1091 : vector<3x16xf32> to vector<3x16xbf16>
    %c5_916 = arith.constant 5 : index
    %c0_917 = arith.constant 0 : index
    %c0_918 = arith.constant 0 : index
    %1093 = vector.load %arg4[%c5_916, %c0_917, %c0_918] : memref<25x16x16xbf16, #tpu.memory_space<vmem>>, vector<1x16x16xbf16>
    %1094 = vector.shape_cast %1093 : vector<1x16x16xbf16> to vector<16x16xbf16>
    %cst_919 = arith.constant dense<0.000000e+00> : vector<3x16xf32>
    %1095 = tpu.matmul %1092, %1094, %cst_919 {dimension_numbers = #tpu.dot_dimension_numbers<[1], [0], [0], [1], [0, 0, 1, 1], [], []>} : vector<3x16xbf16>, vector<16x16xbf16>, vector<3x16xf32> -> vector<3x16xf32>
    %1096 = arith.addf %1090, %1095 : vector<3x16xf32>
    %1097 = vector.extract_strided_slice %800 {offsets = [1, 0], sizes = [3, 16], strides = [1, 1]} : vector<7x16xf32> to vector<3x16xf32>
    %1098 = arith.truncf %1097 : vector<3x16xf32> to vector<3x16xbf16>
    %c6_920 = arith.constant 6 : index
    %c0_921 = arith.constant 0 : index
    %c0_922 = arith.constant 0 : index
    %1099 = vector.load %arg4[%c6_920, %c0_921, %c0_922] : memref<25x16x16xbf16, #tpu.memory_space<vmem>>, vector<1x16x16xbf16>
    %1100 = vector.shape_cast %1099 : vector<1x16x16xbf16> to vector<16x16xbf16>
    %cst_923 = arith.constant dense<0.000000e+00> : vector<3x16xf32>
    %1101 = tpu.matmul %1098, %1100, %cst_923 {dimension_numbers = #tpu.dot_dimension_numbers<[1], [0], [0], [1], [0, 0, 1, 1], [], []>} : vector<3x16xbf16>, vector<16x16xbf16>, vector<3x16xf32> -> vector<3x16xf32>
    %1102 = arith.addf %1096, %1101 : vector<3x16xf32>
    %1103 = vector.extract_strided_slice %800 {offsets = [2, 0], sizes = [3, 16], strides = [1, 1]} : vector<7x16xf32> to vector<3x16xf32>
    %1104 = arith.truncf %1103 : vector<3x16xf32> to vector<3x16xbf16>
    %c7_924 = arith.constant 7 : index
    %c0_925 = arith.constant 0 : index
    %c0_926 = arith.constant 0 : index
    %1105 = vector.load %arg4[%c7_924, %c0_925, %c0_926] : memref<25x16x16xbf16, #tpu.memory_space<vmem>>, vector<1x16x16xbf16>
    %1106 = vector.shape_cast %1105 : vector<1x16x16xbf16> to vector<16x16xbf16>
    %cst_927 = arith.constant dense<0.000000e+00> : vector<3x16xf32>
    %1107 = tpu.matmul %1104, %1106, %cst_927 {dimension_numbers = #tpu.dot_dimension_numbers<[1], [0], [0], [1], [0, 0, 1, 1], [], []>} : vector<3x16xbf16>, vector<16x16xbf16>, vector<3x16xf32> -> vector<3x16xf32>
    %1108 = arith.addf %1102, %1107 : vector<3x16xf32>
    %1109 = vector.extract_strided_slice %800 {offsets = [3, 0], sizes = [3, 16], strides = [1, 1]} : vector<7x16xf32> to vector<3x16xf32>
    %1110 = arith.truncf %1109 : vector<3x16xf32> to vector<3x16xbf16>
    %c8_928 = arith.constant 8 : index
    %c0_929 = arith.constant 0 : index
    %c0_930 = arith.constant 0 : index
    %1111 = vector.load %arg4[%c8_928, %c0_929, %c0_930] : memref<25x16x16xbf16, #tpu.memory_space<vmem>>, vector<1x16x16xbf16>
    %1112 = vector.shape_cast %1111 : vector<1x16x16xbf16> to vector<16x16xbf16>
    %cst_931 = arith.constant dense<0.000000e+00> : vector<3x16xf32>
    %1113 = tpu.matmul %1110, %1112, %cst_931 {dimension_numbers = #tpu.dot_dimension_numbers<[1], [0], [0], [1], [0, 0, 1, 1], [], []>} : vector<3x16xbf16>, vector<16x16xbf16>, vector<3x16xf32> -> vector<3x16xf32>
    %1114 = arith.addf %1108, %1113 : vector<3x16xf32>
    %1115 = vector.extract_strided_slice %800 {offsets = [4, 0], sizes = [3, 16], strides = [1, 1]} : vector<7x16xf32> to vector<3x16xf32>
    %1116 = arith.truncf %1115 : vector<3x16xf32> to vector<3x16xbf16>
    %c9_932 = arith.constant 9 : index
    %c0_933 = arith.constant 0 : index
    %c0_934 = arith.constant 0 : index
    %1117 = vector.load %arg4[%c9_932, %c0_933, %c0_934] : memref<25x16x16xbf16, #tpu.memory_space<vmem>>, vector<1x16x16xbf16>
    %1118 = vector.shape_cast %1117 : vector<1x16x16xbf16> to vector<16x16xbf16>
    %cst_935 = arith.constant dense<0.000000e+00> : vector<3x16xf32>
    %1119 = tpu.matmul %1116, %1118, %cst_935 {dimension_numbers = #tpu.dot_dimension_numbers<[1], [0], [0], [1], [0, 0, 1, 1], [], []>} : vector<3x16xbf16>, vector<16x16xbf16>, vector<3x16xf32> -> vector<3x16xf32>
    %1120 = arith.addf %1114, %1119 : vector<3x16xf32>
    %1121 = vector.extract_strided_slice %827 {offsets = [0, 0], sizes = [3, 16], strides = [1, 1]} : vector<7x16xf32> to vector<3x16xf32>
    %1122 = arith.truncf %1121 : vector<3x16xf32> to vector<3x16xbf16>
    %c10_936 = arith.constant 10 : index
    %c0_937 = arith.constant 0 : index
    %c0_938 = arith.constant 0 : index
    %1123 = vector.load %arg4[%c10_936, %c0_937, %c0_938] : memref<25x16x16xbf16, #tpu.memory_space<vmem>>, vector<1x16x16xbf16>
    %1124 = vector.shape_cast %1123 : vector<1x16x16xbf16> to vector<16x16xbf16>
    %cst_939 = arith.constant dense<0.000000e+00> : vector<3x16xf32>
    %1125 = tpu.matmul %1122, %1124, %cst_939 {dimension_numbers = #tpu.dot_dimension_numbers<[1], [0], [0], [1], [0, 0, 1, 1], [], []>} : vector<3x16xbf16>, vector<16x16xbf16>, vector<3x16xf32> -> vector<3x16xf32>
    %1126 = arith.addf %1120, %1125 : vector<3x16xf32>
    %1127 = vector.extract_strided_slice %827 {offsets = [1, 0], sizes = [3, 16], strides = [1, 1]} : vector<7x16xf32> to vector<3x16xf32>
    %1128 = arith.truncf %1127 : vector<3x16xf32> to vector<3x16xbf16>
    %c11_940 = arith.constant 11 : index
    %c0_941 = arith.constant 0 : index
    %c0_942 = arith.constant 0 : index
    %1129 = vector.load %arg4[%c11_940, %c0_941, %c0_942] : memref<25x16x16xbf16, #tpu.memory_space<vmem>>, vector<1x16x16xbf16>
    %1130 = vector.shape_cast %1129 : vector<1x16x16xbf16> to vector<16x16xbf16>
    %cst_943 = arith.constant dense<0.000000e+00> : vector<3x16xf32>
    %1131 = tpu.matmul %1128, %1130, %cst_943 {dimension_numbers = #tpu.dot_dimension_numbers<[1], [0], [0], [1], [0, 0, 1, 1], [], []>} : vector<3x16xbf16>, vector<16x16xbf16>, vector<3x16xf32> -> vector<3x16xf32>
    %1132 = arith.addf %1126, %1131 : vector<3x16xf32>
    %1133 = vector.extract_strided_slice %827 {offsets = [2, 0], sizes = [3, 16], strides = [1, 1]} : vector<7x16xf32> to vector<3x16xf32>
    %1134 = arith.truncf %1133 : vector<3x16xf32> to vector<3x16xbf16>
    %c12_944 = arith.constant 12 : index
    %c0_945 = arith.constant 0 : index
    %c0_946 = arith.constant 0 : index
    %1135 = vector.load %arg4[%c12_944, %c0_945, %c0_946] : memref<25x16x16xbf16, #tpu.memory_space<vmem>>, vector<1x16x16xbf16>
    %1136 = vector.shape_cast %1135 : vector<1x16x16xbf16> to vector<16x16xbf16>
    %cst_947 = arith.constant dense<0.000000e+00> : vector<3x16xf32>
    %1137 = tpu.matmul %1134, %1136, %cst_947 {dimension_numbers = #tpu.dot_dimension_numbers<[1], [0], [0], [1], [0, 0, 1, 1], [], []>} : vector<3x16xbf16>, vector<16x16xbf16>, vector<3x16xf32> -> vector<3x16xf32>
    %1138 = arith.addf %1132, %1137 : vector<3x16xf32>
    %1139 = vector.extract_strided_slice %827 {offsets = [3, 0], sizes = [3, 16], strides = [1, 1]} : vector<7x16xf32> to vector<3x16xf32>
    %1140 = arith.truncf %1139 : vector<3x16xf32> to vector<3x16xbf16>
    %c13_948 = arith.constant 13 : index
    %c0_949 = arith.constant 0 : index
    %c0_950 = arith.constant 0 : index
    %1141 = vector.load %arg4[%c13_948, %c0_949, %c0_950] : memref<25x16x16xbf16, #tpu.memory_space<vmem>>, vector<1x16x16xbf16>
    %1142 = vector.shape_cast %1141 : vector<1x16x16xbf16> to vector<16x16xbf16>
    %cst_951 = arith.constant dense<0.000000e+00> : vector<3x16xf32>
    %1143 = tpu.matmul %1140, %1142, %cst_951 {dimension_numbers = #tpu.dot_dimension_numbers<[1], [0], [0], [1], [0, 0, 1, 1], [], []>} : vector<3x16xbf16>, vector<16x16xbf16>, vector<3x16xf32> -> vector<3x16xf32>
    %1144 = arith.addf %1138, %1143 : vector<3x16xf32>
    %1145 = vector.extract_strided_slice %827 {offsets = [4, 0], sizes = [3, 16], strides = [1, 1]} : vector<7x16xf32> to vector<3x16xf32>
    %1146 = arith.truncf %1145 : vector<3x16xf32> to vector<3x16xbf16>
    %c14_952 = arith.constant 14 : index
    %c0_953 = arith.constant 0 : index
    %c0_954 = arith.constant 0 : index
    %1147 = vector.load %arg4[%c14_952, %c0_953, %c0_954] : memref<25x16x16xbf16, #tpu.memory_space<vmem>>, vector<1x16x16xbf16>
    %1148 = vector.shape_cast %1147 : vector<1x16x16xbf16> to vector<16x16xbf16>
    %cst_955 = arith.constant dense<0.000000e+00> : vector<3x16xf32>
    %1149 = tpu.matmul %1146, %1148, %cst_955 {dimension_numbers = #tpu.dot_dimension_numbers<[1], [0], [0], [1], [0, 0, 1, 1], [], []>} : vector<3x16xbf16>, vector<16x16xbf16>, vector<3x16xf32> -> vector<3x16xf32>
    %1150 = arith.addf %1144, %1149 : vector<3x16xf32>
    %1151 = vector.extract_strided_slice %854 {offsets = [0, 0], sizes = [3, 16], strides = [1, 1]} : vector<7x16xf32> to vector<3x16xf32>
    %1152 = arith.truncf %1151 : vector<3x16xf32> to vector<3x16xbf16>
    %c15_956 = arith.constant 15 : index
    %c0_957 = arith.constant 0 : index
    %c0_958 = arith.constant 0 : index
    %1153 = vector.load %arg4[%c15_956, %c0_957, %c0_958] : memref<25x16x16xbf16, #tpu.memory_space<vmem>>, vector<1x16x16xbf16>
    %1154 = vector.shape_cast %1153 : vector<1x16x16xbf16> to vector<16x16xbf16>
    %cst_959 = arith.constant dense<0.000000e+00> : vector<3x16xf32>
    %1155 = tpu.matmul %1152, %1154, %cst_959 {dimension_numbers = #tpu.dot_dimension_numbers<[1], [0], [0], [1], [0, 0, 1, 1], [], []>} : vector<3x16xbf16>, vector<16x16xbf16>, vector<3x16xf32> -> vector<3x16xf32>
    %1156 = arith.addf %1150, %1155 : vector<3x16xf32>
    %1157 = vector.extract_strided_slice %854 {offsets = [1, 0], sizes = [3, 16], strides = [1, 1]} : vector<7x16xf32> to vector<3x16xf32>
    %1158 = arith.truncf %1157 : vector<3x16xf32> to vector<3x16xbf16>
    %c16_960 = arith.constant 16 : index
    %c0_961 = arith.constant 0 : index
    %c0_962 = arith.constant 0 : index
    %1159 = vector.load %arg4[%c16_960, %c0_961, %c0_962] : memref<25x16x16xbf16, #tpu.memory_space<vmem>>, vector<1x16x16xbf16>
    %1160 = vector.shape_cast %1159 : vector<1x16x16xbf16> to vector<16x16xbf16>
    %cst_963 = arith.constant dense<0.000000e+00> : vector<3x16xf32>
    %1161 = tpu.matmul %1158, %1160, %cst_963 {dimension_numbers = #tpu.dot_dimension_numbers<[1], [0], [0], [1], [0, 0, 1, 1], [], []>} : vector<3x16xbf16>, vector<16x16xbf16>, vector<3x16xf32> -> vector<3x16xf32>
    %1162 = arith.addf %1156, %1161 : vector<3x16xf32>
    %1163 = vector.extract_strided_slice %854 {offsets = [2, 0], sizes = [3, 16], strides = [1, 1]} : vector<7x16xf32> to vector<3x16xf32>
    %1164 = arith.truncf %1163 : vector<3x16xf32> to vector<3x16xbf16>
    %c17_964 = arith.constant 17 : index
    %c0_965 = arith.constant 0 : index
    %c0_966 = arith.constant 0 : index
    %1165 = vector.load %arg4[%c17_964, %c0_965, %c0_966] : memref<25x16x16xbf16, #tpu.memory_space<vmem>>, vector<1x16x16xbf16>
    %1166 = vector.shape_cast %1165 : vector<1x16x16xbf16> to vector<16x16xbf16>
    %cst_967 = arith.constant dense<0.000000e+00> : vector<3x16xf32>
    %1167 = tpu.matmul %1164, %1166, %cst_967 {dimension_numbers = #tpu.dot_dimension_numbers<[1], [0], [0], [1], [0, 0, 1, 1], [], []>} : vector<3x16xbf16>, vector<16x16xbf16>, vector<3x16xf32> -> vector<3x16xf32>
    %1168 = arith.addf %1162, %1167 : vector<3x16xf32>
    %1169 = vector.extract_strided_slice %854 {offsets = [3, 0], sizes = [3, 16], strides = [1, 1]} : vector<7x16xf32> to vector<3x16xf32>
    %1170 = arith.truncf %1169 : vector<3x16xf32> to vector<3x16xbf16>
    %c18_968 = arith.constant 18 : index
    %c0_969 = arith.constant 0 : index
    %c0_970 = arith.constant 0 : index
    %1171 = vector.load %arg4[%c18_968, %c0_969, %c0_970] : memref<25x16x16xbf16, #tpu.memory_space<vmem>>, vector<1x16x16xbf16>
    %1172 = vector.shape_cast %1171 : vector<1x16x16xbf16> to vector<16x16xbf16>
    %cst_971 = arith.constant dense<0.000000e+00> : vector<3x16xf32>
    %1173 = tpu.matmul %1170, %1172, %cst_971 {dimension_numbers = #tpu.dot_dimension_numbers<[1], [0], [0], [1], [0, 0, 1, 1], [], []>} : vector<3x16xbf16>, vector<16x16xbf16>, vector<3x16xf32> -> vector<3x16xf32>
    %1174 = arith.addf %1168, %1173 : vector<3x16xf32>
    %1175 = vector.extract_strided_slice %854 {offsets = [4, 0], sizes = [3, 16], strides = [1, 1]} : vector<7x16xf32> to vector<3x16xf32>
    %1176 = arith.truncf %1175 : vector<3x16xf32> to vector<3x16xbf16>
    %c19_972 = arith.constant 19 : index
    %c0_973 = arith.constant 0 : index
    %c0_974 = arith.constant 0 : index
    %1177 = vector.load %arg4[%c19_972, %c0_973, %c0_974] : memref<25x16x16xbf16, #tpu.memory_space<vmem>>, vector<1x16x16xbf16>
    %1178 = vector.shape_cast %1177 : vector<1x16x16xbf16> to vector<16x16xbf16>
    %cst_975 = arith.constant dense<0.000000e+00> : vector<3x16xf32>
    %1179 = tpu.matmul %1176, %1178, %cst_975 {dimension_numbers = #tpu.dot_dimension_numbers<[1], [0], [0], [1], [0, 0, 1, 1], [], []>} : vector<3x16xbf16>, vector<16x16xbf16>, vector<3x16xf32> -> vector<3x16xf32>
    %1180 = arith.addf %1174, %1179 : vector<3x16xf32>
    %1181 = vector.extract_strided_slice %881 {offsets = [0, 0], sizes = [3, 16], strides = [1, 1]} : vector<7x16xf32> to vector<3x16xf32>
    %1182 = arith.truncf %1181 : vector<3x16xf32> to vector<3x16xbf16>
    %c20_976 = arith.constant 20 : index
    %c0_977 = arith.constant 0 : index
    %c0_978 = arith.constant 0 : index
    %1183 = vector.load %arg4[%c20_976, %c0_977, %c0_978] : memref<25x16x16xbf16, #tpu.memory_space<vmem>>, vector<1x16x16xbf16>
    %1184 = vector.shape_cast %1183 : vector<1x16x16xbf16> to vector<16x16xbf16>
    %cst_979 = arith.constant dense<0.000000e+00> : vector<3x16xf32>
    %1185 = tpu.matmul %1182, %1184, %cst_979 {dimension_numbers = #tpu.dot_dimension_numbers<[1], [0], [0], [1], [0, 0, 1, 1], [], []>} : vector<3x16xbf16>, vector<16x16xbf16>, vector<3x16xf32> -> vector<3x16xf32>
    %1186 = arith.addf %1180, %1185 : vector<3x16xf32>
    %1187 = vector.extract_strided_slice %881 {offsets = [1, 0], sizes = [3, 16], strides = [1, 1]} : vector<7x16xf32> to vector<3x16xf32>
    %1188 = arith.truncf %1187 : vector<3x16xf32> to vector<3x16xbf16>
    %c21_980 = arith.constant 21 : index
    %c0_981 = arith.constant 0 : index
    %c0_982 = arith.constant 0 : index
    %1189 = vector.load %arg4[%c21_980, %c0_981, %c0_982] : memref<25x16x16xbf16, #tpu.memory_space<vmem>>, vector<1x16x16xbf16>
    %1190 = vector.shape_cast %1189 : vector<1x16x16xbf16> to vector<16x16xbf16>
    %cst_983 = arith.constant dense<0.000000e+00> : vector<3x16xf32>
    %1191 = tpu.matmul %1188, %1190, %cst_983 {dimension_numbers = #tpu.dot_dimension_numbers<[1], [0], [0], [1], [0, 0, 1, 1], [], []>} : vector<3x16xbf16>, vector<16x16xbf16>, vector<3x16xf32> -> vector<3x16xf32>
    %1192 = arith.addf %1186, %1191 : vector<3x16xf32>
    %1193 = vector.extract_strided_slice %881 {offsets = [2, 0], sizes = [3, 16], strides = [1, 1]} : vector<7x16xf32> to vector<3x16xf32>
    %1194 = arith.truncf %1193 : vector<3x16xf32> to vector<3x16xbf16>
    %c22_984 = arith.constant 22 : index
    %c0_985 = arith.constant 0 : index
    %c0_986 = arith.constant 0 : index
    %1195 = vector.load %arg4[%c22_984, %c0_985, %c0_986] : memref<25x16x16xbf16, #tpu.memory_space<vmem>>, vector<1x16x16xbf16>
    %1196 = vector.shape_cast %1195 : vector<1x16x16xbf16> to vector<16x16xbf16>
    %cst_987 = arith.constant dense<0.000000e+00> : vector<3x16xf32>
    %1197 = tpu.matmul %1194, %1196, %cst_987 {dimension_numbers = #tpu.dot_dimension_numbers<[1], [0], [0], [1], [0, 0, 1, 1], [], []>} : vector<3x16xbf16>, vector<16x16xbf16>, vector<3x16xf32> -> vector<3x16xf32>
    %1198 = arith.addf %1192, %1197 : vector<3x16xf32>
    %1199 = vector.extract_strided_slice %881 {offsets = [3, 0], sizes = [3, 16], strides = [1, 1]} : vector<7x16xf32> to vector<3x16xf32>
    %1200 = arith.truncf %1199 : vector<3x16xf32> to vector<3x16xbf16>
    %c23_988 = arith.constant 23 : index
    %c0_989 = arith.constant 0 : index
    %c0_990 = arith.constant 0 : index
    %1201 = vector.load %arg4[%c23_988, %c0_989, %c0_990] : memref<25x16x16xbf16, #tpu.memory_space<vmem>>, vector<1x16x16xbf16>
    %1202 = vector.shape_cast %1201 : vector<1x16x16xbf16> to vector<16x16xbf16>
    %cst_991 = arith.constant dense<0.000000e+00> : vector<3x16xf32>
    %1203 = tpu.matmul %1200, %1202, %cst_991 {dimension_numbers = #tpu.dot_dimension_numbers<[1], [0], [0], [1], [0, 0, 1, 1], [], []>} : vector<3x16xbf16>, vector<16x16xbf16>, vector<3x16xf32> -> vector<3x16xf32>
    %1204 = arith.addf %1198, %1203 : vector<3x16xf32>
    %1205 = vector.extract_strided_slice %881 {offsets = [4, 0], sizes = [3, 16], strides = [1, 1]} : vector<7x16xf32> to vector<3x16xf32>
    %1206 = arith.truncf %1205 : vector<3x16xf32> to vector<3x16xbf16>
    %c24_992 = arith.constant 24 : index
    %c0_993 = arith.constant 0 : index
    %c0_994 = arith.constant 0 : index
    %1207 = vector.load %arg4[%c24_992, %c0_993, %c0_994] : memref<25x16x16xbf16, #tpu.memory_space<vmem>>, vector<1x16x16xbf16>
    %1208 = vector.shape_cast %1207 : vector<1x16x16xbf16> to vector<16x16xbf16>
    %cst_995 = arith.constant dense<0.000000e+00> : vector<3x16xf32>
    %1209 = tpu.matmul %1206, %1208, %cst_995 {dimension_numbers = #tpu.dot_dimension_numbers<[1], [0], [0], [1], [0, 0, 1, 1], [], []>} : vector<3x16xbf16>, vector<16x16xbf16>, vector<3x16xf32> -> vector<3x16xf32>
    %1210 = arith.addf %1204, %1209 : vector<3x16xf32>
    %1211 = vector.broadcast %1 : vector<1x16xf32> to vector<3x16xf32>
    %1212 = arith.addf %1210, %1211 : vector<3x16xf32>
    %cst_996 = arith.constant 0.000000e+00 : f32
    %1213 = vector.broadcast %cst_996 : f32 to vector<3x16xf32>
    %1214 = arith.maximumf %1212, %1213 : vector<3x16xf32>
    %1215 = vector.extract_strided_slice %800 {offsets = [0, 0], sizes = [3, 16], strides = [1, 1]} : vector<7x16xf32> to vector<3x16xf32>
    %1216 = arith.truncf %1215 : vector<3x16xf32> to vector<3x16xbf16>
    %c0_997 = arith.constant 0 : index
    %c0_998 = arith.constant 0 : index
    %c0_999 = arith.constant 0 : index
    %1217 = vector.load %arg4[%c0_997, %c0_998, %c0_999] : memref<25x16x16xbf16, #tpu.memory_space<vmem>>, vector<1x16x16xbf16>
    %1218 = vector.shape_cast %1217 : vector<1x16x16xbf16> to vector<16x16xbf16>
    %cst_1000 = arith.constant dense<0.000000e+00> : vector<3x16xf32>
    %1219 = tpu.matmul %1216, %1218, %cst_1000 {dimension_numbers = #tpu.dot_dimension_numbers<[1], [0], [0], [1], [0, 0, 1, 1], [], []>} : vector<3x16xbf16>, vector<16x16xbf16>, vector<3x16xf32> -> vector<3x16xf32>
    %1220 = vector.extract_strided_slice %800 {offsets = [1, 0], sizes = [3, 16], strides = [1, 1]} : vector<7x16xf32> to vector<3x16xf32>
    %1221 = arith.truncf %1220 : vector<3x16xf32> to vector<3x16xbf16>
    %c1_1001 = arith.constant 1 : index
    %c0_1002 = arith.constant 0 : index
    %c0_1003 = arith.constant 0 : index
    %1222 = vector.load %arg4[%c1_1001, %c0_1002, %c0_1003] : memref<25x16x16xbf16, #tpu.memory_space<vmem>>, vector<1x16x16xbf16>
    %1223 = vector.shape_cast %1222 : vector<1x16x16xbf16> to vector<16x16xbf16>
    %cst_1004 = arith.constant dense<0.000000e+00> : vector<3x16xf32>
    %1224 = tpu.matmul %1221, %1223, %cst_1004 {dimension_numbers = #tpu.dot_dimension_numbers<[1], [0], [0], [1], [0, 0, 1, 1], [], []>} : vector<3x16xbf16>, vector<16x16xbf16>, vector<3x16xf32> -> vector<3x16xf32>
    %1225 = arith.addf %1219, %1224 : vector<3x16xf32>
    %1226 = vector.extract_strided_slice %800 {offsets = [2, 0], sizes = [3, 16], strides = [1, 1]} : vector<7x16xf32> to vector<3x16xf32>
    %1227 = arith.truncf %1226 : vector<3x16xf32> to vector<3x16xbf16>
    %c2_1005 = arith.constant 2 : index
    %c0_1006 = arith.constant 0 : index
    %c0_1007 = arith.constant 0 : index
    %1228 = vector.load %arg4[%c2_1005, %c0_1006, %c0_1007] : memref<25x16x16xbf16, #tpu.memory_space<vmem>>, vector<1x16x16xbf16>
    %1229 = vector.shape_cast %1228 : vector<1x16x16xbf16> to vector<16x16xbf16>
    %cst_1008 = arith.constant dense<0.000000e+00> : vector<3x16xf32>
    %1230 = tpu.matmul %1227, %1229, %cst_1008 {dimension_numbers = #tpu.dot_dimension_numbers<[1], [0], [0], [1], [0, 0, 1, 1], [], []>} : vector<3x16xbf16>, vector<16x16xbf16>, vector<3x16xf32> -> vector<3x16xf32>
    %1231 = arith.addf %1225, %1230 : vector<3x16xf32>
    %1232 = vector.extract_strided_slice %800 {offsets = [3, 0], sizes = [3, 16], strides = [1, 1]} : vector<7x16xf32> to vector<3x16xf32>
    %1233 = arith.truncf %1232 : vector<3x16xf32> to vector<3x16xbf16>
    %c3_1009 = arith.constant 3 : index
    %c0_1010 = arith.constant 0 : index
    %c0_1011 = arith.constant 0 : index
    %1234 = vector.load %arg4[%c3_1009, %c0_1010, %c0_1011] : memref<25x16x16xbf16, #tpu.memory_space<vmem>>, vector<1x16x16xbf16>
    %1235 = vector.shape_cast %1234 : vector<1x16x16xbf16> to vector<16x16xbf16>
    %cst_1012 = arith.constant dense<0.000000e+00> : vector<3x16xf32>
    %1236 = tpu.matmul %1233, %1235, %cst_1012 {dimension_numbers = #tpu.dot_dimension_numbers<[1], [0], [0], [1], [0, 0, 1, 1], [], []>} : vector<3x16xbf16>, vector<16x16xbf16>, vector<3x16xf32> -> vector<3x16xf32>
    %1237 = arith.addf %1231, %1236 : vector<3x16xf32>
    %1238 = vector.extract_strided_slice %800 {offsets = [4, 0], sizes = [3, 16], strides = [1, 1]} : vector<7x16xf32> to vector<3x16xf32>
    %1239 = arith.truncf %1238 : vector<3x16xf32> to vector<3x16xbf16>
    %c4_1013 = arith.constant 4 : index
    %c0_1014 = arith.constant 0 : index
    %c0_1015 = arith.constant 0 : index
    %1240 = vector.load %arg4[%c4_1013, %c0_1014, %c0_1015] : memref<25x16x16xbf16, #tpu.memory_space<vmem>>, vector<1x16x16xbf16>
    %1241 = vector.shape_cast %1240 : vector<1x16x16xbf16> to vector<16x16xbf16>
    %cst_1016 = arith.constant dense<0.000000e+00> : vector<3x16xf32>
    %1242 = tpu.matmul %1239, %1241, %cst_1016 {dimension_numbers = #tpu.dot_dimension_numbers<[1], [0], [0], [1], [0, 0, 1, 1], [], []>} : vector<3x16xbf16>, vector<16x16xbf16>, vector<3x16xf32> -> vector<3x16xf32>
    %1243 = arith.addf %1237, %1242 : vector<3x16xf32>
    %1244 = vector.extract_strided_slice %827 {offsets = [0, 0], sizes = [3, 16], strides = [1, 1]} : vector<7x16xf32> to vector<3x16xf32>
    %1245 = arith.truncf %1244 : vector<3x16xf32> to vector<3x16xbf16>
    %c5_1017 = arith.constant 5 : index
    %c0_1018 = arith.constant 0 : index
    %c0_1019 = arith.constant 0 : index
    %1246 = vector.load %arg4[%c5_1017, %c0_1018, %c0_1019] : memref<25x16x16xbf16, #tpu.memory_space<vmem>>, vector<1x16x16xbf16>
    %1247 = vector.shape_cast %1246 : vector<1x16x16xbf16> to vector<16x16xbf16>
    %cst_1020 = arith.constant dense<0.000000e+00> : vector<3x16xf32>
    %1248 = tpu.matmul %1245, %1247, %cst_1020 {dimension_numbers = #tpu.dot_dimension_numbers<[1], [0], [0], [1], [0, 0, 1, 1], [], []>} : vector<3x16xbf16>, vector<16x16xbf16>, vector<3x16xf32> -> vector<3x16xf32>
    %1249 = arith.addf %1243, %1248 : vector<3x16xf32>
    %1250 = vector.extract_strided_slice %827 {offsets = [1, 0], sizes = [3, 16], strides = [1, 1]} : vector<7x16xf32> to vector<3x16xf32>
    %1251 = arith.truncf %1250 : vector<3x16xf32> to vector<3x16xbf16>
    %c6_1021 = arith.constant 6 : index
    %c0_1022 = arith.constant 0 : index
    %c0_1023 = arith.constant 0 : index
    %1252 = vector.load %arg4[%c6_1021, %c0_1022, %c0_1023] : memref<25x16x16xbf16, #tpu.memory_space<vmem>>, vector<1x16x16xbf16>
    %1253 = vector.shape_cast %1252 : vector<1x16x16xbf16> to vector<16x16xbf16>
    %cst_1024 = arith.constant dense<0.000000e+00> : vector<3x16xf32>
    %1254 = tpu.matmul %1251, %1253, %cst_1024 {dimension_numbers = #tpu.dot_dimension_numbers<[1], [0], [0], [1], [0, 0, 1, 1], [], []>} : vector<3x16xbf16>, vector<16x16xbf16>, vector<3x16xf32> -> vector<3x16xf32>
    %1255 = arith.addf %1249, %1254 : vector<3x16xf32>
    %1256 = vector.extract_strided_slice %827 {offsets = [2, 0], sizes = [3, 16], strides = [1, 1]} : vector<7x16xf32> to vector<3x16xf32>
    %1257 = arith.truncf %1256 : vector<3x16xf32> to vector<3x16xbf16>
    %c7_1025 = arith.constant 7 : index
    %c0_1026 = arith.constant 0 : index
    %c0_1027 = arith.constant 0 : index
    %1258 = vector.load %arg4[%c7_1025, %c0_1026, %c0_1027] : memref<25x16x16xbf16, #tpu.memory_space<vmem>>, vector<1x16x16xbf16>
    %1259 = vector.shape_cast %1258 : vector<1x16x16xbf16> to vector<16x16xbf16>
    %cst_1028 = arith.constant dense<0.000000e+00> : vector<3x16xf32>
    %1260 = tpu.matmul %1257, %1259, %cst_1028 {dimension_numbers = #tpu.dot_dimension_numbers<[1], [0], [0], [1], [0, 0, 1, 1], [], []>} : vector<3x16xbf16>, vector<16x16xbf16>, vector<3x16xf32> -> vector<3x16xf32>
    %1261 = arith.addf %1255, %1260 : vector<3x16xf32>
    %1262 = vector.extract_strided_slice %827 {offsets = [3, 0], sizes = [3, 16], strides = [1, 1]} : vector<7x16xf32> to vector<3x16xf32>
    %1263 = arith.truncf %1262 : vector<3x16xf32> to vector<3x16xbf16>
    %c8_1029 = arith.constant 8 : index
    %c0_1030 = arith.constant 0 : index
    %c0_1031 = arith.constant 0 : index
    %1264 = vector.load %arg4[%c8_1029, %c0_1030, %c0_1031] : memref<25x16x16xbf16, #tpu.memory_space<vmem>>, vector<1x16x16xbf16>
    %1265 = vector.shape_cast %1264 : vector<1x16x16xbf16> to vector<16x16xbf16>
    %cst_1032 = arith.constant dense<0.000000e+00> : vector<3x16xf32>
    %1266 = tpu.matmul %1263, %1265, %cst_1032 {dimension_numbers = #tpu.dot_dimension_numbers<[1], [0], [0], [1], [0, 0, 1, 1], [], []>} : vector<3x16xbf16>, vector<16x16xbf16>, vector<3x16xf32> -> vector<3x16xf32>
    %1267 = arith.addf %1261, %1266 : vector<3x16xf32>
    %1268 = vector.extract_strided_slice %827 {offsets = [4, 0], sizes = [3, 16], strides = [1, 1]} : vector<7x16xf32> to vector<3x16xf32>
    %1269 = arith.truncf %1268 : vector<3x16xf32> to vector<3x16xbf16>
    %c9_1033 = arith.constant 9 : index
    %c0_1034 = arith.constant 0 : index
    %c0_1035 = arith.constant 0 : index
    %1270 = vector.load %arg4[%c9_1033, %c0_1034, %c0_1035] : memref<25x16x16xbf16, #tpu.memory_space<vmem>>, vector<1x16x16xbf16>
    %1271 = vector.shape_cast %1270 : vector<1x16x16xbf16> to vector<16x16xbf16>
    %cst_1036 = arith.constant dense<0.000000e+00> : vector<3x16xf32>
    %1272 = tpu.matmul %1269, %1271, %cst_1036 {dimension_numbers = #tpu.dot_dimension_numbers<[1], [0], [0], [1], [0, 0, 1, 1], [], []>} : vector<3x16xbf16>, vector<16x16xbf16>, vector<3x16xf32> -> vector<3x16xf32>
    %1273 = arith.addf %1267, %1272 : vector<3x16xf32>
    %1274 = vector.extract_strided_slice %854 {offsets = [0, 0], sizes = [3, 16], strides = [1, 1]} : vector<7x16xf32> to vector<3x16xf32>
    %1275 = arith.truncf %1274 : vector<3x16xf32> to vector<3x16xbf16>
    %c10_1037 = arith.constant 10 : index
    %c0_1038 = arith.constant 0 : index
    %c0_1039 = arith.constant 0 : index
    %1276 = vector.load %arg4[%c10_1037, %c0_1038, %c0_1039] : memref<25x16x16xbf16, #tpu.memory_space<vmem>>, vector<1x16x16xbf16>
    %1277 = vector.shape_cast %1276 : vector<1x16x16xbf16> to vector<16x16xbf16>
    %cst_1040 = arith.constant dense<0.000000e+00> : vector<3x16xf32>
    %1278 = tpu.matmul %1275, %1277, %cst_1040 {dimension_numbers = #tpu.dot_dimension_numbers<[1], [0], [0], [1], [0, 0, 1, 1], [], []>} : vector<3x16xbf16>, vector<16x16xbf16>, vector<3x16xf32> -> vector<3x16xf32>
    %1279 = arith.addf %1273, %1278 : vector<3x16xf32>
    %1280 = vector.extract_strided_slice %854 {offsets = [1, 0], sizes = [3, 16], strides = [1, 1]} : vector<7x16xf32> to vector<3x16xf32>
    %1281 = arith.truncf %1280 : vector<3x16xf32> to vector<3x16xbf16>
    %c11_1041 = arith.constant 11 : index
    %c0_1042 = arith.constant 0 : index
    %c0_1043 = arith.constant 0 : index
    %1282 = vector.load %arg4[%c11_1041, %c0_1042, %c0_1043] : memref<25x16x16xbf16, #tpu.memory_space<vmem>>, vector<1x16x16xbf16>
    %1283 = vector.shape_cast %1282 : vector<1x16x16xbf16> to vector<16x16xbf16>
    %cst_1044 = arith.constant dense<0.000000e+00> : vector<3x16xf32>
    %1284 = tpu.matmul %1281, %1283, %cst_1044 {dimension_numbers = #tpu.dot_dimension_numbers<[1], [0], [0], [1], [0, 0, 1, 1], [], []>} : vector<3x16xbf16>, vector<16x16xbf16>, vector<3x16xf32> -> vector<3x16xf32>
    %1285 = arith.addf %1279, %1284 : vector<3x16xf32>
    %1286 = vector.extract_strided_slice %854 {offsets = [2, 0], sizes = [3, 16], strides = [1, 1]} : vector<7x16xf32> to vector<3x16xf32>
    %1287 = arith.truncf %1286 : vector<3x16xf32> to vector<3x16xbf16>
    %c12_1045 = arith.constant 12 : index
    %c0_1046 = arith.constant 0 : index
    %c0_1047 = arith.constant 0 : index
    %1288 = vector.load %arg4[%c12_1045, %c0_1046, %c0_1047] : memref<25x16x16xbf16, #tpu.memory_space<vmem>>, vector<1x16x16xbf16>
    %1289 = vector.shape_cast %1288 : vector<1x16x16xbf16> to vector<16x16xbf16>
    %cst_1048 = arith.constant dense<0.000000e+00> : vector<3x16xf32>
    %1290 = tpu.matmul %1287, %1289, %cst_1048 {dimension_numbers = #tpu.dot_dimension_numbers<[1], [0], [0], [1], [0, 0, 1, 1], [], []>} : vector<3x16xbf16>, vector<16x16xbf16>, vector<3x16xf32> -> vector<3x16xf32>
    %1291 = arith.addf %1285, %1290 : vector<3x16xf32>
    %1292 = vector.extract_strided_slice %854 {offsets = [3, 0], sizes = [3, 16], strides = [1, 1]} : vector<7x16xf32> to vector<3x16xf32>
    %1293 = arith.truncf %1292 : vector<3x16xf32> to vector<3x16xbf16>
    %c13_1049 = arith.constant 13 : index
    %c0_1050 = arith.constant 0 : index
    %c0_1051 = arith.constant 0 : index
    %1294 = vector.load %arg4[%c13_1049, %c0_1050, %c0_1051] : memref<25x16x16xbf16, #tpu.memory_space<vmem>>, vector<1x16x16xbf16>
    %1295 = vector.shape_cast %1294 : vector<1x16x16xbf16> to vector<16x16xbf16>
    %cst_1052 = arith.constant dense<0.000000e+00> : vector<3x16xf32>
    %1296 = tpu.matmul %1293, %1295, %cst_1052 {dimension_numbers = #tpu.dot_dimension_numbers<[1], [0], [0], [1], [0, 0, 1, 1], [], []>} : vector<3x16xbf16>, vector<16x16xbf16>, vector<3x16xf32> -> vector<3x16xf32>
    %1297 = arith.addf %1291, %1296 : vector<3x16xf32>
    %1298 = vector.extract_strided_slice %854 {offsets = [4, 0], sizes = [3, 16], strides = [1, 1]} : vector<7x16xf32> to vector<3x16xf32>
    %1299 = arith.truncf %1298 : vector<3x16xf32> to vector<3x16xbf16>
    %c14_1053 = arith.constant 14 : index
    %c0_1054 = arith.constant 0 : index
    %c0_1055 = arith.constant 0 : index
    %1300 = vector.load %arg4[%c14_1053, %c0_1054, %c0_1055] : memref<25x16x16xbf16, #tpu.memory_space<vmem>>, vector<1x16x16xbf16>
    %1301 = vector.shape_cast %1300 : vector<1x16x16xbf16> to vector<16x16xbf16>
    %cst_1056 = arith.constant dense<0.000000e+00> : vector<3x16xf32>
    %1302 = tpu.matmul %1299, %1301, %cst_1056 {dimension_numbers = #tpu.dot_dimension_numbers<[1], [0], [0], [1], [0, 0, 1, 1], [], []>} : vector<3x16xbf16>, vector<16x16xbf16>, vector<3x16xf32> -> vector<3x16xf32>
    %1303 = arith.addf %1297, %1302 : vector<3x16xf32>
    %1304 = vector.extract_strided_slice %881 {offsets = [0, 0], sizes = [3, 16], strides = [1, 1]} : vector<7x16xf32> to vector<3x16xf32>
    %1305 = arith.truncf %1304 : vector<3x16xf32> to vector<3x16xbf16>
    %c15_1057 = arith.constant 15 : index
    %c0_1058 = arith.constant 0 : index
    %c0_1059 = arith.constant 0 : index
    %1306 = vector.load %arg4[%c15_1057, %c0_1058, %c0_1059] : memref<25x16x16xbf16, #tpu.memory_space<vmem>>, vector<1x16x16xbf16>
    %1307 = vector.shape_cast %1306 : vector<1x16x16xbf16> to vector<16x16xbf16>
    %cst_1060 = arith.constant dense<0.000000e+00> : vector<3x16xf32>
    %1308 = tpu.matmul %1305, %1307, %cst_1060 {dimension_numbers = #tpu.dot_dimension_numbers<[1], [0], [0], [1], [0, 0, 1, 1], [], []>} : vector<3x16xbf16>, vector<16x16xbf16>, vector<3x16xf32> -> vector<3x16xf32>
    %1309 = arith.addf %1303, %1308 : vector<3x16xf32>
    %1310 = vector.extract_strided_slice %881 {offsets = [1, 0], sizes = [3, 16], strides = [1, 1]} : vector<7x16xf32> to vector<3x16xf32>
    %1311 = arith.truncf %1310 : vector<3x16xf32> to vector<3x16xbf16>
    %c16_1061 = arith.constant 16 : index
    %c0_1062 = arith.constant 0 : index
    %c0_1063 = arith.constant 0 : index
    %1312 = vector.load %arg4[%c16_1061, %c0_1062, %c0_1063] : memref<25x16x16xbf16, #tpu.memory_space<vmem>>, vector<1x16x16xbf16>
    %1313 = vector.shape_cast %1312 : vector<1x16x16xbf16> to vector<16x16xbf16>
    %cst_1064 = arith.constant dense<0.000000e+00> : vector<3x16xf32>
    %1314 = tpu.matmul %1311, %1313, %cst_1064 {dimension_numbers = #tpu.dot_dimension_numbers<[1], [0], [0], [1], [0, 0, 1, 1], [], []>} : vector<3x16xbf16>, vector<16x16xbf16>, vector<3x16xf32> -> vector<3x16xf32>
    %1315 = arith.addf %1309, %1314 : vector<3x16xf32>
    %1316 = vector.extract_strided_slice %881 {offsets = [2, 0], sizes = [3, 16], strides = [1, 1]} : vector<7x16xf32> to vector<3x16xf32>
    %1317 = arith.truncf %1316 : vector<3x16xf32> to vector<3x16xbf16>
    %c17_1065 = arith.constant 17 : index
    %c0_1066 = arith.constant 0 : index
    %c0_1067 = arith.constant 0 : index
    %1318 = vector.load %arg4[%c17_1065, %c0_1066, %c0_1067] : memref<25x16x16xbf16, #tpu.memory_space<vmem>>, vector<1x16x16xbf16>
    %1319 = vector.shape_cast %1318 : vector<1x16x16xbf16> to vector<16x16xbf16>
    %cst_1068 = arith.constant dense<0.000000e+00> : vector<3x16xf32>
    %1320 = tpu.matmul %1317, %1319, %cst_1068 {dimension_numbers = #tpu.dot_dimension_numbers<[1], [0], [0], [1], [0, 0, 1, 1], [], []>} : vector<3x16xbf16>, vector<16x16xbf16>, vector<3x16xf32> -> vector<3x16xf32>
    %1321 = arith.addf %1315, %1320 : vector<3x16xf32>
    %1322 = vector.extract_strided_slice %881 {offsets = [3, 0], sizes = [3, 16], strides = [1, 1]} : vector<7x16xf32> to vector<3x16xf32>
    %1323 = arith.truncf %1322 : vector<3x16xf32> to vector<3x16xbf16>
    %c18_1069 = arith.constant 18 : index
    %c0_1070 = arith.constant 0 : index
    %c0_1071 = arith.constant 0 : index
    %1324 = vector.load %arg4[%c18_1069, %c0_1070, %c0_1071] : memref<25x16x16xbf16, #tpu.memory_space<vmem>>, vector<1x16x16xbf16>
    %1325 = vector.shape_cast %1324 : vector<1x16x16xbf16> to vector<16x16xbf16>
    %cst_1072 = arith.constant dense<0.000000e+00> : vector<3x16xf32>
    %1326 = tpu.matmul %1323, %1325, %cst_1072 {dimension_numbers = #tpu.dot_dimension_numbers<[1], [0], [0], [1], [0, 0, 1, 1], [], []>} : vector<3x16xbf16>, vector<16x16xbf16>, vector<3x16xf32> -> vector<3x16xf32>
    %1327 = arith.addf %1321, %1326 : vector<3x16xf32>
    %1328 = vector.extract_strided_slice %881 {offsets = [4, 0], sizes = [3, 16], strides = [1, 1]} : vector<7x16xf32> to vector<3x16xf32>
    %1329 = arith.truncf %1328 : vector<3x16xf32> to vector<3x16xbf16>
    %c19_1073 = arith.constant 19 : index
    %c0_1074 = arith.constant 0 : index
    %c0_1075 = arith.constant 0 : index
    %1330 = vector.load %arg4[%c19_1073, %c0_1074, %c0_1075] : memref<25x16x16xbf16, #tpu.memory_space<vmem>>, vector<1x16x16xbf16>
    %1331 = vector.shape_cast %1330 : vector<1x16x16xbf16> to vector<16x16xbf16>
    %cst_1076 = arith.constant dense<0.000000e+00> : vector<3x16xf32>
    %1332 = tpu.matmul %1329, %1331, %cst_1076 {dimension_numbers = #tpu.dot_dimension_numbers<[1], [0], [0], [1], [0, 0, 1, 1], [], []>} : vector<3x16xbf16>, vector<16x16xbf16>, vector<3x16xf32> -> vector<3x16xf32>
    %1333 = arith.addf %1327, %1332 : vector<3x16xf32>
    %1334 = vector.extract_strided_slice %908 {offsets = [0, 0], sizes = [3, 16], strides = [1, 1]} : vector<7x16xf32> to vector<3x16xf32>
    %1335 = arith.truncf %1334 : vector<3x16xf32> to vector<3x16xbf16>
    %c20_1077 = arith.constant 20 : index
    %c0_1078 = arith.constant 0 : index
    %c0_1079 = arith.constant 0 : index
    %1336 = vector.load %arg4[%c20_1077, %c0_1078, %c0_1079] : memref<25x16x16xbf16, #tpu.memory_space<vmem>>, vector<1x16x16xbf16>
    %1337 = vector.shape_cast %1336 : vector<1x16x16xbf16> to vector<16x16xbf16>
    %cst_1080 = arith.constant dense<0.000000e+00> : vector<3x16xf32>
    %1338 = tpu.matmul %1335, %1337, %cst_1080 {dimension_numbers = #tpu.dot_dimension_numbers<[1], [0], [0], [1], [0, 0, 1, 1], [], []>} : vector<3x16xbf16>, vector<16x16xbf16>, vector<3x16xf32> -> vector<3x16xf32>
    %1339 = arith.addf %1333, %1338 : vector<3x16xf32>
    %1340 = vector.extract_strided_slice %908 {offsets = [1, 0], sizes = [3, 16], strides = [1, 1]} : vector<7x16xf32> to vector<3x16xf32>
    %1341 = arith.truncf %1340 : vector<3x16xf32> to vector<3x16xbf16>
    %c21_1081 = arith.constant 21 : index
    %c0_1082 = arith.constant 0 : index
    %c0_1083 = arith.constant 0 : index
    %1342 = vector.load %arg4[%c21_1081, %c0_1082, %c0_1083] : memref<25x16x16xbf16, #tpu.memory_space<vmem>>, vector<1x16x16xbf16>
    %1343 = vector.shape_cast %1342 : vector<1x16x16xbf16> to vector<16x16xbf16>
    %cst_1084 = arith.constant dense<0.000000e+00> : vector<3x16xf32>
    %1344 = tpu.matmul %1341, %1343, %cst_1084 {dimension_numbers = #tpu.dot_dimension_numbers<[1], [0], [0], [1], [0, 0, 1, 1], [], []>} : vector<3x16xbf16>, vector<16x16xbf16>, vector<3x16xf32> -> vector<3x16xf32>
    %1345 = arith.addf %1339, %1344 : vector<3x16xf32>
    %1346 = vector.extract_strided_slice %908 {offsets = [2, 0], sizes = [3, 16], strides = [1, 1]} : vector<7x16xf32> to vector<3x16xf32>
    %1347 = arith.truncf %1346 : vector<3x16xf32> to vector<3x16xbf16>
    %c22_1085 = arith.constant 22 : index
    %c0_1086 = arith.constant 0 : index
    %c0_1087 = arith.constant 0 : index
    %1348 = vector.load %arg4[%c22_1085, %c0_1086, %c0_1087] : memref<25x16x16xbf16, #tpu.memory_space<vmem>>, vector<1x16x16xbf16>
    %1349 = vector.shape_cast %1348 : vector<1x16x16xbf16> to vector<16x16xbf16>
    %cst_1088 = arith.constant dense<0.000000e+00> : vector<3x16xf32>
    %1350 = tpu.matmul %1347, %1349, %cst_1088 {dimension_numbers = #tpu.dot_dimension_numbers<[1], [0], [0], [1], [0, 0, 1, 1], [], []>} : vector<3x16xbf16>, vector<16x16xbf16>, vector<3x16xf32> -> vector<3x16xf32>
    %1351 = arith.addf %1345, %1350 : vector<3x16xf32>
    %1352 = vector.extract_strided_slice %908 {offsets = [3, 0], sizes = [3, 16], strides = [1, 1]} : vector<7x16xf32> to vector<3x16xf32>
    %1353 = arith.truncf %1352 : vector<3x16xf32> to vector<3x16xbf16>
    %c23_1089 = arith.constant 23 : index
    %c0_1090 = arith.constant 0 : index
    %c0_1091 = arith.constant 0 : index
    %1354 = vector.load %arg4[%c23_1089, %c0_1090, %c0_1091] : memref<25x16x16xbf16, #tpu.memory_space<vmem>>, vector<1x16x16xbf16>
    %1355 = vector.shape_cast %1354 : vector<1x16x16xbf16> to vector<16x16xbf16>
    %cst_1092 = arith.constant dense<0.000000e+00> : vector<3x16xf32>
    %1356 = tpu.matmul %1353, %1355, %cst_1092 {dimension_numbers = #tpu.dot_dimension_numbers<[1], [0], [0], [1], [0, 0, 1, 1], [], []>} : vector<3x16xbf16>, vector<16x16xbf16>, vector<3x16xf32> -> vector<3x16xf32>
    %1357 = arith.addf %1351, %1356 : vector<3x16xf32>
    %1358 = vector.extract_strided_slice %908 {offsets = [4, 0], sizes = [3, 16], strides = [1, 1]} : vector<7x16xf32> to vector<3x16xf32>
    %1359 = arith.truncf %1358 : vector<3x16xf32> to vector<3x16xbf16>
    %c24_1093 = arith.constant 24 : index
    %c0_1094 = arith.constant 0 : index
    %c0_1095 = arith.constant 0 : index
    %1360 = vector.load %arg4[%c24_1093, %c0_1094, %c0_1095] : memref<25x16x16xbf16, #tpu.memory_space<vmem>>, vector<1x16x16xbf16>
    %1361 = vector.shape_cast %1360 : vector<1x16x16xbf16> to vector<16x16xbf16>
    %cst_1096 = arith.constant dense<0.000000e+00> : vector<3x16xf32>
    %1362 = tpu.matmul %1359, %1361, %cst_1096 {dimension_numbers = #tpu.dot_dimension_numbers<[1], [0], [0], [1], [0, 0, 1, 1], [], []>} : vector<3x16xbf16>, vector<16x16xbf16>, vector<3x16xf32> -> vector<3x16xf32>
    %1363 = arith.addf %1357, %1362 : vector<3x16xf32>
    %1364 = vector.broadcast %1 : vector<1x16xf32> to vector<3x16xf32>
    %1365 = arith.addf %1363, %1364 : vector<3x16xf32>
    %cst_1097 = arith.constant 0.000000e+00 : f32
    %1366 = vector.broadcast %cst_1097 : f32 to vector<3x16xf32>
    %1367 = arith.maximumf %1365, %1366 : vector<3x16xf32>
    %1368 = vector.extract_strided_slice %1061 {offsets = [0, 0], sizes = [1, 16], strides = [1, 1]} : vector<3x16xf32> to vector<1x16xf32>
    %1369 = arith.truncf %1368 : vector<1x16xf32> to vector<1x16xbf16>
    %c0_1098 = arith.constant 0 : index
    %c0_1099 = arith.constant 0 : index
    %c0_1100 = arith.constant 0 : index
    %1370 = vector.load %arg6[%c0_1098, %c0_1099, %c0_1100] : memref<9x16x16xbf16, #tpu.memory_space<vmem>>, vector<1x16x16xbf16>
    %1371 = vector.shape_cast %1370 : vector<1x16x16xbf16> to vector<16x16xbf16>
    %cst_1101 = arith.constant dense<0.000000e+00> : vector<1x16xf32>
    %1372 = tpu.matmul %1369, %1371, %cst_1101 {dimension_numbers = #tpu.dot_dimension_numbers<[1], [0], [0], [1], [0, 0, 1, 1], [], []>} : vector<1x16xbf16>, vector<16x16xbf16>, vector<1x16xf32> -> vector<1x16xf32>
    %1373 = vector.extract_strided_slice %1061 {offsets = [1, 0], sizes = [1, 16], strides = [1, 1]} : vector<3x16xf32> to vector<1x16xf32>
    %1374 = arith.truncf %1373 : vector<1x16xf32> to vector<1x16xbf16>
    %c1_1102 = arith.constant 1 : index
    %c0_1103 = arith.constant 0 : index
    %c0_1104 = arith.constant 0 : index
    %1375 = vector.load %arg6[%c1_1102, %c0_1103, %c0_1104] : memref<9x16x16xbf16, #tpu.memory_space<vmem>>, vector<1x16x16xbf16>
    %1376 = vector.shape_cast %1375 : vector<1x16x16xbf16> to vector<16x16xbf16>
    %cst_1105 = arith.constant dense<0.000000e+00> : vector<1x16xf32>
    %1377 = tpu.matmul %1374, %1376, %cst_1105 {dimension_numbers = #tpu.dot_dimension_numbers<[1], [0], [0], [1], [0, 0, 1, 1], [], []>} : vector<1x16xbf16>, vector<16x16xbf16>, vector<1x16xf32> -> vector<1x16xf32>
    %1378 = arith.addf %1372, %1377 : vector<1x16xf32>
    %1379 = vector.extract_strided_slice %1061 {offsets = [2, 0], sizes = [1, 16], strides = [1, 1]} : vector<3x16xf32> to vector<1x16xf32>
    %1380 = arith.truncf %1379 : vector<1x16xf32> to vector<1x16xbf16>
    %c2_1106 = arith.constant 2 : index
    %c0_1107 = arith.constant 0 : index
    %c0_1108 = arith.constant 0 : index
    %1381 = vector.load %arg6[%c2_1106, %c0_1107, %c0_1108] : memref<9x16x16xbf16, #tpu.memory_space<vmem>>, vector<1x16x16xbf16>
    %1382 = vector.shape_cast %1381 : vector<1x16x16xbf16> to vector<16x16xbf16>
    %cst_1109 = arith.constant dense<0.000000e+00> : vector<1x16xf32>
    %1383 = tpu.matmul %1380, %1382, %cst_1109 {dimension_numbers = #tpu.dot_dimension_numbers<[1], [0], [0], [1], [0, 0, 1, 1], [], []>} : vector<1x16xbf16>, vector<16x16xbf16>, vector<1x16xf32> -> vector<1x16xf32>
    %1384 = arith.addf %1378, %1383 : vector<1x16xf32>
    %1385 = vector.extract_strided_slice %1214 {offsets = [0, 0], sizes = [1, 16], strides = [1, 1]} : vector<3x16xf32> to vector<1x16xf32>
    %1386 = arith.truncf %1385 : vector<1x16xf32> to vector<1x16xbf16>
    %c3_1110 = arith.constant 3 : index
    %c0_1111 = arith.constant 0 : index
    %c0_1112 = arith.constant 0 : index
    %1387 = vector.load %arg6[%c3_1110, %c0_1111, %c0_1112] : memref<9x16x16xbf16, #tpu.memory_space<vmem>>, vector<1x16x16xbf16>
    %1388 = vector.shape_cast %1387 : vector<1x16x16xbf16> to vector<16x16xbf16>
    %cst_1113 = arith.constant dense<0.000000e+00> : vector<1x16xf32>
    %1389 = tpu.matmul %1386, %1388, %cst_1113 {dimension_numbers = #tpu.dot_dimension_numbers<[1], [0], [0], [1], [0, 0, 1, 1], [], []>} : vector<1x16xbf16>, vector<16x16xbf16>, vector<1x16xf32> -> vector<1x16xf32>
    %1390 = arith.addf %1384, %1389 : vector<1x16xf32>
    %1391 = vector.extract_strided_slice %1214 {offsets = [1, 0], sizes = [1, 16], strides = [1, 1]} : vector<3x16xf32> to vector<1x16xf32>
    %1392 = arith.truncf %1391 : vector<1x16xf32> to vector<1x16xbf16>
    %c4_1114 = arith.constant 4 : index
    %c0_1115 = arith.constant 0 : index
    %c0_1116 = arith.constant 0 : index
    %1393 = vector.load %arg6[%c4_1114, %c0_1115, %c0_1116] : memref<9x16x16xbf16, #tpu.memory_space<vmem>>, vector<1x16x16xbf16>
    %1394 = vector.shape_cast %1393 : vector<1x16x16xbf16> to vector<16x16xbf16>
    %cst_1117 = arith.constant dense<0.000000e+00> : vector<1x16xf32>
    %1395 = tpu.matmul %1392, %1394, %cst_1117 {dimension_numbers = #tpu.dot_dimension_numbers<[1], [0], [0], [1], [0, 0, 1, 1], [], []>} : vector<1x16xbf16>, vector<16x16xbf16>, vector<1x16xf32> -> vector<1x16xf32>
    %1396 = arith.addf %1390, %1395 : vector<1x16xf32>
    %1397 = vector.extract_strided_slice %1214 {offsets = [2, 0], sizes = [1, 16], strides = [1, 1]} : vector<3x16xf32> to vector<1x16xf32>
    %1398 = arith.truncf %1397 : vector<1x16xf32> to vector<1x16xbf16>
    %c5_1118 = arith.constant 5 : index
    %c0_1119 = arith.constant 0 : index
    %c0_1120 = arith.constant 0 : index
    %1399 = vector.load %arg6[%c5_1118, %c0_1119, %c0_1120] : memref<9x16x16xbf16, #tpu.memory_space<vmem>>, vector<1x16x16xbf16>
    %1400 = vector.shape_cast %1399 : vector<1x16x16xbf16> to vector<16x16xbf16>
    %cst_1121 = arith.constant dense<0.000000e+00> : vector<1x16xf32>
    %1401 = tpu.matmul %1398, %1400, %cst_1121 {dimension_numbers = #tpu.dot_dimension_numbers<[1], [0], [0], [1], [0, 0, 1, 1], [], []>} : vector<1x16xbf16>, vector<16x16xbf16>, vector<1x16xf32> -> vector<1x16xf32>
    %1402 = arith.addf %1396, %1401 : vector<1x16xf32>
    %1403 = vector.extract_strided_slice %1367 {offsets = [0, 0], sizes = [1, 16], strides = [1, 1]} : vector<3x16xf32> to vector<1x16xf32>
    %1404 = arith.truncf %1403 : vector<1x16xf32> to vector<1x16xbf16>
    %c6_1122 = arith.constant 6 : index
    %c0_1123 = arith.constant 0 : index
    %c0_1124 = arith.constant 0 : index
    %1405 = vector.load %arg6[%c6_1122, %c0_1123, %c0_1124] : memref<9x16x16xbf16, #tpu.memory_space<vmem>>, vector<1x16x16xbf16>
    %1406 = vector.shape_cast %1405 : vector<1x16x16xbf16> to vector<16x16xbf16>
    %cst_1125 = arith.constant dense<0.000000e+00> : vector<1x16xf32>
    %1407 = tpu.matmul %1404, %1406, %cst_1125 {dimension_numbers = #tpu.dot_dimension_numbers<[1], [0], [0], [1], [0, 0, 1, 1], [], []>} : vector<1x16xbf16>, vector<16x16xbf16>, vector<1x16xf32> -> vector<1x16xf32>
    %1408 = arith.addf %1402, %1407 : vector<1x16xf32>
    %1409 = vector.extract_strided_slice %1367 {offsets = [1, 0], sizes = [1, 16], strides = [1, 1]} : vector<3x16xf32> to vector<1x16xf32>
    %1410 = arith.truncf %1409 : vector<1x16xf32> to vector<1x16xbf16>
    %c7_1126 = arith.constant 7 : index
    %c0_1127 = arith.constant 0 : index
    %c0_1128 = arith.constant 0 : index
    %1411 = vector.load %arg6[%c7_1126, %c0_1127, %c0_1128] : memref<9x16x16xbf16, #tpu.memory_space<vmem>>, vector<1x16x16xbf16>
    %1412 = vector.shape_cast %1411 : vector<1x16x16xbf16> to vector<16x16xbf16>
    %cst_1129 = arith.constant dense<0.000000e+00> : vector<1x16xf32>
    %1413 = tpu.matmul %1410, %1412, %cst_1129 {dimension_numbers = #tpu.dot_dimension_numbers<[1], [0], [0], [1], [0, 0, 1, 1], [], []>} : vector<1x16xbf16>, vector<16x16xbf16>, vector<1x16xf32> -> vector<1x16xf32>
    %1414 = arith.addf %1408, %1413 : vector<1x16xf32>
    %1415 = vector.extract_strided_slice %1367 {offsets = [2, 0], sizes = [1, 16], strides = [1, 1]} : vector<3x16xf32> to vector<1x16xf32>
    %1416 = arith.truncf %1415 : vector<1x16xf32> to vector<1x16xbf16>
    %c8_1130 = arith.constant 8 : index
    %c0_1131 = arith.constant 0 : index
    %c0_1132 = arith.constant 0 : index
    %1417 = vector.load %arg6[%c8_1130, %c0_1131, %c0_1132] : memref<9x16x16xbf16, #tpu.memory_space<vmem>>, vector<1x16x16xbf16>
    %1418 = vector.shape_cast %1417 : vector<1x16x16xbf16> to vector<16x16xbf16>
    %cst_1133 = arith.constant dense<0.000000e+00> : vector<1x16xf32>
    %1419 = tpu.matmul %1416, %1418, %cst_1133 {dimension_numbers = #tpu.dot_dimension_numbers<[1], [0], [0], [1], [0, 0, 1, 1], [], []>} : vector<1x16xbf16>, vector<16x16xbf16>, vector<1x16xf32> -> vector<1x16xf32>
    %1420 = arith.addf %1414, %1419 : vector<1x16xf32>
    %1421 = arith.addf %1420, %2 : vector<1x16xf32>
    %cst_1134 = arith.constant 0.000000e+00 : f32
    %1422 = vector.broadcast %cst_1134 : f32 to vector<1x16xf32>
    %1423 = arith.maximumf %1421, %1422 : vector<1x16xf32>
    %1424 = arith.truncf %1423 : vector<1x16xf32> to vector<1x16xbf16>
    %cst_1135 = arith.constant dense<0.000000e+00> : vector<1x32xf32>
    %1425 = tpu.matmul %1424, %3, %cst_1135 {dimension_numbers = #tpu.dot_dimension_numbers<[1], [0], [0], [1], [0, 0, 1, 1], [], []>} : vector<1x16xbf16>, vector<16x32xbf16>, vector<1x32xf32> -> vector<1x32xf32>
    %1426 = arith.addf %4, %1425 : vector<1x32xf32>
    %cst_1136 = arith.constant 0.000000e+00 : f32
    %1427 = vector.broadcast %cst_1136 : f32 to vector<1x32xf32>
    %1428 = arith.maximumf %1426, %1427 : vector<1x32xf32>
    %1429 = arith.truncf %1428 : vector<1x32xf32> to vector<1x32xbf16>
    %cst_1137 = arith.constant dense<0.000000e+00> : vector<1x6xf32>
    %1430 = tpu.matmul %1429, %5, %cst_1137 {dimension_numbers = #tpu.dot_dimension_numbers<[1], [0], [0], [1], [0, 0, 1, 1], [], []>} : vector<1x32xbf16>, vector<32x6xbf16>, vector<1x6xf32> -> vector<1x6xf32>
    %1431 = arith.addf %1430, %6 : vector<1x6xf32>
    %c1_1138 = arith.constant 1 : index
    %c0_1139 = arith.constant 0 : index
    %1432 = vector.load %arg12[%c1_1138, %c0_1139] : memref<2x6xf32, #tpu.memory_space<vmem>>, vector<1x6xf32>
    tpu.vector_store %arg12[%c1_1138, %c0_1139], %1431 {strides = array<i32>} : memref<2x6xf32, #tpu.memory_space<vmem>>, vector<1x6xf32>,
    return
  }
  func.func @transform_0(%arg0: i32) -> (i32, i32, i32, i32) {
    %c0_i32 = arith.constant 0 : i32
    %c0_i32_0 = arith.constant 0 : i32
    %c0_i32_1 = arith.constant 0 : i32
    %c0_i32_2 = arith.constant 0 : i32
    return %arg0, %c0_i32, %c0_i32_0, %c0_i32_1 : i32, i32, i32, i32
  }
  func.func @transform_1(%arg0: i32) -> (i32, i32, i32) {
    %c0_i32 = arith.constant 0 : i32
    %c0_i32_0 = arith.constant 0 : i32
    %c0_i32_1 = arith.constant 0 : i32
    %c0_i32_2 = arith.constant 0 : i32
    return %c0_i32, %c0_i32_0, %c0_i32_1 : i32, i32, i32
  }
  func.func @transform_2(%arg0: i32) -> (i32, i32) {
    %c0_i32 = arith.constant 0 : i32
    %c0_i32_0 = arith.constant 0 : i32
    %c0_i32_1 = arith.constant 0 : i32
    return %c0_i32, %c0_i32_0 : i32, i32
  }
  func.func @transform_3(%arg0: i32) -> (i32, i32, i32) {
    %c0_i32 = arith.constant 0 : i32
    %c0_i32_0 = arith.constant 0 : i32
    %c0_i32_1 = arith.constant 0 : i32
    %c0_i32_2 = arith.constant 0 : i32
    return %c0_i32, %c0_i32_0, %c0_i32_1 : i32, i32, i32
  }
  func.func @transform_4(%arg0: i32) -> (i32, i32) {
    %c0_i32 = arith.constant 0 : i32
    %c0_i32_0 = arith.constant 0 : i32
    %c0_i32_1 = arith.constant 0 : i32
    return %c0_i32, %c0_i32_0 : i32, i32
  }
  func.func @transform_5(%arg0: i32) -> (i32, i32, i32) {
    %c0_i32 = arith.constant 0 : i32
    %c0_i32_0 = arith.constant 0 : i32
    %c0_i32_1 = arith.constant 0 : i32
    %c0_i32_2 = arith.constant 0 : i32
    return %c0_i32, %c0_i32_0, %c0_i32_1 : i32, i32, i32
  }
  func.func @transform_6(%arg0: i32) -> (i32, i32) {
    %c0_i32 = arith.constant 0 : i32
    %c0_i32_0 = arith.constant 0 : i32
    %c0_i32_1 = arith.constant 0 : i32
    return %c0_i32, %c0_i32_0 : i32, i32
  }
  func.func @transform_7(%arg0: i32) -> (i32, i32) {
    %c0_i32 = arith.constant 0 : i32
    %c0_i32_0 = arith.constant 0 : i32
    %c0_i32_1 = arith.constant 0 : i32
    return %c0_i32, %c0_i32_0 : i32, i32
  }
  func.func @transform_8(%arg0: i32) -> (i32, i32) {
    %c0_i32 = arith.constant 0 : i32
    %c0_i32_0 = arith.constant 0 : i32
    %c0_i32_1 = arith.constant 0 : i32
    return %c0_i32, %c0_i32_0 : i32, i32
  }
  func.func @transform_9(%arg0: i32) -> (i32, i32) {
    %c0_i32 = arith.constant 0 : i32
    %c0_i32_0 = arith.constant 0 : i32
    %c0_i32_1 = arith.constant 0 : i32
    return %c0_i32, %c0_i32_0 : i32, i32
  }
  func.func @transform_10(%arg0: i32) -> (i32, i32) {
    %c0_i32 = arith.constant 0 : i32
    %c0_i32_0 = arith.constant 0 : i32
    %c0_i32_1 = arith.constant 0 : i32
    return %c0_i32, %c0_i32_0 : i32, i32
  }
  func.func @transform_11(%arg0: i32) -> (i32, i32) {
    %c0_i32 = arith.constant 0 : i32
    %c0_i32_0 = arith.constant 0 : i32
    return %arg0, %c0_i32 : i32, i32
  }
}

</mosaic_0001>

<bundles_post_ra>
// kernel: dqn_forward.1
= control target key start
LH: loop header
LB: loop body
LE: loop exit
PB: predicated region body
PF: predicated region fallthrough
CT: control target
= control target key end

     0   :  { %vm73_vm0 = vcmask 130048   ;;  %s6784_s0 = inlined_call_operand.vmem [shape: bf16[2,8,8,16], index: 0, kind: input, shape index: {}]   ;;  %s6785_s1 = inlined_call_operand.vmem [shape: bf16[4,16,16], index: 1, kind: input, shape index: {}]   ;;  %s6786_s2 = inlined_call_operand.vmem [shape: f32[1,16], index: 2, kind: input, shape index: {}]   ;;  %s6787_s3 = inlined_call_operand.vmem [shape: bf16[25,16,16], index: 3, kind: input, shape index: {}]   ;;  %s6788_s4 = inlined_call_operand.vmem [shape: f32[1,16], index: 4, kind: input, shape index: {}]   ;;  %s6789_s5 = inlined_call_operand.vmem [shape: bf16[9,16,16], index: 5, kind: input, shape index: {}]   ;;  %s6790_s6 = inlined_call_operand.vmem [shape: f32[1,16], index: 6, kind: input, shape index: {}]   ;;  %s6791_s7 = inlined_call_operand.vmem [shape: bf16[16,32], index: 7, kind: input, shape index: {}]   ;;  %s6792_s8 = inlined_call_operand.vmem [shape: f32[1,32], index: 8, kind: input, shape index: {}]   ;;  %s6793_s9 = inlined_call_operand.vmem [shape: bf16[32,6], index: 9, kind: input, shape index: {}]   ;;  %s6794_s10 = inlined_call_operand.vmem [shape: f32[1,6], index: 10, kind: input, shape index: {}]   ;;  %s6795_s11 = inlined_call_operand.hbm [shape: f32[2,6], index: 11, kind: output, shape index: {}]  }
   0x1   :  { %v5589_v0 = vld [vmem:[%s6785_s1] sm:$0xff]  ;;  %v5594_v1 = vld [vmem:[%s6785_s1 + $0x10] sm:$0xff]  ;;  %v5605_v5 = vld [vmem:[%s6785_s1 + $0x8] sm:$0xff] }
   0x2   :  { %v51_v2 = vld [vmem:[%s6784_s0] sm:$0xf]  ;;  %v4722_v4 = vld [vmem:[%s6784_s0 + $0x4] sm:$0xf]  ;;  %v5610_v6 = vld [vmem:[%s6785_s1 + $0x18] sm:$0xff]  ;;  %106 = vmatpush.bf16.msra.mxu1 %v5589_v0  ;;  %133 = vmatpush.bf16.msra.mxu2 %v5594_v1 }
   0x3   :  { %v58_v3 = vunpack.c.l.b16 %v51_v2  ;;  %v144_v7 = vunpack.c.l.b16 %v4722_v4  ;;  %84 = vmatpush.bf16.msra.mxu0 %v5605_v5  ;;  %169 = vmatpush.bf16.msra.mxu3 %v5610_v6 }
   0x5   :  { %v59_v8 = vpack.c.b16 %v58_v3, %v58_v3 }
   0x6   :  { %16 = vsyncpa [#allocation3], 0  ;;  %v145_v9 = vpack.c.b16 %v144_v7, %v144_v7  ;;  %219 = vmatpush.bf16.msrb.mxu2 %v5594_v1  ;;  %4721 = vmatmul.msk.bf16.vlgmr.msra.gmra.mxu1 %vm73_vm0, %v51_v2  ;;  %v4739_v12 = vld [vmem:[%s6784_s0 + $0x8] sm:$0xf]  ;;  %v4744_v24 = vld [vmem:[%s6784_s0 + $0xc] sm:$0xf] }
   0x7   :  { %246 = vmatpush.bf16.msrb.mxu3 %v5610_v6  ;;  %v61_v10 = vshrl.u32 %v59_v8, 16  ;;  %v63_v11 = vshll.u32 %v59_v8, 16  ;;  %4729 = vmatmul.msk.bf16.vlgmr.msra.gmra.mxu2 %vm73_vm0, %v4722_v4  ;;  %v227_v17 = vunpack.c.l.b16 %v4739_v12  ;;  %v301_v26 = vunpack.c.l.b16 %v4744_v24  ;;  %v4749_v31 = vld [vmem:[%s6784_s0 + $0x10] sm:$0xf]  ;;  %v4754_v38 = vld [vmem:[%s6784_s0 + $0x14] sm:$0xf] }
   0x8   :  { %v147_v13 = vshrl.u32 %v145_v9, 16  ;;  %v149_v14 = vshll.u32 %v145_v9, 16  ;;  %188 = vmatpush.bf16.msrb.mxu0 %v5605_v5  ;;  %201 = vmatpush.bf16.msrb.mxu1 %v5589_v0  ;;  %v375_v33 = vunpack.c.l.b16 %v4749_v31  ;;  %v449_v40 = vunpack.c.l.b16 %v4754_v38  ;;  %v4759_v45 = vld [vmem:[%s6784_s0 + $0x18] sm:$0xf]  ;;  %v4764_v53 = vld [vmem:[%s6784_s0 + $0x1c] sm:$0xf] }
   0x9   :  { %v65_v15 = vrot.slane %v63_v11, 1  ;;  %v228_v20 = vpack.c.b16 %v227_v17, %v227_v17  ;;  %v302_v27 = vpack.c.b16 %v301_v26, %v301_v26  ;;  %v523_v47 = vunpack.c.l.b16 %v4759_v45  ;;  %v5688_v60 = vld [vmem:[%s6787_s3 + $0x10] sm:$0xff]  ;;  %v5695_v61 = vld [vmem:[%s6787_s3] sm:$0xff]  ;;  %v5701_v62 = vld [vmem:[%s6787_s3 + $0x8] sm:$0xff]  ;;  %s5525_s23 = smov [#allocation2]   ;;  %s4701_s26 = sshll.u32 %s6795_s11, 4  ;;  %s4702_s26 = int_to_ptr.hbm [resolvable:$true] %s4701_s26 }
   0xa   :  { %293 = vmatpush.bf16.msra.mxu2 %v5594_v1  ;;  %v151_v16 = vrot.slane %v149_v14, 1  ;;  %v376_v34 = vpack.c.b16 %v375_v33, %v375_v33  ;;  %v450_v41 = vpack.c.b16 %v449_v40, %v449_v40  ;;  %v597_v54 = vunpack.c.l.b16 %v4764_v53  ;;  %v5707_v63 = vld [vmem:[%s6787_s3 + $0x18] sm:$0xff]  ;;  %v5719_v2 = vld [vmem:[%s6787_s3 + $0x28] sm:$0xff]  ;;  %v5725_v3 = vld [vmem:[%s6787_s3 + $0x20] sm:$0xff]  ;;  %s4699_s24 = sshll.u32 %s5525_s23, 4  ;;  %s4700_s24 = int_to_ptr.vmem [resolvable:$true] %s4699_s24 }
   0xb   :  { %v66_v18 = vor.u32 %v65_v15, %v61_v10  ;;  %v232_v21 = vshll.u32 %v228_v20, 16  ;;  %v230_v22 = vshrl.u32 %v228_v20, 16  ;;  %v306_v28 = vshll.u32 %v302_v27, 16  ;;  %v5737_v10 = vld [vmem:[%s6786_s2] ss:$0 sm:$0xff]  ;;  %v5762_v33 = vld [vmem:[%s6787_s3 + $0x58] sm:$0xff] }
   0xc   :  { %275 = vmatpush.bf16.msra.mxu1 %v5589_v0  ;;  %v152_v19 = vor.u32 %v151_v16, %v147_v13  ;;  %v304_v29 = vshrl.u32 %v302_v27, 16  ;;  %v380_v35 = vshll.u32 %v376_v34, 16  ;;  %v378_v36 = vshrl.u32 %v376_v34, 16 }
   0xd   :  { %4716 = vmatmul.msk.bf16.vlgmr.msra.gmra.mxu0 %vm73_vm0, %v66_v18  ;;  %v234_v23 = vrot.slane %v232_v21, 1  ;;  %v308_v30 = vrot.slane %v306_v28, 1  ;;  %v454_v42 = vshll.u32 %v450_v41, 16  ;;  %v452_v43 = vshrl.u32 %v450_v41, 16  ;;  %v5743_v18 = vld [vmem:[%s6787_s3 + $0x48] sm:$0xff]  ;;  %v5748_v21 = vld [vmem:[%s6787_s3 + $0x50] sm:$0xff] }
   0xe   :  { %4736 = vmatmul.msk.bf16.vlgmr.msra.gmra.mxu3 %vm73_vm0, %v152_v19  ;;  %262 = vmatpush.bf16.msra.mxu0 %v5605_v5  ;;  %v382_v37 = vrot.slane %v380_v35, 1  ;;  %v524_v48 = vpack.c.b16 %v523_v47, %v523_v47  ;;  %v598_v55 = vpack.c.b16 %v597_v54, %v597_v54  ;;  %v5784_v54 = vld [vmem:[%s6787_s3 + $0x70] sm:$0xff]  ;;  %vm2384_vm1 = vcmask 261120  }
   0xf   :  { %320 = vmatpush.bf16.msra.mxu3 %v5610_v6  ;;  %v235_v25 = vor.u32 %v234_v23, %v230_v22  ;;  %v309_v32 = vor.u32 %v308_v30, %v304_v29  ;;  %v456_v44 = vrot.slane %v454_v42, 1  ;;  %vm2401_vm2 = vcmask 40960  }
  0x10   :  { %v383_v39 = vor.u32 %v382_v37, %v378_v36  ;;  %v528_v49 = vshll.u32 %v524_v48, 16  ;;  %v526_v50 = vshrl.u32 %v524_v48, 16  ;;  %v600_v56 = vshrl.u32 %v598_v55, 16 }
  0x11   :  { %v457_v46 = vor.u32 %v456_v44, %v452_v43  ;;  %v602_v57 = vshll.u32 %v598_v55, 16  ;;  %v5772_v44 = vld [vmem:[%s6787_s3 + $0x68] sm:$0xff] }
  0x12   :  { %v530_v51 = vrot.slane %v528_v49, 1 }
  0x13   :  { %v604_v58 = vrot.slane %v602_v57, 1 }
  0x14   :  { %v531_v52 = vor.u32 %v530_v51, %v526_v50 }
  0x15   :  { %v605_v59 = vor.u32 %v604_v58, %v600_v56  ;;  %v5791_v58 = vld [vmem:[%s6787_s3 + $0x60] sm:$0xff] }
  0x16   :  { %4738 = vmatmul.msk.bf16.vlgmr.msrb.gmra.mxu1 %vm73_vm0, %v4722_v4 }
  0x17   :  { %4740 = vmatmul.msk.bf16.vlgmr.msrb.gmra.mxu2 %vm73_vm0, %v4739_v12  ;;  %349 = vmatpush.bf16.msrb.mxu1 %v5589_v0 }
  0x18   :  { %367 = vmatpush.bf16.msrb.mxu2 %v5594_v1 }
  0x1d   :  { %4737 = vmatmul.msk.bf16.vlgmr.msrb.gmra.mxu0 %vm73_vm0, %v152_v19 }
  0x1e   :  { %4741 = vmatmul.msk.bf16.vlgmr.msrb.gmra.mxu3 %vm73_vm0, %v235_v25  ;;  %336 = vmatpush.bf16.msrb.mxu0 %v5605_v5 }
  0x1f   :  { %394 = vmatpush.bf16.msrb.mxu3 %v5610_v6 }
  0x26   :  { %4743 = vmatmul.msk.bf16.vlgmr.msra.gmra.mxu1 %vm73_vm0, %v4739_v12 }
  0x27   :  { %4745 = vmatmul.msk.bf16.vlgmr.msra.gmra.mxu2 %vm73_vm0, %v4744_v24  ;;  %423 = vmatpush.bf16.msra.mxu1 %v5589_v0 }
  0x28   :  { %441 = vmatpush.bf16.msra.mxu2 %v5594_v1 }
  0x2d   :  { %4742 = vmatmul.msk.bf16.vlgmr.msra.gmra.mxu0 %vm73_vm0, %v235_v25 }
  0x2e   :  { %4746 = vmatmul.msk.bf16.vlgmr.msra.gmra.mxu3 %vm73_vm0, %v309_v32  ;;  %410 = vmatpush.bf16.msra.mxu0 %v5605_v5 }
  0x2f   :  { %468 = vmatpush.bf16.msra.mxu3 %v5610_v6 }
  0x36   :  { %4748 = vmatmul.msk.bf16.vlgmr.msrb.gmra.mxu1 %vm73_vm0, %v4744_v24 }
  0x37   :  { %4750 = vmatmul.msk.bf16.vlgmr.msrb.gmra.mxu2 %vm73_vm0, %v4749_v31  ;;  %497 = vmatpush.bf16.msrb.mxu1 %v5589_v0 }
  0x38   :  { %515 = vmatpush.bf16.msrb.mxu2 %v5594_v1 }
  0x3d   :  { %4747 = vmatmul.msk.bf16.vlgmr.msrb.gmra.mxu0 %vm73_vm0, %v309_v32  ;;  %v5757_v32 = vld [vmem:[%s6787_s3 + $0x40] sm:$0xff] }
  0x3e   :  { %4751 = vmatmul.msk.bf16.vlgmr.msrb.gmra.mxu3 %vm73_vm0, %v383_v39  ;;  %484 = vmatpush.bf16.msrb.mxu0 %v5605_v5 }
  0x3f   :  { %542 = vmatpush.bf16.msrb.mxu3 %v5610_v6 }
  0x46   :  { %4753 = vmatmul.msk.bf16.vlgmr.msra.gmra.mxu1 %vm73_vm0, %v4749_v31 }
  0x47   :  { %4755 = vmatmul.msk.bf16.vlgmr.msra.gmra.mxu2 %vm73_vm0, %v4754_v38  ;;  %571 = vmatpush.bf16.msra.mxu1 %v5589_v0  ;;  %v5713_v0 = vld [vmem:[%s6787_s3 + $0x30] sm:$0xff] }
  0x48   :  { %589 = vmatpush.bf16.msra.mxu2 %v5594_v1 }
  0x4d   :  { %4752 = vmatmul.msk.bf16.vlgmr.msra.gmra.mxu0 %vm73_vm0, %v383_v39 }
  0x4e   :  { %4756 = vmatmul.msk.bf16.vlgmr.msra.gmra.mxu3 %vm73_vm0, %v457_v46  ;;  %558 = vmatpush.bf16.msra.mxu0 %v5605_v5 }
  0x4f   :  { %616 = vmatpush.bf16.msra.mxu3 %v5610_v6  ;;  %v5731_v6 = vld [vmem:[%s6787_s3 + $0x38] sm:$0xff] }
  0x56   :  { %4758 = vmatmul.msk.bf16.vlgmr.msrb.gmra.mxu1 %vm73_vm0, %v4754_v38 }
  0x57   :  { %4760 = vmatmul.msk.bf16.vlgmr.msrb.gmra.mxu2 %vm73_vm0, %v4759_v45  ;;  %675 = vmatpush.bf16.msrb.mxu1 %v5695_v61 }
  0x58   :  { %702 = vmatpush.bf16.msrb.mxu2 %v5688_v60 }
  0x5d   :  { %4757 = vmatmul.msk.bf16.vlgmr.msrb.gmra.mxu0 %vm73_vm0, %v457_v46 }
  0x5e   :  { %4761 = vmatmul.msk.bf16.vlgmr.msrb.gmra.mxu3 %vm73_vm0, %v531_v52  ;;  %654 = vmatpush.bf16.msrb.mxu0 %v5701_v62 }
  0x5f   :  { %731 = vmatpush.bf16.msrb.mxu3 %v5707_v63 }
  0x66   :  { %4763 = vmatmul.msk.bf16.vlgmr.msra.gmra.mxu1 %vm73_vm0, %v4759_v45 }
  0x67   :  { %4765 = vmatmul.msk.bf16.vlgmr.msra.gmra.mxu2 %vm73_vm0, %v4764_v53  ;;  %785 = vmatpush.bf16.msra.mxu1 %v5719_v2 }
  0x68   :  { %817 = vmatpush.bf16.msra.mxu2 %v5713_v0 }
  0x6d   :  { %4762 = vmatmul.msk.bf16.vlgmr.msra.gmra.mxu0 %vm73_vm0, %v531_v52 }
  0x6e   :  { %4766 = vmatmul.msk.bf16.vlgmr.msra.gmra.mxu3 %vm73_vm0, %v605_v59  ;;  %758 = vmatpush.bf16.msra.mxu0 %v5725_v3  ;;  %v5796_v59 = vld [vmem:[%s6787_s3 + $0x78] sm:$0xff] }
  0x6f   :  { %845 = vmatpush.bf16.msra.mxu3 %v5731_v6 }
  0x83   :  { %v108_v1 = vpop.f32.mrf.mxu1 }
  0x8a   :  { %v86_v4 = vpop.f32.mrf.mxu0  ;;  %v135_v5 = vpop.f32.mrf.mxu2 }
  0x8b   :  { %v109_v7 = vadd.f32 %v108_v1, %v86_v4  ;;  %v110_v8 = vpop.f32.mrf.mxu1 }
  0x8d   :  { %v139_v9 = vadd.f32 %v135_v5, %v109_v7 }
  0x91   :  { %v171_v11 = vpop.f32.mrf.mxu3 }
  0x92   :  { %v175_v12 = vadd.f32 %v171_v11, %v139_v9  ;;  %v88_v13 = vpop.f32.mrf.mxu0  ;;  %v137_v14 = vpop.f32.mrf.mxu2 }
  0x93   :  { %v203_v16 = vpop.f32.mrf.mxu1  ;;  %v5812_v13 = vld [vmem:[%s6787_s3 + $0x88] sm:$0xff] }
  0x94   :  { %v179_v15 = vadd.f32 %v5737_v10, %v175_v12 }
  0x96   :  { %v180_v17 = vmax.f32 %v179_v15, 0.0 }
  0x98   :  { %v625_v19 = vpack.c.bf16 %v180_v17, %v180_v17 }
  0x99   :  { %v173_v20 = vpop.f32.mrf.mxu3 }
  0x9a   :  { %4778 = vmatmul.msk.bf16.vlgmr.msrb.gmra.mxu1 %vm73_vm0, %v625_v19  ;;  %v190_v22 = vpop.f32.mrf.mxu0  ;;  %v221_v23 = vpop.f32.mrf.mxu2  ;;  %v685_v24 = vrot.slane %v625_v19, 1  ;;  %v632_v25 = vshrl.u32 %v625_v19, 16  ;;  %v634_v26 = vshll.u32 %v625_v19, 16  ;;  %v741_v56 = vrot.slane %v625_v19, 2 }
  0x9b   :  { %v204_v27 = vadd.f32 %v203_v16, %v190_v22  ;;  %901 = vmatpush.bf16.msrb.mxu1 %v5743_v18  ;;  %v205_v28 = vpop.f32.mrf.mxu1 }
  0x9c   :  { %4785 = vmatmul.msk.bf16.vlgmr.msrb.gmra.mxu2 %vm73_vm0, %v685_v24  ;;  %v636_v29 = vrot.slane %v634_v26, 1  ;;  %v712_v30 = vrot.slane %v632_v25, 1  ;;  %v713_v31 = vrot.slane %v634_v26, 2  ;;  %v5826_v28 = vld [vmem:[%s6787_s3 + $0x90] sm:$0xff] }
  0x9d   :  { %928 = vmatpush.bf16.msrb.mxu2 %v5748_v21  ;;  %v225_v34 = vadd.f32 %v221_v23, %v204_v27 }
  0x9e   :  { %v637_v35 = vor.u32 %v636_v29, %v632_v25  ;;  %v714_v36 = vor.u32 %v713_v31, %v712_v30 }
  0xa0   :  { %4773 = vmatmul.msk.bf16.vlgmr.msrb.gmra.mxu0 %vm73_vm0, %v637_v35  ;;  %4792 = vmatmul.msk.bf16.vlgmr.msrb.gmra.mxu3 %vm73_vm0, %v714_v36  ;;  %v5840_v35 = vld [vmem:[%s6787_s3 + $0x98] sm:$0xff] }
  0xa1   :  { %v248_v37 = vpop.f32.mrf.mxu3  ;;  %874 = vmatpush.bf16.msrb.mxu0 %v5757_v32  ;;  %960 = vmatpush.bf16.msrb.mxu3 %v5762_v33 }
  0xa2   :  { %v252_v38 = vadd.f32 %v248_v37, %v225_v34  ;;  %v192_v39 = vpop.f32.mrf.mxu0  ;;  %v223_v40 = vpop.f32.mrf.mxu2  ;;  %v5835_v34 = vld [vmem:[%s6787_s3 + $0x80] sm:$0xff] }
  0xa3   :  { %v277_v42 = vpop.f32.mrf.mxu1 }
  0xa4   :  { %v253_v41 = vadd.f32 %v5737_v10, %v252_v38 }
  0xa6   :  { %v254_v43 = vmax.f32 %v253_v41, 0.0 }
  0xa8   :  { %v5774_v45 = vpack.c.bf16 %v254_v43, %v254_v43 }
  0xa9   :  { %v250_v46 = vpop.f32.mrf.mxu3 }
  0xaa   :  { %4806 = vmatmul.msk.bf16.vlgmr.msra.gmra.mxu1 %vm73_vm0, %v5774_v45  ;;  %v264_v47 = vpop.f32.mrf.mxu0  ;;  %v295_v48 = vpop.f32.mrf.mxu2  ;;  %v797_v49 = vshll.u32 %v5774_v45, 16  ;;  %v795_v51 = vshrl.u32 %v5774_v45, 16  ;;  %v828_v1 = vrot.slane %v5774_v45, 1  ;;  %v884_v15 = vrot.slane %v5774_v45, 2  ;;  %v5855_v46 = vld [vmem:[%s6787_s3 + $0xa8] sm:$0xff] }
  0xab   :  { %v278_v50 = vadd.f32 %v277_v42, %v264_v47  ;;  %1017 = vmatpush.bf16.msra.mxu1 %v5772_v44  ;;  %v279_v53 = vpop.f32.mrf.mxu1 }
  0xac   :  { %v799_v52 = vrot.slane %v797_v49, 1  ;;  %v855_v17 = vrot.slane %v795_v51, 1  ;;  %v856_v19 = vrot.slane %v797_v49, 2 }
  0xad   :  { %v299_v55 = vadd.f32 %v295_v48, %v278_v50 }
  0xae   :  { %v5786_v57 = vor.u32 %v799_v52, %v795_v51  ;;  %v5828_v29 = vor.u32 %v856_v19, %v855_v17 }
  0xb0   :  { %4799 = vmatmul.msk.bf16.vlgmr.msra.gmra.mxu0 %vm73_vm0, %v741_v56  ;;  %4813 = vmatmul.msk.bf16.vlgmr.msra.gmra.mxu2 %vm73_vm0, %v5786_v57  ;;  %v5867_v56 = vld [vmem:[%s6787_s3 + $0xb0] sm:$0xff] }
  0xb1   :  { %4820 = vmatmul.msk.bf16.vlgmr.msra.gmra.mxu3 %vm73_vm0, %v828_v1  ;;  %v322_v4 = vpop.f32.mrf.mxu3  ;;  %1044 = vmatpush.bf16.msra.mxu2 %v5784_v54 }
  0xb2   :  { %v326_v5 = vadd.f32 %v322_v4, %v299_v55  ;;  %v266_v7 = vpop.f32.mrf.mxu0  ;;  %v297_v8 = vpop.f32.mrf.mxu2  ;;  %988 = vmatpush.bf16.msra.mxu0 %v5791_v58  ;;  %1071 = vmatpush.bf16.msra.mxu3 %v5796_v59 }
  0xb3   :  { %v351_v11 = vpop.f32.mrf.mxu1  ;;  %v5878_v8 = vld [vmem:[%s6787_s3 + $0xa0] sm:$0xff] }
  0xb4   :  { %v327_v9 = vadd.f32 %v5737_v10, %v326_v5 }
  0xb6   :  { %v328_v12 = vmax.f32 %v327_v9, 0.0  ;;  %v5883_v9 = vld [vmem:[%s6787_s3 + $0xb8] sm:$0xff] }
  0xb8   :  { %v5814_v14 = vpack.c.bf16 %v328_v12, %v328_v12 }
  0xb9   :  { %v324_v16 = vpop.f32.mrf.mxu3 }
  0xba   :  { %4834 = vmatmul.msk.bf16.vlgmr.msrb.gmra.mxu1 %vm73_vm0, %v884_v15  ;;  %v938_v20 = vshrl.u32 %v5814_v14, 16  ;;  %v940_v22 = vshll.u32 %v5814_v14, 16  ;;  %v338_v23 = vpop.f32.mrf.mxu0  ;;  %v369_v24 = vpop.f32.mrf.mxu2  ;;  %v5870_v4 = vrot.slane %v5814_v14, 1  ;;  %v5873_v5 = vrot.slane %v5814_v14, 2 }
  0xbb   :  { %v352_v25 = vadd.f32 %v351_v11, %v338_v23  ;;  %1131 = vmatpush.bf16.msrb.mxu1 %v5812_v13  ;;  %v353_v27 = vpop.f32.mrf.mxu1 }
  0xbc   :  { %v942_v26 = vrot.slane %v940_v22, 1  ;;  %v998_v40 = vrot.slane %v938_v20, 1  ;;  %v999_v41 = vrot.slane %v940_v22, 2 }
  0xbd   :  { %v373_v31 = vadd.f32 %v369_v24, %v352_v25 }
  0xbe   :  { %v5830_v30 = vor.u32 %v942_v26, %v938_v20  ;;  %v5857_v47 = vor.u32 %v999_v41, %v998_v40 }
  0xc0   :  { %4827 = vmatmul.msk.bf16.vlgmr.msrb.gmra.mxu0 %vm73_vm0, %v5828_v29  ;;  %4841 = vmatmul.msk.bf16.vlgmr.msrb.gmra.mxu2 %vm73_vm0, %v5814_v14 }
  0xc1   :  { %4848 = vmatmul.msk.bf16.vlgmr.msrb.gmra.mxu3 %vm73_vm0, %v5830_v30  ;;  %v396_v36 = vpop.f32.mrf.mxu3  ;;  %1160 = vmatpush.bf16.msrb.mxu2 %v5826_v28 }
  0xc2   :  { %v400_v37 = vadd.f32 %v396_v36, %v373_v31  ;;  %v340_v38 = vpop.f32.mrf.mxu0  ;;  %v371_v39 = vpop.f32.mrf.mxu2  ;;  %1103 = vmatpush.bf16.msrb.mxu0 %v5835_v34  ;;  %1187 = vmatpush.bf16.msrb.mxu3 %v5840_v35 }
  0xc3   :  { %v425_v42 = vpop.f32.mrf.mxu1 }
  0xc4   :  { %v401_v43 = vadd.f32 %v5737_v10, %v400_v37 }
  0xc6   :  { %v402_v48 = vmax.f32 %v401_v43, 0.0 }
  0xc8   :  { %v5862_v55 = vpack.c.bf16 %v402_v48, %v402_v48 }
  0xc9   :  { %v398_v49 = vpop.f32.mrf.mxu3 }
  0xca   :  { %4862 = vmatmul.msk.bf16.vlgmr.msra.gmra.mxu1 %vm73_vm0, %v5857_v47  ;;  %v412_v50 = vpop.f32.mrf.mxu0  ;;  %v443_v51 = vpop.f32.mrf.mxu2  ;;  %v1081_v20 = vshrl.u32 %v5862_v55, 16  ;;  %v5897_v23 = vrot.slane %v5862_v55, 1  ;;  %v1083_v25 = vshll.u32 %v5862_v55, 16 }
  0xcb   :  { %v426_v52 = vadd.f32 %v425_v42, %v412_v50  ;;  %1246 = vmatpush.bf16.msra.mxu1 %v5855_v46  ;;  %v427_v53 = vpop.f32.mrf.mxu1  ;;  %v5913_v50 = vld [vmem:[%s6787_s3 + $0xc0] sm:$0xff] }
  0xcc   :  { %v1141_v26 = vrot.slane %v1081_v20, 1  ;;  %v1142_v27 = vrot.slane %v1083_v25, 2  ;;  %v1085_v37 = vrot.slane %v1083_v25, 1 }
  0xcd   :  { %v447_v7 = vadd.f32 %v443_v51, %v426_v52  ;;  %v5916_v51 = vrot.slane %v5862_v55, 2 }
  0xce   :  { %v5905_v41 = vor.u32 %v1142_v27, %v1141_v26  ;;  %v5907_v48 = vor.u32 %v1085_v37, %v1081_v20 }
  0xd0   :  { %4855 = vmatmul.msk.bf16.vlgmr.msra.gmra.mxu0 %vm73_vm0, %v5870_v4  ;;  %4869 = vmatmul.msk.bf16.vlgmr.msra.gmra.mxu2 %vm73_vm0, %v5873_v5 }
  0xd1   :  { %4876 = vmatmul.msk.bf16.vlgmr.msra.gmra.mxu3 %vm73_vm0, %v5862_v55  ;;  %v470_v11 = vpop.f32.mrf.mxu3  ;;  %1274 = vmatpush.bf16.msra.mxu2 %v5867_v56 }
  0xd2   :  { %v474_v12 = vadd.f32 %v470_v11, %v447_v7  ;;  %v414_v16 = vpop.f32.mrf.mxu0  ;;  %1214 = vmatpush.bf16.msra.mxu0 %v5878_v8  ;;  %v445_v17 = vpop.f32.mrf.mxu2  ;;  %1303 = vmatpush.bf16.msra.mxu3 %v5883_v9 }
  0xd3   :  { %v499_v22 = vpop.f32.mrf.mxu1 }
  0xd4   :  { %v475_v19 = vadd.f32 %v5737_v10, %v474_v12 }
  0xd6   :  { %v476_v24 = vmax.f32 %v475_v19, 0.0 }
  0xd8   :  { %v5902_v36 = vpack.c.bf16 %v476_v24, %v476_v24 }
  0xd9   :  { %v472_v31 = vpop.f32.mrf.mxu3 }
  0xda   :  { %4890 = vmatmul.msk.bf16.vlgmr.msrb.gmra.mxu1 %vm73_vm0, %v5897_v23  ;;  %v486_v38 = vpop.f32.mrf.mxu0  ;;  %v517_v39 = vpop.f32.mrf.mxu2  ;;  %v1226_v49 = vshll.u32 %v5902_v36, 16  ;;  %v1224_v53 = vshrl.u32 %v5902_v36, 16  ;;  %v5936_v31 = vrot.slane %v5902_v36, 1 }
  0xdb   :  { %1349 = vmatpush.bf16.msrb.mxu1 %v5701_v62  ;;  %v500_v40 = vadd.f32 %v499_v22, %v486_v38  ;;  %v501_v42 = vpop.f32.mrf.mxu1 }
  0xdc   :  { %v1228_v7 = vrot.slane %v1226_v49, 1  ;;  %v1284_v20 = vrot.slane %v1224_v53, 1  ;;  %v1285_v22 = vrot.slane %v1226_v49, 2 }
  0xdd   :  { %v521_v43 = vadd.f32 %v517_v39, %v500_v40 }
  0xde   :  { %v5930_v19 = vor.u32 %v1228_v7, %v1224_v53  ;;  %v5938_v38 = vor.u32 %v1285_v22, %v1284_v20  ;;  %v5955_v53 = vrot.slane %v5902_v36, 2 }
  0xe0   :  { %4883 = vmatmul.msk.bf16.vlgmr.msrb.gmra.mxu0 %vm73_vm0, %v5907_v48  ;;  %4897 = vmatmul.msk.bf16.vlgmr.msrb.gmra.mxu2 %vm73_vm0, %v5905_v41 }
  0xe1   :  { %4904 = vmatmul.msk.bf16.vlgmr.msrb.gmra.mxu3 %vm73_vm0, %v5916_v51  ;;  %1362 = vmatpush.bf16.msrb.mxu2 %v5695_v61  ;;  %v544_v52 = vpop.f32.mrf.mxu3 }
  0xe2   :  { %1330 = vmatpush.bf16.msrb.mxu0 %v5913_v50  ;;  %1375 = vmatpush.bf16.msrb.mxu3 %v5688_v60  ;;  %v488_v11 = vpop.f32.mrf.mxu0  ;;  %v5928_v12 = vadd.f32 %v544_v52, %v521_v43  ;;  %v519_v16 = vpop.f32.mrf.mxu2 }
  0xe3   :  { %v573_v17 = vpop.f32.mrf.mxu1 }
  0xe9   :  { %v546_v24 = vpop.f32.mrf.mxu3 }
  0xea   :  { %4918 = vmatmul.msk.bf16.vlgmr.msra.gmra.mxu1 %vm73_vm0, %v5930_v19  ;;  %v560_v25 = vpop.f32.mrf.mxu0  ;;  %v591_v26 = vpop.f32.mrf.mxu2 }
  0xeb   :  { %1403 = vmatpush.bf16.msra.mxu1 %v5725_v3  ;;  %v574_v27 = vadd.f32 %v573_v17, %v560_v25  ;;  %v575_v37 = vpop.f32.mrf.mxu1 }
  0xed   :  { %v595_v39 = vadd.f32 %v591_v26, %v574_v27 }
  0xf0   :  { %4911 = vmatmul.msk.bf16.vlgmr.msra.gmra.mxu0 %vm73_vm0, %v5902_v36  ;;  %4925 = vmatmul.msk.bf16.vlgmr.msra.gmra.mxu2 %vm73_vm0, %v5936_v31 }
  0xf1   :  { %4932 = vmatmul.msk.bf16.vlgmr.msra.gmra.mxu3 %vm73_vm0, %v5938_v38  ;;  %1417 = vmatpush.bf16.msra.mxu2 %v5719_v2  ;;  %v618_v40 = vpop.f32.mrf.mxu3 }
  0xf2   :  { %1389 = vmatpush.bf16.msra.mxu0 %v5707_v63  ;;  %1431 = vmatpush.bf16.msra.mxu3 %v5713_v0  ;;  %v562_v42 = vpop.f32.mrf.mxu0  ;;  %v5949_v43 = vadd.f32 %v618_v40, %v595_v39  ;;  %v593_v49 = vpop.f32.mrf.mxu2 }
  0xf9   :  { %v620_v52 = vpop.f32.mrf.mxu3 }
  0xfa   :  { %4940 = vmatmul.msk.bf16.vlgmr.msrb.gmra.mxu1 %vm73_vm0, %v5786_v57 }
  0xfb   :  { %1459 = vmatpush.bf16.msrb.mxu1 %v5757_v32 }
 0x100   :  { %4939 = vmatmul.msk.bf16.vlgmr.msrb.gmra.mxu0 %vm73_vm0, %v5955_v53  ;;  %4941 = vmatmul.msk.bf16.vlgmr.msrb.gmra.mxu2 %vm73_vm0, %v5774_v45 }
 0x101   :  { %4942 = vmatmul.msk.bf16.vlgmr.msrb.gmra.mxu3 %vm73_vm0, %v828_v1  ;;  %1473 = vmatpush.bf16.msrb.mxu2 %v5743_v18 }
 0x102   :  { %1445 = vmatpush.bf16.msrb.mxu0 %v5731_v6  ;;  %1487 = vmatpush.bf16.msrb.mxu3 %v5748_v21 }
 0x10a   :  { %4944 = vmatmul.msk.bf16.vlgmr.msra.gmra.mxu1 %vm73_vm0, %v884_v15 }
 0x10b   :  { %1515 = vmatpush.bf16.msra.mxu1 %v5791_v58 }
 0x110   :  { %4943 = vmatmul.msk.bf16.vlgmr.msra.gmra.mxu0 %vm73_vm0, %v5828_v29  ;;  %4945 = vmatmul.msk.bf16.vlgmr.msra.gmra.mxu2 %vm73_vm0, %v5814_v14 }
 0x111   :  { %4946 = vmatmul.msk.bf16.vlgmr.msra.gmra.mxu3 %vm73_vm0, %v5830_v30  ;;  %1529 = vmatpush.bf16.msra.mxu2 %v5772_v44 }
 0x112   :  { %1501 = vmatpush.bf16.msra.mxu0 %v5762_v33  ;;  %1543 = vmatpush.bf16.msra.mxu3 %v5784_v54 }
 0x117   :  { %v677_v45 = vpop.f32.mrf.mxu1 }
 0x11a   :  { %4948 = vmatmul.msk.bf16.vlgmr.msrb.gmra.mxu1 %vm73_vm0, %v5857_v47 }
 0x11b   :  { %1571 = vmatpush.bf16.msrb.mxu1 %v5835_v34 }
 0x11d   :  { %v656_v57 = vpop.f32.mrf.mxu0 }
 0x11e   :  { %v678_v1 = vadd.f32 %v677_v45, %v656_v57  ;;  %v549_v57 = vadd.f32 %v5737_v10, %v5928_v12 }
 0x11f   :  { %v679_v15 = vpop.f32.mrf.mxu1  ;;  %v704_v29 = vpop.f32.mrf.mxu2 }
 0x120   :  { %v708_v7 = vadd.f32 %v704_v29, %v678_v1  ;;  %4947 = vmatmul.msk.bf16.vlgmr.msrb.gmra.mxu0 %vm73_vm0, %v5870_v4  ;;  %4949 = vmatmul.msk.bf16.vlgmr.msrb.gmra.mxu2 %vm73_vm0, %v5873_v5 }
 0x121   :  { %4950 = vmatmul.msk.bf16.vlgmr.msrb.gmra.mxu3 %vm73_vm0, %v5862_v55  ;;  %1585 = vmatpush.bf16.msrb.mxu2 %v5812_v13 }
 0x122   :  { %1557 = vmatpush.bf16.msrb.mxu0 %v5796_v59  ;;  %1599 = vmatpush.bf16.msrb.mxu3 %v5826_v28 }
 0x123   :  { %v733_v11 = vpop.f32.mrf.mxu3 }
 0x124   :  { %v737_v16 = vadd.f32 %v733_v11, %v708_v7  ;;  %v550_v7 = vmax.f32 %v549_v57, 0.0 }
 0x125   :  { %v658_v17 = vpop.f32.mrf.mxu0 }
 0x126   :  { %v6016_v12 = vpack.c.bf16 %v550_v7, %v550_v7 }
 0x127   :  { %v706_v20 = vpop.f32.mrf.mxu2  ;;  %v787_v22 = vpop.f32.mrf.mxu1 }
 0x128   :  { %v1662_v57 = vrot.slane %v6016_v12, 1 }
 0x12a   :  { %4952 = vmatmul.msk.bf16.vlgmr.msra.gmra.mxu1 %vm73_vm0, %v5897_v23 }
 0x12b   :  { %v735_v24 = vpop.f32.mrf.mxu3  ;;  %1631 = vmatpush.bf16.msra.mxu1 %v5878_v8 }
 0x12d   :  { %v760_v25 = vpop.f32.mrf.mxu0 }
 0x12e   :  { %v764_v26 = vadd.f32 %v760_v25, %v737_v16 }
 0x12f   :  { %v789_v27 = vpop.f32.mrf.mxu1 }
 0x130   :  { %4951 = vmatmul.msk.bf16.vlgmr.msra.gmra.mxu0 %vm73_vm0, %v5907_v48  ;;  %4953 = vmatmul.msk.bf16.vlgmr.msra.gmra.mxu2 %vm73_vm0, %v5905_v41  ;;  %v791_v37 = vadd.f32 %v787_v22, %v764_v26  ;;  %v1640_v27 = vshll.u32 %v6016_v12, 16 }
 0x131   :  { %4954 = vmatmul.msk.bf16.vlgmr.msra.gmra.mxu3 %vm73_vm0, %v5916_v51  ;;  %1654 = vmatpush.bf16.msra.mxu2 %v5855_v46 }
 0x132   :  { %1613 = vmatpush.bf16.msra.mxu0 %v5840_v35  ;;  %1673 = vmatpush.bf16.msra.mxu3 %v5867_v56 }
 0x133   :  { %v819_v39 = vpop.f32.mrf.mxu2 }
 0x134   :  { %v823_v40 = vadd.f32 %v819_v39, %v791_v37  ;;  %v847_v42 = vpop.f32.mrf.mxu3  ;;  %v1638_v39 = vshrl.u32 %v6016_v12, 16 }
 0x135   :  { %v762_v49 = vpop.f32.mrf.mxu0 }
 0x136   :  { %v851_v52 = vadd.f32 %v847_v42, %v823_v40 }
 0x137   :  { %v903_v45 = vpop.f32.mrf.mxu1 }
 0x13a   :  { %4956 = vmatmul.msk.bf16.vlgmr.msrb.gmra.mxu1 %vm73_vm0, %v5930_v19 }
 0x13b   :  { %v821_v1 = vpop.f32.mrf.mxu2  ;;  %1711 = vmatpush.bf16.msrb.mxu1 %v5913_v50 }
 0x13c   :  { %v849_v15 = vpop.f32.mrf.mxu3 }
 0x13d   :  { %v876_v29 = vpop.f32.mrf.mxu0 }
 0x13e   :  { %v880_v11 = vadd.f32 %v876_v29, %v851_v52 }
 0x13f   :  { %v905_v16 = vpop.f32.mrf.mxu1 }
 0x140   :  { %4955 = vmatmul.msk.bf16.vlgmr.msrb.gmra.mxu0 %vm73_vm0, %v5902_v36  ;;  %4957 = vmatmul.msk.bf16.vlgmr.msrb.gmra.mxu2 %vm73_vm0, %v5936_v31  ;;  %v907_v17 = vadd.f32 %v903_v45, %v880_v11 }
 0x141   :  { %4958 = vmatmul.msk.bf16.vlgmr.msrb.gmra.mxu3 %vm73_vm0, %v5938_v38  ;;  %1727 = vmatpush.bf16.msrb.mxu2 %v5701_v62  ;;  %v1642_v62 = vrot.slane %v1640_v27, 1 }
 0x142   :  { %1693 = vmatpush.bf16.msrb.mxu0 %v5883_v9  ;;  %1740 = vmatpush.bf16.msrb.mxu3 %v5695_v61 }
 0x143   :  { %v930_v20 = vpop.f32.mrf.mxu2  ;;  %v6025_v52 = vor.u32 %v1642_v62, %v1638_v39 }
 0x144   :  { %v934_v22 = vadd.f32 %v930_v20, %v907_v17  ;;  %v962_v24 = vpop.f32.mrf.mxu3  ;;  %v1700_v17 = vrot.slane %v6016_v12, 2  ;;  %v1680_v20 = vrot.slane %v1638_v39, 1 }
 0x145   :  { %v878_v25 = vpop.f32.mrf.mxu0 }
 0x146   :  { %v966_v26 = vadd.f32 %v962_v24, %v934_v22  ;;  %v1681_v22 = vrot.slane %v1640_v27, 2 }
 0x147   :  { %v1019_v37 = vpop.f32.mrf.mxu1 }
 0x148   :  { %v6043_v25 = vor.u32 %v1681_v22, %v1680_v20 }
 0x14a   :  { %4960 = vmatmul.msk.bf16.vlgmr.msra.gmra.mxu1 %vm73_vm0, %v6016_v12 }
 0x14b   :  { %v932_v40 = vpop.f32.mrf.mxu2  ;;  %1767 = vmatpush.bf16.msra.mxu1 %v5707_v63 }
 0x14c   :  { %v964_v42 = vpop.f32.mrf.mxu3 }
 0x14d   :  { %v990_v49 = vpop.f32.mrf.mxu0 }
 0x14e   :  { %v994_v61 = vadd.f32 %v990_v49, %v966_v26 }
 0x14f   :  { %v1021_v45 = vpop.f32.mrf.mxu1 }
 0x150   :  { %4959 = vmatmul.msk.bf16.vlgmr.msra.gmra.mxu0 %vm73_vm0, %v5955_v53  ;;  %4961 = vmatmul.msk.bf16.vlgmr.msra.gmra.mxu2 %vm73_vm0, %v6025_v52  ;;  %v1023_v1 = vadd.f32 %v1019_v37, %v994_v61 }
 0x151   :  { %4962 = vmatmul.msk.bf16.vlgmr.msra.gmra.mxu3 %vm73_vm0, %v1662_v57  ;;  %1781 = vmatpush.bf16.msra.mxu2 %v5725_v3 }
 0x152   :  { %1753 = vmatpush.bf16.msra.mxu0 %v5688_v60  ;;  %1795 = vmatpush.bf16.msra.mxu3 %v5719_v2 }
 0x153   :  { %v1046_v63 = vpop.f32.mrf.mxu2 }
 0x154   :  { %v1050_v15 = vadd.f32 %v1046_v63, %v1023_v1  ;;  %v1073_v29 = vpop.f32.mrf.mxu3 }
 0x155   :  { %v992_v7 = vpop.f32.mrf.mxu0 }
 0x156   :  { %v1077_v11 = vadd.f32 %v1073_v29, %v1050_v15 }
 0x157   :  { %v1133_v16 = vpop.f32.mrf.mxu1 }
 0x15a   :  { %4964 = vmatmul.msk.bf16.vlgmr.msrb.gmra.mxu1 %vm73_vm0, %v1700_v17 }
 0x15b   :  { %v1048_v24 = vpop.f32.mrf.mxu2  ;;  %1823 = vmatpush.bf16.msrb.mxu1 %v5731_v6 }
 0x15c   :  { %v1075_v60 = vpop.f32.mrf.mxu3 }
 0x15d   :  { %v1105_v3 = vpop.f32.mrf.mxu0 }
 0x15e   :  { %v1109_v2 = vadd.f32 %v1105_v3, %v1077_v11 }
 0x15f   :  { %v1135_v26 = vpop.f32.mrf.mxu1 }
 0x160   :  { %4963 = vmatmul.msk.bf16.vlgmr.msrb.gmra.mxu0 %vm73_vm0, %v6043_v25  ;;  %4965 = vmatmul.msk.bf16.vlgmr.msrb.gmra.mxu2 %vm73_vm0, %v5830_v30  ;;  %v1137_v37 = vadd.f32 %v1133_v16, %v1109_v2  ;;  %v5441_v26 = vld [vmem:[%s6789_s5] sm:$0xff] }
 0x161   :  { %4966 = vmatmul.msk.bf16.vlgmr.msrb.gmra.mxu3 %vm73_vm0, %v5814_v14  ;;  %1837 = vmatpush.bf16.msrb.mxu2 %v5757_v32 }
 0x162   :  { %1809 = vmatpush.bf16.msrb.mxu0 %v5713_v0  ;;  %1851 = vmatpush.bf16.msrb.mxu3 %v5743_v18 }
 0x163   :  { %v1162_v6 = vpop.f32.mrf.mxu2 }
 0x164   :  { %v1166_v27 = vadd.f32 %v1162_v6, %v1137_v37  ;;  %v1189_v39 = vpop.f32.mrf.mxu3 }
 0x165   :  { %v1107_v62 = vpop.f32.mrf.mxu0 }
 0x166   :  { %v1193_v40 = vadd.f32 %v1189_v39, %v1166_v27 }
 0x167   :  { %v1248_v42 = vpop.f32.mrf.mxu1 }
 0x16a   :  { %4968 = vmatmul.msk.bf16.vlgmr.msra.gmra.mxu1 %vm73_vm0, %v5857_v47 }
 0x16b   :  { %v1164_v30 = vpop.f32.mrf.mxu2  ;;  %1879 = vmatpush.bf16.msra.mxu1 %v5762_v33 }
 0x16c   :  { %v1191_v49 = vpop.f32.mrf.mxu3 }
 0x16d   :  { %v1216_v14 = vpop.f32.mrf.mxu0 }
 0x16e   :  { %v1220_v61 = vadd.f32 %v1216_v14, %v1193_v40 }
 0x16f   :  { %v1250_v32 = vpop.f32.mrf.mxu1 }
 0x170   :  { %4967 = vmatmul.msk.bf16.vlgmr.msra.gmra.mxu0 %vm73_vm0, %v5870_v4  ;;  %4969 = vmatmul.msk.bf16.vlgmr.msra.gmra.mxu2 %vm73_vm0, %v5873_v5  ;;  %v1252_v0 = vadd.f32 %v1248_v42, %v1220_v61 }
 0x171   :  { %4970 = vmatmul.msk.bf16.vlgmr.msra.gmra.mxu3 %vm73_vm0, %v5862_v55  ;;  %1893 = vmatpush.bf16.msra.mxu2 %v5791_v58 }
 0x172   :  { %1865 = vmatpush.bf16.msra.mxu0 %v5748_v21  ;;  %1907 = vmatpush.bf16.msra.mxu3 %v5772_v44 }
 0x173   :  { %v1276_v18 = vpop.f32.mrf.mxu2 }
 0x174   :  { %v1280_v33 = vadd.f32 %v1276_v18, %v1252_v0  ;;  %v1305_v47 = vpop.f32.mrf.mxu3 }
 0x175   :  { %v1218_v45 = vpop.f32.mrf.mxu0 }
 0x176   :  { %v6066_v1 = vadd.f32 %v1305_v47, %v1280_v33 }
 0x177   :  { %v1351_v4 = vpop.f32.mrf.mxu1 }
 0x17a   :  { %4972 = vmatmul.msk.bf16.vlgmr.msrb.gmra.mxu1 %vm73_vm0, %v5897_v23 }
 0x17b   :  { %v1278_v5 = vpop.f32.mrf.mxu2  ;;  %1935 = vmatpush.bf16.msrb.mxu1 %v5796_v59 }
 0x17c   :  { %v1307_v55 = vpop.f32.mrf.mxu3 }
 0x17d   :  { %v6071_v63 = vpop.f32.mrf.mxu0 }
 0x17e   :  { %v1336_v6 = vadd.f32 %v6071_v63, %v6066_v1 }
 0x17f   :  { %v1353_v58 = vpop.f32.mrf.mxu1 }
 0x180   :  { %4971 = vmatmul.msk.bf16.vlgmr.msrb.gmra.mxu0 %vm73_vm0, %v5907_v48  ;;  %4973 = vmatmul.msk.bf16.vlgmr.msrb.gmra.mxu2 %vm73_vm0, %v5905_v41 }
 0x181   :  { %4974 = vmatmul.msk.bf16.vlgmr.msrb.gmra.mxu3 %vm73_vm0, %v5916_v51  ;;  %1949 = vmatpush.bf16.msrb.mxu2 %v5835_v34 }
 0x182   :  { %1921 = vmatpush.bf16.msrb.mxu0 %v5784_v54  ;;  %1963 = vmatpush.bf16.msrb.mxu3 %v5812_v13 }
 0x183   :  { %v1364_v21 = vpop.f32.mrf.mxu2 }
 0x184   :  { %v1377_v44 = vpop.f32.mrf.mxu3 }
 0x185   :  { %v1334_v59 = vpop.f32.mrf.mxu0 }
 0x187   :  { %v1405_v23 = vpop.f32.mrf.mxu1 }
 0x18a   :  { %4976 = vmatmul.msk.bf16.vlgmr.msra.gmra.mxu1 %vm73_vm0, %v5930_v19  ;;  %v1365_v19 = vadd.f32 %v1364_v21, %v1351_v4 }
 0x18b   :  { %v1366_v48 = vpop.f32.mrf.mxu2  ;;  %1991 = vmatpush.bf16.msra.mxu1 %v5840_v35 }
 0x18c   :  { %v1379_v41 = vpop.f32.mrf.mxu3  ;;  %v1381_v7 = vadd.f32 %v1377_v44, %v1365_v19 }
 0x18d   :  { %v1391_v15 = vpop.f32.mrf.mxu0  ;;  %v5444_v41 = vld [vmem:[%s6789_s5 + $0x18] sm:$0xff] }
 0x18f   :  { %v1407_v29 = vpop.f32.mrf.mxu1 }
 0x190   :  { %4975 = vmatmul.msk.bf16.vlgmr.msra.gmra.mxu0 %vm73_vm0, %v5902_v36  ;;  %4977 = vmatmul.msk.bf16.vlgmr.msra.gmra.mxu2 %vm73_vm0, %v5936_v31  ;;  %v623_v36 = vadd.f32 %v5737_v10, %v5949_v43  ;;  %v1395_v10 = vadd.f32 %v1391_v15, %v1381_v7 }
 0x191   :  { %4978 = vmatmul.msk.bf16.vlgmr.msra.gmra.mxu3 %vm73_vm0, %v5938_v38  ;;  %2009 = vmatpush.bf16.msra.mxu2 %v5878_v8 }
 0x192   :  { %1977 = vmatpush.bf16.msra.mxu0 %v5826_v28  ;;  %2032 = vmatpush.bf16.msra.mxu3 %v5855_v46  ;;  %v5442_v28 = vld [vmem:[%s6789_s5 + $0x8] sm:$0xff]  ;;  %v624_v46 = vmax.f32 %v623_v36, 0.0  ;;  %v1409_v20 = vadd.f32 %v1405_v23, %v1395_v10 }
 0x193   :  { %v1419_v54 = vpop.f32.mrf.mxu2 }
 0x194   :  { %v1433_v13 = vpop.f32.mrf.mxu3  ;;  %v1423_v24 = vadd.f32 %v1419_v54, %v1409_v20  ;;  %v5445_v54 = vld [vmem:[%s6789_s5 + $0x20] sm:$0xff] }
 0x195   :  { %v1393_v34 = vpop.f32.mrf.mxu0 }
 0x196   :  { %v1437_v60 = vadd.f32 %v1433_v13, %v1423_v24  ;;  %v5446_v13 = vld [vmem:[%s6789_s5 + $0x28] sm:$0xff] }
 0x197   :  { %v1461_v35 = vpop.f32.mrf.mxu1 }
 0x19a   :  { %4980 = vmatmul.msk.bf16.vlgmr.msrb.gmra.mxu1 %vm73_vm0, %v6016_v12  ;;  %v6125_v12 = vld [vmem:[%s6788_s4] ss:$0 sm:$0xff] }
 0x19b   :  { %v1421_v51 = vpop.f32.mrf.mxu2  ;;  %2071 = vmatpush.bf16.msrb.mxu1 %v5883_v9  ;;  %v1998_v9 = vpack.c.bf16 %v624_v46, %v624_v46  ;;  %v1340_v62 = vadd.f32 %v6125_v12, %v1336_v6 }
 0x19c   :  { %v1435_v31 = vpop.f32.mrf.mxu3 }
 0x19d   :  { %v1447_v8 = vpop.f32.mrf.mxu0  ;;  %v2018_v22 = vshll.u32 %v1998_v9, 16  ;;  %v1341_v32 = vmax.f32 %v1340_v62, 0.0  ;;  %v2040_v5 = vrot.slane %v1998_v9, 1  ;;  %v2078_v55 = vrot.slane %v1998_v9, 2 }
 0x19e   :  { %v1451_v37 = vadd.f32 %v1447_v8, %v1437_v60 }
 0x19f   :  { %v1463_v38 = vpop.f32.mrf.mxu1  ;;  %v2059_v30 = vrot.slane %v2018_v22, 2 }
 0x1a0   :  { %4979 = vmatmul.msk.bf16.vlgmr.msrb.gmra.mxu0 %vm73_vm0, %v5955_v53  ;;  %4981 = vmatmul.msk.bf16.vlgmr.msrb.gmra.mxu2 %vm73_vm0, %v6025_v52  ;;  %v5443_v52 = vld [vmem:[%s6789_s5 + $0x10] sm:$0xff]  ;;  %v1465_v39 = vadd.f32 %v1461_v35, %v1451_v37 }
 0x1a1   :  { %4982 = vmatmul.msk.bf16.vlgmr.msrb.gmra.mxu3 %vm73_vm0, %v1662_v57  ;;  %2089 = vmatpush.bf16.msrb.mxu2 %v5913_v50  ;;  %v2016_v50 = vshrl.u32 %v1998_v9, 16  ;;  %v2020_v57 = vrot.slane %v2018_v22, 1 }
 0x1a2   :  { %2051 = vmatpush.bf16.msrb.mxu0 %v5867_v56  ;;  %2123 = vmatpush.bf16.msrb.mxu3 %v5442_v28 }
 0x1a3   :  { %v1475_v43 = vpop.f32.mrf.mxu2  ;;  %v2021_v27 = vor.u32 %v2020_v57, %v2016_v50  ;;  %v2058_v42 = vrot.slane %v2016_v50, 1 }
 0x1a4   :  { %v1489_v11 = vpop.f32.mrf.mxu3  ;;  %v1479_v49 = vadd.f32 %v1475_v43, %v1465_v39 }
 0x1a5   :  { %v1449_v16 = vpop.f32.mrf.mxu0  ;;  %v2060_v33 = vor.u32 %v2059_v30, %v2058_v42 }
 0x1a6   :  { %v1493_v18 = vadd.f32 %v1489_v11, %v1479_v49 }
 0x1a7   :  { %v1517_v53 = vpop.f32.mrf.mxu1 }
 0x1aa   :  { %4984 = vmatmul.msk.bf16.vlgmr.msra.gmra.mxu1 %vm73_vm0, %v1700_v17 }
 0x1ab   :  { %v1477_v56 = vpop.f32.mrf.mxu2  ;;  %2171 = vmatpush.bf16.msra.mxu1 %v5443_v52 }
 0x1ac   :  { %v1491_v3 = vpop.f32.mrf.mxu3 }
 0x1ad   :  { %v1503_v2 = vpop.f32.mrf.mxu0 }
 0x1ae   :  { %v1507_v47 = vadd.f32 %v1503_v2, %v1493_v18 }
 0x1af   :  { %v1519_v17 = vpop.f32.mrf.mxu1 }
 0x1b0   :  { %4983 = vmatmul.msk.bf16.vlgmr.msra.gmra.mxu0 %vm73_vm0, %v6043_v25  ;;  %4985 = vmatmul.msk.bf16.vlgmr.msra.gmra.mxu2 %vm73_vm0, %v1998_v9  ;;  %v2098_v25 = vpack.c.bf16 %v1341_v32, %v1341_v32  ;;  %v1521_v63 = vadd.f32 %v1517_v53, %v1507_v47 }
 0x1b1   :  { %4986 = vmatmul.msk.bf16.vlgmr.msra.gmra.mxu3 %vm73_vm0, %v2021_v27  ;;  %2144 = vmatpush.bf16.msra.mxu0 %v5441_v26 }
 0x1b2   :  { %v2105_v58 = vshrl.u32 %v2098_v25, 16  ;;  %2198 = vmatpush.bf16.msra.mxu2 %v5444_v41  ;;  %v2154_v35 = vrot.slane %v2098_v25, 1  ;;  %2226 = vmatpush.bf16.msra.mxu3 %v5445_v54 }
 0x1b3   :  { %v1531_v40 = vpop.f32.mrf.mxu2 }
 0x1b4   :  { %v1545_v14 = vpop.f32.mrf.mxu3  ;;  %v1535_v44 = vadd.f32 %v1531_v40, %v1521_v63 }
 0x1b5   :  { %v1505_v61 = vpop.f32.mrf.mxu0 }
 0x1b6   :  { %v1549_v23 = vadd.f32 %v1545_v14, %v1535_v44 }
 0x1b7   :  { %v1573_v0 = vpop.f32.mrf.mxu1 }
 0x1ba   :  { %4988 = vmatmul.msk.bf16.vlgmr.msrb.gmra.mxu1 %vm73_vm0, %v2060_v33 }
 0x1bb   :  { %v1533_v45 = vpop.f32.mrf.mxu2 }
 0x1bc   :  { %v1547_v1 = vpop.f32.mrf.mxu3 }
 0x1bd   :  { %v1559_v4 = vpop.f32.mrf.mxu0 }
 0x1be   :  { %v1563_v29 = vadd.f32 %v1559_v4, %v1549_v23 }
 0x1bf   :  { %v1575_v21 = vpop.f32.mrf.mxu1 }
 0x1c0   :  { %4987 = vmatmul.msk.bf16.vlgmr.msrb.gmra.mxu0 %vm73_vm0, %v2040_v5  ;;  %4989 = vmatmul.msk.bf16.vlgmr.msrb.gmra.mxu2 %vm73_vm0, %v2078_v55  ;;  %v1577_v36 = vadd.f32 %v1573_v0, %v1563_v29 }
 0x1c1   :  { %4996 = vmatmul.msk.bf16.vlgmr.msrb.gmra.mxu3 %vm73_vm0, %v2105_v58  ;;  %2254 = vmatpush.bf16.msrb.mxu0 %v5446_v13 }
 0x1c3   :  { %v1587_v59 = vpop.f32.mrf.mxu2 }
 0x1c4   :  { %v1601_v48 = vpop.f32.mrf.mxu3  ;;  %v1591_v19 = vadd.f32 %v1587_v59, %v1577_v36 }
 0x1c5   :  { %v1561_v15 = vpop.f32.mrf.mxu0 }
 0x1c6   :  { %v1605_v46 = vadd.f32 %v1601_v48, %v1591_v19 }
 0x1c7   :  { %v1633_v34 = vpop.f32.mrf.mxu1 }
 0x1ca   :  { %5008 = vmatmul.msk.bf16.vlgmr.msra.gmra.mxu1 %vm73_vm0, %v2154_v35 }
 0x1cb   :  { %v1589_v51 = vpop.f32.mrf.mxu2 }
 0x1cc   :  { %v1603_v31 = vpop.f32.mrf.mxu3 }
 0x1cd   :  { %v1615_v8 = vpop.f32.mrf.mxu0 }
 0x1ce   :  { %v1619_v38 = vadd.f32 %v1615_v8, %v1605_v46 }
 0x1cf   :  { %v1635_v28 = vpop.f32.mrf.mxu1 }
 0x1d0   :  { %5001 = vmatmul.msk.bf16.vlgmr.msra.gmra.mxu0 %vm73_vm0, %v2098_v25  ;;  %v1637_v43 = vadd.f32 %v1633_v34, %v1619_v38  ;;  %v5448_v28 = vld [vmem:[%s6789_s5 + $0x38] sm:$0xff]  ;;  %v5449_v38 = vld [vmem:[%s6789_s5 + $0x40] sm:$0xff] }
 0x1d1   :  { %2309 = vmatpush.bf16.msrb.mxu2 %v5448_v28  ;;  %2337 = vmatpush.bf16.msrb.mxu3 %v5449_v38 }
 0x1d3   :  { %v1656_v7 = vpop.f32.mrf.mxu2 }
 0x1d4   :  { %v1675_v10 = vpop.f32.mrf.mxu3  ;;  %v1660_v16 = vadd.f32 %v1656_v7, %v1637_v43  ;;  %v5447_v7 = vld [vmem:[%s6789_s5 + $0x30] sm:$0xff] }
 0x1d5   :  { %v1617_v9 = vpop.f32.mrf.mxu0  ;;  %2281 = vmatpush.bf16.msrb.mxu1 %v5447_v7 }
 0x1d6   :  { %v1679_v22 = vadd.f32 %v1675_v10, %v1660_v16 }
 0x1d7   :  { %v1713_v11 = vpop.f32.mrf.mxu1 }
 0x1db   :  { %v1658_v20 = vpop.f32.mrf.mxu2 }
 0x1dc   :  { %v1677_v53 = vpop.f32.mrf.mxu3 }
 0x1dd   :  { %v1695_v52 = vpop.f32.mrf.mxu0 }
 0x1de   :  { %v1699_v24 = vadd.f32 %v1695_v52, %v1679_v22 }
 0x1df   :  { %v1715_v50 = vpop.f32.mrf.mxu1 }
 0x1e0   :  { %v1717_v57 = vadd.f32 %v1713_v11, %v1699_v24 }
 0x1e2   :  { %v1718_v56 = vadd.f32 %v6125_v12, %v1717_v57 }
 0x1e3   :  { %v1729_v60 = vpop.f32.mrf.mxu2 }
 0x1e4   :  { %v1719_v3 = vmax.f32 %v1718_v56, 0.0  ;;  %v1742_v2 = vpop.f32.mrf.mxu3 }
 0x1e5   :  { %v1697_v26 = vpop.f32.mrf.mxu0  ;;  %v1743_v47 = vadd.f32 %v1742_v2, %v1729_v60 }
 0x1e6   :  { %v2178_v37 = vpack.c.bf16 %v1719_v3, %v1719_v3 }
 0x1e7   :  { %v1769_v6 = vpop.f32.mrf.mxu1 }
 0x1e8   :  { %v2208_v17 = vshrl.u32 %v2178_v37, 16  ;;  %v2237_v27 = vrot.slane %v2178_v37, 1  ;;  %5015 = vmatmul.msk.bf16.vlgmr.msra.gmra.mxu2 %vm73_vm0, %v2178_v37 }
 0x1ea   :  { %5022 = vmatmul.msk.bf16.vlgmr.msra.gmra.mxu3 %vm73_vm0, %v2208_v17  ;;  %5029 = vmatmul.msk.bf16.vlgmr.msrb.gmra.mxu0 %vm73_vm0, %v2237_v27 }
 0x1eb   :  { %v1731_v39 = vpop.f32.mrf.mxu2 }
 0x1ec   :  { %v1744_v62 = vpop.f32.mrf.mxu3 }
 0x1ed   :  { %v1755_v40 = vpop.f32.mrf.mxu0 }
 0x1ee   :  { %v1759_v25 = vadd.f32 %v1755_v40, %v1743_v47 }
 0x1ef   :  { %v1771_v42 = vpop.f32.mrf.mxu1 }
 0x1f0   :  { %v1773_v5 = vadd.f32 %v1769_v6, %v1759_v25 }
 0x1f3   :  { %v1783_v30 = vpop.f32.mrf.mxu2 }
 0x1f4   :  { %v1797_v49 = vpop.f32.mrf.mxu3  ;;  %v1787_v63 = vadd.f32 %v1783_v30, %v1773_v5 }
 0x1f5   :  { %v1757_v14 = vpop.f32.mrf.mxu0 }
 0x1f6   :  { %v1801_v21 = vadd.f32 %v1797_v49, %v1787_v63 }
 0x1f7   :  { %v1825_v61 = vpop.f32.mrf.mxu1 }
 0x1fb   :  { %v1785_v32 = vpop.f32.mrf.mxu2 }
 0x1fc   :  { %v1799_v0 = vpop.f32.mrf.mxu3 }
 0x1fd   :  { %v1811_v18 = vpop.f32.mrf.mxu0 }
 0x1fe   :  { %v1815_v23 = vadd.f32 %v1811_v18, %v1801_v21 }
 0x1ff   :  { %v1827_v33 = vpop.f32.mrf.mxu1 }
 0x200   :  { %v1829_v41 = vadd.f32 %v1825_v61, %v1815_v23 }
 0x203   :  { %v1839_v45 = vpop.f32.mrf.mxu2 }
 0x204   :  { %v1853_v1 = vpop.f32.mrf.mxu3  ;;  %v1843_v29 = vadd.f32 %v1839_v45, %v1829_v41 }
 0x205   :  { %v1813_v4 = vpop.f32.mrf.mxu0 }
 0x206   :  { %v1857_v35 = vadd.f32 %v1853_v1, %v1843_v29 }
 0x207   :  { %v1881_v55 = vpop.f32.mrf.mxu1 }
 0x20b   :  { %v1841_v58 = vpop.f32.mrf.mxu2 }
 0x20c   :  { %v1855_v44 = vpop.f32.mrf.mxu3 }
 0x20d   :  { %v1867_v59 = vpop.f32.mrf.mxu0 }
 0x20e   :  { %v1871_v36 = vadd.f32 %v1867_v59, %v1857_v35  ;;  %v5409_v35 = vld [vmem:[%s6791_s7] sm:$0xff] }
 0x20f   :  { %v1883_v48 = vpop.f32.mrf.mxu1  ;;  %2363 = vmatpush.bf16.msra.mxu0 %v5409_v35 }
 0x210   :  { %v1885_v8 = vadd.f32 %v1881_v55, %v1871_v36  ;;  %v5411_v36 = vld [vmem:[%s6793_s9 + $0x8] sm:$0xff] }
 0x211   :  { %2394 = vmatpush.bf16.msra.mxu1 %v5411_v36 }
 0x213   :  { %v1895_v15 = vpop.f32.mrf.mxu2 }
 0x214   :  { %v1909_v54 = vpop.f32.mrf.mxu3  ;;  %v1899_v10 = vadd.f32 %v1895_v15, %v1885_v8 }
 0x215   :  { %v1869_v13 = vpop.f32.mrf.mxu0 }
 0x216   :  { %v1913_v43 = vadd.f32 %v1909_v54, %v1899_v10 }
 0x217   :  { %v1937_v34 = vpop.f32.mrf.mxu1 }
 0x21b   :  { %v1897_v51 = vpop.f32.mrf.mxu2 }
 0x21c   :  { %v1911_v19 = vpop.f32.mrf.mxu3  ;;  %v6173_v51 = vld [vmem:[%s6785_s1 + $0x8] sm:$0xff] }
 0x21d   :  { %v1923_v31 = vpop.f32.mrf.mxu0  ;;  %v6178_v19 = vld [vmem:[%s6785_s1] sm:$0xff]  ;;  %2435 = vmatpush.bf16.msra.mxu2 %v6173_v51 }
 0x21e   :  { %v1927_v20 = vadd.f32 %v1923_v31, %v1913_v43  ;;  %v5410_v31 = vld [vmem:[%s6793_s9] sm:$0xff]  ;;  %2457 = vmatpush.bf16.msra.mxu3 %v6178_v19 }
 0x21f   :  { %v1939_v46 = vpop.f32.mrf.mxu1  ;;  %2395 = vmatpush.bf16.msra.mxu1 %v5410_v31 }
 0x220   :  { %v1941_v53 = vadd.f32 %v1937_v34, %v1927_v20 }
 0x223   :  { %v1951_v9 = vpop.f32.mrf.mxu2 }
 0x224   :  { %v1965_v11 = vpop.f32.mrf.mxu3  ;;  %v1955_v24 = vadd.f32 %v1951_v9, %v1941_v53  ;;  %v42_v9 = vld [vmem:[%s6790_s6] sm:$0x1] }
 0x225   :  { %v1925_v16 = vpop.f32.mrf.mxu0 }
 0x226   :  { %v1969_v60 = vadd.f32 %v1965_v11, %v1955_v24 }
 0x227   :  { %v1993_v22 = vpop.f32.mrf.mxu1 }
 0x22b   :  { %v1953_v52 = vpop.f32.mrf.mxu2 }
 0x22c   :  { %v1967_v50 = vpop.f32.mrf.mxu3  ;;  %v5065_v52 = vld [vmem:[%s6784_s0 + $0x20] sm:$0xf] }
 0x22d   :  { %v1979_v57 = vpop.f32.mrf.mxu0  ;;  %v2410_v24 = vunpack.c.l.b16 %v5065_v52 }
 0x22e   :  { %v1983_v3 = vadd.f32 %v1979_v57, %v1969_v60 }
 0x22f   :  { %v1995_v56 = vpop.f32.mrf.mxu1  ;;  %v2411_v50 = vpack.c.b16 %v2410_v24, %v2410_v24 }
 0x230   :  { %v1997_v6 = vadd.f32 %v1993_v22, %v1983_v3 }
 0x231   :  { %v2415_v57 = vshll.u32 %v2411_v50, 16  ;;  %v2413_v56 = vshrl.u32 %v2411_v50, 16 }
 0x233   :  { %v2011_v2 = vpop.f32.mrf.mxu2  ;;  %v2417_v60 = vrot.slane %v2415_v57, 1 }
 0x234   :  { %v2034_v26 = vpop.f32.mrf.mxu3  ;;  %v2015_v27 = vadd.f32 %v2011_v2, %v1997_v6  ;;  %v6199_v2 = vld [vmem:[%s6785_s1 + $0x10] sm:$0xff] }
 0x235   :  { %v1981_v37 = vpop.f32.mrf.mxu0  ;;  %v2418_v3 = vor.u32 %v2417_v60, %v2413_v56  ;;  %2483 = vmatpush.bf16.msrb.mxu0 %v6199_v2 }
 0x236   :  { %v2038_v62 = vadd.f32 %v2034_v26, %v2015_v27  ;;  %v6206_v26 = vld [vmem:[%s6785_s1 + $0x18] sm:$0xff]  ;;  %v5078_v37 = vld [vmem:[%s6784_s0 + $0x24] sm:$0xf] }
 0x237   :  { %v2073_v17 = vpop.f32.mrf.mxu1  ;;  %v2493_v6 = vunpack.c.l.b16 %v5078_v37 }
 0x23b   :  { %v2013_v39 = vpop.f32.mrf.mxu2 }
 0x23c   :  { %v2036_v40 = vpop.f32.mrf.mxu3 }
 0x23d   :  { %v2053_v42 = vpop.f32.mrf.mxu0 }
 0x23e   :  { %v2057_v30 = vadd.f32 %v2053_v42, %v2038_v62  ;;  %v5095_v42 = vld [vmem:[%s6784_s0 + $0x28] sm:$0xf] }
 0x23f   :  { %v2075_v49 = vpop.f32.mrf.mxu1 }
 0x240   :  { %v2077_v14 = vadd.f32 %v2073_v17, %v2057_v30  ;;  %v2494_v17 = vpack.c.b16 %v2493_v6, %v2493_v6  ;;  %v2573_v30 = vunpack.c.l.b16 %v5095_v42 }
 0x242   :  { %v2498_v27 = vshll.u32 %v2494_v17, 16  ;;  %v2496_v39 = vshrl.u32 %v2494_v17, 16  ;;  %v2574_v49 = vpack.c.b16 %v2573_v30, %v2573_v30  ;;  %v6302_v17 = vld [vmem:[%s6787_s3 + $0x18] sm:$0xff] }
 0x243   :  { %v2091_v61 = vpop.f32.mrf.mxu2 }
 0x244   :  { %v2095_v32 = vadd.f32 %v2091_v61, %v2077_v14  ;;  %v2125_v0 = vpop.f32.mrf.mxu3  ;;  %v2500_v62 = vrot.slane %v2498_v27, 1  ;;  %v2578_v14 = vshll.u32 %v2574_v49, 16  ;;  %v45_v61 = vld [vmem:[%s6792_s8] sm:$0x1] }
 0x245   :  { %v2055_v18 = vpop.f32.mrf.mxu0 }
 0x246   :  { %v2096_v33 = vadd.f32 %v6125_v12, %v2095_v32  ;;  %v2501_v40 = vor.u32 %v2500_v62, %v2496_v39  ;;  %v2580_v18 = vrot.slane %v2578_v14, 1  ;;  %v50_v39 = vld [vmem:[%s6794_s10] sm:$0x1] }
 0x247   :  { %v2173_v47 = vpop.f32.mrf.mxu1  ;;  %v6311_v62 = vld [vmem:[%s6787_s3 + $0x20] sm:$0xff] }
 0x248   :  { %v2097_v25 = vmax.f32 %v2096_v33, 0.0 }
 0x24a   :  { %v2261_v45 = vpack.c.bf16 %v2097_v25, %v2097_v25 }
 0x24b   :  { %v2093_v1 = vpop.f32.mrf.mxu2 }
 0x24c   :  { %v2291_v4 = vshrl.u32 %v2261_v45, 16  ;;  %v2320_v5 = vrot.slane %v2261_v45, 1  ;;  %v2127_v55 = vpop.f32.mrf.mxu3  ;;  %5036 = vmatmul.msk.bf16.vlgmr.msrb.gmra.mxu1 %vm73_vm0, %v2261_v45  ;;  %v5100_v1 = vld [vmem:[%s6784_s0 + $0x2c] sm:$0xf] }
 0x24d   :  { %v2146_v63 = vpop.f32.mrf.mxu0  ;;  %2518 = vmatpush.bf16.msrb.mxu1 %v6206_v26 }
 0x24e   :  { %v2147_v58 = vadd.f32 %v2146_v63, %v2125_v0  ;;  %5043 = vmatmul.msk.bf16.vlgmr.msrb.gmra.mxu2 %vm73_vm0, %v2291_v4  ;;  %5050 = vmatmul.msk.bf16.vlgmr.msrb.gmra.mxu3 %vm73_vm0, %v2320_v5  ;;  %v2576_v0 = vshrl.u32 %v2574_v49, 16  ;;  %v2647_v5 = vunpack.c.l.b16 %v5100_v1 }
 0x24f   :  { %v2175_v21 = vpop.f32.mrf.mxu1  ;;  %2534 = vmatpush.bf16.msrb.mxu2 %v6173_v51  ;;  %2547 = vmatpush.bf16.msrb.mxu3 %v6178_v19 }
 0x250   :  { %v2177_v44 = vadd.f32 %v2173_v47, %v2147_v58  ;;  %v2581_v25 = vor.u32 %v2580_v18, %v2576_v0  ;;  %v2648_v55 = vpack.c.b16 %v2647_v5, %v2647_v5  ;;  %v6324_v18 = vld [vmem:[%s6787_s3 + $0x30] sm:$0xff] }
 0x252   :  { %v2652_v63 = vshll.u32 %v2648_v55, 16  ;;  %v2650_v58 = vshrl.u32 %v2648_v55, 16  ;;  %v6336_v55 = vld [vmem:[%s6786_s2] ss:$0 sm:$0xff] }
 0x254   :  { %v2654_v21 = vrot.slane %v2652_v63, 1 }
 0x255   :  { %v2148_v59 = vpop.f32.mrf.mxu0 }
 0x256   :  { %v5105_v59 = vld [vmem:[%s6784_s0 + $0x30] sm:$0xf] }
 0x25e   :  { %5077 = vmatmul.msk.bf16.vlgmr.msra.gmra.mxu3 %vm73_vm0, %v5065_v52  ;;  %5072 = vmatmul.msk.bf16.vlgmr.msra.gmra.mxu2 %vm73_vm0, %v2418_v3 }
 0x25f   :  { %2621 = vmatpush.bf16.msra.mxu3 %v6178_v19  ;;  %2608 = vmatpush.bf16.msra.mxu2 %v6173_v51 }
 0x267   :  { %v2256_v23 = vpop.f32.mrf.mxu0 }
 0x26b   :  { %v2200_v12 = vpop.f32.mrf.mxu2 }
 0x26c   :  { %v2204_v48 = vadd.f32 %v2200_v12, %v2177_v44  ;;  %v2655_v44 = vor.u32 %v2654_v21, %v2650_v58 }
 0x26d   :  { %v2228_v41 = vpop.f32.mrf.mxu3 }
 0x26e   :  { %v2232_v15 = vadd.f32 %v2228_v41, %v2204_v48  ;;  %5094 = vmatmul.msk.bf16.vlgmr.msrb.gmra.mxu3 %vm73_vm0, %v5078_v37  ;;  %5093 = vmatmul.msk.bf16.vlgmr.msrb.gmra.mxu2 %vm73_vm0, %v2501_v40 }
 0x26f   :  { %v2258_v29 = vpop.f32.mrf.mxu0  ;;  %2695 = vmatpush.bf16.msrb.mxu3 %v6178_v19  ;;  %2682 = vmatpush.bf16.msrb.mxu2 %v6173_v51 }
 0x270   :  { %v2260_v54 = vadd.f32 %v2256_v23, %v2232_v15  ;;  %v2721_v23 = vunpack.c.l.b16 %v5105_v59 }
 0x272   :  { %v2722_v12 = vpack.c.b16 %v2721_v23, %v2721_v23  ;;  %v6342_v23 = vld [vmem:[%s6787_s3 + $0x48] sm:$0xff] }
 0x273   :  { %v2202_v13 = vpop.f32.mrf.mxu2 }
 0x274   :  { %v2726_v48 = vshll.u32 %v2722_v12, 16  ;;  %v2724_v41 = vshrl.u32 %v2722_v12, 16 }
 0x275   :  { %v2230_v34 = vpop.f32.mrf.mxu3 }
 0x276   :  { %v2728_v15 = vrot.slane %v2726_v48, 1 }
 0x278   :  { %v2729_v29 = vor.u32 %v2728_v15, %v2724_v41 }
 0x27e   :  { %5099 = vmatmul.msk.bf16.vlgmr.msra.gmra.mxu3 %vm73_vm0, %v5095_v42  ;;  %5098 = vmatmul.msk.bf16.vlgmr.msra.gmra.mxu2 %vm73_vm0, %v2581_v25 }
 0x27f   :  { %2769 = vmatpush.bf16.msra.mxu3 %v6178_v19  ;;  %2756 = vmatpush.bf16.msra.mxu2 %v6173_v51 }
 0x28e   :  { %5104 = vmatmul.msk.bf16.vlgmr.msrb.gmra.mxu3 %vm73_vm0, %v5100_v1  ;;  %5103 = vmatmul.msk.bf16.vlgmr.msrb.gmra.mxu2 %vm73_vm0, %v2655_v44 }
 0x28f   :  { %2843 = vmatpush.bf16.msrb.mxu3 %v6178_v19  ;;  %2830 = vmatpush.bf16.msrb.mxu2 %v6173_v51 }
 0x29e   :  { %5109 = vmatmul.msk.bf16.vlgmr.msra.gmra.mxu3 %vm73_vm0, %v5105_v59  ;;  %5108 = vmatmul.msk.bf16.vlgmr.msra.gmra.mxu2 %vm73_vm0, %v2729_v29 }
 0x29f   :  { %2917 = vmatpush.bf16.msra.mxu3 %v6178_v19  ;;  %2904 = vmatpush.bf16.msra.mxu2 %v6173_v51  ;;  %v5115_v51 = vld [vmem:[%s6784_s0 + $0x38] sm:$0xf] }
 0x2c9   :  { %v2283_v8 = vpop.f32.mrf.mxu1 }
 0x2ca   :  { %v2287_v28 = vadd.f32 %v2283_v8, %v2260_v54  ;;  %v5110_v54 = vld [vmem:[%s6784_s0 + $0x34] sm:$0xf]  ;;  %v2869_v8 = vunpack.c.l.b16 %v5115_v51 }
 0x2cb   :  { %v2795_v13 = vunpack.c.l.b16 %v5110_v54  ;;  %5114 = vmatmul.msk.bf16.vlgmr.msrb.gmra.mxu3 %vm73_vm0, %v5110_v54 }
 0x2cd   :  { %v2796_v34 = vpack.c.b16 %v2795_v13, %v2795_v13  ;;  %v6348_v13 = vld [vmem:[%s6787_s3 + $0x50] sm:$0xff] }
 0x2cf   :  { %v2800_v35 = vshll.u32 %v2796_v34, 16  ;;  %v2798_v36 = vshrl.u32 %v2796_v34, 16 }
 0x2d1   :  { %v2285_v46 = vpop.f32.mrf.mxu1  ;;  %v2311_v38 = vpop.f32.mrf.mxu2  ;;  %v2802_v19 = vrot.slane %v2800_v35, 1 }
 0x2d2   :  { %v2315_v7 = vadd.f32 %v2311_v38, %v2287_v28  ;;  %v2339_v10 = vpop.f32.mrf.mxu3  ;;  %v2870_v28 = vpack.c.b16 %v2869_v8, %v2869_v8 }
 0x2d3   :  { %v2803_v31 = vor.u32 %v2802_v19, %v2798_v36  ;;  %v6355_v19 = vld [vmem:[%s6787_s3 + $0x40] sm:$0xff] }
 0x2d4   :  { %v2343_v43 = vadd.f32 %v2339_v10, %v2315_v7  ;;  %v2874_v46 = vshll.u32 %v2870_v28, 16  ;;  %v2872_v38 = vshrl.u32 %v2870_v28, 16 }
 0x2d5   :  { %5113 = vmatmul.msk.bf16.vlgmr.msrb.gmra.mxu2 %vm73_vm0, %v2803_v31 }
 0x2d6   :  { %v2344_v11 = vadd.f32 %v2343_v43, %v42_v9  ;;  %v2876_v7 = vrot.slane %v2874_v46, 1 }
 0x2d8   :  { %v2345_v16 = vmax.f32 %v2344_v11, 0.0  ;;  %v2877_v10 = vor.u32 %v2876_v7, %v2872_v38 }
 0x2d9   :  { %v2313_v20 = vpop.f32.mrf.mxu2 }
 0x2da   :  { %v2346_v22 = vpack.c.bf16 %v2345_v16, %v2345_v16  ;;  %v2341_v53 = vpop.f32.mrf.mxu3  ;;  %v5120_v16 = vld [vmem:[%s6784_s0 + $0x3c] sm:$0xf] }
 0x2db   :  { %5119 = vmatmul.msk.bf16.vlgmr.msra.gmra.mxu3 %vm73_vm0, %v5115_v51  ;;  %v2943_v20 = vunpack.c.l.b16 %v5120_v16  ;;  %v6283_v53 = vld [vmem:[%s6787_s3 + $0x8] sm:$0xff] }
 0x2dc   :  { %5055 = vmatmul.msk.bf16.vlgmr.msra.gmra.mxu0 %vm73_vm0, %v2346_v22  ;;  %2999 = vmatpush.bf16.msrb.mxu2 %v6283_v53 }
 0x2dd   :  { %2565 = vmatpush.bf16.msra.mxu0 %v6199_v2  ;;  %v2944_v22 = vpack.c.b16 %v2943_v20, %v2943_v20 }
 0x2df   :  { %v2948_v52 = vshll.u32 %v2944_v22, 16  ;;  %v2946_v24 = vshrl.u32 %v2944_v22, 16 }
 0x2e1   :  { %v2437_v11 = vpop.f32.mrf.mxu2  ;;  %v2950_v56 = vrot.slane %v2948_v52, 1 }
 0x2e2   :  { %v2459_v9 = vpop.f32.mrf.mxu3 }
 0x2e3   :  { %v2951_v3 = vor.u32 %v2950_v56, %v2946_v24  ;;  %v2460_v0 = vadd.f32 %v2459_v9, %v2437_v11 }
 0x2e5   :  { %5118 = vmatmul.msk.bf16.vlgmr.msra.gmra.mxu2 %vm73_vm0, %v2877_v10 }
 0x2e6   :  { %3100 = vmatpush.bf16.msra.mxu2 %v6311_v62 }
 0x2e9   :  { %v2439_v60 = vpop.f32.mrf.mxu2 }
 0x2ea   :  { %v2461_v50 = vpop.f32.mrf.mxu3 }
 0x2ec   :  { %5085 = vmatmul.msk.bf16.vlgmr.msrb.gmra.mxu0 %vm73_vm0, %v5078_v37 }
 0x2ed   :  { %2639 = vmatpush.bf16.msrb.mxu0 %v6199_v2 }
 0x2f1   :  { %v2536_v37 = vpop.f32.mrf.mxu2 }
 0x2f2   :  { %v2549_v6 = vpop.f32.mrf.mxu3 }
 0x2f9   :  { %v2538_v30 = vpop.f32.mrf.mxu2 }
 0x2fa   :  { %v2551_v49 = vpop.f32.mrf.mxu3  ;;  %v6396_v30 = vld [vmem:[%s6787_s3 + $0x78] sm:$0xff] }
 0x2fc   :  { %5096 = vmatmul.msk.bf16.vlgmr.msra.gmra.mxu0 %vm73_vm0, %v5095_v42 }
 0x2fd   :  { %2713 = vmatpush.bf16.msra.mxu0 %v6199_v2 }
 0x30c   :  { %5101 = vmatmul.msk.bf16.vlgmr.msrb.gmra.mxu0 %vm73_vm0, %v5100_v1 }
 0x30d   :  { %2787 = vmatpush.bf16.msrb.mxu0 %v6199_v2 }
 0x31c   :  { %5106 = vmatmul.msk.bf16.vlgmr.msra.gmra.mxu0 %vm73_vm0, %v5105_v59 }
 0x31d   :  { %2861 = vmatpush.bf16.msra.mxu0 %v6199_v2 }
 0x32c   :  { %5111 = vmatmul.msk.bf16.vlgmr.msrb.gmra.mxu0 %vm73_vm0, %v5110_v54  ;;  %v2550_v54 = vadd.f32 %v2549_v6, %v2536_v37  ;;  %v6384_v6 = vld [vmem:[%s6787_s3 + $0x60] sm:$0xff] }
 0x32d   :  { %2935 = vmatpush.bf16.msrb.mxu0 %v6199_v2  ;;  %v6290_v2 = vld [vmem:[%s6787_s3] sm:$0xff] }
 0x32e   :  { %3020 = vmatpush.bf16.msrb.mxu3 %v6290_v2 }
 0x33c   :  { %5116 = vmatmul.msk.bf16.vlgmr.msra.gmra.mxu0 %vm73_vm0, %v5115_v51 }
 0x34c   :  { %5121 = vmatmul.msk.bf16.vlgmr.msrb.gmra.mxu0 %vm73_vm0, %v5120_v16  ;;  %v6371_v16 = vld [vmem:[%s6787_s3 + $0x68] sm:$0xff] }
 0x359   :  { %v2365_v32 = vpop.f32.mrf.mxu0 }
 0x35a   :  { %v2369_v33 = vadd.f32 %v2365_v32, %v45_v61  ;;  %v6318_v61 = vld [vmem:[%s6787_s3 + $0x28] sm:$0xff] }
 0x35b   :  { %3126 = vmatpush.bf16.msra.mxu3 %v6318_v61 }
 0x35c   :  { %v2370_v47 = vmax.f32 %v2369_v33, 0.0  ;;  %v6329_v33 = vld [vmem:[%s6787_s3 + $0x38] sm:$0xff] }
 0x35e   :  { %v2371_v45 = vpack.c.bf16 %v2370_v47, %v2370_v47  ;;  %v2610_v47 = vpop.f32.mrf.mxu2 }
 0x360   :  { %5064 = vmatmul.msk.bf16.vlgmr.msra.gmra.mxu1 %vm2384_vm1, %v2371_v45 }
 0x361   :  { %v2367_v4 = vpop.f32.mrf.mxu0  ;;  %2592 = vmatpush.bf16.msra.mxu1 %v6206_v26 }
 0x366   :  { %v2612_v58 = vpop.f32.mrf.mxu2 }
 0x369   :  { %v2485_v43 = vpop.f32.mrf.mxu0 }
 0x36a   :  { %v2489_v1 = vadd.f32 %v2485_v43, %v2460_v0 }
 0x36e   :  { %v2684_v38 = vpop.f32.mrf.mxu2 }
 0x370   :  { %5092 = vmatmul.msk.bf16.vlgmr.msrb.gmra.mxu1 %vm73_vm0, %v2501_v40 }
 0x371   :  { %2666 = vmatpush.bf16.msrb.mxu1 %v6206_v26  ;;  %v2487_v57 = vpop.f32.mrf.mxu0 }
 0x376   :  { %v2686_v52 = vpop.f32.mrf.mxu2 }
 0x379   :  { %v2567_v27 = vpop.f32.mrf.mxu0 }
 0x37a   :  { %v2571_v51 = vadd.f32 %v2567_v27, %v2550_v54  ;;  %v6425_v54 = vld [vmem:[%s6787_s3 + $0x80] sm:$0xff] }
 0x380   :  { %5097 = vmatmul.msk.bf16.vlgmr.msra.gmra.mxu1 %vm73_vm0, %v2581_v25  ;;  %v2623_v25 = vpop.f32.mrf.mxu3 }
 0x381   :  { %2740 = vmatpush.bf16.msra.mxu1 %v6206_v26  ;;  %v2569_v14 = vpop.f32.mrf.mxu0  ;;  %v2624_v24 = vadd.f32 %v2623_v25, %v2610_v47 }
 0x382   :  { %v2758_v14 = vpop.f32.mrf.mxu2 }
 0x388   :  { %v2625_v21 = vpop.f32.mrf.mxu3 }
 0x389   :  { %v2641_v45 = vpop.f32.mrf.mxu0 }
 0x38a   :  { %v2760_v21 = vpop.f32.mrf.mxu2 }
 0x390   :  { %5102 = vmatmul.msk.bf16.vlgmr.msrb.gmra.mxu1 %vm73_vm0, %v2655_v44 }
 0x391   :  { %2814 = vmatpush.bf16.msrb.mxu1 %v6206_v26  ;;  %v2643_v44 = vpop.f32.mrf.mxu0 }
 0x399   :  { %v2715_v9 = vpop.f32.mrf.mxu0 }
 0x3a0   :  { %5107 = vmatmul.msk.bf16.vlgmr.msra.gmra.mxu1 %vm73_vm0, %v2729_v29 }
 0x3a1   :  { %2888 = vmatpush.bf16.msra.mxu1 %v6206_v26  ;;  %v2717_v60 = vpop.f32.mrf.mxu0 }
 0x3a9   :  { %v2789_v47 = vpop.f32.mrf.mxu0 }
 0x3b0   :  { %5112 = vmatmul.msk.bf16.vlgmr.msrb.gmra.mxu1 %vm73_vm0, %v2803_v31  ;;  %v6361_v31 = vld [vmem:[%s6787_s3 + $0x58] sm:$0xff] }
 0x3b1   :  { %2962 = vmatpush.bf16.msrb.mxu1 %v6206_v26  ;;  %v6296_v26 = vld [vmem:[%s6787_s3 + $0x10] sm:$0xff] }
 0x3b2   :  { %3046 = vmatpush.bf16.msra.mxu0 %v6296_v26 }
 0x3b6   :  { %3157 = vmatpush.bf16.msrb.mxu0 %v6324_v18 }
 0x3c0   :  { %5117 = vmatmul.msk.bf16.vlgmr.msra.gmra.mxu1 %vm73_vm0, %v2877_v10  ;;  %v2697_v10 = vpop.f32.mrf.mxu3 }
 0x3c1   :  { %3074 = vmatpush.bf16.msra.mxu1 %v6302_v17  ;;  %v2698_v58 = vadd.f32 %v2697_v10, %v2684_v38 }
 0x3c8   :  { %v2699_v56 = vpop.f32.mrf.mxu3 }
 0x3d0   :  { %5122 = vmatmul.msk.bf16.vlgmr.msrb.gmra.mxu1 %vm73_vm0, %v2951_v3  ;;  %v2771_v0 = vpop.f32.mrf.mxu3 }
 0x3d1   :  { %3184 = vmatpush.bf16.msrb.mxu1 %v6329_v33  ;;  %v2772_v52 = vadd.f32 %v2771_v0, %v2758_v14 }
 0x3d3   :  { %v2793_v60 = vadd.f32 %v2789_v47, %v2772_v52 }
 0x3dd   :  { %v2397_v40 = vpop.f32.mrf.mxu1 }
 0x3de   :  { %v2398_v42 = vadd.f32 %v2397_v40, %v50_v39  ;;  %v2645_v39 = vadd.f32 %v2641_v45, %v2624_v24 }
 0x3e0   :  { %2402 = vst.msk [vmem:[#allocation2] sm:$0x1] %vm2401_vm2, %v2398_v42  ;;  %v6391_v42 = vld [vmem:[%s6787_s3 + $0x70] sm:$0xff] }
 0x3e5   :  { %v2399_v32 = vpop.f32.mrf.mxu1 }
 0x3ed   :  { %v2520_v4 = vpop.f32.mrf.mxu1 }
 0x3ee   :  { %v2524_v5 = vadd.f32 %v2520_v4, %v2489_v1  ;;  %v6411_v1 = vld [vmem:[%s6787_s3 + $0x88] sm:$0xff] }
 0x3f0   :  { %v2525_v63 = vadd.f32 %v6336_v55, %v2524_v5 }
 0x3f2   :  { %v2526_v59 = vmax.f32 %v2525_v63, 0.0 }
 0x3f4   :  { %v2971_v12 = vpack.c.bf16 %v2526_v59, %v2526_v59 }
 0x3f5   :  { %v2522_v48 = vpop.f32.mrf.mxu1 }
 0x3f6   :  { %v2977_v41 = vshrl.u32 %v2971_v12, 16  ;;  %v2979_v15 = vshll.u32 %v2971_v12, 16  ;;  %v3029_v29 = vrot.slane %v2971_v12, 1  ;;  %5134 = vmatmul.msk.bf16.vlgmr.msrb.gmra.mxu3 %vm73_vm0, %v2971_v12  ;;  %v3083_v27 = vrot.slane %v2971_v12, 2 }
 0x3f7   :  { %3238 = vmatpush.bf16.msrb.mxu3 %v6342_v23 }
 0x3f8   :  { %v2981_v34 = vrot.slane %v2979_v15, 1  ;;  %v3055_v35 = vrot.slane %v2977_v41, 1  ;;  %v3056_v36 = vrot.slane %v2979_v15, 2  ;;  %5141 = vmatmul.msk.bf16.vlgmr.msra.gmra.mxu0 %vm73_vm0, %v3029_v29  ;;  %v2791_v15 = vpop.f32.mrf.mxu0 }
 0x3f9   :  { %3264 = vmatpush.bf16.msra.mxu0 %v6348_v13 }
 0x3fa   :  { %v2982_v8 = vor.u32 %v2981_v34, %v2977_v41  ;;  %v3057_v28 = vor.u32 %v3056_v36, %v3055_v35  ;;  %v2773_v41 = vpop.f32.mrf.mxu3  ;;  %v2719_v36 = vadd.f32 %v2715_v9, %v2698_v58 }
 0x3fc   :  { %5129 = vmatmul.msk.bf16.vlgmr.msrb.gmra.mxu2 %vm73_vm0, %v2982_v8  ;;  %5148 = vmatmul.msk.bf16.vlgmr.msra.gmra.mxu1 %vm73_vm0, %v3057_v28  ;;  %v6439_v8 = vld [vmem:[%s6787_s3 + $0x98] sm:$0xff] }
 0x3fd   :  { %v2594_v46 = vpop.f32.mrf.mxu1  ;;  %3212 = vmatpush.bf16.msrb.mxu2 %v6355_v19  ;;  %3295 = vmatpush.bf16.msra.mxu1 %v6361_v31 }
 0x3fe   :  { %v2598_v7 = vadd.f32 %v2594_v46, %v2571_v51  ;;  %v6434_v51 = vld [vmem:[%s6787_s3 + $0x90] sm:$0xff] }
 0x400   :  { %v2599_v43 = vadd.f32 %v6336_v55, %v2598_v7 }
 0x402   :  { %v2600_v11 = vmax.f32 %v2599_v43, 0.0  ;;  %v6456_v43 = vld [vmem:[%s6787_s3 + $0xa8] sm:$0xff]  ;;  %v2845_v41 = vpop.f32.mrf.mxu3 }
 0x404   :  { %v6373_v20 = vpack.c.bf16 %v2600_v11, %v2600_v11 }
 0x405   :  { %v2596_v22 = vpop.f32.mrf.mxu1 }
 0x406   :  { %5162 = vmatmul.msk.bf16.vlgmr.msra.gmra.mxu3 %vm73_vm0, %v6373_v20  ;;  %v3135_v50 = vshrl.u32 %v6373_v20, 16  ;;  %v3137_v57 = vshll.u32 %v6373_v20, 16  ;;  %v3167_v37 = vrot.slane %v6373_v20, 1  ;;  %v3221_v5 = vrot.slane %v6373_v20, 2 }
 0x407   :  { %3350 = vmatpush.bf16.msra.mxu3 %v6371_v16 }
 0x408   :  { %v3139_v3 = vrot.slane %v3137_v57, 1  ;;  %v3193_v44 = vrot.slane %v3135_v50, 1  ;;  %v3194_v59 = vrot.slane %v3137_v57, 2 }
 0x40a   :  { %v6386_v40 = vor.u32 %v3139_v3, %v3135_v50  ;;  %v6427_v34 = vor.u32 %v3194_v59, %v3193_v44  ;;  %v6466_v50 = vld [vmem:[%s6787_s3 + $0xa0] sm:$0xff]  ;;  %v6477_v3 = vld [vmem:[%s6787_s3 + $0xb0] sm:$0xff] }
 0x40c   :  { %5155 = vmatmul.msk.bf16.vlgmr.msra.gmra.mxu2 %vm73_vm0, %v3083_v27  ;;  %5169 = vmatmul.msk.bf16.vlgmr.msrb.gmra.mxu0 %vm73_vm0, %v6386_v40  ;;  %v6482_v27 = vld [vmem:[%s6787_s3 + $0xb8] sm:$0xff] }
 0x40d   :  { %5176 = vmatmul.msk.bf16.vlgmr.msrb.gmra.mxu1 %vm73_vm0, %v3167_v37  ;;  %v2668_v49 = vpop.f32.mrf.mxu1  ;;  %3322 = vmatpush.bf16.msra.mxu2 %v6384_v6 }
 0x40e   :  { %v2672_v32 = vadd.f32 %v2668_v49, %v2645_v39  ;;  %3376 = vmatpush.bf16.msrb.mxu0 %v6391_v42  ;;  %3402 = vmatpush.bf16.msrb.mxu1 %v6396_v30  ;;  %v2863_v49 = vpop.f32.mrf.mxu0 }
 0x410   :  { %v2673_v25 = vadd.f32 %v6336_v55, %v2672_v32 }
 0x412   :  { %v2674_v45 = vmax.f32 %v2673_v25, 0.0 }
 0x414   :  { %v6413_v4 = vpack.c.bf16 %v2674_v45, %v2674_v45 }
 0x415   :  { %v2670_v63 = vpop.f32.mrf.mxu1 }
 0x416   :  { %5190 = vmatmul.msk.bf16.vlgmr.msrb.gmra.mxu3 %vm73_vm0, %v3221_v5  ;;  %v3273_v12 = vshrl.u32 %v6413_v4, 16  ;;  %v3275_v48 = vshll.u32 %v6413_v4, 16  ;;  %v6469_v57 = vrot.slane %v6413_v4, 1  ;;  %v6472_v56 = vrot.slane %v6413_v4, 2  ;;  %v2865_v44 = vpop.f32.mrf.mxu0 }
 0x417   :  { %3460 = vmatpush.bf16.msrb.mxu3 %v6411_v1 }
 0x418   :  { %v3277_v29 = vrot.slane %v3275_v48, 1  ;;  %v3331_v38 = vrot.slane %v3273_v12, 1  ;;  %v3332_v7 = vrot.slane %v3275_v48, 2  ;;  %v2832_v48 = vpop.f32.mrf.mxu2 }
 0x419   :  { %v2846_v15 = vadd.f32 %v2845_v41, %v2832_v48 }
 0x41a   :  { %v6429_v35 = vor.u32 %v3277_v29, %v3273_v12  ;;  %v6451_v9 = vor.u32 %v3332_v7, %v3331_v38 }
 0x41c   :  { %5183 = vmatmul.msk.bf16.vlgmr.msrb.gmra.mxu2 %vm73_vm0, %v6427_v34  ;;  %5197 = vmatmul.msk.bf16.vlgmr.msra.gmra.mxu0 %vm73_vm0, %v6413_v4 }
 0x41d   :  { %5204 = vmatmul.msk.bf16.vlgmr.msra.gmra.mxu1 %vm73_vm0, %v6429_v35  ;;  %v2742_v28 = vpop.f32.mrf.mxu1  ;;  %3433 = vmatpush.bf16.msrb.mxu2 %v6425_v54 }
 0x41e   :  { %v2746_v46 = vadd.f32 %v2742_v28, %v2719_v36  ;;  %3488 = vmatpush.bf16.msra.mxu0 %v6434_v51  ;;  %3514 = vmatpush.bf16.msra.mxu1 %v6439_v8  ;;  %v6509_v36 = vld [vmem:[%s6787_s3 + $0xc0] sm:$0xff]  ;;  %v2867_v28 = vadd.f32 %v2863_v49, %v2846_v15  ;;  %v2937_v49 = vpop.f32.mrf.mxu0 }
 0x420   :  { %v2747_v10 = vadd.f32 %v6336_v55, %v2746_v46 }
 0x422   :  { %v2748_v11 = vmax.f32 %v2747_v10, 0.0 }
 0x424   :  { %v6461_v24 = vpack.c.bf16 %v2748_v11, %v2748_v11 }
 0x425   :  { %v2744_v22 = vpop.f32.mrf.mxu1 }
 0x426   :  { %5218 = vmatmul.msk.bf16.vlgmr.msra.gmra.mxu3 %vm73_vm0, %v6451_v9  ;;  %v3411_v0 = vshrl.u32 %v6461_v24, 16  ;;  %v6496_v47 = vrot.slane %v6461_v24, 1  ;;  %v3413_v45 = vshll.u32 %v6461_v24, 16  ;;  %v6515_v7 = vrot.slane %v6461_v24, 2 }
 0x427   :  { %3571 = vmatpush.bf16.msra.mxu3 %v6456_v43 }
 0x428   :  { %v3469_v63 = vrot.slane %v3411_v0, 1  ;;  %v3470_v58 = vrot.slane %v3413_v45, 2  ;;  %v3415_v12 = vrot.slane %v3413_v45, 1 }
 0x42a   :  { %v6504_v29 = vor.u32 %v3470_v58, %v3469_v63  ;;  %v6511_v46 = vor.u32 %v3415_v12, %v3411_v0 }
 0x42c   :  { %5211 = vmatmul.msk.bf16.vlgmr.msra.gmra.mxu2 %vm73_vm0, %v6469_v57  ;;  %5225 = vmatmul.msk.bf16.vlgmr.msrb.gmra.mxu0 %vm73_vm0, %v6472_v56 }
 0x42d   :  { %5232 = vmatmul.msk.bf16.vlgmr.msrb.gmra.mxu1 %vm73_vm0, %v6461_v24  ;;  %v2816_v39 = vpop.f32.mrf.mxu1  ;;  %3540 = vmatpush.bf16.msra.mxu2 %v6466_v50 }
 0x42e   :  { %v2820_v14 = vadd.f32 %v2816_v39, %v2793_v60  ;;  %3598 = vmatpush.bf16.msrb.mxu0 %v6477_v3  ;;  %3626 = vmatpush.bf16.msrb.mxu1 %v6482_v27  ;;  %v2834_v60 = vpop.f32.mrf.mxu2  ;;  %v2847_v39 = vpop.f32.mrf.mxu3 }
 0x430   :  { %v2821_v32 = vadd.f32 %v6336_v55, %v2820_v14 }
 0x432   :  { %v2822_v25 = vmax.f32 %v2821_v32, 0.0 }
 0x434   :  { %v6501_v59 = vpack.c.bf16 %v2822_v25, %v2822_v25 }
 0x435   :  { %v2818_v21 = vpop.f32.mrf.mxu1 }
 0x436   :  { %5246 = vmatmul.msk.bf16.vlgmr.msrb.gmra.mxu3 %vm73_vm0, %v6496_v47  ;;  %v3551_v38 = vshll.u32 %v6501_v59, 16  ;;  %v3549_v11 = vshrl.u32 %v6501_v59, 16  ;;  %v2906_v45 = vpop.f32.mrf.mxu2  ;;  %v2919_v63 = vpop.f32.mrf.mxu3  ;;  %v6537_v48 = vrot.slane %v6501_v59, 1 }
 0x437   :  { %3668 = vmatpush.bf16.msrb.mxu3 %v6283_v53  ;;  %v2920_v58 = vadd.f32 %v2919_v63, %v2906_v45  ;;  %v2939_v21 = vpop.f32.mrf.mxu0 }
 0x438   :  { %v3553_v22 = vrot.slane %v3551_v38, 1  ;;  %v3607_v32 = vrot.slane %v3549_v11, 1  ;;  %v3608_v0 = vrot.slane %v3551_v38, 2 }
 0x439   :  { %v2941_v12 = vadd.f32 %v2937_v49, %v2920_v58 }
 0x43a   :  { %v6529_v14 = vor.u32 %v3553_v22, %v3549_v11  ;;  %v6534_v44 = vor.u32 %v3608_v0, %v3607_v32  ;;  %v6554_v11 = vrot.slane %v6501_v59, 2 }
 0x43c   :  { %5239 = vmatmul.msk.bf16.vlgmr.msrb.gmra.mxu2 %vm73_vm0, %v6511_v46  ;;  %5253 = vmatmul.msk.bf16.vlgmr.msra.gmra.mxu0 %vm73_vm0, %v6504_v29 }
 0x43d   :  { %5260 = vmatmul.msk.bf16.vlgmr.msra.gmra.mxu1 %vm73_vm0, %v6515_v7  ;;  %3652 = vmatpush.bf16.msrb.mxu2 %v6509_v36  ;;  %v2890_v10 = vpop.f32.mrf.mxu1 }
 0x43e   :  { %3681 = vmatpush.bf16.msra.mxu0 %v6290_v2  ;;  %v6526_v52 = vadd.f32 %v2890_v10, %v2867_v28  ;;  %3694 = vmatpush.bf16.msra.mxu1 %v6296_v26  ;;  %v2908_v28 = vpop.f32.mrf.mxu2  ;;  %v2921_v38 = vpop.f32.mrf.mxu3 }
 0x445   :  { %v2892_v25 = vpop.f32.mrf.mxu1 }
 0x446   :  { %5274 = vmatmul.msk.bf16.vlgmr.msra.gmra.mxu3 %vm73_vm0, %v6529_v14 }
 0x447   :  { %3722 = vmatpush.bf16.msra.mxu3 %v6311_v62 }
 0x44c   :  { %5267 = vmatmul.msk.bf16.vlgmr.msra.gmra.mxu2 %vm73_vm0, %v6501_v59  ;;  %5281 = vmatmul.msk.bf16.vlgmr.msrb.gmra.mxu0 %vm73_vm0, %v6537_v48 }
 0x44d   :  { %5288 = vmatmul.msk.bf16.vlgmr.msrb.gmra.mxu1 %vm73_vm0, %v6534_v44  ;;  %3708 = vmatpush.bf16.msra.mxu2 %v6302_v17  ;;  %v2964_v41 = vpop.f32.mrf.mxu1 }
 0x44e   :  { %3736 = vmatpush.bf16.msrb.mxu0 %v6318_v61  ;;  %v6547_v15 = vadd.f32 %v2964_v41, %v2941_v12  ;;  %3750 = vmatpush.bf16.msrb.mxu1 %v6324_v18 }
 0x455   :  { %v2966_v10 = vpop.f32.mrf.mxu1 }
 0x456   :  { %5296 = vmatmul.msk.bf16.vlgmr.msrb.gmra.mxu3 %vm73_vm0, %v6386_v40 }
 0x457   :  { %3778 = vmatpush.bf16.msrb.mxu3 %v6355_v19 }
 0x45c   :  { %5295 = vmatmul.msk.bf16.vlgmr.msrb.gmra.mxu2 %vm73_vm0, %v6554_v11  ;;  %5297 = vmatmul.msk.bf16.vlgmr.msra.gmra.mxu0 %vm73_vm0, %v6373_v20 }
 0x45d   :  { %5298 = vmatmul.msk.bf16.vlgmr.msra.gmra.mxu1 %vm73_vm0, %v3167_v37  ;;  %3764 = vmatpush.bf16.msrb.mxu2 %v6329_v33 }
 0x45e   :  { %3792 = vmatpush.bf16.msra.mxu0 %v6342_v23  ;;  %3806 = vmatpush.bf16.msra.mxu1 %v6348_v13 }
 0x466   :  { %5300 = vmatmul.msk.bf16.vlgmr.msra.gmra.mxu3 %vm73_vm0, %v3221_v5 }
 0x467   :  { %3834 = vmatpush.bf16.msra.mxu3 %v6384_v6 }
 0x46c   :  { %5299 = vmatmul.msk.bf16.vlgmr.msra.gmra.mxu2 %vm73_vm0, %v6427_v34  ;;  %5301 = vmatmul.msk.bf16.vlgmr.msrb.gmra.mxu0 %vm73_vm0, %v6413_v4 }
 0x46d   :  { %5302 = vmatmul.msk.bf16.vlgmr.msrb.gmra.mxu1 %vm73_vm0, %v6429_v35  ;;  %3820 = vmatpush.bf16.msra.mxu2 %v6361_v31 }
 0x46e   :  { %3848 = vmatpush.bf16.msrb.mxu0 %v6371_v16  ;;  %3862 = vmatpush.bf16.msrb.mxu1 %v6391_v42 }
 0x475   :  { %v3048_v20 = vpop.f32.mrf.mxu0 }
 0x476   :  { %5304 = vmatmul.msk.bf16.vlgmr.msrb.gmra.mxu3 %vm73_vm0, %v6451_v9 }
 0x477   :  { %3890 = vmatpush.bf16.msrb.mxu3 %v6425_v54 }
 0x479   :  { %v3022_v37 = vpop.f32.mrf.mxu3  ;;  %v3076_v40 = vpop.f32.mrf.mxu1 }
 0x47c   :  { %5303 = vmatmul.msk.bf16.vlgmr.msrb.gmra.mxu2 %vm73_vm0, %v6469_v57  ;;  %5305 = vmatmul.msk.bf16.vlgmr.msra.gmra.mxu0 %vm73_vm0, %v6472_v56 }
 0x47d   :  { %5306 = vmatmul.msk.bf16.vlgmr.msra.gmra.mxu1 %vm73_vm0, %v6461_v24  ;;  %v3050_v5 = vpop.f32.mrf.mxu0  ;;  %3876 = vmatpush.bf16.msrb.mxu2 %v6396_v30 }
 0x47e   :  { %3904 = vmatpush.bf16.msra.mxu0 %v6411_v1  ;;  %3918 = vmatpush.bf16.msra.mxu1 %v6434_v51 }
 0x47f   :  { %v3001_v34 = vpop.f32.mrf.mxu2 }
 0x480   :  { %v3023_v22 = vadd.f32 %v3022_v37, %v3001_v34 }
 0x481   :  { %v3024_v60 = vpop.f32.mrf.mxu3  ;;  %v3078_v39 = vpop.f32.mrf.mxu1 }
 0x482   :  { %v3052_v49 = vadd.f32 %v3048_v20, %v3023_v22  ;;  %v2895_v20 = vadd.f32 %v6336_v55, %v6526_v52 }
 0x484   :  { %v3080_v32 = vadd.f32 %v3076_v40, %v3052_v49  ;;  %v2896_v22 = vmax.f32 %v2895_v20, 0.0 }
 0x486   :  { %5308 = vmatmul.msk.bf16.vlgmr.msra.gmra.mxu3 %vm73_vm0, %v6496_v47  ;;  %v6615_v52 = vpack.c.bf16 %v2896_v22, %v2896_v22 }
 0x487   :  { %v3003_v0 = vpop.f32.mrf.mxu2  ;;  %3950 = vmatpush.bf16.msra.mxu3 %v6466_v50 }
 0x488   :  { %v3981_v20 = vrot.slane %v6615_v52, 1 }
 0x489   :  { %v3128_v25 = vpop.f32.mrf.mxu3  ;;  %v3159_v45 = vpop.f32.mrf.mxu0 }
 0x48a   :  { %v3186_v63 = vpop.f32.mrf.mxu1 }
 0x48c   :  { %5307 = vmatmul.msk.bf16.vlgmr.msra.gmra.mxu2 %vm73_vm0, %v6511_v46  ;;  %5309 = vmatmul.msk.bf16.vlgmr.msrb.gmra.mxu0 %vm73_vm0, %v6504_v29 }
 0x48d   :  { %5310 = vmatmul.msk.bf16.vlgmr.msrb.gmra.mxu1 %vm73_vm0, %v6515_v7  ;;  %3932 = vmatpush.bf16.msra.mxu2 %v6439_v8 }
 0x48e   :  { %3973 = vmatpush.bf16.msrb.mxu0 %v6456_v43  ;;  %3992 = vmatpush.bf16.msrb.mxu1 %v6477_v3 }
 0x48f   :  { %v3102_v58 = vpop.f32.mrf.mxu2 }
 0x490   :  { %v3106_v21 = vadd.f32 %v3102_v58, %v3080_v32 }
 0x491   :  { %v3130_v12 = vpop.f32.mrf.mxu3  ;;  %v3161_v41 = vpop.f32.mrf.mxu0 }
 0x492   :  { %v3132_v28 = vadd.f32 %v3128_v25, %v3106_v21  ;;  %v3188_v38 = vpop.f32.mrf.mxu1  ;;  %v3957_v21 = vshrl.u32 %v6615_v52, 16 }
 0x494   :  { %v3163_v10 = vadd.f32 %v3159_v45, %v3132_v28 }
 0x496   :  { %5312 = vmatmul.msk.bf16.vlgmr.msrb.gmra.mxu3 %vm73_vm0, %v6529_v14  ;;  %v3190_v37 = vadd.f32 %v3186_v63, %v3163_v10  ;;  %v3959_v63 = vshll.u32 %v6615_v52, 16 }
 0x497   :  { %v3104_v40 = vpop.f32.mrf.mxu2  ;;  %4030 = vmatpush.bf16.msrb.mxu3 %v6509_v36 }
 0x498   :  { %v3961_v12 = vrot.slane %v3959_v63, 1 }
 0x499   :  { %v3240_v5 = vpop.f32.mrf.mxu3  ;;  %v3266_v34 = vpop.f32.mrf.mxu0 }
 0x49a   :  { %v3297_v60 = vpop.f32.mrf.mxu1  ;;  %v6624_v10 = vor.u32 %v3961_v12, %v3957_v21 }
 0x49c   :  { %5311 = vmatmul.msk.bf16.vlgmr.msrb.gmra.mxu2 %vm73_vm0, %v6501_v59  ;;  %5313 = vmatmul.msk.bf16.vlgmr.msra.gmra.mxu0 %vm73_vm0, %v6537_v48 }
 0x49d   :  { %5314 = vmatmul.msk.bf16.vlgmr.msra.gmra.mxu1 %vm73_vm0, %v6534_v44  ;;  %4012 = vmatpush.bf16.msrb.mxu2 %v6482_v27 }
 0x49e   :  { %4046 = vmatpush.bf16.msra.mxu0 %v6283_v53  ;;  %4059 = vmatpush.bf16.msra.mxu1 %v6290_v2 }
 0x49f   :  { %v3214_v39 = vpop.f32.mrf.mxu2 }
 0x4a0   :  { %v3218_v49 = vadd.f32 %v3214_v39, %v3190_v37 }
 0x4a1   :  { %v3242_v32 = vpop.f32.mrf.mxu3  ;;  %v3268_v0 = vpop.f32.mrf.mxu0 }
 0x4a2   :  { %v3244_v25 = vadd.f32 %v3240_v5, %v3218_v49  ;;  %v3299_v45 = vpop.f32.mrf.mxu1  ;;  %v3999_v49 = vrot.slane %v3957_v21, 1  ;;  %v4000_v32 = vrot.slane %v3959_v63, 2 }
 0x4a4   :  { %v3270_v58 = vadd.f32 %v3266_v34, %v3244_v25  ;;  %v6642_v45 = vor.u32 %v4000_v32, %v3999_v49 }
 0x4a6   :  { %5316 = vmatmul.msk.bf16.vlgmr.msra.gmra.mxu3 %vm73_vm0, %v6615_v52  ;;  %v3301_v41 = vadd.f32 %v3297_v60, %v3270_v58  ;;  %v4019_v60 = vrot.slane %v6615_v52, 2 }
 0x4a7   :  { %v3216_v28 = vpop.f32.mrf.mxu2  ;;  %4086 = vmatpush.bf16.msra.mxu3 %v6302_v17 }
 0x4a9   :  { %v3352_v53 = vpop.f32.mrf.mxu3  ;;  %v3378_v2 = vpop.f32.mrf.mxu0 }
 0x4aa   :  { %v3404_v38 = vpop.f32.mrf.mxu1 }
 0x4ac   :  { %5315 = vmatmul.msk.bf16.vlgmr.msra.gmra.mxu2 %vm73_vm0, %v6554_v11  ;;  %5317 = vmatmul.msk.bf16.vlgmr.msrb.gmra.mxu0 %vm73_vm0, %v6624_v10 }
 0x4ad   :  { %5318 = vmatmul.msk.bf16.vlgmr.msrb.gmra.mxu1 %vm73_vm0, %v3981_v20  ;;  %4072 = vmatpush.bf16.msra.mxu2 %v6296_v26 }
 0x4ae   :  { %4100 = vmatpush.bf16.msrb.mxu0 %v6311_v62  ;;  %4114 = vmatpush.bf16.msrb.mxu1 %v6318_v61 }
 0x4af   :  { %v3324_v17 = vpop.f32.mrf.mxu2 }
 0x4b0   :  { %v3328_v37 = vadd.f32 %v3324_v17, %v3301_v41 }
 0x4b1   :  { %v3354_v40 = vpop.f32.mrf.mxu3  ;;  %v3380_v5 = vpop.f32.mrf.mxu0 }
 0x4b2   :  { %v3356_v34 = vadd.f32 %v3352_v53, %v3328_v37  ;;  %v3406_v22 = vpop.f32.mrf.mxu1 }
 0x4b4   :  { %v3382_v39 = vadd.f32 %v3378_v2, %v3356_v34 }
 0x4b6   :  { %5320 = vmatmul.msk.bf16.vlgmr.msrb.gmra.mxu3 %vm73_vm0, %v4019_v60  ;;  %v3408_v26 = vadd.f32 %v3404_v38, %v3382_v39 }
 0x4b7   :  { %v3326_v0 = vpop.f32.mrf.mxu2  ;;  %4142 = vmatpush.bf16.msrb.mxu3 %v6329_v33 }
 0x4b9   :  { %v3462_v62 = vpop.f32.mrf.mxu3  ;;  %v3490_v61 = vpop.f32.mrf.mxu0 }
 0x4ba   :  { %v3516_v25 = vpop.f32.mrf.mxu1 }
 0x4bc   :  { %5319 = vmatmul.msk.bf16.vlgmr.msrb.gmra.mxu2 %vm73_vm0, %v6642_v45  ;;  %5321 = vmatmul.msk.bf16.vlgmr.msra.gmra.mxu0 %vm73_vm0, %v6429_v35 }
 0x4bd   :  { %5322 = vmatmul.msk.bf16.vlgmr.msra.gmra.mxu1 %vm73_vm0, %v6413_v4  ;;  %4128 = vmatpush.bf16.msrb.mxu2 %v6324_v18 }
 0x4be   :  { %4156 = vmatpush.bf16.msra.mxu0 %v6355_v19  ;;  %4170 = vmatpush.bf16.msra.mxu1 %v6342_v23 }
 0x4bf   :  { %v3435_v33 = vpop.f32.mrf.mxu2 }
 0x4c0   :  { %v3439_v63 = vadd.f32 %v3435_v33, %v3408_v26 }
 0x4c1   :  { %v3464_v58 = vpop.f32.mrf.mxu3  ;;  %v3492_v21 = vpop.f32.mrf.mxu0 }
 0x4c2   :  { %v3466_v12 = vadd.f32 %v3462_v62, %v3439_v63  ;;  %v3518_v41 = vpop.f32.mrf.mxu1  ;;  %v5479_v63 = vld [vmem:[%s6789_s5] sm:$0xff] }
 0x4c4   :  { %v3494_v28 = vadd.f32 %v3490_v61, %v3466_v12 }
 0x4c6   :  { %5324 = vmatmul.msk.bf16.vlgmr.msra.gmra.mxu3 %vm73_vm0, %v6451_v9  ;;  %v3520_v35 = vadd.f32 %v3516_v25, %v3494_v28 }
 0x4c7   :  { %v3437_v53 = vpop.f32.mrf.mxu2  ;;  %4198 = vmatpush.bf16.msra.mxu3 %v6361_v31 }
 0x4c9   :  { %v3573_v4 = vpop.f32.mrf.mxu3  ;;  %v3600_v18 = vpop.f32.mrf.mxu0 }
 0x4ca   :  { %v3628_v2 = vpop.f32.mrf.mxu1 }
 0x4cc   :  { %5323 = vmatmul.msk.bf16.vlgmr.msra.gmra.mxu2 %vm73_vm0, %v6469_v57  ;;  %5325 = vmatmul.msk.bf16.vlgmr.msrb.gmra.mxu0 %vm73_vm0, %v6472_v56 }
 0x4cd   :  { %5326 = vmatmul.msk.bf16.vlgmr.msrb.gmra.mxu1 %vm73_vm0, %v6461_v24  ;;  %4184 = vmatpush.bf16.msra.mxu2 %v6348_v13 }
 0x4ce   :  { %4212 = vmatpush.bf16.msrb.mxu0 %v6384_v6  ;;  %4226 = vmatpush.bf16.msrb.mxu1 %v6371_v16 }
 0x4cf   :  { %v3542_v23 = vpop.f32.mrf.mxu2 }
 0x4d0   :  { %v3546_v19 = vadd.f32 %v3542_v23, %v3520_v35 }
 0x4d1   :  { %v3575_v31 = vpop.f32.mrf.mxu3  ;;  %v3602_v9 = vpop.f32.mrf.mxu0 }
 0x4d2   :  { %v3577_v38 = vadd.f32 %v3573_v4, %v3546_v19  ;;  %v3630_v17 = vpop.f32.mrf.mxu1 }
 0x4d4   :  { %v3604_v37 = vadd.f32 %v3600_v18, %v3577_v38 }
 0x4d6   :  { %5328 = vmatmul.msk.bf16.vlgmr.msrb.gmra.mxu3 %vm73_vm0, %v6496_v47  ;;  %v6667_v57 = vadd.f32 %v3628_v2, %v3604_v37 }
 0x4d7   :  { %v3544_v56 = vpop.f32.mrf.mxu2  ;;  %4254 = vmatpush.bf16.msrb.mxu3 %v6396_v30 }
 0x4d9   :  { %v3670_v13 = vpop.f32.mrf.mxu3  ;;  %v3683_v24 = vpop.f32.mrf.mxu0 }
 0x4da   :  { %v3696_v6 = vpop.f32.mrf.mxu1 }
 0x4dc   :  { %5327 = vmatmul.msk.bf16.vlgmr.msrb.gmra.mxu2 %vm73_vm0, %v6511_v46  ;;  %5329 = vmatmul.msk.bf16.vlgmr.msra.gmra.mxu0 %vm73_vm0, %v6504_v29 }
 0x4dd   :  { %5330 = vmatmul.msk.bf16.vlgmr.msra.gmra.mxu1 %vm73_vm0, %v6515_v7  ;;  %4240 = vmatpush.bf16.msrb.mxu2 %v6391_v42  ;;  %v3684_v7 = vadd.f32 %v3683_v24, %v3670_v13 }
 0x4de   :  { %4268 = vmatpush.bf16.msra.mxu0 %v6425_v54  ;;  %4282 = vmatpush.bf16.msra.mxu1 %v6411_v1 }
 0x4df   :  { %v3654_v16 = vpop.f32.mrf.mxu2 }
 0x4e0   :  { %v3658_v21 = vadd.f32 %v3654_v16, %v6667_v57 }
 0x4e1   :  { %v3672_v30 = vpop.f32.mrf.mxu3  ;;  %v3685_v47 = vpop.f32.mrf.mxu0 }
 0x4e2   :  { %v3698_v40 = vpop.f32.mrf.mxu1 }
 0x4e6   :  { %5332 = vmatmul.msk.bf16.vlgmr.msra.gmra.mxu3 %vm73_vm0, %v6529_v14 }
 0x4e7   :  { %v3656_v46 = vpop.f32.mrf.mxu2  ;;  %4310 = vmatpush.bf16.msra.mxu3 %v6439_v8 }
 0x4e9   :  { %v3724_v29 = vpop.f32.mrf.mxu3  ;;  %v3738_v5 = vpop.f32.mrf.mxu0 }
 0x4ea   :  { %v3752_v34 = vpop.f32.mrf.mxu1 }
 0x4ec   :  { %5331 = vmatmul.msk.bf16.vlgmr.msra.gmra.mxu2 %vm73_vm0, %v6501_v59  ;;  %5333 = vmatmul.msk.bf16.vlgmr.msrb.gmra.mxu0 %vm73_vm0, %v6537_v48  ;;  %v2969_v59 = vadd.f32 %v6336_v55, %v6547_v15 }
 0x4ed   :  { %5334 = vmatmul.msk.bf16.vlgmr.msrb.gmra.mxu1 %vm73_vm0, %v6534_v44  ;;  %4296 = vmatpush.bf16.msra.mxu2 %v6434_v51  ;;  %v3700_v44 = vadd.f32 %v3696_v6, %v3684_v7  ;;  %v5483_v7 = vld [vmem:[%s6789_s5 + $0x20] sm:$0xff] }
 0x4ee   :  { %4328 = vmatpush.bf16.msrb.mxu0 %v6466_v50  ;;  %4351 = vmatpush.bf16.msrb.mxu1 %v6456_v43  ;;  %v5480_v43 = vld [vmem:[%s6789_s5 + $0x8] sm:$0xff]  ;;  %v2970_v39 = vmax.f32 %v2969_v59, 0.0 }
 0x4ef   :  { %v3710_v42 = vpop.f32.mrf.mxu2  ;;  %v5484_v59 = vld [vmem:[%s6789_s5 + $0x28] sm:$0xff] }
 0x4f0   :  { %v3714_v50 = vadd.f32 %v3710_v42, %v3700_v44 }
 0x4f1   :  { %v3726_v1 = vpop.f32.mrf.mxu3  ;;  %v3740_v54 = vpop.f32.mrf.mxu0 }
 0x4f2   :  { %v3754_v8 = vpop.f32.mrf.mxu1  ;;  %v3728_v55 = vadd.f32 %v3724_v29, %v3714_v50  ;;  %v5482_v1 = vld [vmem:[%s6789_s5 + $0x18] sm:$0xff]  ;;  %v5493_v50 = vld [vmem:[%s6791_s7] sm:$0xff] }
 0x4f4   :  { %v3742_v26 = vadd.f32 %v3738_v5, %v3728_v55 }
 0x4f6   :  { %5336 = vmatmul.msk.bf16.vlgmr.msrb.gmra.mxu3 %vm73_vm0, %v6615_v52  ;;  %v3756_v62 = vadd.f32 %v3752_v34, %v3742_v26  ;;  %v6725_v52 = vld [vmem:[%s6788_s4] ss:$0 sm:$0xff] }
 0x4f7   :  { %v3712_v14 = vpop.f32.mrf.mxu2  ;;  %4390 = vmatpush.bf16.msrb.mxu3 %v6482_v27  ;;  %v4317_v27 = vpack.c.bf16 %v2970_v39, %v2970_v39 }
 0x4f9   :  { %v3780_v51 = vpop.f32.mrf.mxu3  ;;  %v3794_v48 = vpop.f32.mrf.mxu0  ;;  %v4359_v56 = vrot.slane %v4317_v27, 1  ;;  %v4397_v13 = vrot.slane %v4317_v27, 2 }
 0x4fa   :  { %v3808_v22 = vpop.f32.mrf.mxu1 }
 0x4fc   :  { %5335 = vmatmul.msk.bf16.vlgmr.msrb.gmra.mxu2 %vm73_vm0, %v6554_v11  ;;  %5337 = vmatmul.msk.bf16.vlgmr.msra.gmra.mxu0 %vm73_vm0, %v6624_v10  ;;  %v4337_v11 = vshll.u32 %v4317_v27, 16  ;;  %v5481_v10 = vld [vmem:[%s6789_s5 + $0x10] sm:$0xff] }
 0x4fd   :  { %5338 = vmatmul.msk.bf16.vlgmr.msra.gmra.mxu1 %vm73_vm0, %v3981_v20  ;;  %4370 = vmatpush.bf16.msrb.mxu2 %v6477_v3  ;;  %v4335_v3 = vshrl.u32 %v4317_v27, 16 }
 0x4fe   :  { %4408 = vmatpush.bf16.msra.mxu0 %v6509_v36  ;;  %4441 = vmatpush.bf16.msra.mxu1 %v5480_v43  ;;  %v4339_v20 = vrot.slane %v4337_v11, 1  ;;  %v4378_v53 = vrot.slane %v4337_v11, 2 }
 0x4ff   :  { %v3766_v15 = vpop.f32.mrf.mxu2  ;;  %v4377_v35 = vrot.slane %v4335_v3, 1 }
 0x500   :  { %v3770_v61 = vadd.f32 %v3766_v15, %v3756_v62  ;;  %v4340_v12 = vor.u32 %v4339_v20, %v4335_v3 }
 0x501   :  { %v3782_v49 = vpop.f32.mrf.mxu3  ;;  %v3796_v32 = vpop.f32.mrf.mxu0  ;;  %v4379_v31 = vor.u32 %v4378_v53, %v4377_v35 }
 0x502   :  { %v3810_v0 = vpop.f32.mrf.mxu1  ;;  %v3784_v41 = vadd.f32 %v3780_v51, %v3770_v61 }
 0x504   :  { %v3798_v4 = vadd.f32 %v3794_v48, %v3784_v41 }
 0x506   :  { %5340 = vmatmul.msk.bf16.vlgmr.msra.gmra.mxu3 %vm73_vm0, %v4019_v60  ;;  %v3659_v60 = vadd.f32 %v6725_v52, %v3658_v21  ;;  %v3812_v19 = vadd.f32 %v3808_v22, %v3798_v4 }
 0x507   :  { %v3768_v36 = vpop.f32.mrf.mxu2  ;;  %4488 = vmatpush.bf16.msra.mxu3 %v5481_v10 }
 0x509   :  { %v3836_v25 = vpop.f32.mrf.mxu3  ;;  %v3850_v33 = vpop.f32.mrf.mxu0 }
 0x50a   :  { %v3864_v58 = vpop.f32.mrf.mxu1 }
 0x50c   :  { %5339 = vmatmul.msk.bf16.vlgmr.msra.gmra.mxu2 %vm73_vm0, %v6642_v45  ;;  %5341 = vmatmul.msk.bf16.vlgmr.msrb.gmra.mxu0 %vm73_vm0, %v4317_v27  ;;  %v3660_v45 = vmax.f32 %v3659_v60, 0.0 }
 0x50d   :  { %5342 = vmatmul.msk.bf16.vlgmr.msrb.gmra.mxu1 %vm73_vm0, %v4340_v12  ;;  %4462 = vmatpush.bf16.msra.mxu2 %v5479_v63 }
 0x50e   :  { %v4417_v38 = vpack.c.bf16 %v3660_v45, %v3660_v45  ;;  %4514 = vmatpush.bf16.msrb.mxu0 %v5482_v1  ;;  %4541 = vmatpush.bf16.msrb.mxu1 %v5483_v7 }
 0x50f   :  { %v3822_v28 = vpop.f32.mrf.mxu2 }
 0x510   :  { %v3826_v9 = vadd.f32 %v3822_v28, %v3812_v19  ;;  %v4423_v16 = vshrl.u32 %v4417_v38, 16  ;;  %v4471_v34 = vrot.slane %v4417_v38, 1 }
 0x511   :  { %v3838_v18 = vpop.f32.mrf.mxu3  ;;  %v3852_v2 = vpop.f32.mrf.mxu0 }
 0x512   :  { %v3866_v23 = vpop.f32.mrf.mxu1  ;;  %v3840_v24 = vadd.f32 %v3836_v25, %v3826_v9 }
 0x514   :  { %v3854_v30 = vadd.f32 %v3850_v33, %v3840_v24 }
 0x516   :  { %5344 = vmatmul.msk.bf16.vlgmr.msrb.gmra.mxu3 %vm73_vm0, %v4379_v31  ;;  %v3868_v29 = vadd.f32 %v3864_v58, %v3854_v30 }
 0x517   :  { %v3824_v17 = vpop.f32.mrf.mxu2 }
 0x519   :  { %v3892_v37 = vpop.f32.mrf.mxu3  ;;  %v3906_v57 = vpop.f32.mrf.mxu0 }
 0x51a   :  { %v3920_v6 = vpop.f32.mrf.mxu1 }
 0x51c   :  { %5343 = vmatmul.msk.bf16.vlgmr.msrb.gmra.mxu2 %vm73_vm0, %v4359_v56  ;;  %5345 = vmatmul.msk.bf16.vlgmr.msra.gmra.mxu0 %vm73_vm0, %v4397_v13 }
 0x51d   :  { %5352 = vmatmul.msk.bf16.vlgmr.msra.gmra.mxu1 %vm73_vm0, %v4423_v16  ;;  %4568 = vmatpush.bf16.msrb.mxu2 %v5484_v59 }
 0x51f   :  { %v3878_v47 = vpop.f32.mrf.mxu2 }
 0x520   :  { %v3882_v42 = vadd.f32 %v3878_v47, %v3868_v29 }
 0x521   :  { %v3894_v40 = vpop.f32.mrf.mxu3  ;;  %v3908_v46 = vpop.f32.mrf.mxu0 }
 0x522   :  { %v3922_v5 = vpop.f32.mrf.mxu1  ;;  %v3896_v8 = vadd.f32 %v3892_v37, %v3882_v42 }
 0x524   :  { %v3910_v48 = vadd.f32 %v3906_v57, %v3896_v8 }
 0x526   :  { %5364 = vmatmul.msk.bf16.vlgmr.msra.gmra.mxu3 %vm73_vm0, %v4471_v34  ;;  %v3924_v43 = vadd.f32 %v3920_v6, %v3910_v48 }
 0x527   :  { %v3880_v54 = vpop.f32.mrf.mxu2 }
 0x529   :  { %v3952_v14 = vpop.f32.mrf.mxu3  ;;  %v3975_v44 = vpop.f32.mrf.mxu0 }
 0x52a   :  { %v3994_v51 = vpop.f32.mrf.mxu1 }
 0x52c   :  { %5357 = vmatmul.msk.bf16.vlgmr.msra.gmra.mxu2 %vm73_vm0, %v4417_v38 }
 0x52d   :  { %4668 = vmatpush.bf16.msra.mxu2 %v5493_v50 }
 0x52f   :  { %v3934_v22 = vpop.f32.mrf.mxu2 }
 0x530   :  { %v3938_v27 = vadd.f32 %v3934_v22, %v3924_v43  ;;  %v5485_v22 = vld [vmem:[%s6789_s5 + $0x30] sm:$0xff]  ;;  %v5494_v43 = vld [vmem:[%s6793_s9 + $0x8] sm:$0xff] }
 0x531   :  { %v3954_v39 = vpop.f32.mrf.mxu3  ;;  %v3977_v55 = vpop.f32.mrf.mxu0  ;;  %4594 = vmatpush.bf16.msrb.mxu3 %v5485_v22 }
 0x532   :  { %v3996_v15 = vpop.f32.mrf.mxu1  ;;  %v3956_v49 = vadd.f32 %v3952_v14, %v3938_v27 }
 0x534   :  { %v3979_v10 = vadd.f32 %v3975_v44, %v3956_v49  ;;  %v5495_v49 = vld [vmem:[%s6793_s9] sm:$0xff] }
 0x535   :  { %4686 = vmatpush.bf16.msra.mxu3 %v5494_v43 }
 0x536   :  { %v3998_v62 = vadd.f32 %v3994_v51, %v3979_v10 }
 0x537   :  { %v3936_v32 = vpop.f32.mrf.mxu2 }
 0x539   :  { %v4032_v26 = vpop.f32.mrf.mxu3  ;;  %v4048_v0 = vpop.f32.mrf.mxu0  ;;  %4687 = vmatpush.bf16.msra.mxu3 %v5495_v49 }
 0x53a   :  { %v4061_v11 = vpop.f32.mrf.mxu1 }
 0x53b   :  { %v4062_v19 = vadd.f32 %v4061_v11, %v4048_v0 }
 0x53f   :  { %v4014_v3 = vpop.f32.mrf.mxu2 }
 0x540   :  { %v4018_v20 = vadd.f32 %v4014_v3, %v3998_v62 }
 0x541   :  { %v4034_v36 = vpop.f32.mrf.mxu3  ;;  %v4050_v61 = vpop.f32.mrf.mxu0 }
 0x542   :  { %v4036_v25 = vadd.f32 %v4032_v26, %v4018_v20  ;;  %v4063_v33 = vpop.f32.mrf.mxu1  ;;  %v5486_v36 = vld [vmem:[%s6789_s5 + $0x38] sm:$0xff]  ;;  %v5487_v61 = vld [vmem:[%s6789_s5 + $0x40] sm:$0xff] }
 0x543   :  { %4621 = vmatpush.bf16.msra.mxu0 %v5486_v36  ;;  %4648 = vmatpush.bf16.msra.mxu1 %v5487_v61  ;;  %v5498_v36 = vld [vmem:[%s6794_s10] sm:$0x1] }
 0x544   :  { %v4037_v63 = vadd.f32 %v6725_v52, %v4036_v25 }
 0x546   :  { %v4038_v58 = vmax.f32 %v4037_v63, 0.0 }
 0x547   :  { %v4016_v21 = vpop.f32.mrf.mxu2 }
 0x548   :  { %v4495_v12 = vpack.c.bf16 %v4038_v58, %v4038_v58 }
 0x549   :  { %v4088_v41 = vpop.f32.mrf.mxu3  ;;  %v4102_v60 = vpop.f32.mrf.mxu0 }
 0x54a   :  { %v4523_v28 = vshrl.u32 %v4495_v12, 16  ;;  %v4551_v35 = vrot.slane %v4495_v12, 1  ;;  %v4116_v53 = vpop.f32.mrf.mxu1  ;;  %5371 = vmatmul.msk.bf16.vlgmr.msrb.gmra.mxu0 %vm73_vm0, %v4495_v12 }
 0x54c   :  { %5378 = vmatmul.msk.bf16.vlgmr.msrb.gmra.mxu1 %vm73_vm0, %v4523_v28  ;;  %5385 = vmatmul.msk.bf16.vlgmr.msrb.gmra.mxu2 %vm73_vm0, %v4551_v35 }
 0x54f   :  { %v4074_v4 = vpop.f32.mrf.mxu2 }
 0x550   :  { %v4078_v38 = vadd.f32 %v4074_v4, %v4062_v19 }
 0x551   :  { %v4090_v18 = vpop.f32.mrf.mxu3  ;;  %v4104_v2 = vpop.f32.mrf.mxu0 }
 0x552   :  { %v4118_v23 = vpop.f32.mrf.mxu1  ;;  %v4092_v37 = vadd.f32 %v4088_v41, %v4078_v38 }
 0x554   :  { %v4106_v24 = vadd.f32 %v4102_v60, %v4092_v37 }
 0x556   :  { %v4120_v16 = vadd.f32 %v4116_v53, %v4106_v24 }
 0x557   :  { %v4076_v45 = vpop.f32.mrf.mxu2 }
 0x559   :  { %v4144_v31 = vpop.f32.mrf.mxu3  ;;  %v4158_v9 = vpop.f32.mrf.mxu0 }
 0x55a   :  { %v4172_v17 = vpop.f32.mrf.mxu1 }
 0x55f   :  { %v4130_v57 = vpop.f32.mrf.mxu2 }
 0x560   :  { %v4134_v47 = vadd.f32 %v4130_v57, %v4120_v16 }
 0x561   :  { %v4146_v56 = vpop.f32.mrf.mxu3  ;;  %v4160_v13 = vpop.f32.mrf.mxu0 }
 0x562   :  { %v4174_v6 = vpop.f32.mrf.mxu1  ;;  %v4148_v5 = vadd.f32 %v4144_v31, %v4134_v47 }
 0x564   :  { %v4162_v42 = vadd.f32 %v4158_v9, %v4148_v5 }
 0x566   :  { %v4176_v7 = vadd.f32 %v4172_v17, %v4162_v42 }
 0x567   :  { %v4132_v30 = vpop.f32.mrf.mxu2 }
 0x569   :  { %v4200_v40 = vpop.f32.mrf.mxu3  ;;  %v4214_v46 = vpop.f32.mrf.mxu0 }
 0x56a   :  { %v4228_v29 = vpop.f32.mrf.mxu1 }
 0x56f   :  { %v4186_v34 = vpop.f32.mrf.mxu2 }
 0x570   :  { %v4190_v59 = vadd.f32 %v4186_v34, %v4176_v7 }
 0x571   :  { %v4202_v1 = vpop.f32.mrf.mxu3  ;;  %v4216_v54 = vpop.f32.mrf.mxu0 }
 0x572   :  { %v4230_v8 = vpop.f32.mrf.mxu1  ;;  %v4204_v48 = vadd.f32 %v4200_v40, %v4190_v59 }
 0x574   :  { %v4218_v39 = vadd.f32 %v4214_v46, %v4204_v48 }
 0x576   :  { %v4232_v32 = vadd.f32 %v4228_v29, %v4218_v39 }
 0x577   :  { %v4188_v14 = vpop.f32.mrf.mxu2 }
 0x579   :  { %v4256_v44 = vpop.f32.mrf.mxu3  ;;  %v4270_v51 = vpop.f32.mrf.mxu0 }
 0x57a   :  { %v4284_v50 = vpop.f32.mrf.mxu1 }
 0x57f   :  { %v4242_v55 = vpop.f32.mrf.mxu2 }
 0x580   :  { %v4246_v0 = vadd.f32 %v4242_v55, %v4232_v32  ;;  %v5496_v55 = vld [vmem:[%s6790_s6] sm:$0x1] }
 0x581   :  { %v4258_v27 = vpop.f32.mrf.mxu3  ;;  %v4272_v15 = vpop.f32.mrf.mxu0 }
 0x582   :  { %v4286_v26 = vpop.f32.mrf.mxu1  ;;  %v4260_v10 = vadd.f32 %v4256_v44, %v4246_v0  ;;  %v5497_v0 = vld [vmem:[%s6792_s8] sm:$0x1] }
 0x584   :  { %v4274_v25 = vadd.f32 %v4270_v51, %v4260_v10 }
 0x586   :  { %v4288_v63 = vadd.f32 %v4284_v50, %v4274_v25 }
 0x587   :  { %v4244_v11 = vpop.f32.mrf.mxu2 }
 0x589   :  { %v4312_v62 = vpop.f32.mrf.mxu3  ;;  %v4330_v3 = vpop.f32.mrf.mxu0 }
 0x58a   :  { %v4353_v20 = vpop.f32.mrf.mxu1 }
 0x58f   :  { %v4298_v33 = vpop.f32.mrf.mxu2 }
 0x590   :  { %v4302_v12 = vadd.f32 %v4298_v33, %v4288_v63 }
 0x591   :  { %v4314_v58 = vpop.f32.mrf.mxu3  ;;  %v4332_v21 = vpop.f32.mrf.mxu0 }
 0x592   :  { %v4355_v41 = vpop.f32.mrf.mxu1  ;;  %v4316_v60 = vadd.f32 %v4312_v62, %v4302_v12 }
 0x594   :  { %v4334_v18 = vadd.f32 %v4330_v3, %v4316_v60 }
 0x596   :  { %v4357_v2 = vadd.f32 %v4353_v20, %v4334_v18 }
 0x597   :  { %v4300_v28 = vpop.f32.mrf.mxu2 }
 0x599   :  { %v4392_v35 = vpop.f32.mrf.mxu3  ;;  %v4410_v53 = vpop.f32.mrf.mxu0 }
 0x59a   :  { %v4443_v4 = vpop.f32.mrf.mxu1 }
 0x59f   :  { %v4372_v23 = vpop.f32.mrf.mxu2 }
 0x5a0   :  { %v4376_v45 = vadd.f32 %v4372_v23, %v4357_v2 }
 0x5a1   :  { %v4394_v19 = vpop.f32.mrf.mxu3  ;;  %v4412_v31 = vpop.f32.mrf.mxu0 }
 0x5a2   :  { %v4396_v9 = vadd.f32 %v4392_v35, %v4376_v45  ;;  %v4445_v38 = vpop.f32.mrf.mxu1 }
 0x5a4   :  { %v4414_v17 = vadd.f32 %v4410_v53, %v4396_v9 }
 0x5a6   :  { %v4415_v37 = vadd.f32 %v6725_v52, %v4414_v17 }
 0x5a7   :  { %v4374_v57 = vpop.f32.mrf.mxu2 }
 0x5a8   :  { %v4416_v56 = vmax.f32 %v4415_v37, 0.0 }
 0x5a9   :  { %v4490_v13 = vpop.f32.mrf.mxu3 }
 0x5aa   :  { %v4575_v24 = vpack.c.bf16 %v4416_v56, %v4416_v56 }
 0x5ac   :  { %v4603_v6 = vshrl.u32 %v4575_v24, 16  ;;  %v4631_v16 = vrot.slane %v4575_v24, 1  ;;  %5392 = vmatmul.msk.bf16.vlgmr.msrb.gmra.mxu3 %vm73_vm0, %v4575_v24 }
 0x5ae   :  { %5399 = vmatmul.msk.bf16.vlgmr.msra.gmra.mxu0 %vm73_vm0, %v4603_v6  ;;  %5406 = vmatmul.msk.bf16.vlgmr.msra.gmra.mxu1 %vm73_vm0, %v4631_v16 }
 0x5af   :  { %v4464_v30 = vpop.f32.mrf.mxu2 }
 0x5b0   :  { %v4465_v47 = vadd.f32 %v4464_v30, %v4443_v4 }
 0x5b1   :  { %v4492_v40 = vpop.f32.mrf.mxu3 }
 0x5b2   :  { %v4494_v46 = vadd.f32 %v4490_v13, %v4465_v47 }
 0x5b7   :  { %v4466_v29 = vpop.f32.mrf.mxu2 }
 0x5c7   :  { %v4516_v5 = vpop.f32.mrf.mxu0 }
 0x5c8   :  { %v4520_v34 = vadd.f32 %v4516_v5, %v4494_v46 }
 0x5c9   :  { %v4543_v52 = vpop.f32.mrf.mxu1 }
 0x5ca   :  { %v4547_v42 = vadd.f32 %v4543_v52, %v4520_v34 }
 0x5cf   :  { %v4518_v1 = vpop.f32.mrf.mxu0  ;;  %v4570_v54 = vpop.f32.mrf.mxu2 }
 0x5d0   :  { %v4574_v8 = vadd.f32 %v4570_v54, %v4547_v42 }
 0x5d1   :  { %v4545_v7 = vpop.f32.mrf.mxu1 }
 0x5d7   :  { %v4572_v59 = vpop.f32.mrf.mxu2 }
 0x62b   :  { %v4623_v14 = vpop.f32.mrf.mxu0  ;;  %v4650_v44 = vpop.f32.mrf.mxu1 }
 0x62f   :  { %v4596_v51 = vpop.f32.mrf.mxu3 }
 0x630   :  { %v4600_v48 = vadd.f32 %v4596_v51, %v4574_v8 }
 0x632   :  { %v4627_v50 = vadd.f32 %v4623_v14, %v4600_v48 }
 0x633   :  { %v4625_v22 = vpop.f32.mrf.mxu0  ;;  %v4652_v43 = vpop.f32.mrf.mxu1 }
 0x634   :  { %v4654_v39 = vadd.f32 %v4650_v44, %v4627_v50 }
 0x636   :  { %v4655_v27 = vadd.f32 %v5496_v55, %v4654_v39 }
 0x637   :  { %v4598_v15 = vpop.f32.mrf.mxu3 }
 0x638   :  { %v4656_v49 = vmax.f32 %v4655_v27, 0.0 }
 0x63a   :  { %v4657_v32 = vpack.c.bf16 %v4656_v49, %v4656_v49 }
 0x63c   :  { %5407 = vmatmul.msk.bf16.vlgmr.msra.gmra.mxu2 %vm73_vm0, %v4657_v32 }
 0x6bf   :  { %v4670_v26 = vpop.f32.mrf.mxu2 }
 0x6c0   :  { %v4674_v11 = vadd.f32 %v5497_v0, %v4670_v26 }
 0x6c2   :  { %v4675_v10 = vmax.f32 %v4674_v11, 0.0 }
 0x6c4   :  { %v4676_v62 = vpack.c.bf16 %v4675_v10, %v4675_v10 }
 0x6c6   :  { %5408 = vmatmul.msk.bf16.vlgmr.msra.gmra.mxu3 %vm2384_vm1, %v4676_v62 }
 0x6c7   :  { %v4672_v3 = vpop.f32.mrf.mxu2 }
 0x749   :  { %v4689_v20 = vpop.f32.mrf.mxu3 }
 0x74a   :  { %v4690_v61 = vadd.f32 %v5498_v36, %v4689_v20 }
 0x74c   :  { %4693 = vst.msk [vmem:[#allocation2 + $0x1] sm:$0x1] %vm2401_vm2, %v4690_v61 }
 0x74d   :  { %4704 = dma.vmem_to_hbm [thread:$0]  %s4700_s24, 32, %s4702_s26, [#allocation3]  }
 0x751   :  { %v4691_v25 = vpop.f32.mrf.mxu3 }
 0x752   :  { %5523 = dma.done.wait [#allocation3], 32  }
 0x753   :  { %5524 = vsyncadd [#allocation3], 4294967264 }
 0x754   :  { %4709 = vsyncpa [#allocation3], 1 }

</bundles_post_ra>
